<compile_context>
chip_gen: v6e
topology: v6e:2x2x1
jax: 0.10.0
libtpu: 0.0.40
codegen_flags: <defaults>
</compile_context>

<pallas_src>
import math
import numpy as np
import jax
import jax.numpy as jnp
from jax.experimental import pallas as pl
from jax.experimental.pallas import tpu as pltpu

# ----------------------------- problem sizes --------------------------------
B = 2                    # batch
C1 = 16                  # in channels  (c1 != c2 -> Conv path active)
C2 = 32                  # out channels / d_model
WSP = 8                  # spatial width
HSP = 8                  # spatial height
S = WSP * HSP            # tokens per image = 64
BS = B * S               # folded token count = 128
NUM_HEADS = 4
DH = C2 // NUM_HEADS     # 8
NUM_LAYERS = 2
SCALE = 1.0 / math.sqrt(DH)
BN_EPS = 1e-5

NW = 1 + 5 * NUM_LAYERS  # weight-slab entries (pos-linear + 5 per layer)
NB = 2 + 4 * NUM_LAYERS  # bias-slab entries


# ------------------------------- kernel -------------------------------------
def transformer_block_kernel(x_ref, wcv_ref, wslab_ref, bslab_ref, out_ref):
    f32 = jnp.float32
    xt = x_ref[...]                                              # (BS, C1)

    # --- 1x1 Conv + folded BatchNorm + SiLU ----------------------------------
    h = jnp.dot(xt, wcv_ref[...], preferred_element_type=f32) + bslab_ref[0]
    h = h * jax.nn.sigmoid(h)                                    # SiLU

    # --- learned position term: x = p + Linear(p) ----------------------------
    x = h + (jnp.dot(h, wslab_ref[0], preferred_element_type=f32) + bslab_ref[1])

    contract_last = (((1,), (1,)), ((), ()))                     # q @ k^T

    for layer in range(NUM_LAYERS):                              # static unroll
        wb = 1 + 5 * layer
        bb = 2 + 4 * layer

        # fused (q_lin ∘ in_proj_q) etc. -> one (128,32)@(32,32) matmul each
        q = jnp.dot(x, wslab_ref[wb + 0], preferred_element_type=f32) + bslab_ref[bb + 0]
        k = jnp.dot(x, wslab_ref[wb + 1], preferred_element_type=f32) + bslab_ref[bb + 1]
        v = jnp.dot(x, wslab_ref[wb + 2], preferred_element_type=f32) + bslab_ref[bb + 2]

        batch_outs = []
        for b in range(B):                                       # per-sample attention
            r0 = b * S                                           # sublane-aligned slice
            qb, kb, vb = q[r0:r0 + S], k[r0:r0 + S], v[r0:r0 + S]
            head_outs = []
            for hh in range(NUM_HEADS):
                c0 = hh * DH                                     # static lane slice
                qh = qb[:, c0:c0 + DH]
                kh = kb[:, c0:c0 + DH]
                vh = vb[:, c0:c0 + DH]
                s_ = jax.lax.dot_general(qh, kh, contract_last,
                                         preferred_element_type=f32) * SCALE
                s_ = jnp.exp(s_ - jnp.max(s_, axis=-1, keepdims=True))
                s_ = s_ * pl.reciprocal(jnp.sum(s_, axis=-1, keepdims=True),
                                        approx=False)
                head_outs.append(jnp.dot(s_, vh, preferred_element_type=f32))
            batch_outs.append(jnp.concatenate(head_outs, axis=-1))   # (S, C2)
        attn = jnp.concatenate(batch_outs, axis=0)                   # (BS, C2)

        # out_proj as a single full-width matmul over concatenated heads
        attn = jnp.dot(attn, wslab_ref[wb + 3], preferred_element_type=f32) + bslab_ref[bb + 3]
        x = attn + x

        # fc2(fc1(x)) + x : fc2∘fc1 fused host-side into one (C2,C2) weight
        x = jnp.dot(x, wslab_ref[wb + 4], preferred_element_type=f32) + x

    # lane-dense store: (C2, BS) = (32, 128)
    out_ref[...] = x.T


# ------------------------------- wrapper -------------------------------------
def transformer_block_forward(x, w_cv, w_slab, b_slab):
    """x: (B, C1, WSP, HSP) float32 -> (B, C2, WSP, HSP)."""
    b, c1, wd, ht = x.shape
    s = wd * ht
    bs = b * s

    # token-major / channel-last slab, matching torch's flatten(2)+transpose
    x_tok = jnp.transpose(x.reshape(b, c1, s), (0, 2, 1)).reshape(bs, c1)

    out = pl.pallas_call(
        transformer_block_kernel,
        grid=(1,),
        in_specs=[
            pl.BlockSpec((bs, c1), lambda i: (0, 0)),             # tokens
            pl.BlockSpec((c1, C2), lambda i: (0, 0)),             # fused conv+BN weight
            pl.BlockSpec(w_slab.shape, lambda i: (0, 0, 0)),      # packed (C2,C2) weights
            pl.BlockSpec(b_slab.shape, lambda i: (0, 0, 0)),      # packed biases
        ],
        out_specs=pl.BlockSpec((C2, bs), lambda i: (0, 0)),
        out_shape=jax.ShapeDtypeStruct((C2, bs), jnp.float32),
        compiler_params=pltpu.CompilerParams(
            dimension_semantics=("arbitrary",)),
    )(x_tok, w_cv, w_slab, b_slab)

    # (C2, B*S) -> (B, C2, WSP, HSP)
    return jnp.transpose(out.reshape(C2, b, s), (1, 0, 2)).reshape(b, C2, wd, ht)


# ------------------------- parameter construction ----------------------------
def init_params(key):
    """Deterministic params in PyTorch layouts."""
    keys = iter(jax.random.split(key, 40))
    sc = 1.0 / math.sqrt(C2)

    def w(shape, scale=sc):
        return scale * jax.random.normal(next(keys), shape, jnp.float32)

    def small(shape):
        return 0.1 * jax.random.normal(next(keys), shape, jnp.float32)

    p = {
        "conv_w": w((C2, C1, 1, 1), 1.0 / math.sqrt(C1)),   # Conv2d weight (no bias)
        "bn_gamma": 1.0 + small((C2,)),
        "bn_beta": small((C2,)),
        "bn_mean": small((C2,)),
        "bn_var": 0.5 + jax.random.uniform(next(keys), (C2,), jnp.float32),
        "lin_w": w((C2, C2)),                               # nn.Linear(c2, c2)
        "lin_b": small((C2,)),
        "layers": [],
    }
    for _ in range(NUM_LAYERS):
        p["layers"].append({
            "q_w": w((C2, C2)), "k_w": w((C2, C2)), "v_w": w((C2, C2)),
            "in_proj_w": w((3 * C2, C2)), "in_proj_b": small((3 * C2,)),
            "out_w": w((C2, C2)), "out_b": small((C2,)),
            "fc1_w": w((C2, C2)), "fc2_w": w((C2, C2)),
        })
    return p


def to_kernel_params(p):
    """Fold BN into the 1x1 conv, fuse q/k/v Linear with MHA in_proj,
    fuse fc2∘fc1, and pack everything into two slabs."""
    inv_std = 1.0 / jnp.sqrt(p["bn_var"] + BN_EPS)
    scale = p["bn_gamma"] * inv_std
    w_conv = p["conv_w"][:, :, 0, 0]                        # (C2, C1)
    w_cv = (w_conv * scale[:, None]).T                      # (C1, C2), BN-folded
    b_cv = p["bn_beta"] - p["bn_mean"] * scale              # (C2,)

    weights = [p["lin_w"].T]
    biases = [b_cv, p["lin_b"]]
    for layer in range(NUM_LAYERS):
        lp = p["layers"][layer]
        wiq, wik, wiv = jnp.split(lp["in_proj_w"], 3, axis=0)
        biq, bik, biv = jnp.split(lp["in_proj_b"], 3, axis=0)
        weights += [
            (wiq @ lp["q_w"]).T,      # x @ A == (x @ q_w.T) @ wiq.T  (exact fusion)
            (wik @ lp["k_w"]).T,
            (wiv @ lp["v_w"]).T,
            lp["out_w"].T,
            (lp["fc2_w"] @ lp["fc1_w"]).T,   # fc2(fc1(x)) == x @ (fc2_w @ fc1_w).T
        ]
        biases += [biq, bik, biv, lp["out_b"]]

    w_slab = jnp.stack(weights)                 # (NW, C2, C2)
    b_slab = jnp.stack(biases)[:, None, :]      # (NB, 1, C2)
    return w_cv, w_slab, b_slab


# ---------------------------- pure-JAX reference -----------------------------
def reference(x, p):
    w = p["conv_w"][:, :, 0, 0]                                   # (C2, C1)
    y = jnp.einsum("bchw,oc->bohw", x, w)
    y = (y - p["bn_mean"][None, :, None, None]) \
        / jnp.sqrt(p["bn_var"] + BN_EPS)[None, :, None, None]
    y = y * p["bn_gamma"][None, :, None, None] + p["bn_beta"][None, :, None, None]
    y = y * jax.nn.sigmoid(y)                                     # SiLU

    b, c, wd, ht = y.shape
    s = wd * ht
    pseq = jnp.transpose(y.reshape(b, c, s), (2, 0, 1))           # (S, B, C)
    xx = pseq + (pseq @ p["lin_w"].T + p["lin_b"])

    for layer in range(NUM_LAYERS):
        lp = p["layers"][layer]
        q = xx @ lp["q_w"].T
        k = xx @ lp["k_w"].T
        v = xx @ lp["v_w"].T
        wiq, wik, wiv = jnp.split(lp["in_proj_w"], 3, axis=0)
        biq, bik, biv = jnp.split(lp["in_proj_b"], 3, axis=0)
        Q = q @ wiq.T + biq
        K = k @ wik.T + bik
        V = v @ wiv.T + biv
        Qh = Q.reshape(s, b, NUM_HEADS, DH).transpose(1, 2, 0, 3)
        Kh = K.reshape(s, b, NUM_HEADS, DH).transpose(1, 2, 0, 3)
        Vh = V.reshape(s, b, NUM_HEADS, DH).transpose(1, 2, 0, 3)
        att = jax.nn.softmax(
            jnp.einsum("bhqd,bhkd->bhqk", Qh, Kh) * SCALE, axis=-1)
        o = jnp.einsum("bhqk,bhkd->bhqd", att, Vh)
        o = o.transpose(2, 0, 1, 3).reshape(s, b, c)
        o = o @ lp["out_w"].T + lp["out_b"]
        xx = o + xx
        xx = (xx @ lp["fc1_w"].T) @ lp["fc2_w"].T + xx

    return jnp.transpose(xx, (1, 2, 0)).reshape(b, c, wd, ht)


# --------------------------------- main ---------------------------------------
if __name__ == "__main__":
    key = jax.random.PRNGKey(0)
    kx, kp = jax.random.split(key)
    x = jax.random.normal(kx, (B, C1, WSP, HSP), jnp.float32)

    params = init_params(kp)
    w_cv, w_slab, b_slab = to_kernel_params(params)

    out = transformer_block_forward(x, w_cv, w_slab, b_slab)
    jax.block_until_ready(out)

    ref = reference(x, params)
    assert out.shape == (B, C2, WSP, HSP)
    err = float(np.max(np.abs(np.asarray(out) - np.asarray(ref))))
    assert np.allclose(np.asarray(out), np.asarray(ref), atol=1e-4, rtol=1e-4), err

    print("KERNEL_OK")
</pallas_src>

<mosaic_0001>
module attributes {stable_mosaic.version = 11 : i64} {
  func.func @transformer_block_kernel(%arg0: i32, %arg1: memref<128x16xf32, #tpu.memory_space<vmem>>, %arg2: memref<16x32xf32, #tpu.memory_space<vmem>>, %arg3: memref<11x32x32xf32, #tpu.memory_space<vmem>>, %arg4: memref<10x1x32xf32, #tpu.memory_space<vmem>>, %arg5: memref<32x128xf32, #tpu.memory_space<vmem>>) attributes {dimension_semantics = [#tpu.dimension_semantics<arbitrary>], iteration_bounds = array<i64: 1>, scalar_prefetch = 0 : i64, scratch_operands = 0 : i64, tpu.core_type = #tpu.core_type<tc>, window_params = [{pipeline_mode = #tpu.pipeline_mode<synchronous>, transform_indices = @transform_0, window_bounds = array<i64: 128, 16>}, {pipeline_mode = #tpu.pipeline_mode<synchronous>, transform_indices = @transform_1, window_bounds = array<i64: 16, 32>}, {pipeline_mode = #tpu.pipeline_mode<synchronous>, transform_indices = @transform_2, window_bounds = array<i64: 11, 32, 32>}, {pipeline_mode = #tpu.pipeline_mode<synchronous>, transform_indices = @transform_3, window_bounds = array<i64: 10, 1, 32>}, {pipeline_mode = #tpu.pipeline_mode<synchronous>, transform_indices = @transform_4, window_bounds = array<i64: 32, 128>}]} {
    %c0 = arith.constant 0 : index
    %c0_0 = arith.constant 0 : index
    %0 = vector.load %arg1[%c0, %c0_0] : memref<128x16xf32, #tpu.memory_space<vmem>>, vector<128x16xf32>
    %c0_1 = arith.constant 0 : index
    %c0_2 = arith.constant 0 : index
    %1 = vector.load %arg2[%c0_1, %c0_2] : memref<16x32xf32, #tpu.memory_space<vmem>>, vector<16x32xf32>
    %cst = arith.constant dense<0.000000e+00> : vector<128x32xf32>
    %2 = tpu.matmul %0, %1, %cst {dimension_numbers = #tpu.dot_dimension_numbers<[1], [0], [0], [1], [0, 0, 1, 1], [], []>} : vector<128x16xf32>, vector<16x32xf32>, vector<128x32xf32> -> vector<128x32xf32>
    %c0_3 = arith.constant 0 : index
    %c0_4 = arith.constant 0 : index
    %c0_5 = arith.constant 0 : index
    %3 = vector.load %arg4[%c0_3, %c0_4, %c0_5] : memref<10x1x32xf32, #tpu.memory_space<vmem>>, vector<1x1x32xf32>
    %4 = vector.shape_cast %3 : vector<1x1x32xf32> to vector<1x32xf32>
    %5 = vector.broadcast %4 : vector<1x32xf32> to vector<128x32xf32>
    %6 = arith.addf %2, %5 : vector<128x32xf32>
    %7 = arith.negf %6 : vector<128x32xf32>
    %8 = math.exp %7 : vector<128x32xf32>
    %cst_6 = arith.constant 1.000000e+00 : f32
    %9 = vector.broadcast %cst_6 : f32 to vector<128x32xf32>
    %10 = arith.addf %9, %8 : vector<128x32xf32>
    %11 = arith.divf %9, %10 : vector<128x32xf32>
    %12 = arith.mulf %6, %11 : vector<128x32xf32>
    %c0_7 = arith.constant 0 : index
    %c0_8 = arith.constant 0 : index
    %c0_9 = arith.constant 0 : index
    %13 = vector.load %arg3[%c0_7, %c0_8, %c0_9] : memref<11x32x32xf32, #tpu.memory_space<vmem>>, vector<1x32x32xf32>
    %14 = vector.shape_cast %13 : vector<1x32x32xf32> to vector<32x32xf32>
    %cst_10 = arith.constant dense<0.000000e+00> : vector<128x32xf32>
    %15 = tpu.matmul %12, %14, %cst_10 {dimension_numbers = #tpu.dot_dimension_numbers<[1], [0], [0], [1], [0, 0, 1, 1], [], []>} : vector<128x32xf32>, vector<32x32xf32>, vector<128x32xf32> -> vector<128x32xf32>
    %c1 = arith.constant 1 : index
    %c0_11 = arith.constant 0 : index
    %c0_12 = arith.constant 0 : index
    %16 = vector.load %arg4[%c1, %c0_11, %c0_12] : memref<10x1x32xf32, #tpu.memory_space<vmem>>, vector<1x1x32xf32>
    %17 = vector.shape_cast %16 : vector<1x1x32xf32> to vector<1x32xf32>
    %18 = vector.broadcast %17 : vector<1x32xf32> to vector<128x32xf32>
    %19 = arith.addf %15, %18 : vector<128x32xf32>
    %20 = arith.addf %12, %19 : vector<128x32xf32>
    %c1_13 = arith.constant 1 : index
    %c0_14 = arith.constant 0 : index
    %c0_15 = arith.constant 0 : index
    %21 = vector.load %arg3[%c1_13, %c0_14, %c0_15] : memref<11x32x32xf32, #tpu.memory_space<vmem>>, vector<1x32x32xf32>
    %22 = vector.shape_cast %21 : vector<1x32x32xf32> to vector<32x32xf32>
    %cst_16 = arith.constant dense<0.000000e+00> : vector<128x32xf32>
    %23 = tpu.matmul %20, %22, %cst_16 {dimension_numbers = #tpu.dot_dimension_numbers<[1], [0], [0], [1], [0, 0, 1, 1], [], []>} : vector<128x32xf32>, vector<32x32xf32>, vector<128x32xf32> -> vector<128x32xf32>
    %c2 = arith.constant 2 : index
    %c0_17 = arith.constant 0 : index
    %c0_18 = arith.constant 0 : index
    %24 = vector.load %arg4[%c2, %c0_17, %c0_18] : memref<10x1x32xf32, #tpu.memory_space<vmem>>, vector<1x1x32xf32>
    %25 = vector.shape_cast %24 : vector<1x1x32xf32> to vector<1x32xf32>
    %26 = vector.broadcast %25 : vector<1x32xf32> to vector<128x32xf32>
    %27 = arith.addf %23, %26 : vector<128x32xf32>
    %c2_19 = arith.constant 2 : index
    %c0_20 = arith.constant 0 : index
    %c0_21 = arith.constant 0 : index
    %28 = vector.load %arg3[%c2_19, %c0_20, %c0_21] : memref<11x32x32xf32, #tpu.memory_space<vmem>>, vector<1x32x32xf32>
    %29 = vector.shape_cast %28 : vector<1x32x32xf32> to vector<32x32xf32>
    %cst_22 = arith.constant dense<0.000000e+00> : vector<128x32xf32>
    %30 = tpu.matmul %20, %29, %cst_22 {dimension_numbers = #tpu.dot_dimension_numbers<[1], [0], [0], [1], [0, 0, 1, 1], [], []>} : vector<128x32xf32>, vector<32x32xf32>, vector<128x32xf32> -> vector<128x32xf32>
    %c3 = arith.constant 3 : index
    %c0_23 = arith.constant 0 : index
    %c0_24 = arith.constant 0 : index
    %31 = vector.load %arg4[%c3, %c0_23, %c0_24] : memref<10x1x32xf32, #tpu.memory_space<vmem>>, vector<1x1x32xf32>
    %32 = vector.shape_cast %31 : vector<1x1x32xf32> to vector<1x32xf32>
    %33 = vector.broadcast %32 : vector<1x32xf32> to vector<128x32xf32>
    %34 = arith.addf %30, %33 : vector<128x32xf32>
    %c3_25 = arith.constant 3 : index
    %c0_26 = arith.constant 0 : index
    %c0_27 = arith.constant 0 : index
    %35 = vector.load %arg3[%c3_25, %c0_26, %c0_27] : memref<11x32x32xf32, #tpu.memory_space<vmem>>, vector<1x32x32xf32>
    %36 = vector.shape_cast %35 : vector<1x32x32xf32> to vector<32x32xf32>
    %cst_28 = arith.constant dense<0.000000e+00> : vector<128x32xf32>
    %37 = tpu.matmul %20, %36, %cst_28 {dimension_numbers = #tpu.dot_dimension_numbers<[1], [0], [0], [1], [0, 0, 1, 1], [], []>} : vector<128x32xf32>, vector<32x32xf32>, vector<128x32xf32> -> vector<128x32xf32>
    %c4 = arith.constant 4 : index
    %c0_29 = arith.constant 0 : index
    %c0_30 = arith.constant 0 : index
    %38 = vector.load %arg4[%c4, %c0_29, %c0_30] : memref<10x1x32xf32, #tpu.memory_space<vmem>>, vector<1x1x32xf32>
    %39 = vector.shape_cast %38 : vector<1x1x32xf32> to vector<1x32xf32>
    %40 = vector.broadcast %39 : vector<1x32xf32> to vector<128x32xf32>
    %41 = arith.addf %37, %40 : vector<128x32xf32>
    %42 = vector.extract_strided_slice %27 {offsets = [0, 0], sizes = [64, 32], strides = [1, 1]} : vector<128x32xf32> to vector<64x32xf32>
    %43 = vector.extract_strided_slice %34 {offsets = [0, 0], sizes = [64, 32], strides = [1, 1]} : vector<128x32xf32> to vector<64x32xf32>
    %44 = vector.extract_strided_slice %41 {offsets = [0, 0], sizes = [64, 32], strides = [1, 1]} : vector<128x32xf32> to vector<64x32xf32>
    %45 = vector.extract_strided_slice %42 {offsets = [0, 0], sizes = [64, 8], strides = [1, 1]} : vector<64x32xf32> to vector<64x8xf32>
    %46 = vector.extract_strided_slice %43 {offsets = [0, 0], sizes = [64, 8], strides = [1, 1]} : vector<64x32xf32> to vector<64x8xf32>
    %47 = vector.extract_strided_slice %44 {offsets = [0, 0], sizes = [64, 8], strides = [1, 1]} : vector<64x32xf32> to vector<64x8xf32>
    %cst_31 = arith.constant dense<0.000000e+00> : vector<64x64xf32>
    %48 = tpu.matmul %45, %46, %cst_31 {dimension_numbers = #tpu.dot_dimension_numbers<[1], [1], [0], [0], [0, 0, 1, 0], [], []>} : vector<64x8xf32>, vector<64x8xf32>, vector<64x64xf32> -> vector<64x64xf32>
    %cst_32 = arith.constant 0.353553385 : f32
    %49 = vector.broadcast %cst_32 : f32 to vector<64x64xf32>
    %50 = arith.mulf %48, %49 : vector<64x64xf32>
    %cst_33 = arith.constant dense<0xFF800000> : vector<64xf32>
    %51 = vector.multi_reduction <maximumf>, %50, %cst_33 [1] : vector<64x64xf32> to vector<64xf32>
    %52 = vector.shape_cast %51 : vector<64xf32> to vector<64x1xf32>
    %53 = vector.broadcast %52 : vector<64x1xf32> to vector<64x64xf32>
    %54 = arith.subf %50, %53 : vector<64x64xf32>
    %55 = math.exp %54 : vector<64x64xf32>
    %cst_34 = arith.constant dense<0.000000e+00> : vector<64xf32>
    %56 = vector.multi_reduction <add>, %55, %cst_34 [1] : vector<64x64xf32> to vector<64xf32>
    %57 = vector.shape_cast %56 : vector<64xf32> to vector<64x1xf32>
    %58 = tpu.reciprocal %57 : vector<64x1xf32> -> vector<64x1xf32>
    %59 = vector.broadcast %58 : vector<64x1xf32> to vector<64x64xf32>
    %60 = arith.mulf %55, %59 : vector<64x64xf32>
    %cst_35 = arith.constant dense<0.000000e+00> : vector<64x8xf32>
    %61 = tpu.matmul %60, %47, %cst_35 {dimension_numbers = #tpu.dot_dimension_numbers<[1], [0], [0], [1], [0, 0, 1, 1], [], []>} : vector<64x64xf32>, vector<64x8xf32>, vector<64x8xf32> -> vector<64x8xf32>
    %62 = vector.extract_strided_slice %42 {offsets = [0, 8], sizes = [64, 8], strides = [1, 1]} : vector<64x32xf32> to vector<64x8xf32>
    %63 = vector.extract_strided_slice %43 {offsets = [0, 8], sizes = [64, 8], strides = [1, 1]} : vector<64x32xf32> to vector<64x8xf32>
    %64 = vector.extract_strided_slice %44 {offsets = [0, 8], sizes = [64, 8], strides = [1, 1]} : vector<64x32xf32> to vector<64x8xf32>
    %cst_36 = arith.constant dense<0.000000e+00> : vector<64x64xf32>
    %65 = tpu.matmul %62, %63, %cst_36 {dimension_numbers = #tpu.dot_dimension_numbers<[1], [1], [0], [0], [0, 0, 1, 0], [], []>} : vector<64x8xf32>, vector<64x8xf32>, vector<64x64xf32> -> vector<64x64xf32>
    %cst_37 = arith.constant 0.353553385 : f32
    %66 = vector.broadcast %cst_37 : f32 to vector<64x64xf32>
    %67 = arith.mulf %65, %66 : vector<64x64xf32>
    %cst_38 = arith.constant dense<0xFF800000> : vector<64xf32>
    %68 = vector.multi_reduction <maximumf>, %67, %cst_38 [1] : vector<64x64xf32> to vector<64xf32>
    %69 = vector.shape_cast %68 : vector<64xf32> to vector<64x1xf32>
    %70 = vector.broadcast %69 : vector<64x1xf32> to vector<64x64xf32>
    %71 = arith.subf %67, %70 : vector<64x64xf32>
    %72 = math.exp %71 : vector<64x64xf32>
    %cst_39 = arith.constant dense<0.000000e+00> : vector<64xf32>
    %73 = vector.multi_reduction <add>, %72, %cst_39 [1] : vector<64x64xf32> to vector<64xf32>
    %74 = vector.shape_cast %73 : vector<64xf32> to vector<64x1xf32>
    %75 = tpu.reciprocal %74 : vector<64x1xf32> -> vector<64x1xf32>
    %76 = vector.broadcast %75 : vector<64x1xf32> to vector<64x64xf32>
    %77 = arith.mulf %72, %76 : vector<64x64xf32>
    %cst_40 = arith.constant dense<0.000000e+00> : vector<64x8xf32>
    %78 = tpu.matmul %77, %64, %cst_40 {dimension_numbers = #tpu.dot_dimension_numbers<[1], [0], [0], [1], [0, 0, 1, 1], [], []>} : vector<64x64xf32>, vector<64x8xf32>, vector<64x8xf32> -> vector<64x8xf32>
    %79 = vector.extract_strided_slice %42 {offsets = [0, 16], sizes = [64, 8], strides = [1, 1]} : vector<64x32xf32> to vector<64x8xf32>
    %80 = vector.extract_strided_slice %43 {offsets = [0, 16], sizes = [64, 8], strides = [1, 1]} : vector<64x32xf32> to vector<64x8xf32>
    %81 = vector.extract_strided_slice %44 {offsets = [0, 16], sizes = [64, 8], strides = [1, 1]} : vector<64x32xf32> to vector<64x8xf32>
    %cst_41 = arith.constant dense<0.000000e+00> : vector<64x64xf32>
    %82 = tpu.matmul %79, %80, %cst_41 {dimension_numbers = #tpu.dot_dimension_numbers<[1], [1], [0], [0], [0, 0, 1, 0], [], []>} : vector<64x8xf32>, vector<64x8xf32>, vector<64x64xf32> -> vector<64x64xf32>
    %cst_42 = arith.constant 0.353553385 : f32
    %83 = vector.broadcast %cst_42 : f32 to vector<64x64xf32>
    %84 = arith.mulf %82, %83 : vector<64x64xf32>
    %cst_43 = arith.constant dense<0xFF800000> : vector<64xf32>
    %85 = vector.multi_reduction <maximumf>, %84, %cst_43 [1] : vector<64x64xf32> to vector<64xf32>
    %86 = vector.shape_cast %85 : vector<64xf32> to vector<64x1xf32>
    %87 = vector.broadcast %86 : vector<64x1xf32> to vector<64x64xf32>
    %88 = arith.subf %84, %87 : vector<64x64xf32>
    %89 = math.exp %88 : vector<64x64xf32>
    %cst_44 = arith.constant dense<0.000000e+00> : vector<64xf32>
    %90 = vector.multi_reduction <add>, %89, %cst_44 [1] : vector<64x64xf32> to vector<64xf32>
    %91 = vector.shape_cast %90 : vector<64xf32> to vector<64x1xf32>
    %92 = tpu.reciprocal %91 : vector<64x1xf32> -> vector<64x1xf32>
    %93 = vector.broadcast %92 : vector<64x1xf32> to vector<64x64xf32>
    %94 = arith.mulf %89, %93 : vector<64x64xf32>
    %cst_45 = arith.constant dense<0.000000e+00> : vector<64x8xf32>
    %95 = tpu.matmul %94, %81, %cst_45 {dimension_numbers = #tpu.dot_dimension_numbers<[1], [0], [0], [1], [0, 0, 1, 1], [], []>} : vector<64x64xf32>, vector<64x8xf32>, vector<64x8xf32> -> vector<64x8xf32>
    %96 = vector.extract_strided_slice %42 {offsets = [0, 24], sizes = [64, 8], strides = [1, 1]} : vector<64x32xf32> to vector<64x8xf32>
    %97 = vector.extract_strided_slice %43 {offsets = [0, 24], sizes = [64, 8], strides = [1, 1]} : vector<64x32xf32> to vector<64x8xf32>
    %98 = vector.extract_strided_slice %44 {offsets = [0, 24], sizes = [64, 8], strides = [1, 1]} : vector<64x32xf32> to vector<64x8xf32>
    %cst_46 = arith.constant dense<0.000000e+00> : vector<64x64xf32>
    %99 = tpu.matmul %96, %97, %cst_46 {dimension_numbers = #tpu.dot_dimension_numbers<[1], [1], [0], [0], [0, 0, 1, 0], [], []>} : vector<64x8xf32>, vector<64x8xf32>, vector<64x64xf32> -> vector<64x64xf32>
    %cst_47 = arith.constant 0.353553385 : f32
    %100 = vector.broadcast %cst_47 : f32 to vector<64x64xf32>
    %101 = arith.mulf %99, %100 : vector<64x64xf32>
    %cst_48 = arith.constant dense<0xFF800000> : vector<64xf32>
    %102 = vector.multi_reduction <maximumf>, %101, %cst_48 [1] : vector<64x64xf32> to vector<64xf32>
    %103 = vector.shape_cast %102 : vector<64xf32> to vector<64x1xf32>
    %104 = vector.broadcast %103 : vector<64x1xf32> to vector<64x64xf32>
    %105 = arith.subf %101, %104 : vector<64x64xf32>
    %106 = math.exp %105 : vector<64x64xf32>
    %cst_49 = arith.constant dense<0.000000e+00> : vector<64xf32>
    %107 = vector.multi_reduction <add>, %106, %cst_49 [1] : vector<64x64xf32> to vector<64xf32>
    %108 = vector.shape_cast %107 : vector<64xf32> to vector<64x1xf32>
    %109 = tpu.reciprocal %108 : vector<64x1xf32> -> vector<64x1xf32>
    %110 = vector.broadcast %109 : vector<64x1xf32> to vector<64x64xf32>
    %111 = arith.mulf %106, %110 : vector<64x64xf32>
    %cst_50 = arith.constant dense<0.000000e+00> : vector<64x8xf32>
    %112 = tpu.matmul %111, %98, %cst_50 {dimension_numbers = #tpu.dot_dimension_numbers<[1], [0], [0], [1], [0, 0, 1, 1], [], []>} : vector<64x64xf32>, vector<64x8xf32>, vector<64x8xf32> -> vector<64x8xf32>
    %113 = tpu.concatenate %61, %78, %95, %112 in 1 : vector<64x8xf32>, vector<64x8xf32>, vector<64x8xf32>, vector<64x8xf32> -> vector<64x32xf32>
    %114 = vector.extract_strided_slice %27 {offsets = [64, 0], sizes = [64, 32], strides = [1, 1]} : vector<128x32xf32> to vector<64x32xf32>
    %115 = vector.extract_strided_slice %34 {offsets = [64, 0], sizes = [64, 32], strides = [1, 1]} : vector<128x32xf32> to vector<64x32xf32>
    %116 = vector.extract_strided_slice %41 {offsets = [64, 0], sizes = [64, 32], strides = [1, 1]} : vector<128x32xf32> to vector<64x32xf32>
    %117 = vector.extract_strided_slice %114 {offsets = [0, 0], sizes = [64, 8], strides = [1, 1]} : vector<64x32xf32> to vector<64x8xf32>
    %118 = vector.extract_strided_slice %115 {offsets = [0, 0], sizes = [64, 8], strides = [1, 1]} : vector<64x32xf32> to vector<64x8xf32>
    %119 = vector.extract_strided_slice %116 {offsets = [0, 0], sizes = [64, 8], strides = [1, 1]} : vector<64x32xf32> to vector<64x8xf32>
    %cst_51 = arith.constant dense<0.000000e+00> : vector<64x64xf32>
    %120 = tpu.matmul %117, %118, %cst_51 {dimension_numbers = #tpu.dot_dimension_numbers<[1], [1], [0], [0], [0, 0, 1, 0], [], []>} : vector<64x8xf32>, vector<64x8xf32>, vector<64x64xf32> -> vector<64x64xf32>
    %cst_52 = arith.constant 0.353553385 : f32
    %121 = vector.broadcast %cst_52 : f32 to vector<64x64xf32>
    %122 = arith.mulf %120, %121 : vector<64x64xf32>
    %cst_53 = arith.constant dense<0xFF800000> : vector<64xf32>
    %123 = vector.multi_reduction <maximumf>, %122, %cst_53 [1] : vector<64x64xf32> to vector<64xf32>
    %124 = vector.shape_cast %123 : vector<64xf32> to vector<64x1xf32>
    %125 = vector.broadcast %124 : vector<64x1xf32> to vector<64x64xf32>
    %126 = arith.subf %122, %125 : vector<64x64xf32>
    %127 = math.exp %126 : vector<64x64xf32>
    %cst_54 = arith.constant dense<0.000000e+00> : vector<64xf32>
    %128 = vector.multi_reduction <add>, %127, %cst_54 [1] : vector<64x64xf32> to vector<64xf32>
    %129 = vector.shape_cast %128 : vector<64xf32> to vector<64x1xf32>
    %130 = tpu.reciprocal %129 : vector<64x1xf32> -> vector<64x1xf32>
    %131 = vector.broadcast %130 : vector<64x1xf32> to vector<64x64xf32>
    %132 = arith.mulf %127, %131 : vector<64x64xf32>
    %cst_55 = arith.constant dense<0.000000e+00> : vector<64x8xf32>
    %133 = tpu.matmul %132, %119, %cst_55 {dimension_numbers = #tpu.dot_dimension_numbers<[1], [0], [0], [1], [0, 0, 1, 1], [], []>} : vector<64x64xf32>, vector<64x8xf32>, vector<64x8xf32> -> vector<64x8xf32>
    %134 = vector.extract_strided_slice %114 {offsets = [0, 8], sizes = [64, 8], strides = [1, 1]} : vector<64x32xf32> to vector<64x8xf32>
    %135 = vector.extract_strided_slice %115 {offsets = [0, 8], sizes = [64, 8], strides = [1, 1]} : vector<64x32xf32> to vector<64x8xf32>
    %136 = vector.extract_strided_slice %116 {offsets = [0, 8], sizes = [64, 8], strides = [1, 1]} : vector<64x32xf32> to vector<64x8xf32>
    %cst_56 = arith.constant dense<0.000000e+00> : vector<64x64xf32>
    %137 = tpu.matmul %134, %135, %cst_56 {dimension_numbers = #tpu.dot_dimension_numbers<[1], [1], [0], [0], [0, 0, 1, 0], [], []>} : vector<64x8xf32>, vector<64x8xf32>, vector<64x64xf32> -> vector<64x64xf32>
    %cst_57 = arith.constant 0.353553385 : f32
    %138 = vector.broadcast %cst_57 : f32 to vector<64x64xf32>
    %139 = arith.mulf %137, %138 : vector<64x64xf32>
    %cst_58 = arith.constant dense<0xFF800000> : vector<64xf32>
    %140 = vector.multi_reduction <maximumf>, %139, %cst_58 [1] : vector<64x64xf32> to vector<64xf32>
    %141 = vector.shape_cast %140 : vector<64xf32> to vector<64x1xf32>
    %142 = vector.broadcast %141 : vector<64x1xf32> to vector<64x64xf32>
    %143 = arith.subf %139, %142 : vector<64x64xf32>
    %144 = math.exp %143 : vector<64x64xf32>
    %cst_59 = arith.constant dense<0.000000e+00> : vector<64xf32>
    %145 = vector.multi_reduction <add>, %144, %cst_59 [1] : vector<64x64xf32> to vector<64xf32>
    %146 = vector.shape_cast %145 : vector<64xf32> to vector<64x1xf32>
    %147 = tpu.reciprocal %146 : vector<64x1xf32> -> vector<64x1xf32>
    %148 = vector.broadcast %147 : vector<64x1xf32> to vector<64x64xf32>
    %149 = arith.mulf %144, %148 : vector<64x64xf32>
    %cst_60 = arith.constant dense<0.000000e+00> : vector<64x8xf32>
    %150 = tpu.matmul %149, %136, %cst_60 {dimension_numbers = #tpu.dot_dimension_numbers<[1], [0], [0], [1], [0, 0, 1, 1], [], []>} : vector<64x64xf32>, vector<64x8xf32>, vector<64x8xf32> -> vector<64x8xf32>
    %151 = vector.extract_strided_slice %114 {offsets = [0, 16], sizes = [64, 8], strides = [1, 1]} : vector<64x32xf32> to vector<64x8xf32>
    %152 = vector.extract_strided_slice %115 {offsets = [0, 16], sizes = [64, 8], strides = [1, 1]} : vector<64x32xf32> to vector<64x8xf32>
    %153 = vector.extract_strided_slice %116 {offsets = [0, 16], sizes = [64, 8], strides = [1, 1]} : vector<64x32xf32> to vector<64x8xf32>
    %cst_61 = arith.constant dense<0.000000e+00> : vector<64x64xf32>
    %154 = tpu.matmul %151, %152, %cst_61 {dimension_numbers = #tpu.dot_dimension_numbers<[1], [1], [0], [0], [0, 0, 1, 0], [], []>} : vector<64x8xf32>, vector<64x8xf32>, vector<64x64xf32> -> vector<64x64xf32>
    %cst_62 = arith.constant 0.353553385 : f32
    %155 = vector.broadcast %cst_62 : f32 to vector<64x64xf32>
    %156 = arith.mulf %154, %155 : vector<64x64xf32>
    %cst_63 = arith.constant dense<0xFF800000> : vector<64xf32>
    %157 = vector.multi_reduction <maximumf>, %156, %cst_63 [1] : vector<64x64xf32> to vector<64xf32>
    %158 = vector.shape_cast %157 : vector<64xf32> to vector<64x1xf32>
    %159 = vector.broadcast %158 : vector<64x1xf32> to vector<64x64xf32>
    %160 = arith.subf %156, %159 : vector<64x64xf32>
    %161 = math.exp %160 : vector<64x64xf32>
    %cst_64 = arith.constant dense<0.000000e+00> : vector<64xf32>
    %162 = vector.multi_reduction <add>, %161, %cst_64 [1] : vector<64x64xf32> to vector<64xf32>
    %163 = vector.shape_cast %162 : vector<64xf32> to vector<64x1xf32>
    %164 = tpu.reciprocal %163 : vector<64x1xf32> -> vector<64x1xf32>
    %165 = vector.broadcast %164 : vector<64x1xf32> to vector<64x64xf32>
    %166 = arith.mulf %161, %165 : vector<64x64xf32>
    %cst_65 = arith.constant dense<0.000000e+00> : vector<64x8xf32>
    %167 = tpu.matmul %166, %153, %cst_65 {dimension_numbers = #tpu.dot_dimension_numbers<[1], [0], [0], [1], [0, 0, 1, 1], [], []>} : vector<64x64xf32>, vector<64x8xf32>, vector<64x8xf32> -> vector<64x8xf32>
    %168 = vector.extract_strided_slice %114 {offsets = [0, 24], sizes = [64, 8], strides = [1, 1]} : vector<64x32xf32> to vector<64x8xf32>
    %169 = vector.extract_strided_slice %115 {offsets = [0, 24], sizes = [64, 8], strides = [1, 1]} : vector<64x32xf32> to vector<64x8xf32>
    %170 = vector.extract_strided_slice %116 {offsets = [0, 24], sizes = [64, 8], strides = [1, 1]} : vector<64x32xf32> to vector<64x8xf32>
    %cst_66 = arith.constant dense<0.000000e+00> : vector<64x64xf32>
    %171 = tpu.matmul %168, %169, %cst_66 {dimension_numbers = #tpu.dot_dimension_numbers<[1], [1], [0], [0], [0, 0, 1, 0], [], []>} : vector<64x8xf32>, vector<64x8xf32>, vector<64x64xf32> -> vector<64x64xf32>
    %cst_67 = arith.constant 0.353553385 : f32
    %172 = vector.broadcast %cst_67 : f32 to vector<64x64xf32>
    %173 = arith.mulf %171, %172 : vector<64x64xf32>
    %cst_68 = arith.constant dense<0xFF800000> : vector<64xf32>
    %174 = vector.multi_reduction <maximumf>, %173, %cst_68 [1] : vector<64x64xf32> to vector<64xf32>
    %175 = vector.shape_cast %174 : vector<64xf32> to vector<64x1xf32>
    %176 = vector.broadcast %175 : vector<64x1xf32> to vector<64x64xf32>
    %177 = arith.subf %173, %176 : vector<64x64xf32>
    %178 = math.exp %177 : vector<64x64xf32>
    %cst_69 = arith.constant dense<0.000000e+00> : vector<64xf32>
    %179 = vector.multi_reduction <add>, %178, %cst_69 [1] : vector<64x64xf32> to vector<64xf32>
    %180 = vector.shape_cast %179 : vector<64xf32> to vector<64x1xf32>
    %181 = tpu.reciprocal %180 : vector<64x1xf32> -> vector<64x1xf32>
    %182 = vector.broadcast %181 : vector<64x1xf32> to vector<64x64xf32>
    %183 = arith.mulf %178, %182 : vector<64x64xf32>
    %cst_70 = arith.constant dense<0.000000e+00> : vector<64x8xf32>
    %184 = tpu.matmul %183, %170, %cst_70 {dimension_numbers = #tpu.dot_dimension_numbers<[1], [0], [0], [1], [0, 0, 1, 1], [], []>} : vector<64x64xf32>, vector<64x8xf32>, vector<64x8xf32> -> vector<64x8xf32>
    %185 = tpu.concatenate %133, %150, %167, %184 in 1 : vector<64x8xf32>, vector<64x8xf32>, vector<64x8xf32>, vector<64x8xf32> -> vector<64x32xf32>
    %186 = tpu.concatenate %113, %185 in 0 : vector<64x32xf32>, vector<64x32xf32> -> vector<128x32xf32>
    %c4_71 = arith.constant 4 : index
    %c0_72 = arith.constant 0 : index
    %c0_73 = arith.constant 0 : index
    %187 = vector.load %arg3[%c4_71, %c0_72, %c0_73] : memref<11x32x32xf32, #tpu.memory_space<vmem>>, vector<1x32x32xf32>
    %188 = vector.shape_cast %187 : vector<1x32x32xf32> to vector<32x32xf32>
    %cst_74 = arith.constant dense<0.000000e+00> : vector<128x32xf32>
    %189 = tpu.matmul %186, %188, %cst_74 {dimension_numbers = #tpu.dot_dimension_numbers<[1], [0], [0], [1], [0, 0, 1, 1], [], []>} : vector<128x32xf32>, vector<32x32xf32>, vector<128x32xf32> -> vector<128x32xf32>
    %c5 = arith.constant 5 : index
    %c0_75 = arith.constant 0 : index
    %c0_76 = arith.constant 0 : index
    %190 = vector.load %arg4[%c5, %c0_75, %c0_76] : memref<10x1x32xf32, #tpu.memory_space<vmem>>, vector<1x1x32xf32>
    %191 = vector.shape_cast %190 : vector<1x1x32xf32> to vector<1x32xf32>
    %192 = vector.broadcast %191 : vector<1x32xf32> to vector<128x32xf32>
    %193 = arith.addf %189, %192 : vector<128x32xf32>
    %194 = arith.addf %193, %20 : vector<128x32xf32>
    %c5_77 = arith.constant 5 : index
    %c0_78 = arith.constant 0 : index
    %c0_79 = arith.constant 0 : index
    %195 = vector.load %arg3[%c5_77, %c0_78, %c0_79] : memref<11x32x32xf32, #tpu.memory_space<vmem>>, vector<1x32x32xf32>
    %196 = vector.shape_cast %195 : vector<1x32x32xf32> to vector<32x32xf32>
    %cst_80 = arith.constant dense<0.000000e+00> : vector<128x32xf32>
    %197 = tpu.matmul %194, %196, %cst_80 {dimension_numbers = #tpu.dot_dimension_numbers<[1], [0], [0], [1], [0, 0, 1, 1], [], []>} : vector<128x32xf32>, vector<32x32xf32>, vector<128x32xf32> -> vector<128x32xf32>
    %198 = arith.addf %197, %194 : vector<128x32xf32>
    %c6 = arith.constant 6 : index
    %c0_81 = arith.constant 0 : index
    %c0_82 = arith.constant 0 : index
    %199 = vector.load %arg3[%c6, %c0_81, %c0_82] : memref<11x32x32xf32, #tpu.memory_space<vmem>>, vector<1x32x32xf32>
    %200 = vector.shape_cast %199 : vector<1x32x32xf32> to vector<32x32xf32>
    %cst_83 = arith.constant dense<0.000000e+00> : vector<128x32xf32>
    %201 = tpu.matmul %198, %200, %cst_83 {dimension_numbers = #tpu.dot_dimension_numbers<[1], [0], [0], [1], [0, 0, 1, 1], [], []>} : vector<128x32xf32>, vector<32x32xf32>, vector<128x32xf32> -> vector<128x32xf32>
    %c6_84 = arith.constant 6 : index
    %c0_85 = arith.constant 0 : index
    %c0_86 = arith.constant 0 : index
    %202 = vector.load %arg4[%c6_84, %c0_85, %c0_86] : memref<10x1x32xf32, #tpu.memory_space<vmem>>, vector<1x1x32xf32>
    %203 = vector.shape_cast %202 : vector<1x1x32xf32> to vector<1x32xf32>
    %204 = vector.broadcast %203 : vector<1x32xf32> to vector<128x32xf32>
    %205 = arith.addf %201, %204 : vector<128x32xf32>
    %c7 = arith.constant 7 : index
    %c0_87 = arith.constant 0 : index
    %c0_88 = arith.constant 0 : index
    %206 = vector.load %arg3[%c7, %c0_87, %c0_88] : memref<11x32x32xf32, #tpu.memory_space<vmem>>, vector<1x32x32xf32>
    %207 = vector.shape_cast %206 : vector<1x32x32xf32> to vector<32x32xf32>
    %cst_89 = arith.constant dense<0.000000e+00> : vector<128x32xf32>
    %208 = tpu.matmul %198, %207, %cst_89 {dimension_numbers = #tpu.dot_dimension_numbers<[1], [0], [0], [1], [0, 0, 1, 1], [], []>} : vector<128x32xf32>, vector<32x32xf32>, vector<128x32xf32> -> vector<128x32xf32>
    %c7_90 = arith.constant 7 : index
    %c0_91 = arith.constant 0 : index
    %c0_92 = arith.constant 0 : index
    %209 = vector.load %arg4[%c7_90, %c0_91, %c0_92] : memref<10x1x32xf32, #tpu.memory_space<vmem>>, vector<1x1x32xf32>
    %210 = vector.shape_cast %209 : vector<1x1x32xf32> to vector<1x32xf32>
    %211 = vector.broadcast %210 : vector<1x32xf32> to vector<128x32xf32>
    %212 = arith.addf %208, %211 : vector<128x32xf32>
    %c8 = arith.constant 8 : index
    %c0_93 = arith.constant 0 : index
    %c0_94 = arith.constant 0 : index
    %213 = vector.load %arg3[%c8, %c0_93, %c0_94] : memref<11x32x32xf32, #tpu.memory_space<vmem>>, vector<1x32x32xf32>
    %214 = vector.shape_cast %213 : vector<1x32x32xf32> to vector<32x32xf32>
    %cst_95 = arith.constant dense<0.000000e+00> : vector<128x32xf32>
    %215 = tpu.matmul %198, %214, %cst_95 {dimension_numbers = #tpu.dot_dimension_numbers<[1], [0], [0], [1], [0, 0, 1, 1], [], []>} : vector<128x32xf32>, vector<32x32xf32>, vector<128x32xf32> -> vector<128x32xf32>
    %c8_96 = arith.constant 8 : index
    %c0_97 = arith.constant 0 : index
    %c0_98 = arith.constant 0 : index
    %216 = vector.load %arg4[%c8_96, %c0_97, %c0_98] : memref<10x1x32xf32, #tpu.memory_space<vmem>>, vector<1x1x32xf32>
    %217 = vector.shape_cast %216 : vector<1x1x32xf32> to vector<1x32xf32>
    %218 = vector.broadcast %217 : vector<1x32xf32> to vector<128x32xf32>
    %219 = arith.addf %215, %218 : vector<128x32xf32>
    %220 = vector.extract_strided_slice %205 {offsets = [0, 0], sizes = [64, 32], strides = [1, 1]} : vector<128x32xf32> to vector<64x32xf32>
    %221 = vector.extract_strided_slice %212 {offsets = [0, 0], sizes = [64, 32], strides = [1, 1]} : vector<128x32xf32> to vector<64x32xf32>
    %222 = vector.extract_strided_slice %219 {offsets = [0, 0], sizes = [64, 32], strides = [1, 1]} : vector<128x32xf32> to vector<64x32xf32>
    %223 = vector.extract_strided_slice %220 {offsets = [0, 0], sizes = [64, 8], strides = [1, 1]} : vector<64x32xf32> to vector<64x8xf32>
    %224 = vector.extract_strided_slice %221 {offsets = [0, 0], sizes = [64, 8], strides = [1, 1]} : vector<64x32xf32> to vector<64x8xf32>
    %225 = vector.extract_strided_slice %222 {offsets = [0, 0], sizes = [64, 8], strides = [1, 1]} : vector<64x32xf32> to vector<64x8xf32>
    %cst_99 = arith.constant dense<0.000000e+00> : vector<64x64xf32>
    %226 = tpu.matmul %223, %224, %cst_99 {dimension_numbers = #tpu.dot_dimension_numbers<[1], [1], [0], [0], [0, 0, 1, 0], [], []>} : vector<64x8xf32>, vector<64x8xf32>, vector<64x64xf32> -> vector<64x64xf32>
    %cst_100 = arith.constant 0.353553385 : f32
    %227 = vector.broadcast %cst_100 : f32 to vector<64x64xf32>
    %228 = arith.mulf %226, %227 : vector<64x64xf32>
    %cst_101 = arith.constant dense<0xFF800000> : vector<64xf32>
    %229 = vector.multi_reduction <maximumf>, %228, %cst_101 [1] : vector<64x64xf32> to vector<64xf32>
    %230 = vector.shape_cast %229 : vector<64xf32> to vector<64x1xf32>
    %231 = vector.broadcast %230 : vector<64x1xf32> to vector<64x64xf32>
    %232 = arith.subf %228, %231 : vector<64x64xf32>
    %233 = math.exp %232 : vector<64x64xf32>
    %cst_102 = arith.constant dense<0.000000e+00> : vector<64xf32>
    %234 = vector.multi_reduction <add>, %233, %cst_102 [1] : vector<64x64xf32> to vector<64xf32>
    %235 = vector.shape_cast %234 : vector<64xf32> to vector<64x1xf32>
    %236 = tpu.reciprocal %235 : vector<64x1xf32> -> vector<64x1xf32>
    %237 = vector.broadcast %236 : vector<64x1xf32> to vector<64x64xf32>
    %238 = arith.mulf %233, %237 : vector<64x64xf32>
    %cst_103 = arith.constant dense<0.000000e+00> : vector<64x8xf32>
    %239 = tpu.matmul %238, %225, %cst_103 {dimension_numbers = #tpu.dot_dimension_numbers<[1], [0], [0], [1], [0, 0, 1, 1], [], []>} : vector<64x64xf32>, vector<64x8xf32>, vector<64x8xf32> -> vector<64x8xf32>
    %240 = vector.extract_strided_slice %220 {offsets = [0, 8], sizes = [64, 8], strides = [1, 1]} : vector<64x32xf32> to vector<64x8xf32>
    %241 = vector.extract_strided_slice %221 {offsets = [0, 8], sizes = [64, 8], strides = [1, 1]} : vector<64x32xf32> to vector<64x8xf32>
    %242 = vector.extract_strided_slice %222 {offsets = [0, 8], sizes = [64, 8], strides = [1, 1]} : vector<64x32xf32> to vector<64x8xf32>
    %cst_104 = arith.constant dense<0.000000e+00> : vector<64x64xf32>
    %243 = tpu.matmul %240, %241, %cst_104 {dimension_numbers = #tpu.dot_dimension_numbers<[1], [1], [0], [0], [0, 0, 1, 0], [], []>} : vector<64x8xf32>, vector<64x8xf32>, vector<64x64xf32> -> vector<64x64xf32>
    %cst_105 = arith.constant 0.353553385 : f32
    %244 = vector.broadcast %cst_105 : f32 to vector<64x64xf32>
    %245 = arith.mulf %243, %244 : vector<64x64xf32>
    %cst_106 = arith.constant dense<0xFF800000> : vector<64xf32>
    %246 = vector.multi_reduction <maximumf>, %245, %cst_106 [1] : vector<64x64xf32> to vector<64xf32>
    %247 = vector.shape_cast %246 : vector<64xf32> to vector<64x1xf32>
    %248 = vector.broadcast %247 : vector<64x1xf32> to vector<64x64xf32>
    %249 = arith.subf %245, %248 : vector<64x64xf32>
    %250 = math.exp %249 : vector<64x64xf32>
    %cst_107 = arith.constant dense<0.000000e+00> : vector<64xf32>
    %251 = vector.multi_reduction <add>, %250, %cst_107 [1] : vector<64x64xf32> to vector<64xf32>
    %252 = vector.shape_cast %251 : vector<64xf32> to vector<64x1xf32>
    %253 = tpu.reciprocal %252 : vector<64x1xf32> -> vector<64x1xf32>
    %254 = vector.broadcast %253 : vector<64x1xf32> to vector<64x64xf32>
    %255 = arith.mulf %250, %254 : vector<64x64xf32>
    %cst_108 = arith.constant dense<0.000000e+00> : vector<64x8xf32>
    %256 = tpu.matmul %255, %242, %cst_108 {dimension_numbers = #tpu.dot_dimension_numbers<[1], [0], [0], [1], [0, 0, 1, 1], [], []>} : vector<64x64xf32>, vector<64x8xf32>, vector<64x8xf32> -> vector<64x8xf32>
    %257 = vector.extract_strided_slice %220 {offsets = [0, 16], sizes = [64, 8], strides = [1, 1]} : vector<64x32xf32> to vector<64x8xf32>
    %258 = vector.extract_strided_slice %221 {offsets = [0, 16], sizes = [64, 8], strides = [1, 1]} : vector<64x32xf32> to vector<64x8xf32>
    %259 = vector.extract_strided_slice %222 {offsets = [0, 16], sizes = [64, 8], strides = [1, 1]} : vector<64x32xf32> to vector<64x8xf32>
    %cst_109 = arith.constant dense<0.000000e+00> : vector<64x64xf32>
    %260 = tpu.matmul %257, %258, %cst_109 {dimension_numbers = #tpu.dot_dimension_numbers<[1], [1], [0], [0], [0, 0, 1, 0], [], []>} : vector<64x8xf32>, vector<64x8xf32>, vector<64x64xf32> -> vector<64x64xf32>
    %cst_110 = arith.constant 0.353553385 : f32
    %261 = vector.broadcast %cst_110 : f32 to vector<64x64xf32>
    %262 = arith.mulf %260, %261 : vector<64x64xf32>
    %cst_111 = arith.constant dense<0xFF800000> : vector<64xf32>
    %263 = vector.multi_reduction <maximumf>, %262, %cst_111 [1] : vector<64x64xf32> to vector<64xf32>
    %264 = vector.shape_cast %263 : vector<64xf32> to vector<64x1xf32>
    %265 = vector.broadcast %264 : vector<64x1xf32> to vector<64x64xf32>
    %266 = arith.subf %262, %265 : vector<64x64xf32>
    %267 = math.exp %266 : vector<64x64xf32>
    %cst_112 = arith.constant dense<0.000000e+00> : vector<64xf32>
    %268 = vector.multi_reduction <add>, %267, %cst_112 [1] : vector<64x64xf32> to vector<64xf32>
    %269 = vector.shape_cast %268 : vector<64xf32> to vector<64x1xf32>
    %270 = tpu.reciprocal %269 : vector<64x1xf32> -> vector<64x1xf32>
    %271 = vector.broadcast %270 : vector<64x1xf32> to vector<64x64xf32>
    %272 = arith.mulf %267, %271 : vector<64x64xf32>
    %cst_113 = arith.constant dense<0.000000e+00> : vector<64x8xf32>
    %273 = tpu.matmul %272, %259, %cst_113 {dimension_numbers = #tpu.dot_dimension_numbers<[1], [0], [0], [1], [0, 0, 1, 1], [], []>} : vector<64x64xf32>, vector<64x8xf32>, vector<64x8xf32> -> vector<64x8xf32>
    %274 = vector.extract_strided_slice %220 {offsets = [0, 24], sizes = [64, 8], strides = [1, 1]} : vector<64x32xf32> to vector<64x8xf32>
    %275 = vector.extract_strided_slice %221 {offsets = [0, 24], sizes = [64, 8], strides = [1, 1]} : vector<64x32xf32> to vector<64x8xf32>
    %276 = vector.extract_strided_slice %222 {offsets = [0, 24], sizes = [64, 8], strides = [1, 1]} : vector<64x32xf32> to vector<64x8xf32>
    %cst_114 = arith.constant dense<0.000000e+00> : vector<64x64xf32>
    %277 = tpu.matmul %274, %275, %cst_114 {dimension_numbers = #tpu.dot_dimension_numbers<[1], [1], [0], [0], [0, 0, 1, 0], [], []>} : vector<64x8xf32>, vector<64x8xf32>, vector<64x64xf32> -> vector<64x64xf32>
    %cst_115 = arith.constant 0.353553385 : f32
    %278 = vector.broadcast %cst_115 : f32 to vector<64x64xf32>
    %279 = arith.mulf %277, %278 : vector<64x64xf32>
    %cst_116 = arith.constant dense<0xFF800000> : vector<64xf32>
    %280 = vector.multi_reduction <maximumf>, %279, %cst_116 [1] : vector<64x64xf32> to vector<64xf32>
    %281 = vector.shape_cast %280 : vector<64xf32> to vector<64x1xf32>
    %282 = vector.broadcast %281 : vector<64x1xf32> to vector<64x64xf32>
    %283 = arith.subf %279, %282 : vector<64x64xf32>
    %284 = math.exp %283 : vector<64x64xf32>
    %cst_117 = arith.constant dense<0.000000e+00> : vector<64xf32>
    %285 = vector.multi_reduction <add>, %284, %cst_117 [1] : vector<64x64xf32> to vector<64xf32>
    %286 = vector.shape_cast %285 : vector<64xf32> to vector<64x1xf32>
    %287 = tpu.reciprocal %286 : vector<64x1xf32> -> vector<64x1xf32>
    %288 = vector.broadcast %287 : vector<64x1xf32> to vector<64x64xf32>
    %289 = arith.mulf %284, %288 : vector<64x64xf32>
    %cst_118 = arith.constant dense<0.000000e+00> : vector<64x8xf32>
    %290 = tpu.matmul %289, %276, %cst_118 {dimension_numbers = #tpu.dot_dimension_numbers<[1], [0], [0], [1], [0, 0, 1, 1], [], []>} : vector<64x64xf32>, vector<64x8xf32>, vector<64x8xf32> -> vector<64x8xf32>
    %291 = tpu.concatenate %239, %256, %273, %290 in 1 : vector<64x8xf32>, vector<64x8xf32>, vector<64x8xf32>, vector<64x8xf32> -> vector<64x32xf32>
    %292 = vector.extract_strided_slice %205 {offsets = [64, 0], sizes = [64, 32], strides = [1, 1]} : vector<128x32xf32> to vector<64x32xf32>
    %293 = vector.extract_strided_slice %212 {offsets = [64, 0], sizes = [64, 32], strides = [1, 1]} : vector<128x32xf32> to vector<64x32xf32>
    %294 = vector.extract_strided_slice %219 {offsets = [64, 0], sizes = [64, 32], strides = [1, 1]} : vector<128x32xf32> to vector<64x32xf32>
    %295 = vector.extract_strided_slice %292 {offsets = [0, 0], sizes = [64, 8], strides = [1, 1]} : vector<64x32xf32> to vector<64x8xf32>
    %296 = vector.extract_strided_slice %293 {offsets = [0, 0], sizes = [64, 8], strides = [1, 1]} : vector<64x32xf32> to vector<64x8xf32>
    %297 = vector.extract_strided_slice %294 {offsets = [0, 0], sizes = [64, 8], strides = [1, 1]} : vector<64x32xf32> to vector<64x8xf32>
    %cst_119 = arith.constant dense<0.000000e+00> : vector<64x64xf32>
    %298 = tpu.matmul %295, %296, %cst_119 {dimension_numbers = #tpu.dot_dimension_numbers<[1], [1], [0], [0], [0, 0, 1, 0], [], []>} : vector<64x8xf32>, vector<64x8xf32>, vector<64x64xf32> -> vector<64x64xf32>
    %cst_120 = arith.constant 0.353553385 : f32
    %299 = vector.broadcast %cst_120 : f32 to vector<64x64xf32>
    %300 = arith.mulf %298, %299 : vector<64x64xf32>
    %cst_121 = arith.constant dense<0xFF800000> : vector<64xf32>
    %301 = vector.multi_reduction <maximumf>, %300, %cst_121 [1] : vector<64x64xf32> to vector<64xf32>
    %302 = vector.shape_cast %301 : vector<64xf32> to vector<64x1xf32>
    %303 = vector.broadcast %302 : vector<64x1xf32> to vector<64x64xf32>
    %304 = arith.subf %300, %303 : vector<64x64xf32>
    %305 = math.exp %304 : vector<64x64xf32>
    %cst_122 = arith.constant dense<0.000000e+00> : vector<64xf32>
    %306 = vector.multi_reduction <add>, %305, %cst_122 [1] : vector<64x64xf32> to vector<64xf32>
    %307 = vector.shape_cast %306 : vector<64xf32> to vector<64x1xf32>
    %308 = tpu.reciprocal %307 : vector<64x1xf32> -> vector<64x1xf32>
    %309 = vector.broadcast %308 : vector<64x1xf32> to vector<64x64xf32>
    %310 = arith.mulf %305, %309 : vector<64x64xf32>
    %cst_123 = arith.constant dense<0.000000e+00> : vector<64x8xf32>
    %311 = tpu.matmul %310, %297, %cst_123 {dimension_numbers = #tpu.dot_dimension_numbers<[1], [0], [0], [1], [0, 0, 1, 1], [], []>} : vector<64x64xf32>, vector<64x8xf32>, vector<64x8xf32> -> vector<64x8xf32>
    %312 = vector.extract_strided_slice %292 {offsets = [0, 8], sizes = [64, 8], strides = [1, 1]} : vector<64x32xf32> to vector<64x8xf32>
    %313 = vector.extract_strided_slice %293 {offsets = [0, 8], sizes = [64, 8], strides = [1, 1]} : vector<64x32xf32> to vector<64x8xf32>
    %314 = vector.extract_strided_slice %294 {offsets = [0, 8], sizes = [64, 8], strides = [1, 1]} : vector<64x32xf32> to vector<64x8xf32>
    %cst_124 = arith.constant dense<0.000000e+00> : vector<64x64xf32>
    %315 = tpu.matmul %312, %313, %cst_124 {dimension_numbers = #tpu.dot_dimension_numbers<[1], [1], [0], [0], [0, 0, 1, 0], [], []>} : vector<64x8xf32>, vector<64x8xf32>, vector<64x64xf32> -> vector<64x64xf32>
    %cst_125 = arith.constant 0.353553385 : f32
    %316 = vector.broadcast %cst_125 : f32 to vector<64x64xf32>
    %317 = arith.mulf %315, %316 : vector<64x64xf32>
    %cst_126 = arith.constant dense<0xFF800000> : vector<64xf32>
    %318 = vector.multi_reduction <maximumf>, %317, %cst_126 [1] : vector<64x64xf32> to vector<64xf32>
    %319 = vector.shape_cast %318 : vector<64xf32> to vector<64x1xf32>
    %320 = vector.broadcast %319 : vector<64x1xf32> to vector<64x64xf32>
    %321 = arith.subf %317, %320 : vector<64x64xf32>
    %322 = math.exp %321 : vector<64x64xf32>
    %cst_127 = arith.constant dense<0.000000e+00> : vector<64xf32>
    %323 = vector.multi_reduction <add>, %322, %cst_127 [1] : vector<64x64xf32> to vector<64xf32>
    %324 = vector.shape_cast %323 : vector<64xf32> to vector<64x1xf32>
    %325 = tpu.reciprocal %324 : vector<64x1xf32> -> vector<64x1xf32>
    %326 = vector.broadcast %325 : vector<64x1xf32> to vector<64x64xf32>
    %327 = arith.mulf %322, %326 : vector<64x64xf32>
    %cst_128 = arith.constant dense<0.000000e+00> : vector<64x8xf32>
    %328 = tpu.matmul %327, %314, %cst_128 {dimension_numbers = #tpu.dot_dimension_numbers<[1], [0], [0], [1], [0, 0, 1, 1], [], []>} : vector<64x64xf32>, vector<64x8xf32>, vector<64x8xf32> -> vector<64x8xf32>
    %329 = vector.extract_strided_slice %292 {offsets = [0, 16], sizes = [64, 8], strides = [1, 1]} : vector<64x32xf32> to vector<64x8xf32>
    %330 = vector.extract_strided_slice %293 {offsets = [0, 16], sizes = [64, 8], strides = [1, 1]} : vector<64x32xf32> to vector<64x8xf32>
    %331 = vector.extract_strided_slice %294 {offsets = [0, 16], sizes = [64, 8], strides = [1, 1]} : vector<64x32xf32> to vector<64x8xf32>
    %cst_129 = arith.constant dense<0.000000e+00> : vector<64x64xf32>
    %332 = tpu.matmul %329, %330, %cst_129 {dimension_numbers = #tpu.dot_dimension_numbers<[1], [1], [0], [0], [0, 0, 1, 0], [], []>} : vector<64x8xf32>, vector<64x8xf32>, vector<64x64xf32> -> vector<64x64xf32>
    %cst_130 = arith.constant 0.353553385 : f32
    %333 = vector.broadcast %cst_130 : f32 to vector<64x64xf32>
    %334 = arith.mulf %332, %333 : vector<64x64xf32>
    %cst_131 = arith.constant dense<0xFF800000> : vector<64xf32>
    %335 = vector.multi_reduction <maximumf>, %334, %cst_131 [1] : vector<64x64xf32> to vector<64xf32>
    %336 = vector.shape_cast %335 : vector<64xf32> to vector<64x1xf32>
    %337 = vector.broadcast %336 : vector<64x1xf32> to vector<64x64xf32>
    %338 = arith.subf %334, %337 : vector<64x64xf32>
    %339 = math.exp %338 : vector<64x64xf32>
    %cst_132 = arith.constant dense<0.000000e+00> : vector<64xf32>
    %340 = vector.multi_reduction <add>, %339, %cst_132 [1] : vector<64x64xf32> to vector<64xf32>
    %341 = vector.shape_cast %340 : vector<64xf32> to vector<64x1xf32>
    %342 = tpu.reciprocal %341 : vector<64x1xf32> -> vector<64x1xf32>
    %343 = vector.broadcast %342 : vector<64x1xf32> to vector<64x64xf32>
    %344 = arith.mulf %339, %343 : vector<64x64xf32>
    %cst_133 = arith.constant dense<0.000000e+00> : vector<64x8xf32>
    %345 = tpu.matmul %344, %331, %cst_133 {dimension_numbers = #tpu.dot_dimension_numbers<[1], [0], [0], [1], [0, 0, 1, 1], [], []>} : vector<64x64xf32>, vector<64x8xf32>, vector<64x8xf32> -> vector<64x8xf32>
    %346 = vector.extract_strided_slice %292 {offsets = [0, 24], sizes = [64, 8], strides = [1, 1]} : vector<64x32xf32> to vector<64x8xf32>
    %347 = vector.extract_strided_slice %293 {offsets = [0, 24], sizes = [64, 8], strides = [1, 1]} : vector<64x32xf32> to vector<64x8xf32>
    %348 = vector.extract_strided_slice %294 {offsets = [0, 24], sizes = [64, 8], strides = [1, 1]} : vector<64x32xf32> to vector<64x8xf32>
    %cst_134 = arith.constant dense<0.000000e+00> : vector<64x64xf32>
    %349 = tpu.matmul %346, %347, %cst_134 {dimension_numbers = #tpu.dot_dimension_numbers<[1], [1], [0], [0], [0, 0, 1, 0], [], []>} : vector<64x8xf32>, vector<64x8xf32>, vector<64x64xf32> -> vector<64x64xf32>
    %cst_135 = arith.constant 0.353553385 : f32
    %350 = vector.broadcast %cst_135 : f32 to vector<64x64xf32>
    %351 = arith.mulf %349, %350 : vector<64x64xf32>
    %cst_136 = arith.constant dense<0xFF800000> : vector<64xf32>
    %352 = vector.multi_reduction <maximumf>, %351, %cst_136 [1] : vector<64x64xf32> to vector<64xf32>
    %353 = vector.shape_cast %352 : vector<64xf32> to vector<64x1xf32>
    %354 = vector.broadcast %353 : vector<64x1xf32> to vector<64x64xf32>
    %355 = arith.subf %351, %354 : vector<64x64xf32>
    %356 = math.exp %355 : vector<64x64xf32>
    %cst_137 = arith.constant dense<0.000000e+00> : vector<64xf32>
    %357 = vector.multi_reduction <add>, %356, %cst_137 [1] : vector<64x64xf32> to vector<64xf32>
    %358 = vector.shape_cast %357 : vector<64xf32> to vector<64x1xf32>
    %359 = tpu.reciprocal %358 : vector<64x1xf32> -> vector<64x1xf32>
    %360 = vector.broadcast %359 : vector<64x1xf32> to vector<64x64xf32>
    %361 = arith.mulf %356, %360 : vector<64x64xf32>
    %cst_138 = arith.constant dense<0.000000e+00> : vector<64x8xf32>
    %362 = tpu.matmul %361, %348, %cst_138 {dimension_numbers = #tpu.dot_dimension_numbers<[1], [0], [0], [1], [0, 0, 1, 1], [], []>} : vector<64x64xf32>, vector<64x8xf32>, vector<64x8xf32> -> vector<64x8xf32>
    %363 = tpu.concatenate %311, %328, %345, %362 in 1 : vector<64x8xf32>, vector<64x8xf32>, vector<64x8xf32>, vector<64x8xf32> -> vector<64x32xf32>
    %364 = tpu.concatenate %291, %363 in 0 : vector<64x32xf32>, vector<64x32xf32> -> vector<128x32xf32>
    %c9 = arith.constant 9 : index
    %c0_139 = arith.constant 0 : index
    %c0_140 = arith.constant 0 : index
    %365 = vector.load %arg3[%c9, %c0_139, %c0_140] : memref<11x32x32xf32, #tpu.memory_space<vmem>>, vector<1x32x32xf32>
    %366 = vector.shape_cast %365 : vector<1x32x32xf32> to vector<32x32xf32>
    %cst_141 = arith.constant dense<0.000000e+00> : vector<128x32xf32>
    %367 = tpu.matmul %364, %366, %cst_141 {dimension_numbers = #tpu.dot_dimension_numbers<[1], [0], [0], [1], [0, 0, 1, 1], [], []>} : vector<128x32xf32>, vector<32x32xf32>, vector<128x32xf32> -> vector<128x32xf32>
    %c9_142 = arith.constant 9 : index
    %c0_143 = arith.constant 0 : index
    %c0_144 = arith.constant 0 : index
    %368 = vector.load %arg4[%c9_142, %c0_143, %c0_144] : memref<10x1x32xf32, #tpu.memory_space<vmem>>, vector<1x1x32xf32>
    %369 = vector.shape_cast %368 : vector<1x1x32xf32> to vector<1x32xf32>
    %370 = vector.broadcast %369 : vector<1x32xf32> to vector<128x32xf32>
    %371 = arith.addf %367, %370 : vector<128x32xf32>
    %372 = arith.addf %371, %198 : vector<128x32xf32>
    %c10 = arith.constant 10 : index
    %c0_145 = arith.constant 0 : index
    %c0_146 = arith.constant 0 : index
    %373 = vector.load %arg3[%c10, %c0_145, %c0_146] : memref<11x32x32xf32, #tpu.memory_space<vmem>>, vector<1x32x32xf32>
    %374 = vector.shape_cast %373 : vector<1x32x32xf32> to vector<32x32xf32>
    %cst_147 = arith.constant dense<0.000000e+00> : vector<128x32xf32>
    %375 = tpu.matmul %372, %374, %cst_147 {dimension_numbers = #tpu.dot_dimension_numbers<[1], [0], [0], [1], [0, 0, 1, 1], [], []>} : vector<128x32xf32>, vector<32x32xf32>, vector<128x32xf32> -> vector<128x32xf32>
    %376 = arith.addf %375, %372 : vector<128x32xf32>
    %377 = tpu.transpose %376, [1, 0] : vector<128x32xf32> -> vector<32x128xf32>
    %c0_148 = arith.constant 0 : index
    %c0_149 = arith.constant 0 : index
    %378 = vector.load %arg5[%c0_148, %c0_149] : memref<32x128xf32, #tpu.memory_space<vmem>>, vector<32x128xf32>
    tpu.vector_store %arg5[%c0_148, %c0_149], %377 {strides = array<i32>} : memref<32x128xf32, #tpu.memory_space<vmem>>, vector<32x128xf32>,
    return
  }
  func.func @transform_0(%arg0: i32) -> (i32, i32) {
    %c0_i32 = arith.constant 0 : i32
    %c0_i32_0 = arith.constant 0 : i32
    %c0_i32_1 = arith.constant 0 : i32
    return %c0_i32, %c0_i32_0 : i32, i32
  }
  func.func @transform_1(%arg0: i32) -> (i32, i32) {
    %c0_i32 = arith.constant 0 : i32
    %c0_i32_0 = arith.constant 0 : i32
    %c0_i32_1 = arith.constant 0 : i32
    return %c0_i32, %c0_i32_0 : i32, i32
  }
  func.func @transform_2(%arg0: i32) -> (i32, i32, i32) {
    %c0_i32 = arith.constant 0 : i32
    %c0_i32_0 = arith.constant 0 : i32
    %c0_i32_1 = arith.constant 0 : i32
    %c0_i32_2 = arith.constant 0 : i32
    return %c0_i32, %c0_i32_0, %c0_i32_1 : i32, i32, i32
  }
  func.func @transform_3(%arg0: i32) -> (i32, i32, i32) {
    %c0_i32 = arith.constant 0 : i32
    %c0_i32_0 = arith.constant 0 : i32
    %c0_i32_1 = arith.constant 0 : i32
    %c0_i32_2 = arith.constant 0 : i32
    return %c0_i32, %c0_i32_0, %c0_i32_1 : i32, i32, i32
  }
  func.func @transform_4(%arg0: i32) -> (i32, i32) {
    %c0_i32 = arith.constant 0 : i32
    %c0_i32_0 = arith.constant 0 : i32
    %c0_i32_1 = arith.constant 0 : i32
    return %c0_i32, %c0_i32_0 : i32, i32
  }
}

</mosaic_0001>

<bundles_post_ra>
// kernel: tpu_custom_call.1
= control target key start
LH: loop header
LB: loop body
LE: loop exit
PB: predicated region body
PF: predicated region fallthrough
CT: control target
= control target key end

     0   :  { %9 = vsyncpa [#allocation3], 0  ;;  %s16961_s0 = inlined_call_operand.vmem [shape: f32[128,16], index: 0, kind: input, shape index: {}]   ;;  %s16962_s1 = inlined_call_operand.vmem [shape: f32[16,32], index: 1, kind: input, shape index: {}]   ;;  %s16963_s2 = inlined_call_operand.hbm [shape: f32[11,32,32], index: 2, kind: input, shape index: {}]   ;;  %s16964_s3 = inlined_call_operand.vmem [shape: f32[10,1,32], index: 3, kind: input, shape index: {}]   ;;  %s16965_s4 = inlined_call_operand.hbm [shape: f32[32,128], index: 4, kind: output, shape index: {}]  }
   0x1   :  { %10 = vsyncpa [#allocation4], 0  ;;  %s12837_s15 = smov [#allocation2]  }
   0x2   :  { %s20_s16 = sshll.u32 %s12837_s15, 4  ;;  %s21_s16 = int_to_ptr.vmem [resolvable:$true] %s20_s16 }
   0x3   :  { %s12801_s17 = scalar_lea.vmem %s21_s16, 5632  ;;  %p12806_p1 = scmp.lt.s32.totalorder %s21_s16, %s21_s16 }
   0x4   :  { %p12802_p0 = scmp.ne.s32.totalorder %s21_s16, %s12801_s17  ;;  %p12807_p2 = scmp.lt.s32.totalorder %s12801_s17, %s12801_s17 }
   0x6   :  { %p12808_p3 = por %p12807_p2, %p12806_p1 }
   0x8   :  { %p12809_p4 = pnand %p12808_p3, %p12802_p0 }
   0xa   :  { %12812 = shalt.err (!%p12809_p4)
}
   0xb   :  { %s12838_s18 = smov 128   ;;  %s12839_s19 = smov 8  }
   0xc   :  { %26 = dma.hbm_to_vmem [thread:$0]  %s16963_s2, 5632, %s21_s16, [#allocation3], %s12838_s18, %s12838_s18, %s12839_s19  }
   0xd   :  { %12833 = dma.done.wait [#allocation3], 5632  }
   0xe   :  { %12834 = vsyncadd [#allocation3], 4294961664  ;;  %vm57_vm0 = vcmask 130048   ;;  %v49_v0 = vld [vmem:[%s16962_s1 + $0x8] sm:$0xff]  ;;  %v48_v1 = vld [vmem:[%s16962_s1] sm:$0xff]  ;;  %vm375_vm1 = vcmask 261120  }
   0xf   :  { %v32_v2 = vld [vmem:[%s16961_s0] sm:$0xff]  ;;  %10926 = vmatprep.subr.mxu0 %v49_v0  ;;  %v33_v3 = vld [vmem:[%s16961_s0 + $0x8] sm:$0xff]  ;;  %v34_v4 = vld [vmem:[%s16961_s0 + $0x10] sm:$0xff]  ;;  %vm1107_vm2 = vcmask 64512   ;;  %s12840_s11 = smov 120   ;;  %s12841_s12 = smov 112  }
  0x10   :  { %10930 = vmatprep.mubr.msk.f32.mxu0 %vm57_vm0, %v32_v2  ;;  %10927 = vmatpush3.msra.mxu0 %v49_v0  ;;  %v35_v5 = vld [vmem:[%s16961_s0 + $0x18] sm:$0xff]  ;;  %v36_v6 = vld [vmem:[%s16961_s0 + $0x20] sm:$0xff]  ;;  %v37_v7 = vld [vmem:[%s16961_s0 + $0x28] sm:$0xff]  ;;  %s12842_s15 = smov 104   ;;  %vm1269_vm3 = vcmask 523264   ;;  %s12843_s24 = smov 16  }
  0x11   :  { %10928 = vmatprep.subr.mxu0 %v48_v1  ;;  %v38_v8 = vld [vmem:[%s16961_s0 + $0x30] sm:$0xff]  ;;  %v39_v9 = vld [vmem:[%s16961_s0 + $0x38] sm:$0xff]  ;;  %v40_v10 = vld [vmem:[%s16961_s0 + $0x40] sm:$0xff]  ;;  %s12844_s25 = smov 24   ;;  %vm2861_vm4 = vcmask 195584  }
  0x12   :  { %10929 = vmatpush3.msra.mxu0 %v48_v1  ;;  %v41_v11 = vld [vmem:[%s16961_s0 + $0x48] sm:$0xff]  ;;  %v42_v12 = vld [vmem:[%s16961_s0 + $0x50] sm:$0xff]  ;;  %v43_v13 = vld [vmem:[%s16961_s0 + $0x58] sm:$0xff] }
  0x13   :  { %10931 = vmatmul.mubr.msk.f32.vlgmr.msra.gmra.mxu0 %vm57_vm0, %v33_v3  ;;  %v44_v14 = vld [vmem:[%s16961_s0 + $0x60] sm:$0xff]  ;;  %v45_v15 = vld [vmem:[%s16961_s0 + $0x68] sm:$0xff]  ;;  %v46_v16 = vld [vmem:[%s16961_s0 + $0x70] sm:$0xff] }
  0x14   :  { %10933 = vmatprep.mubr.msk.f32.mxu0 %vm57_vm0, %v34_v4  ;;  %v47_v17 = vld [vmem:[%s16961_s0 + $0x78] sm:$0xff]  ;;  %v365_v19 = vld [vmem:[#allocation2 + $0x10] sm:$0xff]  ;;  %v364_v20 = vld [vmem:[#allocation2 + $0x8] sm:$0xff] }
  0x15   :  { %v366_v18 = vld [vmem:[#allocation2 + $0x18] sm:$0xff]  ;;  %v363_v21 = vld [vmem:[#allocation2] sm:$0xff] }
  0x16   :  { %10954 = vmatprep.subr.mxu1 %v366_v18  ;;  %v12947_v22 = vld [vmem:[#allocation2 + $0x58] sm:$0xff]  ;;  %v12953_v23 = vld [vmem:[%s16964_s3] ss:$0 sm:$0xff] }
  0x17   :  { %10934 = vmatmul.mubr.msk.f32.gmra.mxu0 %vm57_vm0, %v35_v5  ;;  %10955 = vmatpush3.msra.mxu1 %v366_v18 }
  0x18   :  { %10936 = vmatprep.mubr.msk.f32.mxu0 %vm57_vm0, %v36_v6  ;;  %10956 = vmatprep.subr.mxu1 %v365_v19 }
  0x19   :  { %10957 = vmatpush3.msra.mxu1 %v365_v19 }
  0x1a   :  { %10958 = vmatprep.subr.mxu1 %v364_v20 }
  0x1b   :  { %10937 = vmatmul.mubr.msk.f32.gmra.mxu0 %vm57_vm0, %v37_v7  ;;  %10959 = vmatpush3.msra.mxu1 %v364_v20 }
  0x1c   :  { %10939 = vmatprep.mubr.msk.f32.mxu0 %vm57_vm0, %v38_v8  ;;  %10960 = vmatprep.subr.mxu1 %v363_v21 }
  0x1d   :  { %10961 = vmatpush3.msra.mxu1 %v363_v21 }
  0x1e   :  { %11018 = vmatprep.subr.mxu1 %v12947_v22 }
  0x1f   :  { %10940 = vmatmul.mubr.msk.f32.gmra.mxu0 %vm57_vm0, %v39_v9 }
  0x20   :  { %10942 = vmatprep.mubr.msk.f32.mxu0 %vm57_vm0, %v40_v10 }
  0x23   :  { %10943 = vmatmul.mubr.msk.f32.gmra.mxu0 %vm57_vm0, %v41_v11 }
  0x24   :  { %10945 = vmatprep.mubr.msk.f32.mxu0 %vm57_vm0, %v42_v12 }
  0x27   :  { %10946 = vmatmul.mubr.msk.f32.gmra.mxu0 %vm57_vm0, %v43_v13 }
  0x28   :  { %10948 = vmatprep.mubr.msk.f32.mxu0 %vm57_vm0, %v44_v14 }
  0x2b   :  { %10949 = vmatmul.mubr.msk.f32.gmra.mxu0 %vm57_vm0, %v45_v15 }
  0x2c   :  { %10951 = vmatprep.mubr.msk.f32.mxu0 %vm57_vm0, %v46_v16 }
  0x2f   :  { %10952 = vmatmul.mubr.msk.f32.gmra.mxu0 %vm57_vm0, %v47_v17 }
  0xd3   :  { %v10932_v24 = vpop.f32.mrf.mxu0 }
  0xd4   :  { %v12956_v25 = vadd.f32 %v10932_v24, %v12953_v23 }
  0xd5   :  { %v172_v26 = vpop.f32.mrf.mxu0 }
  0xd6   :  { %v9583_v27 = vmul.f32 -1.442695, %v12956_v25  ;;  %v12960_v28 = vadd.f32 %v12953_v23, %v172_v26 }
  0xd7   :  { %v10935_v29 = vpop.f32.mrf.mxu0 }
  0xd8   :  { %12211 = vpow2.f32 %v9583_v27  ;;  %v9582_v30 = vmul.f32 -1.442695, %v12960_v28  ;;  %v12964_v31 = vadd.f32 %v10935_v29, %v12953_v23 }
  0xd9   :  { %v182_v32 = vpop.f32.mrf.mxu0 }
  0xda   :  { %12213 = vpow2.f32 %v9582_v30  ;;  %v9585_v33 = vmul.f32 -1.442695, %v12964_v31  ;;  %v12968_v34 = vadd.f32 %v12953_v23, %v182_v32 }
  0xdb   :  { %v10938_v35 = vpop.f32.mrf.mxu0 }
  0xdc   :  { %12215 = vpow2.f32 %v9585_v33  ;;  %v9584_v36 = vmul.f32 -1.442695, %v12968_v34  ;;  %v12972_v37 = vadd.f32 %v10938_v35, %v12953_v23 }
  0xdd   :  { %v192_v38 = vpop.f32.mrf.mxu0 }
  0xde   :  { %12217 = vpow2.f32 %v9584_v36  ;;  %v9587_v39 = vmul.f32 -1.442695, %v12972_v37  ;;  %v12976_v40 = vadd.f32 %v12953_v23, %v192_v38 }
  0xdf   :  { %v10941_v41 = vpop.f32.mrf.mxu0 }
  0xe0   :  { %12219 = vpow2.f32 %v9587_v39  ;;  %v9586_v42 = vmul.f32 -1.442695, %v12976_v40  ;;  %v12980_v43 = vadd.f32 %v10941_v41, %v12953_v23  ;;  %v794_v41 = vld [vmem:[#allocation2 + $0x50] sm:$0xff] }
  0xe1   :  { %v202_v44 = vpop.f32.mrf.mxu0 }
  0xe2   :  { %12221 = vpow2.f32 %v9586_v42  ;;  %v9589_v45 = vmul.f32 -1.442695, %v12980_v43  ;;  %v12984_v46 = vadd.f32 %v12953_v23, %v202_v44 }
  0xe3   :  { %v10944_v47 = vpop.f32.mrf.mxu0 }
  0xe4   :  { %12223 = vpow2.f32 %v9589_v45  ;;  %v9588_v48 = vmul.f32 -1.442695, %v12984_v46  ;;  %v12988_v49 = vadd.f32 %v10944_v47, %v12953_v23 }
  0xe5   :  { %v12212_v50 = vpop.eup %12211  ;;  %v212_v51 = vpop.f32.mrf.mxu0 }
  0xe6   :  { %v300_v52 = vadd.f32 1.0, %v12212_v50  ;;  %12225 = vpow2.f32 %v9588_v48  ;;  %v9591_v53 = vmul.f32 -1.442695, %v12988_v49  ;;  %v12992_v54 = vadd.f32 %v12953_v23, %v212_v51 }
  0xe7   :  { %v12214_v55 = vpop.eup %12213  ;;  %v10947_v56 = vpop.f32.mrf.mxu0 }
  0xe8   :  { %12227 = vrcp.f32 %v300_v52  ;;  %v299_v57 = vadd.f32 1.0, %v12214_v55  ;;  %v9590_v58 = vmul.f32 -1.442695, %v12992_v54  ;;  %v12996_v59 = vadd.f32 %v10947_v56, %v12953_v23 }
  0xe9   :  { %v12216_v60 = vpop.eup %12215  ;;  %12229 = vpow2.f32 %v9591_v53  ;;  %v222_v61 = vpop.f32.mrf.mxu0 }
  0xea   :  { %12231 = vrcp.f32 %v299_v57  ;;  %v302_v62 = vadd.f32 1.0, %v12216_v60  ;;  %v9593_v63 = vmul.f32 -1.442695, %v12996_v59  ;;  %v13000_v0 = vadd.f32 %v12953_v23, %v222_v61 }
  0xeb   :  { %v12218_v1 = vpop.eup %12217  ;;  %12233 = vpow2.f32 %v9590_v58  ;;  %v10950_v2 = vpop.f32.mrf.mxu0 }
  0xec   :  { %12235 = vrcp.f32 %v302_v62  ;;  %v301_v3 = vadd.f32 1.0, %v12218_v1  ;;  %v9592_v4 = vmul.f32 -1.442695, %v13000_v0  ;;  %v13004_v5 = vadd.f32 %v10950_v2, %v12953_v23 }
  0xed   :  { %v12220_v6 = vpop.eup %12219  ;;  %12237 = vpow2.f32 %v9593_v63  ;;  %v232_v7 = vpop.f32.mrf.mxu0 }
  0xee   :  { %12239 = vrcp.f32 %v301_v3  ;;  %v304_v8 = vadd.f32 1.0, %v12220_v6  ;;  %v9595_v9 = vmul.f32 -1.442695, %v13004_v5  ;;  %v13008_v10 = vadd.f32 %v12953_v23, %v232_v7 }
  0xef   :  { %v12222_v11 = vpop.eup %12221  ;;  %12241 = vpow2.f32 %v9592_v4  ;;  %v10953_v12 = vpop.f32.mrf.mxu0 }
  0xf0   :  { %12243 = vrcp.f32 %v304_v8  ;;  %v303_v13 = vadd.f32 1.0, %v12222_v11  ;;  %v9594_v14 = vmul.f32 -1.442695, %v13008_v10  ;;  %v13012_v15 = vadd.f32 %v10953_v12, %v12953_v23  ;;  %v588_v11 = vld [vmem:[#allocation2 + $0x30] sm:$0xff]  ;;  %v792_v12 = vld [vmem:[#allocation2 + $0x40] sm:$0xff] }
  0xf1   :  { %v12224_v16 = vpop.eup %12223  ;;  %12245 = vpow2.f32 %v9595_v9  ;;  %v242_v17 = vpop.f32.mrf.mxu0 }
  0xf2   :  { %12247 = vrcp.f32 %v303_v13  ;;  %v306_v18 = vadd.f32 1.0, %v12224_v16  ;;  %v9597_v19 = vmul.f32 -1.442695, %v13012_v15  ;;  %v13016_v20 = vadd.f32 %v12953_v23, %v242_v17  ;;  %v587_v13 = vld [vmem:[#allocation2 + $0x28] sm:$0xff]  ;;  %v13103_v16 = vld [vmem:[%s16964_s3 + $0x1] ss:$0 sm:$0xff] }
  0xf3   :  { %v12226_v21 = vpop.eup %12225  ;;  %12249 = vpow2.f32 %v9594_v14  ;;  %v586_v14 = vld [vmem:[#allocation2 + $0x20] sm:$0xff] }
  0xf4   :  { %12251 = vrcp.f32 %v306_v18  ;;  %v305_v24 = vadd.f32 1.0, %v12226_v21  ;;  %v9596_v26 = vmul.f32 -1.442695, %v13016_v20 }
  0xf5   :  { %v12228_v27 = vpop.eup %12227  ;;  %12253 = vpow2.f32 %v9597_v19 }
  0xf6   :  { %v12230_v29 = vpop.eup %12229  ;;  %12255 = vrcp.f32 %v305_v24  ;;  %v13023_v36 = vmul.f32 %v12228_v27, %v12956_v25  ;;  %v793_v25 = vld [vmem:[#allocation2 + $0x48] sm:$0xff] }
  0xf7   :  { %v12232_v30 = vpop.eup %12231  ;;  %v308_v32 = vadd.f32 1.0, %v12230_v29  ;;  %12257 = vpow2.f32 %v9596_v26 }
  0xf8   :  { %v12234_v33 = vpop.eup %12233  ;;  %v13020_v35 = vmul.f32 %v12232_v30, %v12960_v28 }
  0xf9   :  { %v12236_v23 = vpop.eup %12235  ;;  %12259 = vrcp.f32 %v308_v32  ;;  %v307_v38 = vadd.f32 1.0, %v12234_v33  ;;  %v952_v32 = vld [vmem:[#allocation2 + $0x70] sm:$0xff] }
  0xfa   :  { %v12238_v39 = vpop.eup %12237  ;;  %10962 = vmatprep.mubr.msk.f32.mxu1 %vm375_vm1, %v13020_v35  ;;  %v13034_v48 = vmul.f32 %v12236_v23, %v12964_v31 }
  0xfb   :  { %v12240_v42 = vpop.eup %12239  ;;  %12261 = vrcp.f32 %v307_v38  ;;  %v310_v44 = vadd.f32 1.0, %v12238_v39  ;;  %10963 = vmatmul.mubr.msk.f32.vlgmr.msra.gmra.mxu1 %vm375_vm1, %v13023_v36 }
  0xfc   :  { %v12242_v45 = vpop.eup %12241  ;;  %v13030_v28 = vmul.f32 %v12240_v42, %v12968_v34  ;;  %11019 = vmatpush3.msra.mxu1 %v12947_v22 }
  0xfd   :  { %v12244_v47 = vpop.eup %12243  ;;  %12263 = vrcp.f32 %v310_v44  ;;  %v309_v50 = vadd.f32 1.0, %v12242_v45  ;;  %11020 = vmatprep.subr.mxu1 %v794_v41 }
  0xfe   :  { %v12246_v51 = vpop.eup %12245  ;;  %10965 = vmatprep.mubr.msk.f32.mxu1 %vm375_vm1, %v13030_v28  ;;  %11021 = vmatpush3.msra.mxu1 %v794_v41  ;;  %v13044_v55 = vmul.f32 %v12244_v47, %v12972_v37  ;;  %v951_v41 = vld [vmem:[#allocation2 + $0x68] sm:$0xff] }
  0xff   :  { %v12248_v52 = vpop.eup %12247  ;;  %12265 = vrcp.f32 %v309_v50  ;;  %v312_v53 = vadd.f32 1.0, %v12246_v51  ;;  %10966 = vmatmul.mubr.msk.f32.gmra.mxu1 %vm375_vm1, %v13034_v48  ;;  %11022 = vmatprep.subr.mxu1 %v793_v25 }
 0x100   :  { %v12250_v22 = vpop.eup %12249  ;;  %v13041_v34 = vmul.f32 %v12248_v52, %v12976_v40  ;;  %11023 = vmatpush3.msra.mxu1 %v793_v25 }
 0x101   :  { %v12252_v31 = vpop.eup %12251  ;;  %12267 = vrcp.f32 %v312_v53  ;;  %v311_v56 = vadd.f32 1.0, %v12250_v22  ;;  %11024 = vmatprep.subr.mxu1 %v792_v12 }
 0x102   :  { %v12254_v57 = vpop.eup %12253  ;;  %10968 = vmatprep.mubr.msk.f32.mxu1 %vm375_vm1, %v13041_v34  ;;  %v13054_v62 = vmul.f32 %v12252_v31, %v12980_v43  ;;  %11025 = vmatpush3.msra.mxu1 %v792_v12 }
 0x103   :  { %v12256_v58 = vpop.eup %12255  ;;  %12269 = vrcp.f32 %v311_v56  ;;  %v314_v60 = vadd.f32 1.0, %v12254_v57  ;;  %10969 = vmatmul.mubr.msk.f32.gmra.mxu1 %vm375_vm1, %v13044_v55 }
 0x104   :  { %v12258_v61 = vpop.eup %12257  ;;  %v13051_v40 = vmul.f32 %v12256_v58, %v12984_v46 }
 0x105   :  { %12271 = vrcp.f32 %v314_v60  ;;  %v313_v37 = vadd.f32 1.0, %v12258_v61 }
 0x106   :  { %v12260_v63 = vpop.eup %12259  ;;  %10971 = vmatprep.mubr.msk.f32.mxu1 %vm375_vm1, %v13051_v40 }
 0x107   :  { %12273 = vrcp.f32 %v313_v37  ;;  %10972 = vmatmul.mubr.msk.f32.gmra.mxu1 %vm375_vm1, %v13054_v62  ;;  %v13061_v2 = vmul.f32 %v12260_v63, %v12988_v49 }
 0x108   :  { %v12262_v1 = vpop.eup %12261 }
 0x109   :  { %v13064_v46 = vmul.f32 %v12262_v1, %v12992_v54 }
 0x10a   :  { %v12264_v3 = vpop.eup %12263 }
 0x10b   :  { %10974 = vmatprep.mubr.msk.f32.mxu1 %vm375_vm1, %v13064_v46  ;;  %v13069_v4 = vmul.f32 %v12264_v3, %v12996_v59 }
 0x10c   :  { %v12266_v43 = vpop.eup %12265  ;;  %10975 = vmatmul.mubr.msk.f32.gmra.mxu1 %vm375_vm1, %v13061_v2 }
 0x10d   :  { %v13074_v6 = vmul.f32 %v12266_v43, %v13000_v0 }
 0x10e   :  { %v12268_v7 = vpop.eup %12267 }
 0x10f   :  { %10977 = vmatprep.mubr.msk.f32.mxu1 %vm375_vm1, %v13074_v6  ;;  %v13079_v54 = vmul.f32 %v12268_v7, %v13004_v5 }
 0x110   :  { %v12270_v49 = vpop.eup %12269  ;;  %10978 = vmatmul.mubr.msk.f32.gmra.mxu1 %vm375_vm1, %v13069_v4 }
 0x111   :  { %v13084_v59 = vmul.f32 %v12270_v49, %v13008_v10  ;;  %v589_v10 = vld [vmem:[#allocation2 + $0x38] sm:$0xff] }
 0x112   :  { %v12272_v8 = vpop.eup %12271  ;;  %10986 = vmatprep.subr.mxu0 %v589_v10 }
 0x113   :  { %10980 = vmatprep.mubr.msk.f32.mxu1 %vm375_vm1, %v13084_v59  ;;  %v13089_v9 = vmul.f32 %v12272_v8, %v13012_v15  ;;  %10987 = vmatpush3.msra.mxu0 %v589_v10  ;;  %v953_v15 = vld [vmem:[#allocation2 + $0x78] sm:$0xff]  ;;  %v13270_v8 = vld [vmem:[%s16964_s3 + $0x2] ss:$0 sm:$0xff] }
 0x114   :  { %v12274_v0 = vpop.eup %12273  ;;  %10981 = vmatmul.mubr.msk.f32.gmra.mxu1 %vm375_vm1, %v13079_v54  ;;  %10988 = vmatprep.subr.mxu0 %v588_v11 }
 0x115   :  { %v13094_v5 = vmul.f32 %v12274_v0, %v13016_v20  ;;  %10989 = vmatpush3.msra.mxu0 %v588_v11 }
 0x116   :  { %10990 = vmatprep.subr.mxu0 %v587_v13 }
 0x117   :  { %10983 = vmatprep.mubr.msk.f32.mxu1 %vm375_vm1, %v13094_v5  ;;  %10991 = vmatpush3.msra.mxu0 %v587_v13 }
 0x118   :  { %10984 = vmatmul.mubr.msk.f32.gmra.mxu1 %vm375_vm1, %v13089_v9  ;;  %10992 = vmatprep.subr.mxu0 %v586_v14 }
 0x119   :  { %10993 = vmatpush3.msra.mxu0 %v586_v14  ;;  %v9635_v14 = vld [vmem:[%s16964_s3 + $0x3] ss:$0 sm:$0xff] }
 0x11a   :  { %11050 = vmatprep.subr.mxu0 %v953_v15 }
 0x1bb   :  { %v10964_v17 = vpop.f32.mrf.mxu1 }
 0x1bc   :  { %v496_v18 = vadd.f32 %v10964_v17, %v13103_v16 }
 0x1bd   :  { %v490_v19 = vpop.f32.mrf.mxu1 }
 0x1be   :  { %v491_v20 = vadd.f32 %v13103_v16, %v490_v19  ;;  %v13111_v26 = vadd.f32 %v496_v18, %v13023_v36 }
 0x1bf   :  { %v10967_v21 = vpop.f32.mrf.mxu1 }
 0x1c0   :  { %v13108_v24 = vadd.f32 %v491_v20, %v13020_v35  ;;  %17042 = vst [vmem:[#allocation9_spill] sm:$0xff] %v13111_v26  ;;  %v506_v27 = vadd.f32 %v10967_v21, %v13103_v16 }
 0x1c1   :  { %v500_v29 = vpop.f32.mrf.mxu1 }
 0x1c2   :  { %17041 = vst [vmem:[#allocation8_spill] sm:$0xff] %v13108_v24  ;;  %v501_v30 = vadd.f32 %v13103_v16, %v500_v29  ;;  %10994 = vmatprep.mubr.msk.f32.mxu0 %vm375_vm1, %v13108_v24  ;;  %11026 = vmatprep.mubr.msk.f32.mxu1 %vm375_vm1, %v13108_v24  ;;  %v13127_v23 = vadd.f32 %v506_v27, %v13034_v48  ;;  %v950_v48 = vld [vmem:[#allocation2 + $0x60] sm:$0xff] }
 0x1c3   :  { %v10970_v33 = vpop.f32.mrf.mxu1  ;;  %10995 = vmatmul.mubr.msk.f32.vlgmr.msra.gmra.mxu0 %vm375_vm1, %v13111_v26  ;;  %11027 = vmatmul.mubr.msk.f32.vlgmr.msra.gmra.mxu1 %vm375_vm1, %v13111_v26 }
 0x1c4   :  { %v13124_v35 = vadd.f32 %v501_v30, %v13030_v28  ;;  %11051 = vmatpush3.msra.mxu0 %v953_v15  ;;  %17044 = vst [vmem:[#allocation11_spill] sm:$0xff] %v13127_v23  ;;  %v516_v36 = vadd.f32 %v10970_v33, %v13103_v16 }
 0x1c5   :  { %v510_v38 = vpop.f32.mrf.mxu1  ;;  %11052 = vmatprep.subr.mxu0 %v952_v32 }
 0x1c6   :  { %17043 = vst [vmem:[#allocation10_spill] sm:$0xff] %v13124_v35  ;;  %v511_v39 = vadd.f32 %v13103_v16, %v510_v38  ;;  %10997 = vmatprep.mubr.msk.f32.mxu0 %vm375_vm1, %v13124_v35  ;;  %11029 = vmatprep.mubr.msk.f32.mxu1 %vm375_vm1, %v13124_v35  ;;  %v13143_v45 = vadd.f32 %v516_v36, %v13044_v55 }
 0x1c7   :  { %v10973_v42 = vpop.f32.mrf.mxu1  ;;  %10998 = vmatmul.mubr.msk.f32.gmra.mxu0 %vm375_vm1, %v13127_v23  ;;  %11030 = vmatmul.mubr.msk.f32.gmra.mxu1 %vm375_vm1, %v13127_v23 }
 0x1c8   :  { %v13140_v44 = vadd.f32 %v511_v39, %v13041_v34  ;;  %11053 = vmatpush3.msra.mxu0 %v952_v32  ;;  %17046 = vst [vmem:[#allocation13_spill] sm:$0xff] %v13143_v45  ;;  %v526_v28 = vadd.f32 %v10973_v42, %v13103_v16 }
 0x1c9   :  { %v520_v25 = vpop.f32.mrf.mxu1  ;;  %11054 = vmatprep.subr.mxu0 %v951_v41 }
 0x1ca   :  { %17045 = vst [vmem:[#allocation12_spill] sm:$0xff] %v13140_v44  ;;  %v521_v47 = vadd.f32 %v13103_v16, %v520_v25  ;;  %11000 = vmatprep.mubr.msk.f32.mxu0 %vm375_vm1, %v13140_v44  ;;  %11032 = vmatprep.mubr.msk.f32.mxu1 %vm375_vm1, %v13140_v44  ;;  %v13159_v52 = vadd.f32 %v526_v28, %v13054_v62 }
 0x1cb   :  { %11001 = vmatmul.mubr.msk.f32.gmra.mxu0 %vm375_vm1, %v13143_v45  ;;  %11033 = vmatmul.mubr.msk.f32.gmra.mxu1 %vm375_vm1, %v13143_v45 }
 0x1cc   :  { %v13156_v50 = vadd.f32 %v521_v47, %v13051_v40  ;;  %v10976_v51 = vpop.f32.mrf.mxu1  ;;  %11055 = vmatpush3.msra.mxu0 %v951_v41  ;;  %17048 = vst [vmem:[#allocation15_spill] sm:$0xff] %v13159_v52 }
 0x1cd   :  { %11056 = vmatprep.subr.mxu0 %v950_v48  ;;  %v536_v53 = vadd.f32 %v10976_v51, %v13103_v16 }
 0x1ce   :  { %17047 = vst [vmem:[#allocation14_spill] sm:$0xff] %v13156_v50  ;;  %v530_v22 = vpop.f32.mrf.mxu1  ;;  %11003 = vmatprep.mubr.msk.f32.mxu0 %vm375_vm1, %v13156_v50  ;;  %11035 = vmatprep.mubr.msk.f32.mxu1 %vm375_vm1, %v13156_v50 }
 0x1cf   :  { %v531_v34 = vadd.f32 %v13103_v16, %v530_v22  ;;  %11004 = vmatmul.mubr.msk.f32.gmra.mxu0 %vm375_vm1, %v13159_v52  ;;  %11036 = vmatmul.mubr.msk.f32.gmra.mxu1 %vm375_vm1, %v13159_v52  ;;  %v13175_v56 = vadd.f32 %v536_v53, %v13061_v2 }
 0x1d0   :  { %v10979_v31 = vpop.f32.mrf.mxu1  ;;  %11057 = vmatpush3.msra.mxu0 %v950_v48 }
 0x1d1   :  { %v13172_v55 = vadd.f32 %v531_v34, %v13064_v46  ;;  %17050 = vst [vmem:[#allocation17_spill] sm:$0xff] %v13175_v56  ;;  %v546_v57 = vadd.f32 %v10979_v31, %v13103_v16 }
 0x1d2   :  { %v540_v58 = vpop.f32.mrf.mxu1 }
 0x1d3   :  { %17049 = vst [vmem:[#allocation16_spill] sm:$0xff] %v13172_v55  ;;  %v541_v60 = vadd.f32 %v13103_v16, %v540_v58  ;;  %11006 = vmatprep.mubr.msk.f32.mxu0 %vm375_vm1, %v13172_v55  ;;  %11038 = vmatprep.mubr.msk.f32.mxu1 %vm375_vm1, %v13172_v55  ;;  %v13191_v62 = vadd.f32 %v546_v57, %v13069_v4 }
 0x1d4   :  { %v10982_v61 = vpop.f32.mrf.mxu1  ;;  %11007 = vmatmul.mubr.msk.f32.gmra.mxu0 %vm375_vm1, %v13175_v56  ;;  %11039 = vmatmul.mubr.msk.f32.gmra.mxu1 %vm375_vm1, %v13175_v56 }
 0x1d5   :  { %v13188_v40 = vadd.f32 %v541_v60, %v13074_v6  ;;  %17052 = vst [vmem:[#allocation19_spill] sm:$0xff] %v13191_v62  ;;  %v556_v37 = vadd.f32 %v10982_v61, %v13103_v16 }
 0x1d6   :  { %v550_v63 = vpop.f32.mrf.mxu1 }
 0x1d7   :  { %17051 = vst [vmem:[#allocation18_spill] sm:$0xff] %v13188_v40  ;;  %v551_v1 = vadd.f32 %v13103_v16, %v550_v63  ;;  %11009 = vmatprep.mubr.msk.f32.mxu0 %vm375_vm1, %v13188_v40  ;;  %11041 = vmatprep.mubr.msk.f32.mxu1 %vm375_vm1, %v13188_v40  ;;  %v13207_v3 = vadd.f32 %v556_v37, %v13079_v54 }
 0x1d8   :  { %v10985_v2 = vpop.f32.mrf.mxu1  ;;  %11010 = vmatmul.mubr.msk.f32.gmra.mxu0 %vm375_vm1, %v13191_v62  ;;  %11042 = vmatmul.mubr.msk.f32.gmra.mxu1 %vm375_vm1, %v13191_v62 }
 0x1d9   :  { %v13204_v46 = vadd.f32 %v551_v1, %v13084_v59  ;;  %17054 = vst [vmem:[#allocation21_spill] sm:$0xff] %v13207_v3  ;;  %v566_v43 = vadd.f32 %v10985_v2, %v13103_v16 }
 0x1da   :  { %v560_v4 = vpop.f32.mrf.mxu1 }
 0x1db   :  { %17053 = vst [vmem:[#allocation20_spill] sm:$0xff] %v13204_v46  ;;  %v561_v6 = vadd.f32 %v13103_v16, %v560_v4  ;;  %11012 = vmatprep.mubr.msk.f32.mxu0 %vm375_vm1, %v13204_v46  ;;  %11044 = vmatprep.mubr.msk.f32.mxu1 %vm375_vm1, %v13204_v46  ;;  %v13223_v49 = vadd.f32 %v566_v43, %v13089_v9 }
 0x1dc   :  { %11013 = vmatmul.mubr.msk.f32.gmra.mxu0 %vm375_vm1, %v13207_v3  ;;  %11045 = vmatmul.mubr.msk.f32.gmra.mxu1 %vm375_vm1, %v13207_v3 }
 0x1dd   :  { %v13220_v7 = vadd.f32 %v561_v6, %v13094_v5  ;;  %17056 = vst [vmem:[#allocation23_spill] sm:$0xff] %v13223_v49 }
 0x1df   :  { %17055 = vst [vmem:[#allocation22_spill] sm:$0xff] %v13220_v7  ;;  %11015 = vmatprep.mubr.msk.f32.mxu0 %vm375_vm1, %v13220_v7  ;;  %11047 = vmatprep.mubr.msk.f32.mxu1 %vm375_vm1, %v13220_v7 }
 0x1e0   :  { %11016 = vmatmul.mubr.msk.f32.gmra.mxu0 %vm375_vm1, %v13223_v49  ;;  %11048 = vmatmul.mubr.msk.f32.gmra.mxu1 %vm375_vm1, %v13223_v49 }
 0x1e1   :  { %11058 = vmatprep.mubr.msk.f32.mxu0 %vm375_vm1, %v13108_v24 }
 0x1e4   :  { %11059 = vmatmul.mubr.msk.f32.vlgmr.msra.gmra.mxu0 %vm375_vm1, %v13111_v26 }
 0x1e5   :  { %11061 = vmatprep.mubr.msk.f32.mxu0 %vm375_vm1, %v13124_v35 }
 0x1e8   :  { %11062 = vmatmul.mubr.msk.f32.gmra.mxu0 %vm375_vm1, %v13127_v23 }
 0x1e9   :  { %11064 = vmatprep.mubr.msk.f32.mxu0 %vm375_vm1, %v13140_v44 }
 0x1ec   :  { %11065 = vmatmul.mubr.msk.f32.gmra.mxu0 %vm375_vm1, %v13143_v45 }
 0x1ed   :  { %11067 = vmatprep.mubr.msk.f32.mxu0 %vm375_vm1, %v13156_v50 }
 0x1f0   :  { %11068 = vmatmul.mubr.msk.f32.gmra.mxu0 %vm375_vm1, %v13159_v52 }
 0x1f1   :  { %11070 = vmatprep.mubr.msk.f32.mxu0 %vm375_vm1, %v13172_v55 }
 0x1f4   :  { %11071 = vmatmul.mubr.msk.f32.gmra.mxu0 %vm375_vm1, %v13175_v56 }
 0x1f5   :  { %11073 = vmatprep.mubr.msk.f32.mxu0 %vm375_vm1, %v13188_v40 }
 0x1f8   :  { %11074 = vmatmul.mubr.msk.f32.gmra.mxu0 %vm375_vm1, %v13191_v62 }
 0x1f9   :  { %11076 = vmatprep.mubr.msk.f32.mxu0 %vm375_vm1, %v13204_v46 }
 0x1fc   :  { %11077 = vmatmul.mubr.msk.f32.gmra.mxu0 %vm375_vm1, %v13207_v3 }
 0x1fd   :  { %11079 = vmatprep.mubr.msk.f32.mxu0 %vm375_vm1, %v13220_v7 }
 0x200   :  { %11080 = vmatmul.mubr.msk.f32.gmra.mxu0 %vm375_vm1, %v13223_v49 }
 0x283   :  { %v13265_v54 = vpop.f32.mrf.mxu0  ;;  %v11028_v59 = vpop.f32.mrf.mxu1 }
 0x284   :  { %v13350_v58 = vadd.f32 %v11028_v59, %v9635_v14 }
 0x285   :  { %v712_v0 = vpop.f32.mrf.mxu0  ;;  %v870_v9 = vpop.f32.mrf.mxu1 }
 0x286   :  { %v13273_v5 = vadd.f32 %v13270_v8, %v712_v0  ;;  %v13333_v53 = vadd.f32 %v9635_v14, %v870_v9  ;;  %v13386_v9 = vadd.f32 %v13265_v54, %v13270_v8 }
 0x287   :  { %v13275_v10 = vpop.f32.mrf.mxu0  ;;  %v11031_v11 = vpop.f32.mrf.mxu1 }
 0x288   :  { %11098 = vmatprep.mubr.msk.f32.mxu1 %vm1107_vm2, %v13273_v5  ;;  %v13329_v47 = vadd.f32 %v11031_v11, %v9635_v14 }
 0x289   :  { %v13279_v12 = vpop.f32.mrf.mxu0  ;;  %v880_v13 = vpop.f32.mrf.mxu1 }
 0x28a   :  { %v13312_v39 = vadd.f32 %v9635_v14, %v880_v13  ;;  %v13404_v54 = vadd.f32 %v13270_v8, %v13279_v12  ;;  %v13422_v12 = vadd.f32 %v13275_v10, %v13270_v8 }
 0x28b   :  { %v13284_v15 = vpop.f32.mrf.mxu0  ;;  %v11034_v16 = vpop.f32.mrf.mxu1 }
 0x28c   :  { %v13286_v17 = vadd.f32 %v11034_v16, %v9635_v14 }
 0x28d   :  { %v13288_v18 = vpop.f32.mrf.mxu0  ;;  %v890_v19 = vpop.f32.mrf.mxu1 }
 0x28e   :  { %1513 = vrot.lane.b32.xlu1 %v13286_v17, %s12840_s11  ;;  %v13296_v29 = vadd.f32 %v9635_v14, %v890_v19 }
 0x28f   :  { %v13292_v20 = vpop.f32.mrf.mxu0  ;;  %v11037_v21 = vpop.f32.mrf.mxu1 }
 0x290   :  { %v13294_v27 = vadd.f32 %v11037_v21, %v9635_v14 }
 0x291   :  { %v13298_v30 = vpop.f32.mrf.mxu0  ;;  %v900_v32 = vpop.f32.mrf.mxu1 }
 0x292   :  { %v13300_v33 = vadd.f32 %v9635_v14, %v900_v32  ;;  %1517 = vrot.lane.b32.xlu0 %v13294_v27, %s12840_s11  ;;  %11082 = vmatprep.subr.msk.mxu1 %vm1107_vm2, %v13294_v27  ;;  %v9653_v32 = vld [vmem:[%s16964_s3 + $0x4] ss:$0 sm:$0xff] }
 0x293   :  { %1511 = vrot.lane.b32.xlu1 %v13296_v29, %s12840_s11  ;;  %11083 = vmatpush3.xpose.msk.msra.mxu1 %vm1107_vm2, %v13294_v27 }
 0x294   :  { %v11008_v36 = vpop.f32.mrf.mxu0  ;;  %v11040_v38 = vpop.f32.mrf.mxu1  ;;  %11084 = vmatprep.subr.msk.mxu1 %vm1107_vm2, %v13300_v33 }
 0x295   :  { %v13315_v41 = vadd.f32 %v11008_v36, %v13270_v8  ;;  %v13317_v42 = vadd.f32 %v11040_v38, %v9635_v14  ;;  %v13429_v38 = vadd.f32 %v13284_v15, %v13270_v8  ;;  %v13444_v15 = vadd.f32 %v13270_v8, %v13288_v18 }
 0x296   :  { %v13319_v28 = vpop.f32.mrf.mxu0  ;;  %v13321_v25 = vpop.f32.mrf.mxu1  ;;  %1515 = vrot.lane.b32.xlu0 %v13300_v33, %s12840_s11 }
 0x297   :  { %17057 = vst [vmem:[#allocation24_spill] sm:$0xff] %v13315_v41  ;;  %17058 = vst [vmem:[#allocation25_spill] sm:$0xff] %v13317_v42  ;;  %1507 = vrot.lane.b32.xlu1 %v13312_v39, %s12840_s11  ;;  %11085 = vmatpush3.xpose.msk.msra.mxu1 %vm1107_vm2, %v13300_v33 }
 0x298   :  { %17059 = vst [vmem:[#allocation26_spill] sm:$0xff] %v13319_v28  ;;  %17060 = vst [vmem:[#allocation27_spill] sm:$0xff] %v13321_v25  ;;  %v11011_v48 = vpop.f32.mrf.mxu0  ;;  %v11043_v51 = vpop.f32.mrf.mxu1  ;;  %11086 = vmatprep.subr.msk.mxu1 %vm1107_vm2, %v13286_v17 }
 0x299   :  { %v13336_v22 = vadd.f32 %v11011_v48, %v13270_v8  ;;  %v13338_v34 = vadd.f32 %v11043_v51, %v9635_v14 }
 0x29a   :  { %v13340_v31 = vpop.f32.mrf.mxu0  ;;  %v13342_v57 = vpop.f32.mrf.mxu1  ;;  %1509 = vrot.lane.b32.xlu0 %v13329_v47, %s12840_s11 }
 0x29b   :  { %17061 = vst [vmem:[#allocation28_spill] sm:$0xff] %v13336_v22  ;;  %17062 = vst [vmem:[#allocation29_spill] sm:$0xff] %v13338_v34  ;;  %1503 = vrot.lane.b32.xlu1 %v13333_v53, %s12840_s11  ;;  %11087 = vmatpush3.xpose.msk.msra.mxu1 %vm1107_vm2, %v13286_v17 }
 0x29c   :  { %17063 = vst [vmem:[#allocation30_spill] sm:$0xff] %v13340_v31  ;;  %17064 = vst [vmem:[#allocation31_spill] sm:$0xff] %v13342_v57  ;;  %v11014_v60 = vpop.f32.mrf.mxu0  ;;  %v11046_v61 = vpop.f32.mrf.mxu1  ;;  %11088 = vmatprep.subr.msk.mxu1 %vm1107_vm2, %v13296_v29 }
 0x29d   :  { %v13355_v37 = vadd.f32 %v11014_v60, %v13270_v8  ;;  %v13357_v63 = vadd.f32 %v11046_v61, %v9635_v14  ;;  %v13451_v61 = vadd.f32 %v13270_v8, %v13298_v30 }
 0x29e   :  { %v13359_v1 = vpop.f32.mrf.mxu0  ;;  %v13361_v2 = vpop.f32.mrf.mxu1  ;;  %1505 = vrot.lane.b32.xlu0 %v13350_v58, %s12840_s11 }
 0x29f   :  { %17065 = vst [vmem:[#allocation32_spill] sm:$0xff] %v13355_v37  ;;  %17066 = vst [vmem:[#allocation33_spill] sm:$0xff] %v13357_v63  ;;  %1943 = vrot.lane.b32.xlu1 %v13294_v27, %s12841_s12  ;;  %11089 = vmatpush3.xpose.msk.msra.mxu1 %vm1107_vm2, %v13296_v29 }
 0x2a0   :  { %17067 = vst [vmem:[#allocation34_spill] sm:$0xff] %v13359_v1  ;;  %17068 = vst [vmem:[#allocation35_spill] sm:$0xff] %v13361_v2  ;;  %v11017_v43 = vpop.f32.mrf.mxu0  ;;  %v11049_v4 = vpop.f32.mrf.mxu1  ;;  %11090 = vmatprep.subr.msk.mxu1 %vm1107_vm2, %v13329_v47 }
 0x2a1   :  { %v13372_v6 = vadd.f32 %v11017_v43, %v13270_v8  ;;  %v13374_v59 = vadd.f32 %v11049_v4, %v9635_v14 }
 0x2a2   :  { %v13376_v0 = vpop.f32.mrf.mxu0  ;;  %1487 = vrot.lane.b32.xlu0 %v13273_v5, %s12840_s11 }
 0x2a3   :  { %17069 = vst [vmem:[#allocation36_spill] sm:$0xff] %v13372_v6  ;;  %17070 = vst [vmem:[#allocation37_spill] sm:$0xff] %v13374_v59  ;;  %1941 = vrot.lane.b32.xlu1 %v13300_v33, %s12841_s12  ;;  %11091 = vmatpush3.xpose.msk.msra.mxu1 %vm1107_vm2, %v13329_v47 }
 0x2a4   :  { %17071 = vst [vmem:[#allocation38_spill] sm:$0xff] %v13376_v0  ;;  %v13388_v11 = vpop.f32.mrf.mxu0  ;;  %11092 = vmatprep.subr.msk.mxu1 %vm1107_vm2, %v13312_v39 }
 0x2a5   :  { %v13500_v7 = vadd.f32 %v13388_v11, %v9653_v32 }
 0x2a6   :  { %v13392_v13 = vpop.f32.mrf.mxu0  ;;  %1489 = vrot.lane.b32.xlu0 %v13386_v9, %s12840_s11 }
 0x2a7   :  { %1937 = vrot.lane.b32.xlu1 %v13296_v29, %s12841_s12  ;;  %11093 = vmatpush3.xpose.msk.msra.mxu1 %vm1107_vm2, %v13312_v39  ;;  %17081 = vst [vmem:[#allocation48_spill] sm:$0xff] %v13500_v7 }
 0x2a8   :  { %v11063_v14 = vpop.f32.mrf.mxu0  ;;  %11094 = vmatprep.subr.msk.mxu1 %vm1107_vm2, %v13350_v58 }
 0x2aa   :  { %v1038_v16 = vpop.f32.mrf.mxu0  ;;  %1939 = vrot.lane.b32.xlu0 %v13286_v17, %s12841_s12 }
 0x2ab   :  { %1491 = vrot.lane.b32.xlu1 %v13404_v54, %s12840_s11  ;;  %11095 = vmatpush3.xpose.msk.msra.mxu1 %vm1107_vm2, %v13350_v58 }
 0x2ac   :  { %v11066_v19 = vpop.f32.mrf.mxu0  ;;  %11096 = vmatprep.subr.msk.mxu1 %vm1107_vm2, %v13333_v53 }
 0x2ad   :  { %v13456_v4 = vadd.f32 %v11066_v19, %v9653_v32 }
 0x2ae   :  { %v1048_v21 = vpop.f32.mrf.mxu0  ;;  %1935 = vrot.lane.b32.xlu0 %v13329_v47, %s12841_s12 }
 0x2af   :  { %1933 = vrot.lane.b32.xlu1 %v13312_v39, %s12841_s12  ;;  %11097 = vmatpush3.xpose.msk.msra.mxu1 %vm1107_vm2, %v13333_v53  ;;  %17073 = vst [vmem:[#allocation40_spill] sm:$0xff] %v13456_v4  ;;  %v13467_v18 = vadd.f32 %v9653_v32, %v1048_v21  ;;  %v13487_v21 = vadd.f32 %v13292_v20, %v13270_v8 }
 0x2b0   :  { %v11069_v36 = vpop.f32.mrf.mxu0  ;;  %v13511_v20 = vadd.f32 %v9653_v32, %v13392_v13 }
 0x2b1   :  { %v13431_v48 = vadd.f32 %v11069_v36, %v9653_v32  ;;  %17075 = vst [vmem:[#allocation42_spill] sm:$0xff] %v13467_v18 }
 0x2b2   :  { %v1058_v51 = vpop.f32.mrf.mxu0  ;;  %1493 = vrot.lane.b32.xlu0 %v13422_v12, %s12840_s11  ;;  %11099 = vmatmul.mubr.msk.f32.vlgmr.msra.gmra.mxu1 %vm1107_vm2, %v13386_v9  ;;  %17083 = vst [vmem:[#allocation50_spill] sm:$0xff] %v13511_v20 }
 0x2b3   :  { %v13437_v10 = vadd.f32 %v9653_v32, %v1058_v51  ;;  %11110 = vmatprep.subr.mxu1 %v13431_v48  ;;  %1497 = vrot.lane.b32.xlu1 %v13429_v38, %s12840_s11  ;;  %v13475_v51 = vadd.f32 %v11063_v14, %v9653_v32 }
 0x2b4   :  { %v11072_v60 = vpop.f32.mrf.mxu0  ;;  %11101 = vmatprep.mubr.msk.f32.mxu1 %vm1107_vm2, %v13404_v54  ;;  %11111 = vmatpush3.msra.mxu1 %v13431_v48 }
 0x2b5   :  { %v13453_v43 = vadd.f32 %v11072_v60, %v9653_v32  ;;  %11112 = vmatprep.subr.mxu1 %v13437_v10  ;;  %17077 = vst [vmem:[#allocation44_spill] sm:$0xff] %v13475_v51 }
 0x2b6   :  { %v13458_v36 = vpop.f32.mrf.mxu0  ;;  %11113 = vmatpush3.msra.mxu1 %v13437_v10  ;;  %1495 = vrot.lane.b32.xlu0 %v13444_v15, %s12840_s11 }
 0x2b7   :  { %17072 = vst [vmem:[#allocation39_spill] sm:$0xff] %v13453_v43  ;;  %17074 = vst [vmem:[#allocation41_spill] sm:$0xff] %v13458_v36  ;;  %1499 = vrot.lane.b32.xlu1 %v13451_v61, %s12840_s11  ;;  %11102 = vmatmul.mubr.msk.f32.gmra.mxu1 %vm1107_vm2, %v13422_v12 }
 0x2b8   :  { %11114 = vmatprep.subr.mxu1 %v13456_v4  ;;  %v11075_v30 = vpop.f32.mrf.mxu0  ;;  %11104 = vmatprep.mubr.msk.f32.mxu1 %vm1107_vm2, %v13444_v15 }
 0x2b9   :  { %v13472_v19 = vadd.f32 %v11075_v30, %v9653_v32  ;;  %11115 = vmatpush3.msra.mxu1 %v13456_v4  ;;  %v13489_v30 = vadd.f32 %v9653_v32, %v1038_v16 }
 0x2ba   :  { %11116 = vmatprep.subr.mxu1 %v13467_v18  ;;  %v13478_v60 = vpop.f32.mrf.mxu0  ;;  %1931 = vrot.lane.b32.xlu0 %v13350_v58, %s12841_s12 }
 0x2bb   :  { %17076 = vst [vmem:[#allocation43_spill] sm:$0xff] %v13472_v19  ;;  %17078 = vst [vmem:[#allocation45_spill] sm:$0xff] %v13478_v60  ;;  %11117 = vmatpush3.msra.mxu1 %v13467_v18  ;;  %1929 = vrot.lane.b32.xlu1 %v13333_v53, %s12841_s12 }
 0x2bc   :  { %17079 = vst [vmem:[#allocation46_spill] sm:$0xff] %v13489_v30  ;;  %11105 = vmatmul.mubr.msk.f32.gmra.mxu1 %vm1107_vm2, %v13429_v38  ;;  %11118 = vmatprep.subr.mxu1 %v13475_v51  ;;  %v11078_v14 = vpop.f32.mrf.mxu0 }
 0x2bd   :  { %v13494_v49 = vadd.f32 %v11078_v14, %v9653_v32  ;;  %11107 = vmatprep.mubr.msk.f32.mxu1 %vm1107_vm2, %v13451_v61  ;;  %11119 = vmatpush3.msra.mxu1 %v13475_v51 }
 0x2be   :  { %11120 = vmatprep.subr.mxu1 %v13489_v30  ;;  %v13503_v8 = vpop.f32.mrf.mxu0  ;;  %1501 = vrot.lane.b32.xlu0 %v13487_v21, %s12840_s11 }
 0x2bf   :  { %17080 = vst [vmem:[#allocation47_spill] sm:$0xff] %v13494_v49  ;;  %17082 = vst [vmem:[#allocation49_spill] sm:$0xff] %v13503_v8  ;;  %11121 = vmatpush3.msra.mxu1 %v13489_v30  ;;  %1915 = vrot.lane.b32.xlu1 %v13386_v9, %s12841_s12 }
 0x2c0   :  { %11108 = vmatmul.mubr.msk.f32.gmra.mxu1 %vm1107_vm2, %v13487_v21  ;;  %11122 = vmatprep.subr.mxu1 %v13500_v7  ;;  %v11081_v11 = vpop.f32.mrf.mxu0 }
 0x2c1   :  { %v13516_v16 = vadd.f32 %v11081_v11, %v9653_v32  ;;  %11123 = vmatpush3.msra.mxu1 %v13500_v7 }
 0x2c2   :  { %11124 = vmatprep.subr.mxu1 %v13511_v20  ;;  %1913 = vrot.lane.b32.xlu0 %v13273_v5, %s12841_s12 }
 0x2c3   :  { %17084 = vst [vmem:[#allocation51_spill] sm:$0xff] %v13516_v16  ;;  %11125 = vmatpush3.msra.mxu1 %v13511_v20  ;;  %1919 = vrot.lane.b32.xlu1 %v13422_v12, %s12841_s12 }
 0x2c6   :  { %1917 = vrot.lane.b32.xlu0 %v13404_v54, %s12841_s12 }
 0x2c7   :  { %1923 = vrot.lane.b32.xlu1 %v13429_v38, %s12841_s12 }
 0x2ca   :  { %1921 = vrot.lane.b32.xlu0 %v13444_v15, %s12841_s12 }
 0x2cb   :  { %1927 = vrot.lane.b32.xlu1 %v13487_v21, %s12841_s12 }
 0x2ce   :  { %1925 = vrot.lane.b32.xlu0 %v13451_v61, %s12841_s12 }
 0x2cf   :  { %2359 = vrot.lane.b32.xlu1 %v13300_v33, %s12842_s15 }
 0x2d2   :  { %2361 = vrot.lane.b32.xlu0 %v13294_v27, %s12842_s15 }
 0x2d3   :  { %1760 = vrot.lane.b32.xlu1 %v13511_v20, %s12840_s11 }
 0x2d6   :  { %1762 = vrot.lane.b32.xlu0 %v13500_v7, %s12840_s11 }
 0x2d7   :  { %2178 = vrot.lane.b32.xlu1 %v13511_v20, %s12841_s12 }
 0x2da   :  { %2180 = vrot.lane.b32.xlu0 %v13500_v7, %s12841_s12 }
 0x2db   :  { %1766 = vrot.lane.b32.xlu1 %v13475_v51, %s12840_s11 }
 0x2de   :  { %2184 = vrot.lane.b32.xlu0 %v13475_v51, %s12841_s12 }
 0x2df   :  { %1764 = vrot.lane.b32.xlu1 %v13489_v30, %s12840_s11 }
 0x2e2   :  { %1770 = vrot.lane.b32.xlu0 %v13456_v4, %s12840_s11 }
 0x2e3   :  { %2182 = vrot.lane.b32.xlu1 %v13489_v30, %s12841_s12 }
 0x2e6   :  { %2188 = vrot.lane.b32.xlu0 %v13456_v4, %s12841_s12 }
 0x2e7   :  { %2186 = vrot.lane.b32.xlu1 %v13467_v18, %s12841_s12 }
 0x2ea   :  { %1768 = vrot.lane.b32.xlu0 %v13467_v18, %s12840_s11 }
 0x2eb   :  { %1772 = vrot.lane.b32.xlu1 %v13437_v10, %s12840_s11 }
 0x2ee   :  { %1774 = vrot.lane.b32.xlu0 %v13431_v48, %s12840_s11 }
 0x2ef   :  { %2190 = vrot.lane.b32.xlu1 %v13437_v10, %s12841_s12 }
 0x2f2   :  { %2192 = vrot.lane.b32.xlu0 %v13431_v48, %s12841_s12 }
 0x300   :  { %v1514_v27 = vpop.permute.xlu1 %1513 }
 0x304   :  { %v1518_v33 = vpop.permute.xlu0 %1517 }
 0x305   :  { %v1512_v13 = vpop.permute.xlu1 %1511  ;;  %11138 = vmatprep.subr.msk.mxu0 %vm1107_vm2, %v1518_v33 }
 0x306   :  { %11139 = vmatpush3.xpose.msk.msra.mxu0 %vm1107_vm2, %v1518_v33 }
 0x308   :  { %v1516_v32 = vpop.permute.xlu0 %1515 }
 0x309   :  { %v1508_v14 = vpop.permute.xlu1 %1507  ;;  %11140 = vmatprep.subr.msk.mxu0 %vm1107_vm2, %v1516_v32 }
 0x30a   :  { %11141 = vmatpush3.xpose.msk.msra.mxu0 %vm1107_vm2, %v1516_v32 }
 0x30b   :  { %11142 = vmatprep.subr.msk.mxu0 %vm1107_vm2, %v1514_v27 }
 0x30c   :  { %v1510_v11 = vpop.permute.xlu0 %1509 }
 0x30d   :  { %v1504_v3 = vpop.permute.xlu1 %1503 }
 0x30e   :  { %11143 = vmatpush3.xpose.msk.msra.mxu0 %vm1107_vm2, %v1514_v27 }
 0x30f   :  { %11144 = vmatprep.subr.msk.mxu0 %vm1107_vm2, %v1512_v13 }
 0x310   :  { %v1506_v46 = vpop.permute.xlu0 %1505 }
 0x311   :  { %v1944_v62 = vpop.permute.xlu1 %1943 }
 0x312   :  { %11145 = vmatpush3.xpose.msk.msra.mxu0 %vm1107_vm2, %v1512_v13 }
 0x313   :  { %11146 = vmatprep.subr.msk.mxu0 %vm1107_vm2, %v1510_v11 }
 0x314   :  { %v1488_v33 = vpop.permute.xlu0 %1487 }
 0x315   :  { %v1942_v40 = vpop.permute.xlu1 %1941  ;;  %11154 = vmatprep.mubr.msk.f32.mxu0 %vm1107_vm2, %v1488_v33 }
 0x316   :  { %11147 = vmatpush3.xpose.msk.msra.mxu0 %vm1107_vm2, %v1510_v11 }
 0x317   :  { %11148 = vmatprep.subr.msk.mxu0 %vm1107_vm2, %v1508_v14 }
 0x318   :  { %v1490_v32 = vpop.permute.xlu0 %1489 }
 0x319   :  { %v1938_v56 = vpop.permute.xlu1 %1937 }
 0x31a   :  { %11149 = vmatpush3.xpose.msk.msra.mxu0 %vm1107_vm2, %v1508_v14 }
 0x31b   :  { %11150 = vmatprep.subr.msk.mxu0 %vm1107_vm2, %v1506_v46 }
 0x31c   :  { %v1940_v27 = vpop.permute.xlu0 %1939 }
 0x31d   :  { %v1492_v55 = vpop.permute.xlu1 %1491 }
 0x31e   :  { %11151 = vmatpush3.xpose.msk.msra.mxu0 %vm1107_vm2, %v1506_v46 }
 0x31f   :  { %11152 = vmatprep.subr.msk.mxu0 %vm1107_vm2, %v1504_v3 }
 0x320   :  { %v1936_v13 = vpop.permute.xlu0 %1935 }
 0x321   :  { %v1934_v52 = vpop.permute.xlu1 %1933 }
 0x322   :  { %11153 = vmatpush3.xpose.msk.msra.mxu0 %vm1107_vm2, %v1504_v3 }
 0x323   :  { %11194 = vmatprep.subr.msk.mxu0 %vm1107_vm2, %v1944_v62 }
 0x324   :  { %v1494_v11 = vpop.permute.xlu0 %1493 }
 0x325   :  { %11155 = vmatmul.mubr.msk.f32.vlgmr.msra.gmra.mxu0 %vm1107_vm2, %v1490_v32  ;;  %v1498_v14 = vpop.permute.xlu1 %1497 }
 0x326   :  { %11157 = vmatprep.mubr.msk.f32.mxu0 %vm1107_vm2, %v1492_v55  ;;  %11195 = vmatpush3.xpose.msk.msra.mxu0 %vm1107_vm2, %v1944_v62 }
 0x327   :  { %11196 = vmatprep.subr.msk.mxu0 %vm1107_vm2, %v1942_v40 }
 0x328   :  { %v1496_v33 = vpop.permute.xlu0 %1495 }
 0x329   :  { %11158 = vmatmul.mubr.msk.f32.gmra.mxu0 %vm1107_vm2, %v1494_v11  ;;  %v1500_v3 = vpop.permute.xlu1 %1499 }
 0x32a   :  { %11160 = vmatprep.mubr.msk.f32.mxu0 %vm1107_vm2, %v1496_v33  ;;  %11197 = vmatpush3.xpose.msk.msra.mxu0 %vm1107_vm2, %v1942_v40 }
 0x32b   :  { %11198 = vmatprep.subr.msk.mxu0 %vm1107_vm2, %v1940_v27 }
 0x32c   :  { %v1932_v46 = vpop.permute.xlu0 %1931 }
 0x32d   :  { %11161 = vmatmul.mubr.msk.f32.gmra.mxu0 %vm1107_vm2, %v1498_v14  ;;  %v1930_v62 = vpop.permute.xlu1 %1929 }
 0x32e   :  { %11163 = vmatprep.mubr.msk.f32.mxu0 %vm1107_vm2, %v1500_v3  ;;  %11199 = vmatpush3.xpose.msk.msra.mxu0 %vm1107_vm2, %v1940_v27 }
 0x32f   :  { %11200 = vmatprep.subr.msk.mxu0 %vm1107_vm2, %v1938_v56 }
 0x330   :  { %v1502_v55 = vpop.permute.xlu0 %1501 }
 0x331   :  { %11164 = vmatmul.mubr.msk.f32.gmra.mxu0 %vm1107_vm2, %v1502_v55  ;;  %v1916_v11 = vpop.permute.xlu1 %1915 }
 0x332   :  { %11201 = vmatpush3.xpose.msk.msra.mxu0 %vm1107_vm2, %v1938_v56 }
 0x333   :  { %11202 = vmatprep.subr.msk.mxu0 %vm1107_vm2, %v1936_v13 }
 0x334   :  { %v1914_v40 = vpop.permute.xlu0 %1913 }
 0x335   :  { %11210 = vmatprep.mubr.msk.f32.mxu0 %vm1107_vm2, %v1914_v40  ;;  %v1920_v14 = vpop.permute.xlu1 %1919 }
 0x336   :  { %11203 = vmatpush3.xpose.msk.msra.mxu0 %vm1107_vm2, %v1936_v13 }
 0x337   :  { %11204 = vmatprep.subr.msk.mxu0 %vm1107_vm2, %v1934_v52 }
 0x338   :  { %v1918_v32 = vpop.permute.xlu0 %1917 }
 0x33a   :  { %11205 = vmatpush3.xpose.msk.msra.mxu0 %vm1107_vm2, %v1934_v52  ;;  %v1924_v52 = vpop.permute.xlu1 %1923 }
 0x33b   :  { %11206 = vmatprep.subr.msk.mxu0 %vm1107_vm2, %v1932_v46 }
 0x33c   :  { %v1922_v27 = vpop.permute.xlu0 %1921 }
 0x33e   :  { %11207 = vmatpush3.xpose.msk.msra.mxu0 %vm1107_vm2, %v1932_v46  ;;  %v1928_v3 = vpop.permute.xlu1 %1927 }
 0x33f   :  { %11208 = vmatprep.subr.msk.mxu0 %vm1107_vm2, %v1930_v62 }
 0x340   :  { %v1926_v56 = vpop.permute.xlu0 %1925 }
 0x342   :  { %11209 = vmatpush3.xpose.msk.msra.mxu0 %vm1107_vm2, %v1930_v62 }
 0x344   :  { %v13612_v33 = vpop.permute.xlu0 %2361 }
 0x345   :  { %17085 = vst [vmem:[#allocation52_spill] sm:$0xff] %v13612_v33  ;;  %11211 = vmatmul.mubr.msk.f32.vlgmr.msra.gmra.mxu0 %vm1107_vm2, %v1916_v11 }
 0x346   :  { %11213 = vmatprep.mubr.msk.f32.mxu0 %vm1107_vm2, %v1918_v32 }
 0x348   :  { %v13616_v13 = vpop.permute.xlu0 %1762 }
 0x349   :  { %11214 = vmatmul.mubr.msk.f32.gmra.mxu0 %vm1107_vm2, %v1920_v14 }
 0x34a   :  { %11216 = vmatprep.mubr.msk.f32.mxu0 %vm1107_vm2, %v1922_v27  ;;  %v13636_v27 = vpop.f32.mrf.mxu1 }
 0x34b   :  { %17088 = vst [vmem:[#allocation55_spill] sm:$0xff] %v13636_v27 }
 0x34c   :  { %v13620_v46 = vpop.permute.xlu0 %2180 }
 0x34d   :  { %17086 = vst [vmem:[#allocation53_spill] sm:$0xff] %v13620_v46  ;;  %11217 = vmatmul.mubr.msk.f32.gmra.mxu0 %vm1107_vm2, %v1924_v52 }
 0x34e   :  { %11219 = vmatprep.mubr.msk.f32.mxu0 %vm1107_vm2, %v1926_v56 }
 0x350   :  { %v13624_v55 = vpop.permute.xlu0 %2184 }
 0x351   :  { %17087 = vst [vmem:[#allocation54_spill] sm:$0xff] %v13624_v55  ;;  %11220 = vmatmul.mubr.msk.f32.gmra.mxu0 %vm1107_vm2, %v1928_v3 }
 0x354   :  { %v13627_v40 = vpop.permute.xlu0 %1770 }
 0x358   :  { %v13629_v62 = vpop.permute.xlu0 %2188 }
 0x35c   :  { %v13631_v32 = vpop.permute.xlu0 %1768 }
 0x360   :  { %v13633_v11 = vpop.permute.xlu0 %1774 }
 0x361   :  { %11166 = vmatprep.subr.mxu1 %v13633_v11 }
 0x372   :  { %v11100_v14 = vpop.f32.mrf.mxu1 }
 0x373   :  { %v13638_v56 = vmul.f32 0.35355338, %v11100_v14 }
 0x374   :  { %v1222_v52 = vpop.f32.mrf.mxu1 }
 0x375   :  { %v13640_v50 = vmul.f32 0.35355338, %v1222_v52  ;;  %v1273_v3 = vsel %vm1269_vm3, %v13638_v56, -inf }
 0x376   :  { %1274 = vmax.xlane.f32.xlu1 %v1273_v3 }
 0x377   :  { %v11103_v45 = vpop.f32.mrf.mxu1  ;;  %v1270_v44 = vsel %vm1269_vm3, %v13640_v50, -inf }
 0x378   :  { %v13646_v23 = vmul.f32 0.35355338, %v11103_v45  ;;  %1271 = vmax.xlane.f32.xlu0 %v1270_v44 }
 0x379   :  { %v1232_v35 = vpop.f32.mrf.mxu1 }
 0x37a   :  { %v13648_v26 = vmul.f32 0.35355338, %v1232_v35  ;;  %v1279_v14 = vsel %vm1269_vm3, %v13646_v23, -inf }
 0x37c   :  { %v11106_v24 = vpop.f32.mrf.mxu1  ;;  %1280 = vmax.xlane.f32.xlu0 %v1279_v14  ;;  %v1276_v3 = vsel %vm1269_vm3, %v13648_v26, -inf }
 0x37d   :  { %v13652_v6 = vmul.f32 0.35355338, %v11106_v24 }
 0x37e   :  { %v1242_v52 = vpop.f32.mrf.mxu1 }
 0x37f   :  { %v13654_v37 = vmul.f32 0.35355338, %v1242_v52  ;;  %v1285_v24 = vsel %vm1269_vm3, %v13652_v6, -inf }
 0x380   :  { %v11109_v0 = vpop.f32.mrf.mxu1  ;;  %1277 = vmax.xlane.f32.xlu0 %v1276_v3  ;;  %v13670_v3 = vpop.f32.mrf.mxu0 }
 0x381   :  { %v1282_v44 = vsel %vm1269_vm3, %v13654_v37, -inf  ;;  %v13660_v45 = vmul.f32 0.35355338, %v11109_v0  ;;  %17089 = vst [vmem:[#allocation56_spill] sm:$0xff] %v13670_v3 }
 0x382   :  { %1283 = vmax.xlane.f32.xlu1 %v1282_v44  ;;  %v1252_v35 = vpop.f32.mrf.mxu1 }
 0x383   :  { %v13662_v22 = vmul.f32 0.35355338, %v1252_v35  ;;  %v1291_v52 = vsel %vm1269_vm3, %v13660_v45, -inf }
 0x384   :  { %1286 = vmax.xlane.f32.xlu0 %v1285_v24 }
 0x385   :  { %v1288_v14 = vsel %vm1269_vm3, %v13662_v22, -inf }
 0x386   :  { %1289 = vmax.xlane.f32.xlu1 %v1288_v14 }
 0x388   :  { %1292 = vmax.xlane.f32.xlu0 %v1291_v52 }
 0x3e5   :  { %v11156_v44 = vpop.f32.mrf.mxu0 }
 0x3e6   :  { %v13672_v1 = vmul.f32 0.35355338, %v11156_v44 }
 0x3e7   :  { %v1617_v0 = vpop.f32.mrf.mxu0 }
 0x3e8   :  { %v13674_v35 = vmul.f32 0.35355338, %v1617_v0  ;;  %v1667_v41 = vsel %vm1269_vm3, %v13672_v1, -inf  ;;  %v13686_v0 = vpop.permute.xlu1 %2359 }
 0x3e9   :  { %v11159_v24 = vpop.f32.mrf.mxu0  ;;  %1668 = vmax.xlane.f32.xlu0 %v1667_v41  ;;  %17090 = vst [vmem:[#allocation57_spill] sm:$0xff] %v13686_v0 }
 0x3ea   :  { %v13678_v31 = vmul.f32 0.35355338, %v11159_v24  ;;  %v1664_v14 = vsel %vm1269_vm3, %v13674_v35, -inf }
 0x3eb   :  { %v1627_v28 = vpop.f32.mrf.mxu0  ;;  %1665 = vmax.xlane.f32.xlu1 %v1664_v14 }
 0x3ec   :  { %v13682_v52 = vmul.f32 0.35355338, %v1627_v28  ;;  %v1673_v44 = vsel %vm1269_vm3, %v13678_v31, -inf }
 0x3ed   :  { %v11162_v25 = vpop.f32.mrf.mxu0  ;;  %1674 = vmax.xlane.f32.xlu0 %v1673_v44 }
 0x3ee   :  { %v13688_v42 = vmul.f32 0.35355338, %v11162_v25  ;;  %v1670_v41 = vsel %vm1269_vm3, %v13682_v52, -inf  ;;  %v13700_v25 = vpop.permute.xlu1 %1760 }
 0x3ef   :  { %v1637_v24 = vpop.f32.mrf.mxu0  ;;  %1671 = vmax.xlane.f32.xlu1 %v1670_v41 }
 0x3f0   :  { %v13692_v57 = vmul.f32 0.35355338, %v1637_v24  ;;  %v1679_v28 = vsel %vm1269_vm3, %v13688_v42, -inf }
 0x3f1   :  { %v11165_v14 = vpop.f32.mrf.mxu0  ;;  %1680 = vmax.xlane.f32.xlu0 %v1679_v28 }
 0x3f2   :  { %v13696_v34 = vmul.f32 0.35355338, %v11165_v14  ;;  %v1676_v44 = vsel %vm1269_vm3, %v13692_v57, -inf  ;;  %v13708_v28 = vpop.permute.xlu1 %2178 }
 0x3f3   :  { %v1647_v2 = vpop.f32.mrf.mxu0  ;;  %1677 = vmax.xlane.f32.xlu1 %v1676_v44  ;;  %17091 = vst [vmem:[#allocation58_spill] sm:$0xff] %v13708_v28 }
 0x3f4   :  { %v13702_v63 = vmul.f32 0.35355338, %v1647_v2  ;;  %v1685_v41 = vsel %vm1269_vm3, %v13696_v34, -inf }
 0x3f5   :  { %1686 = vmax.xlane.f32.xlu0 %v1685_v41 }
 0x3f6   :  { %v1682_v24 = vsel %vm1269_vm3, %v13702_v63, -inf  ;;  %v13710_v14 = vpop.permute.xlu1 %1766 }
 0x3f7   :  { %1683 = vmax.xlane.f32.xlu1 %v1682_v24  ;;  %v13724_v24 = vpop.permute.xlu0 %2192 }
 0x3fa   :  { %v13712_v59 = vpop.permute.xlu1 %1764 }
 0x3fe   :  { %v13720_v41 = vpop.permute.xlu1 %2182 }
 0x3ff   :  { %17092 = vst [vmem:[#allocation59_spill] sm:$0xff] %v13720_v41 }
 0x401   :  { %v1272_v20 = vpop.xlane.xlu0 %1271 }
 0x402   :  { %v13722_v7 = vpop.permute.xlu1 %2186  ;;  %v1294_v36 = vsub.f32 %v13640_v50, %v1272_v20 }
 0x404   :  { %v1302_v60 = vmul.f32 1.442695, %v1294_v36 }
 0x405   :  { %v11212_v27 = vpop.f32.mrf.mxu0  ;;  %v1281_v43 = vpop.xlane.xlu0 %1280 }
 0x406   :  { %v13714_v44 = vmul.f32 0.35355338, %v11212_v27  ;;  %v13726_v51 = vpop.permute.xlu1 %1772  ;;  %12275 = vpow2.f32 %v1302_v60 }
 0x407   :  { %v2043_v30 = vpop.f32.mrf.mxu0 }
 0x408   :  { %2355 = vrot.lane.b32.xlu1 %v13296_v29, %s12842_s15  ;;  %v2093_v2 = vsel %vm1269_vm3, %v13714_v44, -inf  ;;  %v13734_v16 = vmul.f32 0.35355338, %v2043_v30 }
 0x409   :  { %2094 = vmax.xlane.f32.xlu0 %v2093_v2  ;;  %v11215_v29 = vpop.f32.mrf.mxu0  ;;  %v1278_v19 = vpop.xlane.xlu0 %1277 }
 0x40a   :  { %v13728_v27 = vpop.permute.xlu1 %2190  ;;  %v1296_v49 = vsub.f32 %v13648_v26, %v1278_v19  ;;  %v2090_v50 = vsel %vm1269_vm3, %v13734_v16, -inf }
 0x40b   :  { %v2053_v8 = vpop.f32.mrf.mxu0 }
 0x40c   :  { %v1306_v33 = vmul.f32 1.442695, %v1296_v49  ;;  %v13737_v28 = vmul.f32 0.35355338, %v2053_v8 }
 0x40d   :  { %v11218_v0 = vpop.f32.mrf.mxu0 }
 0x40e   :  { %v1275_v2 = vpop.xlane.xlu1 %1274  ;;  %12277 = vpow2.f32 %v1306_v33  ;;  %v2096_v49 = vsel %vm1269_vm3, %v13737_v28, -inf  ;;  %v1297_v33 = vsub.f32 %v13646_v23, %v1281_v43  ;;  %v13763_v43 = vmul.f32 0.35355338, %v11218_v0 }
 0x40f   :  { %v2063_v20 = vpop.f32.mrf.mxu0  ;;  %v1295_v36 = vsub.f32 %v13638_v56, %v1275_v2 }
 0x410   :  { %v13743_v60 = vmul.f32 0.35355338, %v2063_v20  ;;  %v13756_v20 = vmul.f32 0.35355338, %v11215_v29 }
 0x411   :  { %v1304_v30 = vmul.f32 1.442695, %v1295_v36 }
 0x412   :  { %v1284_v3 = vpop.xlane.xlu1 %1283 }
 0x413   :  { %v1298_v18 = vsub.f32 %v13654_v37, %v1284_v3  ;;  %v11221_v37 = vpop.f32.mrf.mxu0  ;;  %v2102_v3 = vsel %vm1269_vm3, %v13743_v60, -inf }
 0x415   :  { %v1310_v26 = vmul.f32 1.442695, %v1298_v18  ;;  %v1287_v18 = vpop.xlane.xlu0 %1286  ;;  %v2073_v56 = vpop.f32.mrf.mxu0 }
 0x416   :  { %v1299_v36 = vsub.f32 %v13652_v6, %v1287_v18 }
 0x417   :  { %12279 = vpow2.f32 %v1310_v26 }
 0x418   :  { %12281 = vpow2.f32 %v1304_v30 }
 0x419   :  { %v1293_v26 = vpop.xlane.xlu0 %1292 }
 0x41a   :  { %v1301_v30 = vsub.f32 %v13660_v45, %v1293_v26 }
 0x41f   :  { %2357 = vrot.lane.b32.xlu0 %v13286_v17, %s12842_s15  ;;  %v1290_v17 = vpop.xlane.xlu1 %1289 }
 0x420   :  { %v1300_v19 = vsub.f32 %v13662_v22, %v1290_v17  ;;  %v13752_v22 = vmul.f32 0.35355338, %v2073_v56  ;;  %v1308_v17 = vmul.f32 1.442695, %v1297_v33  ;;  %v2105_v33 = vsel %vm1269_vm3, %v13763_v43, -inf }
 0x421   :  { %v13780_v56 = vmul.f32 0.35355338, %v11221_v37 }
 0x422   :  { %v1314_v8 = vmul.f32 1.442695, %v1300_v19  ;;  %v2108_v23 = vsel %vm1269_vm3, %v13752_v22, -inf }
 0x423   :  { %v2111_v26 = vsel %vm1269_vm3, %v13780_v56, -inf }
 0x424   :  { %12283 = vpow2.f32 %v1314_v8  ;;  %v2099_v8 = vsel %vm1269_vm3, %v13756_v20, -inf }
 0x425   :  { %12285 = vpow2.f32 %v1308_v17 }
 0x42c   :  { %2091 = vmax.xlane.f32.xlu1 %v2090_v50  ;;  %v13749_v50 = vpop.eup %12275 }
 0x42d   :  { %v1318_v2 = vsel %vm1269_vm3, %v13749_v50, 0.0  ;;  %v13759_v19 = vpop.eup %12277 }
 0x42e   :  { %v1324_v6 = vsel %vm1269_vm3, %v13759_v19, 0.0  ;;  %v13770_v29 = vpop.eup %12279 }
 0x42f   :  { %v13774_v0 = vpop.eup %12281  ;;  %v1330_v45 = vsel %vm1269_vm3, %v13770_v29, 0.0 }
 0x430   :  { %2097 = vmax.xlane.f32.xlu1 %v2096_v49  ;;  %v1312_v49 = vmul.f32 1.442695, %v1299_v36 }
 0x431   :  { %v13778_v18 = vpop.eup %12283 }
 0x432   :  { %12287 = vpow2.f32 %v1312_v49  ;;  %v1336_v17 = vsel %vm1269_vm3, %v13778_v18, 0.0  ;;  %v13786_v36 = vpop.eup %12285 }
 0x434   :  { %2103 = vmax.xlane.f32.xlu1 %v2102_v3  ;;  %v1316_v3 = vmul.f32 1.442695, %v1301_v30 }
 0x436   :  { %12289 = vpow2.f32 %v1316_v3 }
 0x438   :  { %1319 = vadd.xlane.f32.xlu1 %v1318_v2  ;;  %v1321_v2 = vsel %vm1269_vm3, %v13774_v0, 0.0 }
 0x43c   :  { %2109 = vmax.xlane.f32.xlu1 %v2108_v23  ;;  %v1327_v23 = vsel %vm1269_vm3, %v13786_v36, 0.0 }
 0x43e   :  { %2100 = vmax.xlane.f32.xlu0 %v2099_v8 }
 0x43f   :  { %v13792_v37 = vpop.eup %12287 }
 0x440   :  { %1325 = vadd.xlane.f32.xlu1 %v1324_v6  ;;  %v1333_v49 = vsel %vm1269_vm3, %v13792_v37, 0.0 }
 0x442   :  { %2106 = vmax.xlane.f32.xlu0 %v2105_v33 }
 0x443   :  { %v13796_v30 = vpop.eup %12289 }
 0x444   :  { %1331 = vadd.xlane.f32.xlu1 %v1330_v45  ;;  %v1339_v8 = vsel %vm1269_vm3, %v13796_v30, 0.0 }
 0x446   :  { %1322 = vadd.xlane.f32.xlu0 %v1321_v2 }
 0x448   :  { %1337 = vadd.xlane.f32.xlu1 %v1336_v17 }
 0x44a   :  { %2112 = vmax.xlane.f32.xlu0 %v2111_v26 }
 0x44e   :  { %1328 = vadd.xlane.f32.xlu0 %v1327_v23 }
 0x452   :  { %1334 = vadd.xlane.f32.xlu0 %v1333_v49 }
 0x456   :  { %1340 = vadd.xlane.f32.xlu0 %v1339_v8 }
 0x472   :  { %v1669_v6 = vpop.xlane.xlu0 %1668 }
 0x473   :  { %v1689_v3 = vsub.f32 %v13672_v1, %v1669_v6 }
 0x474   :  { %v1666_v33 = vpop.xlane.xlu1 %1665 }
 0x475   :  { %v1698_v45 = vmul.f32 1.442695, %v1689_v3  ;;  %v1688_v2 = vsub.f32 %v13674_v35, %v1666_v33 }
 0x476   :  { %v1675_v17 = vpop.xlane.xlu0 %1674 }
 0x477   :  { %12291 = vpow2.f32 %v1698_v45  ;;  %v1696_v26 = vmul.f32 1.442695, %v1688_v2  ;;  %v1691_v23 = vsub.f32 %v13678_v31, %v1675_v17 }
 0x478   :  { %v1672_v46 = vpop.xlane.xlu1 %1671 }
 0x479   :  { %12293 = vpow2.f32 %v1696_v26  ;;  %v1702_v4 = vmul.f32 1.442695, %v1691_v23  ;;  %v1690_v49 = vsub.f32 %v13682_v52, %v1672_v46 }
 0x47a   :  { %v1681_v41 = vpop.xlane.xlu0 %1680 }
 0x47b   :  { %12295 = vpow2.f32 %v1702_v4  ;;  %v1700_v8 = vmul.f32 1.442695, %v1690_v49  ;;  %v1693_v55 = vsub.f32 %v13688_v42, %v1681_v41 }
 0x47c   :  { %v1678_v1 = vpop.xlane.xlu1 %1677 }
 0x47d   :  { %12297 = vpow2.f32 %v1700_v8  ;;  %v1706_v6 = vmul.f32 1.442695, %v1693_v55  ;;  %v1692_v35 = vsub.f32 %v13692_v57, %v1678_v1 }
 0x47e   :  { %v1687_v3 = vpop.xlane.xlu0 %1686 }
 0x47f   :  { %12299 = vpow2.f32 %v1706_v6  ;;  %v1704_v33 = vmul.f32 1.442695, %v1692_v35  ;;  %v1695_v31 = vsub.f32 %v13696_v34, %v1687_v3 }
 0x480   :  { %v1684_v45 = vpop.xlane.xlu1 %1683 }
 0x481   :  { %12301 = vpow2.f32 %v1704_v33  ;;  %v1710_v2 = vmul.f32 1.442695, %v1695_v31  ;;  %v1694_v46 = vsub.f32 %v13702_v63, %v1684_v45 }
 0x483   :  { %12303 = vpow2.f32 %v1710_v2  ;;  %v1708_v4 = vmul.f32 1.442695, %v1694_v46 }
 0x484   :  { %v13808_v52 = vpop.eup %12291 }
 0x485   :  { %v1715_v42 = vsel %vm1269_vm3, %v13808_v52, 0.0  ;;  %12305 = vpow2.f32 %v1708_v4  ;;  %v13845_v4 = vpop.permute.xlu1 %2355 }
 0x486   :  { %v13812_v55 = vpop.eup %12293  ;;  %1716 = vadd.xlane.f32.xlu0 %v1715_v42 }
 0x487   :  { %v1712_v57 = vsel %vm1269_vm3, %v13812_v55, 0.0 }
 0x488   :  { %v13816_v34 = vpop.eup %12295  ;;  %1713 = vadd.xlane.f32.xlu1 %v1712_v57 }
 0x489   :  { %v1721_v63 = vsel %vm1269_vm3, %v13816_v34, 0.0 }
 0x48a   :  { %v13820_v41 = vpop.eup %12297  ;;  %1722 = vadd.xlane.f32.xlu0 %v1721_v63 }
 0x48b   :  { %v1718_v17 = vsel %vm1269_vm3, %v13820_v41, 0.0 }
 0x48c   :  { %v13824_v26 = vpop.eup %12299  ;;  %1719 = vadd.xlane.f32.xlu1 %v1718_v17 }
 0x48d   :  { %v1727_v23 = vsel %vm1269_vm3, %v13824_v26, 0.0 }
 0x48e   :  { %v13828_v49 = vpop.eup %12301  ;;  %1728 = vadd.xlane.f32.xlu0 %v1727_v23 }
 0x48f   :  { %v1724_v8 = vsel %vm1269_vm3, %v13828_v49, 0.0 }
 0x490   :  { %v13832_v1 = vpop.eup %12303  ;;  %1725 = vadd.xlane.f32.xlu1 %v1724_v8 }
 0x491   :  { %v1733_v3 = vsel %vm1269_vm3, %v13832_v1, 0.0 }
 0x492   :  { %v2095_v6 = vpop.xlane.xlu0 %2094  ;;  %v13837_v33 = vpop.eup %12305 }
 0x493   :  { %v2115_v35 = vsub.f32 %v13714_v44, %v2095_v6  ;;  %v1730_v45 = vsel %vm1269_vm3, %v13837_v33, 0.0 }
 0x494   :  { %1734 = vadd.xlane.f32.xlu1 %v1733_v3 }
 0x495   :  { %v2124_v31 = vmul.f32 1.442695, %v2115_v35 }
 0x496   :  { %v13851_v6 = vpop.permute.xlu0 %2357 }
 0x497   :  { %12307 = vpow2.f32 %v2124_v31 }
 0x498   :  { %1731 = vadd.xlane.f32.xlu1 %v1730_v45 }
 0x4a4   :  { %v13841_v2 = vpop.eup %12307 }
 0x4a5   :  { %v2141_v46 = vsel %vm1269_vm3, %v13841_v2, 0.0 }
 0x4a6   :  { %2142 = vadd.xlane.f32.xlu0 %v2141_v46 }
 0x4b5   :  { %v2092_v44 = vpop.xlane.xlu1 %2091 }
 0x4b6   :  { %v2114_v42 = vsub.f32 %v13734_v16, %v2092_v44 }
 0x4b8   :  { %v2122_v57 = vmul.f32 1.442695, %v2114_v42 }
 0x4b9   :  { %v2098_v63 = vpop.xlane.xlu1 %2097 }
 0x4ba   :  { %12309 = vpow2.f32 %v2122_v57  ;;  %v2116_v8 = vsub.f32 %v13737_v28, %v2098_v63 }
 0x4bc   :  { %2353 = vrot.lane.b32.xlu0 %v13329_v47, %s12842_s15  ;;  %v2126_v35 = vmul.f32 1.442695, %v2116_v8 }
 0x4bd   :  { %v2104_v17 = vpop.xlane.xlu1 %2103 }
 0x4be   :  { %v2118_v3 = vsub.f32 %v13743_v60, %v2104_v17 }
 0x4c0   :  { %v2130_v47 = vmul.f32 1.442695, %v2118_v3 }
 0x4c1   :  { %v1320_v23 = vpop.xlane.xlu1 %1319 }
 0x4c2   :  { %12311 = vrcp.f32 %v1320_v23 }
 0x4c3   :  { %12313 = vpow2.f32 %v2126_v35 }
 0x4c4   :  { %12315 = vpow2.f32 %v2130_v47 }
 0x4c5   :  { %v2110_v31 = vpop.xlane.xlu1 %2109 }
 0x4c6   :  { %v2120_v44 = vsub.f32 %v13752_v22, %v2110_v31 }
 0x4c7   :  { %v13854_v45 = vpop.eup %12309  ;;  %v2101_v16 = vpop.xlane.xlu0 %2100 }
 0x4c8   :  { %v2138_v46 = vsel %vm1269_vm3, %v13854_v45, 0.0  ;;  %v2134_v57 = vmul.f32 1.442695, %v2120_v44 }
 0x4c9   :  { %2139 = vadd.xlane.f32.xlu1 %v2138_v46  ;;  %v1326_v28 = vpop.xlane.xlu1 %1325 }
 0x4ca   :  { %12317 = vrcp.f32 %v1326_v28 }
 0x4cb   :  { %v13859_v42 = vpop.xlane.xlu0 %2106 }
 0x4cd   :  { %v1332_v17 = vpop.xlane.xlu1 %1331 }
 0x4cf   :  { %v1323_v63 = vpop.xlane.xlu0 %1322  ;;  %v12312_v23 = vpop.eup %12311 }
 0x4d0   :  { %12319 = vrcp.f32 %v1323_v63  ;;  %v1350_v60 = vmul.f32 %v12312_v23, %v13749_v50  ;;  %v13863_v35 = vpop.eup %12313 }
 0x4d1   :  { %12321 = vpow2.f32 %v2134_v57  ;;  %v1338_v22 = vpop.xlane.xlu1 %1337  ;;  %v2144_v31 = vsel %vm1269_vm3, %v13863_v35, 0.0  ;;  %v13869_v46 = vpop.eup %12315 }
 0x4d2   :  { %11126 = vmatprep.mubr.msk.f32.mxu1 %vm1269_vm3, %v1350_v60  ;;  %12323 = vrcp.f32 %v1332_v17  ;;  %v2150_v28 = vsel %vm1269_vm3, %v13869_v46, 0.0  ;;  %v2117_v17 = vsub.f32 %v13756_v20, %v2101_v16 }
 0x4d3   :  { %v2113_v8 = vpop.xlane.xlu0 %2112 }
 0x4d7   :  { %v1329_v3 = vpop.xlane.xlu0 %1328  ;;  %v12318_v47 = vpop.eup %12317 }
 0x4d8   :  { %12325 = vrcp.f32 %v1329_v3 }
 0x4d9   :  { %12327 = vrcp.f32 %v1338_v22 }
 0x4da   :  { %2351 = vrot.lane.b32.xlu1 %v13312_v39, %s12842_s15  ;;  %v1352_v39 = vmul.f32 %v12318_v47, %v13759_v19 }
 0x4db   :  { %v1335_v50 = vpop.xlane.xlu0 %1334  ;;  %2145 = vadd.xlane.f32.xlu0 %v2144_v31 }
 0x4dc   :  { %12329 = vrcp.f32 %v1335_v50  ;;  %v2128_v50 = vmul.f32 1.442695, %v2117_v17 }
 0x4dd   :  { %v12320_v44 = vpop.eup %12319 }
 0x4de   :  { %v13873_v57 = vpop.eup %12321  ;;  %v1351_v63 = vmul.f32 %v12320_v44, %v13774_v0 }
 0x4df   :  { %v1341_v23 = vpop.xlane.xlu0 %1340  ;;  %2151 = vadd.xlane.f32.xlu0 %v2150_v28  ;;  %v2156_v60 = vsel %vm1269_vm3, %v13873_v57, 0.0  ;;  %v12324_v0 = vpop.eup %12323 }
 0x4e0   :  { %12331 = vrcp.f32 %v1341_v23  ;;  %11127 = vmatmul.mubr.msk.f32.vlgmr.msra.gmra.mxu1 %vm1269_vm3, %v1351_v63  ;;  %v1354_v22 = vmul.f32 %v12324_v0, %v13770_v29  ;;  %v17098_v63 = vld [vmem:[#allocation42_spill] sm:$0xff]  ;;  %v17099_v23 = vld [vmem:[#allocation52_spill] sm:$0xff] }
 0x4e1   :  { %11167 = vmatpush3.msra.mxu1 %v13633_v11  ;;  %11129 = vmatprep.mubr.msk.f32.mxu1 %vm1269_vm3, %v1352_v39  ;;  %12333 = vpow2.f32 %v2128_v50 }
 0x4e2   :  { %11168 = vmatprep.subr.mxu1 %v13726_v51 }
 0x4e3   :  { %2157 = vadd.xlane.f32.xlu0 %v2156_v60  ;;  %11169 = vmatpush3.msra.mxu1 %v13726_v51  ;;  %v2119_v51 = vsub.f32 %v13763_v43, %v13859_v42  ;;  %v2121_v43 = vsub.f32 %v13780_v56, %v2113_v8 }
 0x4e4   :  { %11170 = vmatprep.subr.mxu1 %v13627_v40 }
 0x4e5   :  { %v12326_v19 = vpop.eup %12325  ;;  %11171 = vmatpush3.msra.mxu1 %v13627_v40  ;;  %v2132_v29 = vmul.f32 1.442695, %v2119_v51 }
 0x4e6   :  { %11172 = vmatprep.subr.mxu1 %v13631_v32  ;;  %v1353_v11 = vmul.f32 %v12326_v19, %v13786_v36  ;;  %v12328_v3 = vpop.eup %12327 }
 0x4e7   :  { %11173 = vmatpush3.msra.mxu1 %v13631_v32  ;;  %v1356_v32 = vmul.f32 %v12328_v3, %v13778_v18  ;;  %12335 = vpow2.f32 %v2132_v29  ;;  %v17100_v3 = vld [vmem:[#allocation57_spill] sm:$0xff] }
 0x4e8   :  { %11174 = vmatprep.subr.mxu1 %v13710_v14  ;;  %11130 = vmatmul.mubr.msk.f32.gmra.mxu1 %vm1269_vm3, %v1353_v11 }
 0x4e9   :  { %v12330_v31 = vpop.eup %12329  ;;  %11175 = vmatpush3.msra.mxu1 %v13710_v14  ;;  %11132 = vmatprep.mubr.msk.f32.mxu1 %vm1269_vm3, %v1354_v22 }
 0x4ea   :  { %v1355_v40 = vmul.f32 %v12330_v31, %v13792_v37  ;;  %11176 = vmatprep.subr.mxu1 %v13712_v59 }
 0x4eb   :  { %11177 = vmatpush3.msra.mxu1 %v13712_v59  ;;  %v2136_v59 = vmul.f32 1.442695, %v2121_v43  ;;  %v17101_v43 = vld [vmem:[#allocation51_spill] sm:$0xff] }
 0x4ec   :  { %11178 = vmatprep.subr.mxu1 %v13616_v13  ;;  %11133 = vmatmul.mubr.msk.f32.gmra.mxu1 %vm1269_vm3, %v1355_v40 }
 0x4ed   :  { %v12332_v20 = vpop.eup %12331  ;;  %11179 = vmatpush3.msra.mxu1 %v13616_v13  ;;  %11135 = vmatprep.mubr.msk.f32.mxu1 %vm1269_vm3, %v1356_v32  ;;  %12337 = vpow2.f32 %v2136_v59 }
 0x4ee   :  { %v1357_v14 = vmul.f32 %v12332_v20, %v13796_v30  ;;  %11180 = vmatprep.subr.mxu1 %v13700_v25  ;;  %v13913_v18 = vpop.eup %12333 }
 0x4ef   :  { %11181 = vmatpush3.msra.mxu1 %v13700_v25  ;;  %v2147_v13 = vsel %vm1269_vm3, %v13913_v18, 0.0 }
 0x4f0   :  { %11222 = vmatprep.subr.mxu1 %v13724_v24  ;;  %11136 = vmatmul.mubr.msk.f32.gmra.mxu1 %vm1269_vm3, %v1357_v14 }
 0x4f4   :  { %v13919_v56 = vpop.eup %12335 }
 0x4f5   :  { %v2153_v25 = vsel %vm1269_vm3, %v13919_v56, 0.0 }
 0x4f9   :  { %2349 = vrot.lane.b32.xlu0 %v13350_v58, %s12842_s15 }
 0x4fa   :  { %v13925_v36 = vpop.eup %12337 }
 0x4fd   :  { %2331 = vrot.lane.b32.xlu0 %v13273_v5, %s12842_s15  ;;  %v2159_v5 = vsel %vm1269_vm3, %v13925_v36, 0.0 }
 0x4fe   :  { %2148 = vadd.xlane.f32.xlu1 %v2147_v13 }
 0x501   :  { %2335 = vrot.lane.b32.xlu0 %v13404_v54, %s12842_s15 }
 0x502   :  { %2154 = vadd.xlane.f32.xlu1 %v2153_v25 }
 0x505   :  { %2339 = vrot.lane.b32.xlu0 %v13444_v15, %s12842_s15 }
 0x506   :  { %2160 = vadd.xlane.f32.xlu1 %v2159_v5 }
 0x509   :  { %2343 = vrot.lane.b32.xlu0 %v13451_v61, %s12842_s15 }
 0x50d   :  { %2608 = vrot.lane.b32.xlu0 %v13437_v10, %s12842_s15 }
 0x50f   :  { %v1717_v58 = vpop.xlane.xlu0 %1716 }
 0x510   :  { %12339 = vrcp.f32 %v1717_v58 }
 0x511   :  { %v1714_v54 = vpop.xlane.xlu1 %1713 }
 0x512   :  { %12341 = vrcp.f32 %v1714_v54 }
 0x513   :  { %v1723_v37 = vpop.xlane.xlu0 %1722 }
 0x514   :  { %12343 = vrcp.f32 %v1723_v37 }
 0x515   :  { %v1720_v30 = vpop.xlane.xlu1 %1719 }
 0x516   :  { %12345 = vrcp.f32 %v1720_v30 }
 0x517   :  { %v1729_v16 = vpop.xlane.xlu0 %1728  ;;  %2347 = vrot.lane.b32.xlu1 %v13333_v53, %s12842_s15 }
 0x518   :  { %12347 = vrcp.f32 %v1729_v16 }
 0x519   :  { %v1726_v15 = vpop.xlane.xlu1 %1725 }
 0x51a   :  { %12349 = vrcp.f32 %v1726_v15 }
 0x51b   :  { %2333 = vrot.lane.b32.xlu1 %v13386_v9, %s12842_s15 }
 0x51d   :  { %v1735_v61 = vpop.xlane.xlu1 %1734  ;;  %v12340_v10 = vpop.eup %12339 }
 0x51e   :  { %v1745_v47 = vmul.f32 %v12340_v10, %v13808_v52  ;;  %12351 = vrcp.f32 %v1735_v61  ;;  %v17102_v10 = vld [vmem:[#allocation56_spill] sm:$0xff] }
 0x51f   :  { %v12342_v42 = vpop.eup %12341  ;;  %2337 = vrot.lane.b32.xlu1 %v13422_v12, %s12842_s15 }
 0x520   :  { %v1744_v8 = vmul.f32 %v12342_v42, %v13812_v55 }
 0x521   :  { %v1732_v44 = vpop.xlane.xlu1 %1731  ;;  %v12344_v28 = vpop.eup %12343 }
 0x522   :  { %12353 = vrcp.f32 %v1732_v44  ;;  %11182 = vmatprep.mubr.msk.f32.mxu1 %vm1269_vm3, %v1744_v8  ;;  %v1747_v52 = vmul.f32 %v12344_v28, %v13816_v34  ;;  %v17094_v34 = vld [vmem:[#allocation59_spill] sm:$0xff] }
 0x523   :  { %v12346_v53 = vpop.eup %12345  ;;  %2341 = vrot.lane.b32.xlu1 %v13429_v38, %s12842_s15  ;;  %11183 = vmatmul.mubr.msk.f32.vlgmr.msra.gmra.mxu1 %vm1269_vm3, %v1745_v47  ;;  %v17103_v8 = vld [vmem:[#allocation47_spill] sm:$0xff]  ;;  %v17104_v47 = vld [vmem:[#allocation49_spill] sm:$0xff] }
 0x524   :  { %11223 = vmatpush3.msra.mxu1 %v13724_v24  ;;  %v1746_v9 = vmul.f32 %v12346_v53, %v13820_v41  ;;  %v17095_v41 = vld [vmem:[#allocation40_spill] sm:$0xff] }
 0x525   :  { %11224 = vmatprep.subr.mxu1 %v13728_v27  ;;  %v12348_v12 = vpop.eup %12347 }
 0x526   :  { %11225 = vmatpush3.msra.mxu1 %v13728_v27  ;;  %11185 = vmatprep.mubr.msk.f32.mxu1 %vm1269_vm3, %v1746_v9  ;;  %v1749_v24 = vmul.f32 %v12348_v12, %v13824_v26  ;;  %v17093_v27 = vld [vmem:[#allocation54_spill] sm:$0xff]  ;;  %v17096_v26 = vld [vmem:[#allocation53_spill] sm:$0xff]  ;;  %v17105_v9 = vld [vmem:[#allocation43_spill] sm:$0xff] }
 0x527   :  { %v12350_v55 = vpop.eup %12349  ;;  %11226 = vmatprep.subr.mxu1 %v13629_v62  ;;  %2345 = vrot.lane.b32.xlu1 %v13487_v21, %s12842_s15  ;;  %v17106_v12 = vld [vmem:[#allocation45_spill] sm:$0xff] }
 0x528   :  { %11186 = vmatmul.mubr.msk.f32.gmra.mxu1 %vm1269_vm3, %v1747_v52  ;;  %v1748_v38 = vmul.f32 %v12350_v55, %v13828_v49 }
 0x529   :  { %11227 = vmatpush3.msra.mxu1 %v13629_v62 }
 0x52a   :  { %11228 = vmatprep.subr.mxu1 %v13722_v7  ;;  %11188 = vmatprep.mubr.msk.f32.mxu1 %vm1269_vm3, %v1748_v38  ;;  %v17107_v38 = vld [vmem:[#allocation41_spill] sm:$0xff] }
 0x52b   :  { %11229 = vmatpush3.msra.mxu1 %v13722_v7  ;;  %2610 = vrot.lane.b32.xlu1 %v13431_v48, %s12842_s15  ;;  %v12352_v21 = vpop.eup %12351  ;;  %v17097_v48 = vld [vmem:[#allocation58_spill] sm:$0xff] }
 0x52c   :  { %11230 = vmatprep.subr.mxu1 %v17093_v27  ;;  %11189 = vmatmul.mubr.msk.f32.gmra.mxu1 %vm1269_vm3, %v1749_v24  ;;  %v1751_v49 = vmul.f32 %v12352_v21, %v13832_v1 }
 0x52d   :  { %11231 = vmatpush3.msra.mxu1 %v17093_v27  ;;  %v17108_v27 = vld [vmem:[#allocation39_spill] sm:$0xff] }
 0x52e   :  { %11232 = vmatprep.subr.mxu1 %v17094_v34 }
 0x52f   :  { %v12354_v62 = vpop.eup %12353  ;;  %11233 = vmatpush3.msra.mxu1 %v17094_v34  ;;  %2606 = vrot.lane.b32.xlu1 %v17095_v41, %s12842_s15  ;;  %v2143_v39 = vpop.xlane.xlu0 %2142 }
 0x530   :  { %11234 = vmatprep.subr.mxu1 %v17096_v26  ;;  %v1750_v7 = vmul.f32 %v12354_v62, %v13837_v33  ;;  %12355 = vrcp.f32 %v2143_v39 }
 0x531   :  { %11235 = vmatpush3.msra.mxu1 %v17096_v26 }
 0x532   :  { %11236 = vmatprep.subr.mxu1 %v17097_v48  ;;  %11191 = vmatprep.mubr.msk.f32.mxu1 %vm1269_vm3, %v1750_v7 }
 0x533   :  { %11237 = vmatpush3.msra.mxu1 %v17097_v48  ;;  %2604 = vrot.lane.b32.xlu1 %v17098_v63, %s12842_s15  ;;  %v2354_v17 = vpop.permute.xlu0 %2353 }
 0x534   :  { %11250 = vmatprep.subr.msk.mxu1 %vm1107_vm2, %v17099_v23  ;;  %11192 = vmatmul.mubr.msk.f32.gmra.mxu1 %vm1269_vm3, %v1751_v49 }
 0x53d   :  { %v12356_v60 = vpop.eup %12355 }
 0x53e   :  { %v2171_v1 = vmul.f32 %v12356_v60, %v13841_v2 }
 0x552   :  { %v2140_v33 = vpop.xlane.xlu1 %2139 }
 0x553   :  { %12357 = vrcp.f32 %v2140_v33 }
 0x556   :  { %v2352_v50 = vpop.permute.xlu1 %2351 }
 0x560   :  { %v12358_v0 = vpop.eup %12357 }
 0x561   :  { %v2170_v19 = vmul.f32 %v12358_v0, %v13854_v45 }
 0x563   :  { %11238 = vmatprep.mubr.msk.f32.mxu1 %vm1269_vm3, %v2170_v19 }
 0x564   :  { %v2146_v11 = vpop.xlane.xlu0 %2145  ;;  %11239 = vmatmul.mubr.msk.f32.vlgmr.msra.gmra.mxu1 %vm1269_vm3, %v2171_v1 }
 0x565   :  { %12359 = vrcp.f32 %v2146_v11  ;;  %11251 = vmatpush3.xpose.msk.msra.mxu1 %vm1107_vm2, %v17099_v23 }
 0x566   :  { %11252 = vmatprep.subr.msk.mxu1 %vm1107_vm2, %v17100_v3 }
 0x568   :  { %v2152_v45 = vpop.xlane.xlu0 %2151 }
 0x569   :  { %11253 = vmatpush3.xpose.msk.msra.mxu1 %vm1107_vm2, %v17100_v3  ;;  %12361 = vrcp.f32 %v2152_v45 }
 0x56a   :  { %11254 = vmatprep.subr.msk.mxu1 %vm1107_vm2, %v13851_v6 }
 0x56c   :  { %v2158_v22 = vpop.xlane.xlu0 %2157 }
 0x56d   :  { %11255 = vmatpush3.xpose.msk.msra.mxu1 %vm1107_vm2, %v13851_v6 }
 0x56e   :  { %11256 = vmatprep.subr.msk.mxu1 %vm1107_vm2, %v13845_v4 }
 0x570   :  { %v2350_v6 = vpop.permute.xlu0 %2349 }
 0x571   :  { %11257 = vmatpush3.xpose.msk.msra.mxu1 %vm1107_vm2, %v13845_v4 }
 0x572   :  { %v12360_v2 = vpop.eup %12359  ;;  %11258 = vmatprep.subr.msk.mxu1 %vm1107_vm2, %v2354_v17 }
 0x573   :  { %v2172_v31 = vmul.f32 %v12360_v2, %v13863_v35 }
 0x574   :  { %v2332_v40 = vpop.permute.xlu0 %2331 }
 0x575   :  { %11259 = vmatpush3.xpose.msk.msra.mxu1 %vm1107_vm2, %v2354_v17  ;;  %11241 = vmatprep.mubr.msk.f32.mxu1 %vm1269_vm3, %v2172_v31 }
 0x576   :  { %11260 = vmatprep.subr.msk.mxu1 %vm1107_vm2, %v2352_v50  ;;  %v12362_v20 = vpop.eup %12361 }
 0x577   :  { %v2174_v13 = vmul.f32 %v12362_v20, %v13869_v46 }
 0x578   :  { %v2336_v5 = vpop.permute.xlu0 %2335 }
 0x579   :  { %11261 = vmatpush3.xpose.msk.msra.mxu1 %vm1107_vm2, %v2352_v50 }
 0x57a   :  { %11262 = vmatprep.subr.msk.mxu1 %vm1107_vm2, %v2350_v6 }
 0x57d   :  { %11263 = vmatpush3.xpose.msk.msra.mxu1 %vm1107_vm2, %v2350_v6 }
 0x587   :  { %v2149_v4 = vpop.xlane.xlu1 %2148 }
 0x588   :  { %12363 = vrcp.f32 %v2149_v4 }
 0x589   :  { %12365 = vrcp.f32 %v2158_v22 }
 0x58b   :  { %v2155_v51 = vpop.xlane.xlu1 %2154 }
 0x58c   :  { %12367 = vrcp.f32 %v2155_v51 }
 0x58f   :  { %v2161_v35 = vpop.xlane.xlu1 %2160 }
 0x590   :  { %12369 = vrcp.f32 %v2161_v35 }
 0x593   :  { %v2348_v32 = vpop.permute.xlu1 %2347 }
 0x594   :  { %11264 = vmatprep.subr.msk.mxu1 %vm1107_vm2, %v2348_v32 }
 0x595   :  { %v12364_v29 = vpop.eup %12363  ;;  %11265 = vmatpush3.xpose.msk.msra.mxu1 %vm1107_vm2, %v2348_v32 }
 0x596   :  { %11334 = vmatprep.subr.mxu1 %v17101_v43  ;;  %v2173_v14 = vmul.f32 %v12364_v29, %v13913_v18  ;;  %v12366_v25 = vpop.eup %12365  ;;  %v2340_v18 = vpop.permute.xlu0 %2339 }
 0x597   :  { %v2334_v59 = vpop.permute.xlu1 %2333  ;;  %v2176_v30 = vmul.f32 %v12366_v25, %v13873_v57 }
 0x598   :  { %11242 = vmatmul.mubr.msk.f32.gmra.mxu1 %vm1269_vm3, %v2173_v14 }
 0x599   :  { %v12368_v58 = vpop.eup %12367  ;;  %11244 = vmatprep.mubr.msk.f32.mxu1 %vm1269_vm3, %v2174_v13 }
 0x59a   :  { %v2175_v54 = vmul.f32 %v12368_v58, %v13919_v56  ;;  %v12787_v56 = vld [vmem:[%s16964_s3 + $0x4] ss:$0 sm:$0xff]  ;;  %v2344_v42 = vpop.permute.xlu0 %2343 }
 0x59b   :  { %v2338_v37 = vpop.permute.xlu1 %2337  ;;  %v14028_v57 = vadd.f32 %v12787_v56, %v17102_v10  ;;  %v14038_v44 = vadd.f32 %v12787_v56, %v17104_v47  ;;  %v14047_v52 = vadd.f32 %v12787_v56, %v17106_v12  ;;  %v14054_v24 = vadd.f32 %v12787_v56, %v17107_v38 }
 0x59c   :  { %11245 = vmatmul.mubr.msk.f32.gmra.mxu1 %vm1269_vm3, %v2175_v54 }
 0x59d   :  { %v12370_v16 = vpop.eup %12369  ;;  %11247 = vmatprep.mubr.msk.f32.mxu1 %vm1269_vm3, %v2176_v30 }
 0x59e   :  { %v2177_v46 = vmul.f32 %v12370_v16, %v13925_v36  ;;  %v2609_v28 = vpop.permute.xlu0 %2608 }
 0x59f   :  { %v2342_v15 = vpop.permute.xlu1 %2341 }
 0x5a0   :  { %11248 = vmatmul.mubr.msk.f32.gmra.mxu1 %vm1269_vm3, %v2177_v46  ;;  %v14061_v21 = vpop.f32.mrf.mxu1 }
 0x5a1   :  { %11266 = vmatprep.mubr.msk.f32.mxu1 %vm1107_vm2, %v2332_v40  ;;  %17109 = vst [vmem:[#allocation54_spill] sm:$0xff] %v14061_v21 }
 0x5a2   :  { %v14063_v34 = vpop.f32.mrf.mxu1 }
 0x5a3   :  { %v2346_v61 = vpop.permute.xlu1 %2345  ;;  %17110 = vst [vmem:[#allocation59_spill] sm:$0xff] %v14063_v34 }
 0x5a4   :  { %11267 = vmatmul.mubr.msk.f32.vlgmr.msra.gmra.mxu1 %vm1107_vm2, %v2334_v59 }
 0x5a5   :  { %11335 = vmatpush3.msra.mxu1 %v17101_v43  ;;  %11269 = vmatprep.mubr.msk.f32.mxu1 %vm1107_vm2, %v2336_v5 }
 0x5a6   :  { %11336 = vmatprep.subr.mxu1 %v14028_v57 }
 0x5a7   :  { %11337 = vmatpush3.msra.mxu1 %v14028_v57  ;;  %v2611_v36 = vpop.permute.xlu1 %2610 }
 0x5a8   :  { %11338 = vmatprep.subr.mxu1 %v17103_v8  ;;  %11270 = vmatmul.mubr.msk.f32.gmra.mxu1 %vm1107_vm2, %v2338_v37  ;;  %v14065_v62 = vpop.f32.mrf.mxu1 }
 0x5a9   :  { %11278 = vmatprep.subr.mxu0 %v2611_v36  ;;  %11339 = vmatpush3.msra.mxu1 %v17103_v8  ;;  %17111 = vst [vmem:[#allocation40_spill] sm:$0xff] %v14065_v62 }
 0x5aa   :  { %11272 = vmatprep.mubr.msk.f32.mxu1 %vm1107_vm2, %v2340_v18  ;;  %11279 = vmatpush3.msra.mxu0 %v2611_v36  ;;  %v14067_v41 = vpop.f32.mrf.mxu1  ;;  %v17127_v36 = vld [vmem:[#allocation44_spill] sm:$0xff] }
 0x5ab   :  { %11340 = vmatprep.subr.mxu1 %v14038_v44  ;;  %11280 = vmatprep.subr.mxu0 %v2609_v28  ;;  %v2607_v53 = vpop.permute.xlu1 %2606  ;;  %17112 = vst [vmem:[#allocation53_spill] sm:$0xff] %v14067_v41 }
 0x5ac   :  { %11341 = vmatpush3.msra.mxu1 %v14038_v44  ;;  %11281 = vmatpush3.msra.mxu0 %v2609_v28  ;;  %v14069_v26 = vpop.f32.mrf.mxu1 }
 0x5ad   :  { %11342 = vmatprep.subr.mxu1 %v17105_v9  ;;  %11273 = vmatmul.mubr.msk.f32.gmra.mxu1 %vm1107_vm2, %v2342_v15  ;;  %17113 = vst [vmem:[#allocation58_spill] sm:$0xff] %v14069_v26 }
 0x5ae   :  { %11282 = vmatprep.subr.mxu0 %v2607_v53  ;;  %11343 = vmatpush3.msra.mxu1 %v17105_v9  ;;  %v14071_v7 = vpop.f32.mrf.mxu1 }
 0x5af   :  { %11275 = vmatprep.mubr.msk.f32.mxu1 %vm1107_vm2, %v2344_v42  ;;  %11283 = vmatpush3.msra.mxu0 %v2607_v53  ;;  %v2605_v55 = vpop.permute.xlu1 %2604  ;;  %17114 = vst [vmem:[#allocation42_spill] sm:$0xff] %v14071_v7  ;;  %v17126_v42 = vld [vmem:[#allocation46_spill] sm:$0xff] }
 0x5b0   :  { %11344 = vmatprep.subr.mxu1 %v14047_v52  ;;  %11284 = vmatprep.subr.mxu0 %v2605_v55  ;;  %v14073_v48 = vpop.f32.mrf.mxu1 }
 0x5b1   :  { %11345 = vmatpush3.msra.mxu1 %v14047_v52  ;;  %11285 = vmatpush3.msra.mxu0 %v2605_v55  ;;  %17115 = vst [vmem:[#allocation52_spill] sm:$0xff] %v14073_v48 }
 0x5b2   :  { %11346 = vmatprep.subr.mxu1 %v17108_v27  ;;  %11276 = vmatmul.mubr.msk.f32.gmra.mxu1 %vm1107_vm2, %v2346_v61  ;;  %v14075_v49 = vpop.f32.mrf.mxu1 }
 0x5b3   :  { %11347 = vmatpush3.msra.mxu1 %v17108_v27  ;;  %17116 = vst [vmem:[#allocation57_spill] sm:$0xff] %v14075_v49 }
 0x5b4   :  { %11348 = vmatprep.subr.mxu1 %v14054_v24 }
 0x5b5   :  { %11349 = vmatpush3.msra.mxu1 %v14054_v24 }
 0x5e3   :  { %v14077_v63 = vpop.f32.mrf.mxu1 }
 0x5e4   :  { %17117 = vst [vmem:[#allocation51_spill] sm:$0xff] %v14077_v63 }
 0x5e5   :  { %v14079_v23 = vpop.f32.mrf.mxu1 }
 0x5e8   :  { %v14081_v39 = vpop.f32.mrf.mxu1 }
 0x5e9   :  { %17118 = vst [vmem:[#allocation56_spill] sm:$0xff] %v14081_v39 }
 0x5ea   :  { %v14083_v33 = vpop.f32.mrf.mxu1 }
 0x5ec   :  { %v14085_v60 = vpop.f32.mrf.mxu1 }
 0x5ed   :  { %17119 = vst [vmem:[#allocation47_spill] sm:$0xff] %v14085_v60 }
 0x5ee   :  { %v14087_v0 = vpop.f32.mrf.mxu1 }
 0x5f4   :  { %v14089_v17 = vpop.f32.mrf.mxu1 }
 0x5f5   :  { %17120 = vst [vmem:[#allocation49_spill] sm:$0xff] %v14089_v17 }
 0x5f6   :  { %v14091_v19 = vpop.f32.mrf.mxu1 }
 0x624   :  { %v14093_v1 = vpop.f32.mrf.mxu1 }
 0x625   :  { %17121 = vst [vmem:[#allocation43_spill] sm:$0xff] %v14093_v1 }
 0x626   :  { %v14095_v11 = vpop.f32.mrf.mxu1 }
 0x658   :  { %v14097_v3 = vpop.f32.mrf.mxu1 }
 0x659   :  { %17122 = vst [vmem:[#allocation45_spill] sm:$0xff] %v14097_v3 }
 0x65a   :  { %v14099_v45 = vpop.f32.mrf.mxu1 }
 0x65c   :  { %v14101_v2 = vpop.f32.mrf.mxu1 }
 0x65d   :  { %17123 = vst [vmem:[#allocation41_spill] sm:$0xff] %v14101_v2 }
 0x65e   :  { %v14103_v22 = vpop.f32.mrf.mxu1 }
 0x660   :  { %v14105_v31 = vpop.f32.mrf.mxu1 }
 0x661   :  { %17124 = vst [vmem:[#allocation39_spill] sm:$0xff] %v14105_v31 }
 0x662   :  { %v14107_v50 = vpop.f32.mrf.mxu1 }
 0x663   :  { %17125 = vst [vmem:[#allocation60_spill] sm:$0xff] %v14107_v50 }
 0x664   :  { %v11268_v6 = vpop.f32.mrf.mxu1 }
 0x665   :  { %v2501_v4 = vmul.f32 0.35355338, %v11268_v6 }
 0x666   :  { %v2461_v51 = vpop.f32.mrf.mxu1 }
 0x667   :  { %v2500_v35 = vmul.f32 0.35355338, %v2461_v51  ;;  %v2511_v40 = vsel %vm1269_vm3, %v2501_v4, -inf }
 0x668   :  { %2512 = vmax.xlane.f32.xlu1 %v2511_v40  ;;  %v11271_v32 = vpop.f32.mrf.mxu1 }
 0x669   :  { %v2503_v20 = vmul.f32 0.35355338, %v11271_v32  ;;  %v2508_v29 = vsel %vm1269_vm3, %v2500_v35, -inf }
 0x66a   :  { %2509 = vmax.xlane.f32.xlu0 %v2508_v29  ;;  %v2471_v14 = vpop.f32.mrf.mxu1 }
 0x66b   :  { %v2502_v59 = vmul.f32 0.35355338, %v2471_v14  ;;  %v2517_v25 = vsel %vm1269_vm3, %v2503_v20, -inf }
 0x66d   :  { %v11274_v13 = vpop.f32.mrf.mxu1  ;;  %v2514_v37 = vsel %vm1269_vm3, %v2502_v59, -inf }
 0x66e   :  { %2518 = vmax.xlane.f32.xlu0 %v2517_v25  ;;  %v2505_v54 = vmul.f32 0.35355338, %v11274_v13 }
 0x66f   :  { %v2481_v5 = vpop.f32.mrf.mxu1 }
 0x670   :  { %v2504_v58 = vmul.f32 0.35355338, %v2481_v5  ;;  %v2523_v61 = vsel %vm1269_vm3, %v2505_v54, -inf }
 0x672   :  { %v11277_v30 = vpop.f32.mrf.mxu1  ;;  %2515 = vmax.xlane.f32.xlu0 %v2514_v37  ;;  %v2520_v16 = vsel %vm1269_vm3, %v2504_v58, -inf }
 0x673   :  { %2521 = vmax.xlane.f32.xlu1 %v2520_v16  ;;  %v2507_v46 = vmul.f32 0.35355338, %v11277_v30  ;;  %v17128_v30 = vld [vmem:[#allocation50_spill] sm:$0xff]  ;;  %v17129_v16 = vld [vmem:[#allocation48_spill] sm:$0xff] }
 0x674   :  { %v2491_v18 = vpop.f32.mrf.mxu1 }
 0x675   :  { %v2506_v15 = vmul.f32 0.35355338, %v2491_v18  ;;  %v2529_v10 = vsel %vm1269_vm3, %v2507_v46, -inf }
 0x676   :  { %2524 = vmax.xlane.f32.xlu0 %v2523_v61 }
 0x677   :  { %v2526_v56 = vsel %vm1269_vm3, %v2506_v15, -inf }
 0x678   :  { %2527 = vmax.xlane.f32.xlu1 %v2526_v56 }
 0x67a   :  { %2530 = vmax.xlane.f32.xlu0 %v2529_v10 }
 0x689   :  { %2600 = vrot.lane.b32.xlu1 %v17126_v42, %s12842_s15 }
 0x690   :  { %2602 = vrot.lane.b32.xlu0 %v17127_v36, %s12842_s15 }
 0x6f1   :  { %v2513_v47 = vpop.xlane.xlu1 %2512 }
 0x6f2   :  { %v2533_v28 = vsub.f32 %v2501_v4, %v2513_v47 }
 0x6f3   :  { %v2510_v53 = vpop.xlane.xlu0 %2509 }
 0x6f4   :  { %v2542_v12 = vmul.f32 1.442695, %v2533_v28  ;;  %v2532_v55 = vsub.f32 %v2500_v35, %v2510_v53 }
 0x6f6   :  { %12371 = vpow2.f32 %v2542_v12  ;;  %v2540_v38 = vmul.f32 1.442695, %v2532_v55 }
 0x6f7   :  { %v2519_v6 = vpop.xlane.xlu0 %2518 }
 0x6f8   :  { %12373 = vpow2.f32 %v2540_v38  ;;  %v2535_v61 = vsub.f32 %v2503_v20, %v2519_v6 }
 0x6fa   :  { %v2546_v42 = vmul.f32 1.442695, %v2535_v61 }
 0x6fb   :  { %v2516_v51 = vpop.xlane.xlu0 %2515 }
 0x6fc   :  { %v2522_v40 = vpop.xlane.xlu1 %2521  ;;  %v2534_v18 = vsub.f32 %v2502_v59, %v2516_v51 }
 0x6fd   :  { %v2536_v10 = vsub.f32 %v2504_v58, %v2522_v40 }
 0x6fe   :  { %v2544_v56 = vmul.f32 1.442695, %v2534_v18 }
 0x6ff   :  { %v2525_v32 = vpop.xlane.xlu0 %2524  ;;  %v2548_v47 = vmul.f32 1.442695, %v2536_v10 }
 0x700   :  { %v2537_v36 = vsub.f32 %v2505_v54, %v2525_v32  ;;  %12375 = vpow2.f32 %v2544_v56 }
 0x701   :  { %v2528_v14 = vpop.xlane.xlu1 %2527  ;;  %12377 = vpow2.f32 %v2546_v42 }
 0x702   :  { %v2538_v28 = vsub.f32 %v2506_v15, %v2528_v14  ;;  %v2550_v53 = vmul.f32 1.442695, %v2537_v36  ;;  %12379 = vpow2.f32 %v2548_v47 }
 0x703   :  { %v14121_v29 = vpop.eup %12371  ;;  %v2531_v13 = vpop.xlane.xlu0 %2530 }
 0x704   :  { %v2559_v25 = vsel %vm1269_vm3, %v14121_v29, 0.0  ;;  %v2539_v12 = vsub.f32 %v2507_v46, %v2531_v13  ;;  %v2552_v55 = vmul.f32 1.442695, %v2538_v28  ;;  %12381 = vpow2.f32 %v2550_v53  ;;  %v17130_v13 = vld [vmem:[#allocation37_spill] sm:$0xff] }
 0x705   :  { %v14125_v5 = vpop.eup %12373  ;;  %2560 = vadd.xlane.f32.xlu0 %v2559_v25  ;;  %v2601_v37 = vpop.permute.xlu1 %2600 }
 0x706   :  { %v2556_v4 = vsel %vm1269_vm3, %v14125_v5, 0.0  ;;  %v2554_v38 = vmul.f32 1.442695, %v2539_v12  ;;  %12383 = vpow2.f32 %v2552_v55  ;;  %v17136_v55 = vld [vmem:[#allocation25_spill] sm:$0xff] }
 0x707   :  { %v2603_v35 = vpop.permute.xlu0 %2602  ;;  %2557 = vadd.xlane.f32.xlu1 %v2556_v4  ;;  %v12788_v4 = vld [vmem:[%s16964_s3 + $0x3] ss:$0 sm:$0xff] }
 0x708   :  { %11286 = vmatprep.subr.mxu0 %v2603_v35  ;;  %12385 = vpow2.f32 %v2554_v38  ;;  %v17137_v38 = vld [vmem:[#allocation27_spill] sm:$0xff] }
 0x709   :  { %11287 = vmatpush3.msra.mxu0 %v2603_v35  ;;  %v17131_v35 = vld [vmem:[#allocation55_spill] sm:$0xff] }
 0x70a   :  { %11288 = vmatprep.subr.mxu0 %v2601_v37 }
 0x70b   :  { %11289 = vmatpush3.msra.mxu0 %v2601_v37  ;;  %v14163_v37 = vadd.f32 %v12788_v4, %v17131_v35 }
 0x70d   :  { %v14133_v25 = vpop.eup %12375 }
 0x70e   :  { %v14135_v59 = vpop.eup %12377  ;;  %v2562_v20 = vsel %vm1269_vm3, %v14133_v25, 0.0 }
 0x70f   :  { %v14139_v58 = vpop.eup %12379  ;;  %v2565_v54 = vsel %vm1269_vm3, %v14135_v59, 0.0 }
 0x710   :  { %v2568_v15 = vsel %vm1269_vm3, %v14139_v58, 0.0 }
 0x711   :  { %v14143_v46 = vpop.eup %12381 }
 0x712   :  { %v2571_v51 = vsel %vm1269_vm3, %v14143_v46, 0.0 }
 0x713   :  { %v14147_v6 = vpop.eup %12383 }
 0x714   :  { %v2574_v32 = vsel %vm1269_vm3, %v14147_v6, 0.0 }
 0x715   :  { %v14151_v40 = vpop.eup %12385 }
 0x716   :  { %v2577_v14 = vsel %vm1269_vm3, %v14151_v40, 0.0 }
 0x718   :  { %2596 = vrot.lane.b32.xlu1 %v17128_v30, %s12842_s15  ;;  %v17132_v30 = vld [vmem:[#allocation33_spill] sm:$0xff] }
 0x71b   :  { %2598 = vrot.lane.b32.xlu0 %v17129_v16, %s12842_s15  ;;  %v17133_v16 = vld [vmem:[#allocation35_spill] sm:$0xff] }
 0x71c   :  { %v14170_v18 = vadd.f32 %v12788_v4, %v17133_v16 }
 0x73a   :  { %2563 = vadd.xlane.f32.xlu0 %v2562_v20  ;;  %v14208_v20 = vadd.f32 %v12788_v4, %v17137_v38  ;;  %v12789_v38 = vld [vmem:[%s16964_s3 + $0x2] ss:$0 sm:$0xff] }
 0x73c   :  { %2566 = vadd.xlane.f32.xlu1 %v2565_v54 }
 0x73e   :  { %2569 = vadd.xlane.f32.xlu0 %v2568_v15 }
 0x740   :  { %2572 = vadd.xlane.f32.xlu1 %v2571_v51 }
 0x742   :  { %2575 = vadd.xlane.f32.xlu0 %v2574_v32 }
 0x744   :  { %2578 = vadd.xlane.f32.xlu1 %v2577_v14 }
 0x755   :  { %3278 = vrot.lane.b32.xlu1 %v17130_v13, %s12840_s11 }
 0x758   :  { %3276 = vrot.lane.b32.xlu0 %v14163_v37, %s12840_s11 }
 0x759   :  { %3274 = vrot.lane.b32.xlu1 %v17132_v30, %s12840_s11 }
 0x75d   :  { %3272 = vrot.lane.b32.xlu1 %v14170_v18, %s12840_s11 }
 0x78e   :  { %v2561_v61 = vpop.xlane.xlu0 %2560 }
 0x78f   :  { %12387 = vrcp.f32 %v2561_v61 }
 0x790   :  { %v2558_v56 = vpop.xlane.xlu1 %2557 }
 0x791   :  { %12389 = vrcp.f32 %v2558_v56 }
 0x792   :  { %v2599_v10 = vpop.permute.xlu0 %2598 }
 0x793   :  { %11290 = vmatprep.subr.mxu0 %v2599_v10 }
 0x794   :  { %11291 = vmatpush3.msra.mxu0 %v2599_v10  ;;  %v2597_v42 = vpop.permute.xlu1 %2596 }
 0x795   :  { %11292 = vmatprep.subr.mxu0 %v2597_v42 }
 0x796   :  { %11293 = vmatpush3.msra.mxu0 %v2597_v42 }
 0x797   :  { %11306 = vmatprep.subr.msk.mxu0 %vm1107_vm2, %v17130_v13 }
 0x79c   :  { %v12388_v36 = vpop.eup %12387 }
 0x79d   :  { %v2589_v53 = vmul.f32 %v12388_v36, %v14121_v29  ;;  %v17134_v29 = vld [vmem:[#allocation29_spill] sm:$0xff] }
 0x79e   :  { %v12390_v47 = vpop.eup %12389 }
 0x79f   :  { %v2588_v28 = vmul.f32 %v12390_v47, %v14125_v5  ;;  %v17135_v5 = vld [vmem:[#allocation31_spill] sm:$0xff] }
 0x7a0   :  { %v14197_v12 = vadd.f32 %v12788_v4, %v17135_v5 }
 0x7a1   :  { %11294 = vmatprep.mubr.msk.f32.mxu0 %vm1269_vm3, %v2588_v28 }
 0x7a2   :  { %11295 = vmatmul.mubr.msk.f32.vlgmr.msra.gmra.mxu0 %vm1269_vm3, %v2589_v53 }
 0x7a3   :  { %11307 = vmatpush3.xpose.msk.msra.mxu0 %vm1107_vm2, %v17130_v13 }
 0x7a4   :  { %11308 = vmatprep.subr.msk.mxu0 %vm1107_vm2, %v14163_v37 }
 0x7a7   :  { %11309 = vmatpush3.xpose.msk.msra.mxu0 %vm1107_vm2, %v14163_v37 }
 0x7a8   :  { %11310 = vmatprep.subr.msk.mxu0 %vm1107_vm2, %v17132_v30 }
 0x7ab   :  { %11311 = vmatpush3.xpose.msk.msra.mxu0 %vm1107_vm2, %v17132_v30 }
 0x7ac   :  { %11312 = vmatprep.subr.msk.mxu0 %vm1107_vm2, %v14170_v18 }
 0x7af   :  { %11313 = vmatpush3.xpose.msk.msra.mxu0 %vm1107_vm2, %v14170_v18 }
 0x7b0   :  { %11314 = vmatprep.subr.msk.mxu0 %vm1107_vm2, %v17134_v29 }
 0x7b3   :  { %11315 = vmatpush3.xpose.msk.msra.mxu0 %vm1107_vm2, %v17134_v29 }
 0x7b4   :  { %11316 = vmatprep.subr.msk.mxu0 %vm1107_vm2, %v14197_v12 }
 0x7b7   :  { %11317 = vmatpush3.xpose.msk.msra.mxu0 %vm1107_vm2, %v14197_v12 }
 0x7b8   :  { %11318 = vmatprep.subr.msk.mxu0 %vm1107_vm2, %v17136_v55 }
 0x7bb   :  { %11319 = vmatpush3.xpose.msk.msra.mxu0 %vm1107_vm2, %v17136_v55 }
 0x7bc   :  { %11320 = vmatprep.subr.msk.mxu0 %vm1107_vm2, %v14208_v20 }
 0x7bf   :  { %11321 = vmatpush3.xpose.msk.msra.mxu0 %vm1107_vm2, %v14208_v20 }
 0x7c3   :  { %v2564_v54 = vpop.xlane.xlu0 %2563 }
 0x7c4   :  { %12391 = vrcp.f32 %v2564_v54 }
 0x7c5   :  { %v2567_v15 = vpop.xlane.xlu1 %2566 }
 0x7c6   :  { %12393 = vrcp.f32 %v2567_v15 }
 0x7c7   :  { %v2570_v51 = vpop.xlane.xlu0 %2569 }
 0x7c8   :  { %12395 = vrcp.f32 %v2570_v51 }
 0x7c9   :  { %v2573_v32 = vpop.xlane.xlu1 %2572 }
 0x7ca   :  { %12397 = vrcp.f32 %v2573_v32  ;;  %v17142_v32 = vld [vmem:[#allocation28_spill] sm:$0xff] }
 0x7cb   :  { %v2576_v14 = vpop.xlane.xlu0 %2575 }
 0x7cc   :  { %12399 = vrcp.f32 %v2576_v14  ;;  %v17143_v14 = vld [vmem:[#allocation38_spill] sm:$0xff] }
 0x7cd   :  { %v2579_v4 = vpop.xlane.xlu1 %2578 }
 0x7ce   :  { %12401 = vrcp.f32 %v2579_v4  ;;  %v14255_v4 = vadd.f32 %v12789_v38, %v17143_v14 }
 0x7d1   :  { %v12392_v35 = vpop.eup %12391  ;;  %v14216_v16 = vpop.permute.xlu1 %3278 }
 0x7d2   :  { %11362 = vmatprep.subr.msk.mxu1 %vm1107_vm2, %v14216_v16  ;;  %v2590_v61 = vmul.f32 %v12392_v35, %v14133_v25  ;;  %v17144_v35 = vld [vmem:[#allocation32_spill] sm:$0xff] }
 0x7d3   :  { %v12394_v56 = vpop.eup %12393 }
 0x7d4   :  { %11297 = vmatprep.mubr.msk.f32.mxu0 %vm1269_vm3, %v2590_v61  ;;  %v2591_v10 = vmul.f32 %v12394_v56, %v14135_v59  ;;  %v17145_v61 = vld [vmem:[#allocation36_spill] sm:$0xff] }
 0x7d5   :  { %v12396_v42 = vpop.eup %12395  ;;  %v14301_v2 = vpop.permute.xlu1 %3274 }
 0x7d6   :  { %11298 = vmatmul.mubr.msk.f32.gmra.mxu0 %vm1269_vm3, %v2591_v10  ;;  %v2592_v36 = vmul.f32 %v12396_v42, %v14139_v58  ;;  %v17138_v58 = vld [vmem:[#allocation26_spill] sm:$0xff] }
 0x7d7   :  { %v12398_v47 = vpop.eup %12397  ;;  %v14235_v54 = vadd.f32 %v12789_v38, %v17138_v58 }
 0x7d8   :  { %11300 = vmatprep.mubr.msk.f32.mxu0 %vm1269_vm3, %v2592_v36  ;;  %v2593_v28 = vmul.f32 %v12398_v47, %v14143_v46  ;;  %v17139_v46 = vld [vmem:[#allocation30_spill] sm:$0xff] }
 0x7d9   :  { %v12400_v53 = vpop.eup %12399  ;;  %v14241_v15 = vadd.f32 %v12789_v38, %v17139_v46 }
 0x7da   :  { %11301 = vmatmul.mubr.msk.f32.gmra.mxu0 %vm1269_vm3, %v2593_v28  ;;  %v2594_v25 = vmul.f32 %v12400_v53, %v14147_v6  ;;  %v17140_v6 = vld [vmem:[#allocation24_spill] sm:$0xff] }
 0x7db   :  { %v12402_v5 = vpop.eup %12401 }
 0x7dc   :  { %11303 = vmatprep.mubr.msk.f32.mxu0 %vm1269_vm3, %v2594_v25  ;;  %v2595_v59 = vmul.f32 %v12402_v5, %v14151_v40  ;;  %v17141_v40 = vld [vmem:[#allocation34_spill] sm:$0xff] }
 0x7dd   :  { %v14248_v51 = vadd.f32 %v12789_v38, %v17141_v40 }
 0x7de   :  { %11304 = vmatmul.mubr.msk.f32.gmra.mxu0 %vm1269_vm3, %v2595_v59 }
 0x7df   :  { %11322 = vmatprep.mubr.msk.f32.mxu0 %vm1107_vm2, %v14235_v54 }
 0x7e2   :  { %11323 = vmatmul.mubr.msk.f32.vlgmr.msra.gmra.mxu0 %vm1107_vm2, %v17140_v6 }
 0x7e3   :  { %11325 = vmatprep.mubr.msk.f32.mxu0 %vm1107_vm2, %v14241_v15 }
 0x7e6   :  { %11326 = vmatmul.mubr.msk.f32.gmra.mxu0 %vm1107_vm2, %v17142_v32 }
 0x7e7   :  { %11328 = vmatprep.mubr.msk.f32.mxu0 %vm1107_vm2, %v14248_v51 }
 0x7ea   :  { %11329 = vmatmul.mubr.msk.f32.gmra.mxu0 %vm1107_vm2, %v17144_v35 }
 0x7eb   :  { %11331 = vmatprep.mubr.msk.f32.mxu0 %vm1107_vm2, %v14255_v4 }
 0x7ee   :  { %11332 = vmatmul.mubr.msk.f32.gmra.mxu0 %vm1107_vm2, %v17145_v61 }
 0x862   :  { %v14263_v56 = vpop.f32.mrf.mxu0 }
 0x863   :  { %17146 = vst [vmem:[#allocation46_spill] sm:$0xff] %v14263_v56 }
 0x864   :  { %v14265_v10 = vpop.f32.mrf.mxu0 }
 0x896   :  { %v14267_v42 = vpop.f32.mrf.mxu0 }
 0x897   :  { %17147 = vst [vmem:[#allocation44_spill] sm:$0xff] %v14267_v42 }
 0x898   :  { %v14269_v36 = vpop.f32.mrf.mxu0 }
 0x89a   :  { %v14271_v47 = vpop.f32.mrf.mxu0 }
 0x89b   :  { %17148 = vst [vmem:[#allocation50_spill] sm:$0xff] %v14271_v47 }
 0x89c   :  { %v14273_v28 = vpop.f32.mrf.mxu0 }
 0x89e   :  { %v14275_v53 = vpop.f32.mrf.mxu0 }
 0x89f   :  { %17149 = vst [vmem:[#allocation48_spill] sm:$0xff] %v14275_v53 }
 0x8a0   :  { %v14277_v25 = vpop.f32.mrf.mxu0 }
 0x8a1   :  { %17150 = vst [vmem:[#allocation37_spill] sm:$0xff] %v14277_v25 }
 0x8a2   :  { %v11324_v5 = vpop.f32.mrf.mxu0 }
 0x8a3   :  { %v3024_v59 = vmul.f32 0.35355338, %v11324_v5 }
 0x8a4   :  { %v2984_v38 = vpop.f32.mrf.mxu0 }
 0x8a5   :  { %v3023_v58 = vmul.f32 0.35355338, %v2984_v38  ;;  %v3034_v46 = vsel %vm1269_vm3, %v3024_v59, -inf }
 0x8a6   :  { %3035 = vmax.xlane.f32.xlu0 %v3034_v46  ;;  %v11327_v40 = vpop.f32.mrf.mxu0 }
 0x8a7   :  { %v3026_v48 = vmul.f32 0.35355338, %v11327_v40  ;;  %v3031_v26 = vsel %vm1269_vm3, %v3023_v58, -inf }
 0x8a8   :  { %v2994_v14 = vpop.f32.mrf.mxu0 }
 0x8a9   :  { %v3025_v49 = vmul.f32 0.35355338, %v2994_v14  ;;  %v3040_v5 = vsel %vm1269_vm3, %v3026_v48, -inf }
 0x8aa   :  { %3032 = vmax.xlane.f32.xlu0 %v3031_v26  ;;  %v11330_v7 = vpop.f32.mrf.mxu0 }
 0x8ab   :  { %v3037_v62 = vsel %vm1269_vm3, %v3025_v49, -inf  ;;  %v3028_v21 = vmul.f32 0.35355338, %v11330_v7 }
 0x8ac   :  { %3038 = vmax.xlane.f32.xlu1 %v3037_v62  ;;  %v3004_v41 = vpop.f32.mrf.mxu0 }
 0x8ad   :  { %v3027_v34 = vmul.f32 0.35355338, %v3004_v41  ;;  %v3046_v31 = vsel %vm1269_vm3, %v3028_v21, -inf  ;;  %v14291_v41 = vpop.permute.xlu0 %3276 }
 0x8ae   :  { %3041 = vmax.xlane.f32.xlu0 %v3040_v5  ;;  %v11333_v38 = vpop.f32.mrf.mxu0 }
 0x8af   :  { %v3043_v46 = vsel %vm1269_vm3, %v3027_v34, -inf  ;;  %v3030_v40 = vmul.f32 0.35355338, %v11333_v38 }
 0x8b0   :  { %3044 = vmax.xlane.f32.xlu1 %v3043_v46  ;;  %v3014_v53 = vpop.f32.mrf.mxu0 }
 0x8b1   :  { %v3029_v14 = vmul.f32 0.35355338, %v3014_v53  ;;  %v3052_v62 = vsel %vm1269_vm3, %v3030_v40, -inf }
 0x8b2   :  { %3047 = vmax.xlane.f32.xlu0 %v3046_v31 }
 0x8b3   :  { %v3049_v26 = vsel %vm1269_vm3, %v3029_v14, -inf }
 0x8b4   :  { %3050 = vmax.xlane.f32.xlu1 %v3049_v26 }
 0x8b6   :  { %3053 = vmax.xlane.f32.xlu0 %v3052_v62 }
 0x8c5   :  { %3268 = vrot.lane.b32.xlu1 %v14197_v12, %s12840_s11 }
 0x8cc   :  { %3270 = vrot.lane.b32.xlu0 %v17134_v29, %s12840_s11 }
 0x92f   :  { %v3036_v7 = vpop.xlane.xlu0 %3035 }
 0x930   :  { %v3056_v5 = vsub.f32 %v3024_v59, %v3036_v7  ;;  %v14303_v59 = vpop.permute.xlu1 %3272 }
 0x932   :  { %v3065_v53 = vmul.f32 1.442695, %v3056_v5 }
 0x933   :  { %v3033_v38 = vpop.xlane.xlu0 %3032 }
 0x934   :  { %12403 = vpow2.f32 %v3065_v53  ;;  %v3055_v31 = vsub.f32 %v3023_v58, %v3033_v38 }
 0x935   :  { %v3039_v58 = vpop.xlane.xlu1 %3038 }
 0x936   :  { %v3063_v46 = vmul.f32 1.442695, %v3055_v31  ;;  %v3057_v38 = vsub.f32 %v3025_v49, %v3039_v58 }
 0x937   :  { %v3042_v7 = vpop.xlane.xlu0 %3041 }
 0x938   :  { %12405 = vpow2.f32 %v3063_v46  ;;  %v3058_v53 = vsub.f32 %v3026_v48, %v3042_v7 }
 0x939   :  { %v3045_v31 = vpop.xlane.xlu1 %3044 }
 0x93a   :  { %v3069_v46 = vmul.f32 1.442695, %v3058_v53  ;;  %v3059_v42 = vsub.f32 %v3027_v34, %v3045_v31 }
 0x93b   :  { %v3048_v5 = vpop.xlane.xlu0 %3047 }
 0x93c   :  { %12407 = vpow2.f32 %v3069_v46  ;;  %v3071_v1 = vmul.f32 1.442695, %v3059_v42 }
 0x93d   :  { %v3051_v56 = vpop.xlane.xlu1 %3050 }
 0x93e   :  { %v3061_v63 = vsub.f32 %v3029_v14, %v3051_v56 }
 0x93f   :  { %v3054_v60 = vpop.xlane.xlu0 %3053 }
 0x940   :  { %v3062_v39 = vsub.f32 %v3030_v40, %v3054_v60  ;;  %v3075_v50 = vmul.f32 1.442695, %v3061_v63 }
 0x941   :  { %v14293_v26 = vpop.eup %12403  ;;  %v3269_v40 = vpop.permute.xlu1 %3268 }
 0x942   :  { %v3082_v62 = vsel %vm1269_vm3, %v14293_v26, 0.0  ;;  %v3077_v25 = vmul.f32 1.442695, %v3062_v39 }
 0x943   :  { %3083 = vadd.xlane.f32.xlu0 %v3082_v62  ;;  %v3060_v62 = vsub.f32 %v3028_v21, %v3048_v5 }
 0x945   :  { %v14297_v17 = vpop.eup %12405  ;;  %v3073_v3 = vmul.f32 1.442695, %v3060_v62 }
 0x946   :  { %v3079_v47 = vsel %vm1269_vm3, %v14297_v17, 0.0 }
 0x947   :  { %3080 = vadd.xlane.f32.xlu1 %v3079_v47  ;;  %v3067_v47 = vmul.f32 1.442695, %v3057_v38 }
 0x949   :  { %12409 = vpow2.f32 %v3067_v47  ;;  %v14309_v48 = vpop.eup %12407 }
 0x94a   :  { %12411 = vpow2.f32 %v3073_v3  ;;  %v3088_v21 = vsel %vm1269_vm3, %v14309_v48, 0.0 }
 0x94b   :  { %12413 = vpow2.f32 %v3071_v1 }
 0x94c   :  { %12415 = vpow2.f32 %v3077_v25  ;;  %v3271_v25 = vpop.permute.xlu0 %3270 }
 0x94d   :  { %12417 = vpow2.f32 %v3075_v50 }
 0x956   :  { %v14311_v49 = vpop.eup %12409 }
 0x957   :  { %v14315_v34 = vpop.eup %12411  ;;  %v3085_v63 = vsel %vm1269_vm3, %v14311_v49, 0.0 }
 0x958   :  { %3264 = vrot.lane.b32.xlu1 %v14208_v20, %s12840_s11  ;;  %v14317_v60 = vpop.eup %12413  ;;  %v3094_v3 = vsel %vm1269_vm3, %v14315_v34, 0.0 }
 0x959   :  { %3266 = vrot.lane.b32.xlu0 %v17136_v55, %s12840_s11  ;;  %v14323_v39 = vpop.eup %12415  ;;  %v3091_v50 = vsel %vm1269_vm3, %v14317_v60, 0.0 }
 0x95a   :  { %v3100_v1 = vsel %vm1269_vm3, %v14323_v39, 0.0  ;;  %v14329_v56 = vpop.eup %12417 }
 0x95b   :  { %v3097_v42 = vsel %vm1269_vm3, %v14329_v56, 0.0 }
 0x978   :  { %3089 = vadd.xlane.f32.xlu0 %v3088_v21 }
 0x97c   :  { %3095 = vadd.xlane.f32.xlu0 %v3094_v3  ;;  %3086 = vadd.xlane.f32.xlu1 %v3085_v63 }
 0x980   :  { %3101 = vadd.xlane.f32.xlu0 %v3100_v1  ;;  %3092 = vadd.xlane.f32.xlu1 %v3091_v50 }
 0x984   :  { %3098 = vadd.xlane.f32.xlu1 %v3097_v42 }
 0x995   :  { %3250 = vrot.lane.b32.xlu1 %v17140_v6, %s12840_s11 }
 0x996   :  { %3248 = vrot.lane.b32.xlu0 %v14235_v54, %s12840_s11 }
 0x999   :  { %3254 = vrot.lane.b32.xlu1 %v17142_v32, %s12840_s11 }
 0x99a   :  { %3252 = vrot.lane.b32.xlu0 %v14241_v15, %s12840_s11 }
 0x99d   :  { %3258 = vrot.lane.b32.xlu1 %v17144_v35, %s12840_s11 }
 0x99e   :  { %3256 = vrot.lane.b32.xlu0 %v14248_v51, %s12840_s11 }
 0x9a1   :  { %3262 = vrot.lane.b32.xlu1 %v17145_v61, %s12840_s11 }
 0x9a2   :  { %3260 = vrot.lane.b32.xlu0 %v14255_v4, %s12840_s11 }
 0x9a5   :  { %3535 = vrot.lane.b32.xlu1 %v17101_v43, %s12840_s11 }
 0x9a6   :  { %3533 = vrot.lane.b32.xlu0 %v14028_v57, %s12840_s11 }
 0x9a9   :  { %3531 = vrot.lane.b32.xlu1 %v17103_v8, %s12840_s11 }
 0x9aa   :  { %3527 = vrot.lane.b32.xlu0 %v17105_v9, %s12840_s11 }
 0x9ad   :  { %3529 = vrot.lane.b32.xlu1 %v14038_v44, %s12840_s11 }
 0x9ae   :  { %3523 = vrot.lane.b32.xlu0 %v17108_v27, %s12840_s11 }
 0x9b1   :  { %3525 = vrot.lane.b32.xlu1 %v14047_v52, %s12840_s11 }
 0x9b2   :  { %3704 = vrot.lane.b32.xlu0 %v17130_v13, %s12841_s12 }
 0x9b5   :  { %3521 = vrot.lane.b32.xlu1 %v14054_v24, %s12840_s11 }
 0x9b9   :  { %3702 = vrot.lane.b32.xlu1 %v14163_v37, %s12841_s12 }
 0x9cc   :  { %v3084_v14 = vpop.xlane.xlu0 %3083 }
 0x9cd   :  { %12419 = vrcp.f32 %v3084_v14 }
 0x9d0   :  { %v3081_v7 = vpop.xlane.xlu1 %3080 }
 0x9d1   :  { %12421 = vrcp.f32 %v3081_v7 }
 0x9da   :  { %v12420_v58 = vpop.eup %12419 }
 0x9db   :  { %v3112_v38 = vmul.f32 %v12420_v58, %v14293_v26 }
 0x9de   :  { %v12422_v5 = vpop.eup %12421 }
 0x9df   :  { %v3111_v53 = vmul.f32 %v12422_v5, %v14297_v17  ;;  %v3267_v17 = vpop.permute.xlu0 %3266 }
 0x9e1   :  { %11350 = vmatprep.mubr.msk.f32.mxu1 %vm1269_vm3, %v3111_v53 }
 0x9e2   :  { %11351 = vmatmul.mubr.msk.f32.vlgmr.msra.gmra.mxu1 %vm1269_vm3, %v3112_v38 }
 0x9e3   :  { %11363 = vmatpush3.xpose.msk.msra.mxu1 %vm1107_vm2, %v14216_v16  ;;  %v3265_v16 = vpop.permute.xlu1 %3264 }
 0x9e4   :  { %11364 = vmatprep.subr.msk.mxu1 %vm1107_vm2, %v14291_v41 }
 0x9e7   :  { %11365 = vmatpush3.xpose.msk.msra.mxu1 %vm1107_vm2, %v14291_v41 }
 0x9e8   :  { %11366 = vmatprep.subr.msk.mxu1 %vm1107_vm2, %v14301_v2 }
 0x9eb   :  { %11367 = vmatpush3.xpose.msk.msra.mxu1 %vm1107_vm2, %v14301_v2 }
 0x9ec   :  { %11368 = vmatprep.subr.msk.mxu1 %vm1107_vm2, %v14303_v59 }
 0x9ef   :  { %11369 = vmatpush3.xpose.msk.msra.mxu1 %vm1107_vm2, %v14303_v59 }
 0x9f0   :  { %11370 = vmatprep.subr.msk.mxu1 %vm1107_vm2, %v3271_v25 }
 0x9f3   :  { %11371 = vmatpush3.xpose.msk.msra.mxu1 %vm1107_vm2, %v3271_v25 }
 0x9f4   :  { %11372 = vmatprep.subr.msk.mxu1 %vm1107_vm2, %v3269_v40 }
 0x9f7   :  { %11373 = vmatpush3.xpose.msk.msra.mxu1 %vm1107_vm2, %v3269_v40 }
 0x9f8   :  { %11374 = vmatprep.subr.msk.mxu1 %vm1107_vm2, %v3267_v17 }
 0x9fb   :  { %11375 = vmatpush3.xpose.msk.msra.mxu1 %vm1107_vm2, %v3267_v17 }
 0x9fc   :  { %11376 = vmatprep.subr.msk.mxu1 %vm1107_vm2, %v3265_v16 }
 0x9ff   :  { %11377 = vmatpush3.xpose.msk.msra.mxu1 %vm1107_vm2, %v3265_v16 }
 0xa01   :  { %v3090_v2 = vpop.xlane.xlu0 %3089 }
 0xa02   :  { %12423 = vrcp.f32 %v3090_v2 }
 0xa05   :  { %v3096_v41 = vpop.xlane.xlu0 %3095  ;;  %v3087_v26 = vpop.xlane.xlu1 %3086 }
 0xa06   :  { %12425 = vrcp.f32 %v3087_v26 }
 0xa07   :  { %12427 = vrcp.f32 %v3096_v41 }
 0xa09   :  { %v3102_v59 = vpop.xlane.xlu0 %3101  ;;  %v3093_v31 = vpop.xlane.xlu1 %3092 }
 0xa0a   :  { %12429 = vrcp.f32 %v3093_v31 }
 0xa0b   :  { %12431 = vrcp.f32 %v3102_v59 }
 0xa0d   :  { %v3249_v46 = vpop.permute.xlu0 %3248  ;;  %v3099_v62 = vpop.xlane.xlu1 %3098 }
 0xa0e   :  { %12433 = vrcp.f32 %v3099_v62 }
 0xa0f   :  { %v12424_v3 = vpop.eup %12423 }
 0xa10   :  { %v3114_v25 = vmul.f32 %v12424_v3, %v14309_v48 }
 0xa11   :  { %v3253_v47 = vpop.permute.xlu0 %3252  ;;  %v3251_v21 = vpop.permute.xlu1 %3250 }
 0xa13   :  { %v12426_v63 = vpop.eup %12425 }
 0xa14   :  { %v3113_v42 = vmul.f32 %v12426_v63, %v14311_v49  ;;  %v12428_v40 = vpop.eup %12427 }
 0xa15   :  { %v3257_v1 = vpop.permute.xlu0 %3256  ;;  %v3255_v50 = vpop.permute.xlu1 %3254  ;;  %v3116_v53 = vmul.f32 %v12428_v40, %v14315_v34 }
 0xa16   :  { %11353 = vmatprep.mubr.msk.f32.mxu1 %vm1269_vm3, %v3113_v42 }
 0xa17   :  { %v12430_v14 = vpop.eup %12429  ;;  %11354 = vmatmul.mubr.msk.f32.gmra.mxu1 %vm1269_vm3, %v3114_v25 }
 0xa18   :  { %v3115_v58 = vmul.f32 %v12430_v14, %v14317_v60  ;;  %v12432_v5 = vpop.eup %12431 }
 0xa19   :  { %v3259_v7 = vpop.permute.xlu1 %3258  ;;  %v3261_v17 = vpop.permute.xlu0 %3260  ;;  %v3118_v16 = vmul.f32 %v12432_v5, %v14323_v39 }
 0xa1a   :  { %11356 = vmatprep.mubr.msk.f32.mxu1 %vm1269_vm3, %v3115_v58 }
 0xa1b   :  { %v12434_v38 = vpop.eup %12433  ;;  %11357 = vmatmul.mubr.msk.f32.gmra.mxu1 %vm1269_vm3, %v3116_v53 }
 0xa1c   :  { %v3117_v48 = vmul.f32 %v12434_v38, %v14329_v56 }
 0xa1d   :  { %v3263_v49 = vpop.permute.xlu1 %3262  ;;  %v3534_v2 = vpop.permute.xlu0 %3533 }
 0xa1e   :  { %11359 = vmatprep.mubr.msk.f32.mxu1 %vm1269_vm3, %v3117_v48 }
 0xa1f   :  { %11360 = vmatmul.mubr.msk.f32.gmra.mxu1 %vm1269_vm3, %v3118_v16 }
 0xa20   :  { %11378 = vmatprep.mubr.msk.f32.mxu1 %vm1107_vm2, %v3249_v46 }
 0xa21   :  { %v3536_v60 = vpop.permute.xlu1 %3535  ;;  %v3528_v56 = vpop.permute.xlu0 %3527 }
 0xa22   :  { %11390 = vmatprep.subr.mxu0 %v3536_v60 }
 0xa23   :  { %11391 = vmatpush3.msra.mxu0 %v3536_v60  ;;  %11379 = vmatmul.mubr.msk.f32.vlgmr.msra.gmra.mxu1 %vm1107_vm2, %v3251_v21 }
 0xa24   :  { %11392 = vmatprep.subr.mxu0 %v3534_v2  ;;  %11381 = vmatprep.mubr.msk.f32.mxu1 %vm1107_vm2, %v3253_v47 }
 0xa25   :  { %11393 = vmatpush3.msra.mxu0 %v3534_v2  ;;  %v3532_v34 = vpop.permute.xlu1 %3531  ;;  %v3524_v41 = vpop.permute.xlu0 %3523 }
 0xa26   :  { %11394 = vmatprep.subr.mxu0 %v3532_v34 }
 0xa27   :  { %11395 = vmatpush3.msra.mxu0 %v3532_v34  ;;  %11382 = vmatmul.mubr.msk.f32.gmra.mxu1 %vm1107_vm2, %v3255_v50 }
 0xa28   :  { %11384 = vmatprep.mubr.msk.f32.mxu1 %vm1107_vm2, %v3257_v1 }
 0xa29   :  { %v3530_v39 = vpop.permute.xlu1 %3529  ;;  %v14415_v31 = vpop.permute.xlu0 %3704 }
 0xa2a   :  { %11396 = vmatprep.subr.mxu0 %v3530_v39 }
 0xa2b   :  { %11397 = vmatpush3.msra.mxu0 %v3530_v39  ;;  %11385 = vmatmul.mubr.msk.f32.gmra.mxu1 %vm1107_vm2, %v3259_v7 }
 0xa2c   :  { %11398 = vmatprep.subr.mxu0 %v3528_v56  ;;  %11387 = vmatprep.mubr.msk.f32.mxu1 %vm1107_vm2, %v3261_v17 }
 0xa2d   :  { %11399 = vmatpush3.msra.mxu0 %v3528_v56  ;;  %v3526_v26 = vpop.permute.xlu1 %3525 }
 0xa2e   :  { %11400 = vmatprep.subr.mxu0 %v3526_v26 }
 0xa2f   :  { %11401 = vmatpush3.msra.mxu0 %v3526_v26  ;;  %11388 = vmatmul.mubr.msk.f32.gmra.mxu1 %vm1107_vm2, %v3263_v49 }
 0xa30   :  { %11402 = vmatprep.subr.mxu0 %v3524_v41 }
 0xa31   :  { %11403 = vmatpush3.msra.mxu0 %v3524_v41  ;;  %v3522_v59 = vpop.permute.xlu1 %3521 }
 0xa32   :  { %11404 = vmatprep.subr.mxu0 %v3522_v59 }
 0xa33   :  { %11405 = vmatpush3.msra.mxu0 %v3522_v59 }
 0xa34   :  { %11418 = vmatprep.subr.msk.mxu0 %vm1107_vm2, %v14415_v31 }
 0xaa2   :  { %v14419_v46 = vpop.f32.mrf.mxu1 }
 0xaa3   :  { %17151 = vst [vmem:[#allocation55_spill] sm:$0xff] %v14419_v46 }
 0xaa4   :  { %v14421_v62 = vpop.f32.mrf.mxu1 }
 0xaa5   :  { %17152 = vst [vmem:[#allocation33_spill] sm:$0xff] %v14421_v62 }
 0xad7   :  { %v14423_v47 = vpop.f32.mrf.mxu1 }
 0xad8   :  { %17153 = vst [vmem:[#allocation35_spill] sm:$0xff] %v14423_v47 }
 0xad9   :  { %v14425_v21 = vpop.f32.mrf.mxu1 }
 0xada   :  { %17154 = vst [vmem:[#allocation29_spill] sm:$0xff] %v14425_v21 }
 0xadb   :  { %v14427_v3 = vpop.f32.mrf.mxu1 }
 0xadc   :  { %17155 = vst [vmem:[#allocation31_spill] sm:$0xff] %v14427_v3 }
 0xadd   :  { %v14429_v63 = vpop.f32.mrf.mxu1 }
 0xade   :  { %17156 = vst [vmem:[#allocation25_spill] sm:$0xff] %v14429_v63 }
 0xadf   :  { %v14431_v1 = vpop.f32.mrf.mxu1 }
 0xae0   :  { %17157 = vst [vmem:[#allocation27_spill] sm:$0xff] %v14431_v1 }
 0xae1   :  { %v14433_v50 = vpop.f32.mrf.mxu1 }
 0xae2   :  { %17158 = vst [vmem:[#allocation26_spill] sm:$0xff] %v14433_v50 }
 0xae3   :  { %v11380_v42 = vpop.f32.mrf.mxu1 }
 0xae4   :  { %v3418_v25 = vmul.f32 0.35355338, %v11380_v42 }
 0xae5   :  { %v3378_v40 = vpop.f32.mrf.mxu1 }
 0xae6   :  { %v3417_v14 = vmul.f32 0.35355338, %v3378_v40  ;;  %v3428_v7 = vsel %vm1269_vm3, %v3418_v25, -inf }
 0xae7   :  { %3429 = vmax.xlane.f32.xlu1 %v3428_v7  ;;  %v11383_v58 = vpop.f32.mrf.mxu1 }
 0xae8   :  { %v3420_v5 = vmul.f32 0.35355338, %v11383_v58  ;;  %v3425_v53 = vsel %vm1269_vm3, %v3417_v14, -inf  ;;  %v14447_v58 = vpop.permute.xlu1 %3702 }
 0xae9   :  { %3426 = vmax.xlane.f32.xlu0 %v3425_v53  ;;  %v3388_v38 = vpop.f32.mrf.mxu1 }
 0xaea   :  { %v3419_v48 = vmul.f32 0.35355338, %v3388_v38  ;;  %v3434_v49 = vsel %vm1269_vm3, %v3420_v5, -inf }
 0xaeb   :  { %v11386_v17 = vpop.f32.mrf.mxu1 }
 0xaec   :  { %v3422_v34 = vmul.f32 0.35355338, %v11386_v17  ;;  %v3431_v56 = vsel %vm1269_vm3, %v3419_v48, -inf }
 0xaed   :  { %3435 = vmax.xlane.f32.xlu0 %v3434_v49  ;;  %v3398_v16 = vpop.f32.mrf.mxu1 }
 0xaee   :  { %v3421_v2 = vmul.f32 0.35355338, %v3398_v16  ;;  %v3440_v42 = vsel %vm1269_vm3, %v3422_v34, -inf }
 0xaef   :  { %v11389_v60 = vpop.f32.mrf.mxu1 }
 0xaf0   :  { %v3437_v39 = vsel %vm1269_vm3, %v3421_v2, -inf  ;;  %v3424_v59 = vmul.f32 0.35355338, %v11389_v60 }
 0xaf1   :  { %3432 = vmax.xlane.f32.xlu0 %v3431_v56  ;;  %3438 = vmax.xlane.f32.xlu1 %v3437_v39  ;;  %v3408_v41 = vpop.f32.mrf.mxu1 }
 0xaf2   :  { %v3423_v26 = vmul.f32 0.35355338, %v3408_v41  ;;  %v3446_v7 = vsel %vm1269_vm3, %v3424_v59, -inf }
 0xaf4   :  { %v3443_v40 = vsel %vm1269_vm3, %v3423_v26, -inf }
 0xaf5   :  { %3441 = vmax.xlane.f32.xlu0 %v3440_v42  ;;  %3444 = vmax.xlane.f32.xlu1 %v3443_v40 }
 0xaf9   :  { %3447 = vmax.xlane.f32.xlu0 %v3446_v7 }
 0xb06   :  { %3698 = vrot.lane.b32.xlu1 %v14170_v18, %s12841_s12 }
 0xb0f   :  { %3700 = vrot.lane.b32.xlu0 %v17132_v30, %s12841_s12 }
 0xb70   :  { %v3430_v53 = vpop.xlane.xlu1 %3429 }
 0xb71   :  { %v3450_v38 = vsub.f32 %v3418_v25, %v3430_v53 }
 0xb72   :  { %v3427_v17 = vpop.xlane.xlu0 %3426 }
 0xb73   :  { %v3459_v49 = vmul.f32 1.442695, %v3450_v38  ;;  %v3449_v16 = vsub.f32 %v3417_v14, %v3427_v17 }
 0xb75   :  { %12435 = vpow2.f32 %v3459_v49  ;;  %v3457_v60 = vmul.f32 1.442695, %v3449_v16 }
 0xb76   :  { %v3436_v40 = vpop.xlane.xlu0 %3435 }
 0xb77   :  { %12437 = vpow2.f32 %v3457_v60  ;;  %v3452_v38 = vsub.f32 %v3420_v5, %v3436_v40 }
 0xb79   :  { %v3463_v60 = vmul.f32 1.442695, %v3452_v38 }
 0xb7a   :  { %v3433_v25 = vpop.xlane.xlu0 %3432  ;;  %v3439_v14 = vpop.xlane.xlu1 %3438 }
 0xb7b   :  { %v3451_v7 = vsub.f32 %v3419_v48, %v3433_v25  ;;  %v3453_v49 = vsub.f32 %v3421_v2, %v3439_v14 }
 0xb7d   :  { %v3461_v17 = vmul.f32 1.442695, %v3451_v7 }
 0xb7e   :  { %v3442_v53 = vpop.xlane.xlu0 %3441  ;;  %v3445_v16 = vpop.xlane.xlu1 %3444 }
 0xb7f   :  { %12439 = vpow2.f32 %v3461_v17  ;;  %v3455_v50 = vsub.f32 %v3423_v26, %v3445_v16 }
 0xb80   :  { %12441 = vpow2.f32 %v3463_v60 }
 0xb81   :  { %v3469_v47 = vmul.f32 1.442695, %v3455_v50 }
 0xb82   :  { %v14449_v56 = vpop.eup %12435  ;;  %v3448_v1 = vpop.xlane.xlu0 %3447 }
 0xb83   :  { %v3476_v39 = vsel %vm1269_vm3, %v14449_v56, 0.0  ;;  %v3456_v63 = vsub.f32 %v3424_v59, %v3448_v1  ;;  %v3699_v25 = vpop.permute.xlu1 %3698 }
 0xb84   :  { %v14453_v41 = vpop.eup %12437  ;;  %3477 = vadd.xlane.f32.xlu0 %v3476_v39  ;;  %v3454_v39 = vsub.f32 %v3422_v34, %v3442_v53 }
 0xb85   :  { %v3473_v42 = vsel %vm1269_vm3, %v14453_v41, 0.0  ;;  %v3471_v21 = vmul.f32 1.442695, %v3456_v63 }
 0xb86   :  { %3474 = vadd.xlane.f32.xlu1 %v3473_v42  ;;  %v3465_v42 = vmul.f32 1.442695, %v3453_v49  ;;  %v3467_v3 = vmul.f32 1.442695, %v3454_v39  ;;  %v3701_v40 = vpop.permute.xlu0 %3700 }
 0xb88   :  { %12443 = vpow2.f32 %v3465_v42 }
 0xb89   :  { %12445 = vpow2.f32 %v3467_v3 }
 0xb8a   :  { %12447 = vpow2.f32 %v3469_v47 }
 0xb8b   :  { %12449 = vpow2.f32 %v3471_v21 }
 0xb8c   :  { %v14461_v48 = vpop.eup %12439 }
 0xb8d   :  { %v14463_v5 = vpop.eup %12441  ;;  %v3479_v2 = vsel %vm1269_vm3, %v14461_v48, 0.0 }
 0xb8e   :  { %v3482_v26 = vsel %vm1269_vm3, %v14463_v5, 0.0 }
 0xb95   :  { %v14467_v34 = vpop.eup %12443 }
 0xb96   :  { %v14471_v1 = vpop.eup %12445  ;;  %v3485_v47 = vsel %vm1269_vm3, %v14467_v34, 0.0 }
 0xb97   :  { %3694 = vrot.lane.b32.xlu1 %v14197_v12, %s12841_s12  ;;  %v14475_v21 = vpop.eup %12447  ;;  %v3488_v3 = vsel %vm1269_vm3, %v14471_v1, 0.0 }
 0xb98   :  { %v14479_v63 = vpop.eup %12449  ;;  %v3491_v50 = vsel %vm1269_vm3, %v14475_v21, 0.0 }
 0xb99   :  { %v3494_v59 = vsel %vm1269_vm3, %v14479_v63, 0.0 }
 0xb9a   :  { %3696 = vrot.lane.b32.xlu0 %v17134_v29, %s12841_s12 }
 0xbb9   :  { %3480 = vadd.xlane.f32.xlu0 %v3479_v2 }
 0xbbb   :  { %3483 = vadd.xlane.f32.xlu1 %v3482_v26 }
 0xbbd   :  { %3486 = vadd.xlane.f32.xlu0 %v3485_v47 }
 0xbbf   :  { %3489 = vadd.xlane.f32.xlu1 %v3488_v3 }
 0xbc1   :  { %3492 = vadd.xlane.f32.xlu0 %v3491_v50 }
 0xbc3   :  { %3495 = vadd.xlane.f32.xlu1 %v3494_v59 }
 0xbd4   :  { %3690 = vrot.lane.b32.xlu1 %v14208_v20, %s12841_s12 }
 0xbd7   :  { %3692 = vrot.lane.b32.xlu0 %v17136_v55, %s12841_s12 }
 0xbd8   :  { %3676 = vrot.lane.b32.xlu1 %v17140_v6, %s12841_s12 }
 0xbdb   :  { %3674 = vrot.lane.b32.xlu0 %v14235_v54, %s12841_s12 }
 0xbdc   :  { %3680 = vrot.lane.b32.xlu1 %v17142_v32, %s12841_s12 }
 0xbdf   :  { %3678 = vrot.lane.b32.xlu0 %v14241_v15, %s12841_s12 }
 0xbe0   :  { %3684 = vrot.lane.b32.xlu1 %v17144_v35, %s12841_s12 }
 0xbe3   :  { %3682 = vrot.lane.b32.xlu0 %v14248_v51, %s12841_s12 }
 0xbe4   :  { %3688 = vrot.lane.b32.xlu1 %v17145_v61, %s12841_s12 }
 0xbe7   :  { %3686 = vrot.lane.b32.xlu0 %v14255_v4, %s12841_s12 }
 0xbe8   :  { %3953 = vrot.lane.b32.xlu1 %v17101_v43, %s12841_s12 }
 0xbeb   :  { %3951 = vrot.lane.b32.xlu0 %v14028_v57, %s12841_s12 }
 0xbec   :  { %3949 = vrot.lane.b32.xlu1 %v17103_v8, %s12841_s12 }
 0xbef   :  { %3945 = vrot.lane.b32.xlu0 %v17105_v9, %s12841_s12 }
 0xbf0   :  { %3947 = vrot.lane.b32.xlu1 %v14038_v44, %s12841_s12 }
 0xbf3   :  { %3941 = vrot.lane.b32.xlu0 %v17108_v27, %s12841_s12 }
 0xbf4   :  { %3943 = vrot.lane.b32.xlu1 %v14047_v52, %s12841_s12 }
 0xbf7   :  { %4122 = vrot.lane.b32.xlu0 %v17130_v13, %s12842_s15 }
 0xbf8   :  { %3939 = vrot.lane.b32.xlu1 %v14054_v24, %s12841_s12 }
 0xbfc   :  { %4120 = vrot.lane.b32.xlu1 %v14163_v37, %s12842_s15 }
 0xc0d   :  { %v3478_v14 = vpop.xlane.xlu0 %3477 }
 0xc0e   :  { %12451 = vrcp.f32 %v3478_v14 }
 0xc0f   :  { %v3475_v7 = vpop.xlane.xlu1 %3474 }
 0xc10   :  { %12453 = vrcp.f32 %v3475_v7 }
 0xc11   :  { %v3697_v13 = vpop.permute.xlu0 %3696 }
 0xc13   :  { %v3695_v37 = vpop.permute.xlu1 %3694 }
 0xc1b   :  { %v12452_v53 = vpop.eup %12451 }
 0xc1c   :  { %v3506_v49 = vmul.f32 %v12452_v53, %v14449_v56 }
 0xc1d   :  { %v12454_v38 = vpop.eup %12453 }
 0xc1e   :  { %v3505_v17 = vmul.f32 %v12454_v38, %v14453_v41 }
 0xc20   :  { %11406 = vmatprep.mubr.msk.f32.mxu0 %vm1269_vm3, %v3505_v17 }
 0xc21   :  { %11407 = vmatmul.mubr.msk.f32.vlgmr.msra.gmra.mxu0 %vm1269_vm3, %v3506_v49 }
 0xc22   :  { %11419 = vmatpush3.xpose.msk.msra.mxu0 %vm1107_vm2, %v14415_v31 }
 0xc23   :  { %11420 = vmatprep.subr.msk.mxu0 %vm1107_vm2, %v14447_v58 }
 0xc26   :  { %11421 = vmatpush3.xpose.msk.msra.mxu0 %vm1107_vm2, %v14447_v58 }
 0xc27   :  { %11422 = vmatprep.subr.msk.mxu0 %vm1107_vm2, %v3701_v40 }
 0xc2a   :  { %11423 = vmatpush3.xpose.msk.msra.mxu0 %vm1107_vm2, %v3701_v40 }
 0xc2b   :  { %11424 = vmatprep.subr.msk.mxu0 %vm1107_vm2, %v3699_v25 }
 0xc2e   :  { %11425 = vmatpush3.xpose.msk.msra.mxu0 %vm1107_vm2, %v3699_v25 }
 0xc2f   :  { %11426 = vmatprep.subr.msk.mxu0 %vm1107_vm2, %v3697_v13 }
 0xc32   :  { %11427 = vmatpush3.xpose.msk.msra.mxu0 %vm1107_vm2, %v3697_v13 }
 0xc33   :  { %11428 = vmatprep.subr.msk.mxu0 %vm1107_vm2, %v3695_v37 }
 0xc36   :  { %11429 = vmatpush3.xpose.msk.msra.mxu0 %vm1107_vm2, %v3695_v37 }
 0xc42   :  { %v3481_v31 = vpop.xlane.xlu0 %3480 }
 0xc43   :  { %12455 = vrcp.f32 %v3481_v31 }
 0xc44   :  { %v3484_v58 = vpop.xlane.xlu1 %3483 }
 0xc45   :  { %12457 = vrcp.f32 %v3484_v58 }
 0xc46   :  { %v3487_v56 = vpop.xlane.xlu0 %3486 }
 0xc47   :  { %12459 = vrcp.f32 %v3487_v56 }
 0xc48   :  { %v3490_v41 = vpop.xlane.xlu1 %3489 }
 0xc49   :  { %12461 = vrcp.f32 %v3490_v41 }
 0xc4a   :  { %v3493_v16 = vpop.xlane.xlu0 %3492 }
 0xc4b   :  { %12463 = vrcp.f32 %v3493_v16 }
 0xc4c   :  { %v3496_v60 = vpop.xlane.xlu1 %3495 }
 0xc4d   :  { %12465 = vrcp.f32 %v3496_v60 }
 0xc4e   :  { %v3693_v39 = vpop.permute.xlu0 %3692 }
 0xc4f   :  { %11430 = vmatprep.subr.msk.mxu0 %vm1107_vm2, %v3693_v39 }
 0xc50   :  { %v12456_v42 = vpop.eup %12455  ;;  %11431 = vmatpush3.xpose.msk.msra.mxu0 %vm1107_vm2, %v3693_v39  ;;  %v3691_v2 = vpop.permute.xlu1 %3690 }
 0xc51   :  { %11432 = vmatprep.subr.msk.mxu0 %vm1107_vm2, %v3691_v2  ;;  %v3507_v26 = vmul.f32 %v12456_v42, %v14461_v48 }
 0xc52   :  { %v12458_v47 = vpop.eup %12457  ;;  %v3675_v3 = vpop.permute.xlu0 %3674 }
 0xc53   :  { %11409 = vmatprep.mubr.msk.f32.mxu0 %vm1269_vm3, %v3507_v26  ;;  %v3508_v50 = vmul.f32 %v12458_v47, %v14463_v5 }
 0xc54   :  { %v12460_v59 = vpop.eup %12459  ;;  %11433 = vmatpush3.xpose.msk.msra.mxu0 %vm1107_vm2, %v3691_v2  ;;  %v3677_v40 = vpop.permute.xlu1 %3676 }
 0xc55   :  { %11410 = vmatmul.mubr.msk.f32.gmra.mxu0 %vm1269_vm3, %v3508_v50  ;;  %v3509_v25 = vmul.f32 %v12460_v59, %v14467_v34 }
 0xc56   :  { %v12462_v14 = vpop.eup %12461  ;;  %v3679_v7 = vpop.permute.xlu0 %3678 }
 0xc57   :  { %11412 = vmatprep.mubr.msk.f32.mxu0 %vm1269_vm3, %v3509_v25  ;;  %v3510_v48 = vmul.f32 %v12462_v14, %v14471_v1 }
 0xc58   :  { %v12464_v53 = vpop.eup %12463  ;;  %v3681_v38 = vpop.permute.xlu1 %3680 }
 0xc59   :  { %11413 = vmatmul.mubr.msk.f32.gmra.mxu0 %vm1269_vm3, %v3510_v48  ;;  %v3511_v5 = vmul.f32 %v12464_v53, %v14475_v21 }
 0xc5a   :  { %v12466_v17 = vpop.eup %12465  ;;  %v3683_v49 = vpop.permute.xlu0 %3682 }
 0xc5b   :  { %11415 = vmatprep.mubr.msk.f32.mxu0 %vm1269_vm3, %v3511_v5  ;;  %v3512_v13 = vmul.f32 %v12466_v17, %v14479_v63 }
 0xc5c   :  { %v3685_v37 = vpop.permute.xlu1 %3684 }
 0xc5d   :  { %11416 = vmatmul.mubr.msk.f32.gmra.mxu0 %vm1269_vm3, %v3512_v13 }
 0xc5e   :  { %v3687_v34 = vpop.permute.xlu0 %3686  ;;  %11434 = vmatprep.mubr.msk.f32.mxu0 %vm1107_vm2, %v3675_v3 }
 0xc60   :  { %v3689_v31 = vpop.permute.xlu1 %3688 }
 0xc61   :  { %11435 = vmatmul.mubr.msk.f32.vlgmr.msra.gmra.mxu0 %vm1107_vm2, %v3677_v40 }
 0xc62   :  { %11437 = vmatprep.mubr.msk.f32.mxu0 %vm1107_vm2, %v3679_v7  ;;  %v3952_v1 = vpop.permute.xlu0 %3951 }
 0xc64   :  { %v3954_v58 = vpop.permute.xlu1 %3953 }
 0xc65   :  { %11438 = vmatmul.mubr.msk.f32.gmra.mxu0 %vm1107_vm2, %v3681_v38  ;;  %11446 = vmatprep.subr.mxu1 %v3954_v58 }
 0xc66   :  { %11440 = vmatprep.mubr.msk.f32.mxu0 %vm1107_vm2, %v3683_v49  ;;  %11447 = vmatpush3.msra.mxu1 %v3954_v58  ;;  %v3946_v63 = vpop.permute.xlu0 %3945 }
 0xc67   :  { %11448 = vmatprep.subr.mxu1 %v3952_v1 }
 0xc68   :  { %11449 = vmatpush3.msra.mxu1 %v3952_v1  ;;  %v3950_v21 = vpop.permute.xlu1 %3949 }
 0xc69   :  { %11441 = vmatmul.mubr.msk.f32.gmra.mxu0 %vm1107_vm2, %v3685_v37  ;;  %11450 = vmatprep.subr.mxu1 %v3950_v21 }
 0xc6a   :  { %11443 = vmatprep.mubr.msk.f32.mxu0 %vm1107_vm2, %v3687_v34  ;;  %11451 = vmatpush3.msra.mxu1 %v3950_v21  ;;  %v3942_v41 = vpop.permute.xlu0 %3941 }
 0xc6c   :  { %v3948_v56 = vpop.permute.xlu1 %3947 }
 0xc6d   :  { %11444 = vmatmul.mubr.msk.f32.gmra.mxu0 %vm1107_vm2, %v3689_v31  ;;  %11452 = vmatprep.subr.mxu1 %v3948_v56 }
 0xc6e   :  { %11453 = vmatpush3.msra.mxu1 %v3948_v56  ;;  %v14567_v39 = vpop.permute.xlu0 %4122 }
 0xc6f   :  { %11454 = vmatprep.subr.mxu1 %v3946_v63 }
 0xc70   :  { %11455 = vmatpush3.msra.mxu1 %v3946_v63  ;;  %v3944_v16 = vpop.permute.xlu1 %3943 }
 0xc71   :  { %11456 = vmatprep.subr.mxu1 %v3944_v16 }
 0xc72   :  { %11457 = vmatpush3.msra.mxu1 %v3944_v16 }
 0xc73   :  { %11458 = vmatprep.subr.mxu1 %v3942_v41 }
 0xc74   :  { %11459 = vmatpush3.msra.mxu1 %v3942_v41  ;;  %v3940_v60 = vpop.permute.xlu1 %3939 }
 0xc75   :  { %11460 = vmatprep.subr.mxu1 %v3940_v60 }
 0xc76   :  { %11461 = vmatpush3.msra.mxu1 %v3940_v60 }
 0xc77   :  { %11474 = vmatprep.subr.msk.mxu1 %vm1107_vm2, %v14567_v39 }
 0xce1   :  { %v14571_v42 = vpop.f32.mrf.mxu0 }
 0xce3   :  { %v14573_v2 = vpop.f32.mrf.mxu0 }
 0xd15   :  { %v14575_v26 = vpop.f32.mrf.mxu0 }
 0xd17   :  { %v14577_v47 = vpop.f32.mrf.mxu0 }
 0xd19   :  { %v14579_v3 = vpop.f32.mrf.mxu0 }
 0xd1b   :  { %v14581_v50 = vpop.f32.mrf.mxu0 }
 0xd1d   :  { %v14583_v59 = vpop.f32.mrf.mxu0 }
 0xd1f   :  { %v14585_v40 = vpop.f32.mrf.mxu0 }
 0xd21   :  { %v11436_v25 = vpop.f32.mrf.mxu0 }
 0xd22   :  { %v3844_v14 = vmul.f32 0.35355338, %v11436_v25 }
 0xd23   :  { %v3804_v7 = vpop.f32.mrf.mxu0 }
 0xd24   :  { %v3843_v48 = vmul.f32 0.35355338, %v3804_v7  ;;  %v3854_v53 = vsel %vm1269_vm3, %v3844_v14, -inf }
 0xd25   :  { %3855 = vmax.xlane.f32.xlu1 %v3854_v53  ;;  %v11439_v38 = vpop.f32.mrf.mxu0 }
 0xd26   :  { %v3846_v5 = vmul.f32 0.35355338, %v11439_v38  ;;  %v3851_v17 = vsel %vm1269_vm3, %v3843_v48, -inf  ;;  %v14599_v38 = vpop.permute.xlu1 %4120 }
 0xd27   :  { %3852 = vmax.xlane.f32.xlu0 %v3851_v17  ;;  %v3814_v49 = vpop.f32.mrf.mxu0 }
 0xd28   :  { %v3845_v37 = vmul.f32 0.35355338, %v3814_v49  ;;  %v3860_v34 = vsel %vm1269_vm3, %v3846_v5, -inf }
 0xd29   :  { %v11442_v13 = vpop.f32.mrf.mxu0 }
 0xd2a   :  { %v3848_v21 = vmul.f32 0.35355338, %v11442_v13  ;;  %v3857_v63 = vsel %vm1269_vm3, %v3845_v37, -inf }
 0xd2b   :  { %3861 = vmax.xlane.f32.xlu0 %v3860_v34  ;;  %v3824_v31 = vpop.f32.mrf.mxu0 }
 0xd2c   :  { %v3847_v1 = vmul.f32 0.35355338, %v3824_v31  ;;  %v3866_v25 = vsel %vm1269_vm3, %v3848_v21, -inf }
 0xd2d   :  { %v11445_v58 = vpop.f32.mrf.mxu0 }
 0xd2e   :  { %v3863_v56 = vsel %vm1269_vm3, %v3847_v1, -inf  ;;  %v3850_v60 = vmul.f32 0.35355338, %v11445_v58 }
 0xd2f   :  { %3858 = vmax.xlane.f32.xlu0 %v3857_v63  ;;  %3864 = vmax.xlane.f32.xlu1 %v3863_v56  ;;  %v3834_v41 = vpop.f32.mrf.mxu0 }
 0xd30   :  { %v3849_v16 = vmul.f32 0.35355338, %v3834_v41  ;;  %v3872_v53 = vsel %vm1269_vm3, %v3850_v60, -inf }
 0xd32   :  { %v3869_v7 = vsel %vm1269_vm3, %v3849_v16, -inf }
 0xd33   :  { %3867 = vmax.xlane.f32.xlu0 %v3866_v25  ;;  %3870 = vmax.xlane.f32.xlu1 %v3869_v7 }
 0xd37   :  { %3873 = vmax.xlane.f32.xlu0 %v3872_v53 }
 0xd44   :  { %4116 = vrot.lane.b32.xlu1 %v14170_v18, %s12842_s15 }
 0xd4d   :  { %4118 = vrot.lane.b32.xlu0 %v17132_v30, %s12842_s15 }
 0xdae   :  { %v3856_v17 = vpop.xlane.xlu1 %3855 }
 0xdaf   :  { %v3876_v49 = vsub.f32 %v3844_v14, %v3856_v17 }
 0xdb0   :  { %v3853_v13 = vpop.xlane.xlu0 %3852 }
 0xdb1   :  { %v3885_v34 = vmul.f32 1.442695, %v3876_v49  ;;  %v3875_v31 = vsub.f32 %v3843_v48, %v3853_v13 }
 0xdb3   :  { %12467 = vpow2.f32 %v3885_v34  ;;  %v3883_v58 = vmul.f32 1.442695, %v3875_v31 }
 0xdb4   :  { %v3862_v18 = vpop.xlane.xlu0 %3861 }
 0xdb5   :  { %12469 = vpow2.f32 %v3883_v58  ;;  %v3878_v53 = vsub.f32 %v3846_v5, %v3862_v18 }
 0xdb7   :  { %v3889_v34 = vmul.f32 1.442695, %v3878_v53 }
 0xdb8   :  { %v3859_v14 = vpop.xlane.xlu0 %3858  ;;  %v3865_v48 = vpop.xlane.xlu1 %3864 }
 0xdb9   :  { %v3877_v25 = vsub.f32 %v3845_v37, %v3859_v14  ;;  %v3879_v49 = vsub.f32 %v3847_v1, %v3865_v48 }
 0xdbb   :  { %v3887_v17 = vmul.f32 1.442695, %v3877_v25 }
 0xdbc   :  { %v3868_v7 = vpop.xlane.xlu0 %3867  ;;  %v3871_v13 = vpop.xlane.xlu1 %3870 }
 0xdbd   :  { %v3880_v31 = vsub.f32 %v3848_v21, %v3868_v7  ;;  %12471 = vpow2.f32 %v3887_v17 }
 0xdbe   :  { %12473 = vpow2.f32 %v3889_v34 }
 0xdbf   :  { %v3893_v46 = vmul.f32 1.442695, %v3880_v31 }
 0xdc0   :  { %v14601_v63 = vpop.eup %12467  ;;  %v3874_v58 = vpop.xlane.xlu0 %3873 }
 0xdc1   :  { %v3902_v56 = vsel %vm1269_vm3, %v14601_v63, 0.0 }
 0xdc2   :  { %v14605_v41 = vpop.eup %12469  ;;  %3903 = vadd.xlane.f32.xlu0 %v3902_v56  ;;  %v3891_v56 = vmul.f32 1.442695, %v3879_v49 }
 0xdc3   :  { %v3899_v30 = vsel %vm1269_vm3, %v14605_v41, 0.0 }
 0xdc4   :  { %3900 = vadd.xlane.f32.xlu1 %v3899_v30  ;;  %v3881_v30 = vsub.f32 %v3849_v16, %v3871_v13  ;;  %12475 = vpow2.f32 %v3891_v56 }
 0xdc5   :  { %12477 = vpow2.f32 %v3893_v46 }
 0xdc6   :  { %v3895_v62 = vmul.f32 1.442695, %v3881_v30 }
 0xdc8   :  { %12479 = vpow2.f32 %v3895_v62 }
 0xdca   :  { %v14613_v37 = vpop.eup %12471 }
 0xdcb   :  { %v14615_v5 = vpop.eup %12473  ;;  %v3905_v1 = vsel %vm1269_vm3, %v14613_v37, 0.0 }
 0xdcc   :  { %v3908_v16 = vsel %vm1269_vm3, %v14615_v5, 0.0 }
 0xdd1   :  { %v14619_v21 = vpop.eup %12475 }
 0xdd2   :  { %v3911_v46 = vsel %vm1269_vm3, %v14619_v21, 0.0 }
 0xdd5   :  { %4112 = vrot.lane.b32.xlu1 %v14197_v12, %s12842_s15  ;;  %v3882_v12 = vsub.f32 %v3850_v60, %v3874_v58  ;;  %v14623_v60 = vpop.eup %12477 }
 0xdd6   :  { %v14627_v62 = vpop.eup %12479  ;;  %v3914_v18 = vsel %vm1269_vm3, %v14623_v60, 0.0 }
 0xdd7   :  { %v3917_v48 = vsel %vm1269_vm3, %v14627_v62, 0.0 }
 0xdd8   :  { %4114 = vrot.lane.b32.xlu0 %v17134_v29, %s12842_s15  ;;  %v3897_v29 = vmul.f32 1.442695, %v3882_v12 }
 0xdda   :  { %12481 = vpow2.f32 %v3897_v29 }
 0xde7   :  { %v14631_v14 = vpop.eup %12481 }
 0xde8   :  { %v3920_v25 = vsel %vm1269_vm3, %v14631_v14, 0.0 }
 0xdf7   :  { %3906 = vadd.xlane.f32.xlu0 %v3905_v1 }
 0xdf9   :  { %3909 = vadd.xlane.f32.xlu1 %v3908_v16 }
 0xdfb   :  { %3912 = vadd.xlane.f32.xlu0 %v3911_v46 }
 0xdfd   :  { %3915 = vadd.xlane.f32.xlu1 %v3914_v18 }
 0xdff   :  { %3918 = vadd.xlane.f32.xlu0 %v3917_v48 }
 0xe01   :  { %3921 = vadd.xlane.f32.xlu1 %v3920_v25 }
 0xe12   :  { %4108 = vrot.lane.b32.xlu1 %v14208_v20, %s12842_s15  ;;  %v4117_v20 = vpop.permute.xlu1 %4116 }
 0xe15   :  { %4110 = vrot.lane.b32.xlu0 %v17136_v55, %s12842_s15  ;;  %v4119_v55 = vpop.permute.xlu0 %4118 }
 0xe16   :  { %4094 = vrot.lane.b32.xlu1 %v17140_v6, %s12842_s15 }
 0xe19   :  { %4092 = vrot.lane.b32.xlu0 %v14235_v54, %s12842_s15 }
 0xe1a   :  { %4098 = vrot.lane.b32.xlu1 %v17142_v32, %s12842_s15 }
 0xe1d   :  { %4096 = vrot.lane.b32.xlu0 %v14241_v15, %s12842_s15 }
 0xe1e   :  { %4102 = vrot.lane.b32.xlu1 %v17144_v35, %s12842_s15 }
 0xe21   :  { %4100 = vrot.lane.b32.xlu0 %v14248_v51, %s12842_s15 }
 0xe22   :  { %4106 = vrot.lane.b32.xlu1 %v17145_v61, %s12842_s15 }
 0xe25   :  { %4104 = vrot.lane.b32.xlu0 %v14255_v4, %s12842_s15 }
 0xe4b   :  { %v3904_v54 = vpop.xlane.xlu0 %3903 }
 0xe4c   :  { %12483 = vrcp.f32 %v3904_v54 }
 0xe4d   :  { %v3901_v6 = vpop.xlane.xlu1 %3900 }
 0xe4e   :  { %12485 = vrcp.f32 %v3901_v6 }
 0xe4f   :  { %v4115_v51 = vpop.permute.xlu0 %4114 }
 0xe51   :  { %v4113_v4 = vpop.permute.xlu1 %4112 }
 0xe59   :  { %v12484_v32 = vpop.eup %12483 }
 0xe5a   :  { %v3932_v35 = vmul.f32 %v12484_v32, %v14601_v63 }
 0xe5b   :  { %v12486_v15 = vpop.eup %12485 }
 0xe5c   :  { %v3931_v7 = vmul.f32 %v12486_v15, %v14605_v41 }
 0xe5e   :  { %11462 = vmatprep.mubr.msk.f32.mxu1 %vm1269_vm3, %v3931_v7 }
 0xe5f   :  { %11463 = vmatmul.mubr.msk.f32.vlgmr.msra.gmra.mxu1 %vm1269_vm3, %v3932_v35 }
 0xe60   :  { %11475 = vmatpush3.xpose.msk.msra.mxu1 %vm1107_vm2, %v14567_v39 }
 0xe61   :  { %11476 = vmatprep.subr.msk.mxu1 %vm1107_vm2, %v14599_v38 }
 0xe64   :  { %11477 = vmatpush3.xpose.msk.msra.mxu1 %vm1107_vm2, %v14599_v38 }
 0xe65   :  { %11478 = vmatprep.subr.msk.mxu1 %vm1107_vm2, %v4119_v55 }
 0xe68   :  { %11479 = vmatpush3.xpose.msk.msra.mxu1 %vm1107_vm2, %v4119_v55 }
 0xe69   :  { %11480 = vmatprep.subr.msk.mxu1 %vm1107_vm2, %v4117_v20 }
 0xe6c   :  { %11481 = vmatpush3.xpose.msk.msra.mxu1 %vm1107_vm2, %v4117_v20 }
 0xe6d   :  { %11482 = vmatprep.subr.msk.mxu1 %vm1107_vm2, %v4115_v51 }
 0xe70   :  { %11483 = vmatpush3.xpose.msk.msra.mxu1 %vm1107_vm2, %v4115_v51 }
 0xe71   :  { %11484 = vmatprep.subr.msk.mxu1 %vm1107_vm2, %v4113_v4 }
 0xe74   :  { %11485 = vmatpush3.xpose.msk.msra.mxu1 %vm1107_vm2, %v4113_v4 }
 0xe80   :  { %v3907_v61 = vpop.xlane.xlu0 %3906 }
 0xe81   :  { %12487 = vrcp.f32 %v3907_v61 }
 0xe82   :  { %v3910_v39 = vpop.xlane.xlu1 %3909 }
 0xe83   :  { %12489 = vrcp.f32 %v3910_v39 }
 0xe84   :  { %v3913_v38 = vpop.xlane.xlu0 %3912 }
 0xe85   :  { %12491 = vrcp.f32 %v3913_v38 }
 0xe86   :  { %v3916_v63 = vpop.xlane.xlu1 %3915 }
 0xe87   :  { %12493 = vrcp.f32 %v3916_v63 }
 0xe88   :  { %v3919_v41 = vpop.xlane.xlu0 %3918 }
 0xe89   :  { %12495 = vrcp.f32 %v3919_v41 }
 0xe8a   :  { %v3922_v53 = vpop.xlane.xlu1 %3921 }
 0xe8b   :  { %12497 = vrcp.f32 %v3922_v53 }
 0xe8c   :  { %v4111_v17 = vpop.permute.xlu0 %4110 }
 0xe8d   :  { %11486 = vmatprep.subr.msk.mxu1 %vm1107_vm2, %v4111_v17 }
 0xe8e   :  { %v12488_v49 = vpop.eup %12487  ;;  %11487 = vmatpush3.xpose.msk.msra.mxu1 %vm1107_vm2, %v4111_v17  ;;  %v4109_v13 = vpop.permute.xlu1 %4108 }
 0xe8f   :  { %11488 = vmatprep.subr.msk.mxu1 %vm1107_vm2, %v4109_v13  ;;  %v3933_v34 = vmul.f32 %v12488_v49, %v14613_v37 }
 0xe90   :  { %v12490_v31 = vpop.eup %12489  ;;  %v4093_v29 = vpop.permute.xlu0 %4092 }
 0xe91   :  { %11465 = vmatprep.mubr.msk.f32.mxu1 %vm1269_vm3, %v3933_v34  ;;  %v3934_v58 = vmul.f32 %v12490_v31, %v14615_v5 }
 0xe92   :  { %v12492_v56 = vpop.eup %12491  ;;  %11489 = vmatpush3.xpose.msk.msra.mxu1 %vm1107_vm2, %v4109_v13  ;;  %v4095_v5 = vpop.permute.xlu1 %4094 }
 0xe93   :  { %11466 = vmatmul.mubr.msk.f32.gmra.mxu1 %vm1269_vm3, %v3934_v58  ;;  %v3935_v30 = vmul.f32 %v12492_v56, %v14619_v21 }
 0xe94   :  { %v12494_v12 = vpop.eup %12493  ;;  %v4097_v48 = vpop.permute.xlu0 %4096 }
 0xe95   :  { %11468 = vmatprep.mubr.msk.f32.mxu1 %vm1269_vm3, %v3935_v30  ;;  %v3936_v1 = vmul.f32 %v12494_v12, %v14623_v60 }
 0xe96   :  { %v12496_v16 = vpop.eup %12495  ;;  %v4099_v21 = vpop.permute.xlu1 %4098 }
 0xe97   :  { %11469 = vmatmul.mubr.msk.f32.gmra.mxu1 %vm1269_vm3, %v3936_v1  ;;  %v3937_v37 = vmul.f32 %v12496_v16, %v14627_v62 }
 0xe98   :  { %v12498_v46 = vpop.eup %12497  ;;  %v4101_v60 = vpop.permute.xlu0 %4100 }
 0xe99   :  { %11471 = vmatprep.mubr.msk.f32.mxu1 %vm1269_vm3, %v3937_v37  ;;  %v3938_v18 = vmul.f32 %v12498_v46, %v14631_v14 }
 0xe9a   :  { %v4103_v62 = vpop.permute.xlu1 %4102 }
 0xe9b   :  { %11472 = vmatmul.mubr.msk.f32.gmra.mxu1 %vm1269_vm3, %v3938_v18 }
 0xe9c   :  { %11490 = vmatprep.mubr.msk.f32.mxu1 %vm1107_vm2, %v4093_v29  ;;  %v4105_v25 = vpop.permute.xlu0 %4104 }
 0xe9e   :  { %v4107_v14 = vpop.permute.xlu1 %4106 }
 0xe9f   :  { %11491 = vmatmul.mubr.msk.f32.vlgmr.msra.gmra.mxu1 %vm1107_vm2, %v4095_v5 }
 0xea0   :  { %11493 = vmatprep.mubr.msk.f32.mxu1 %vm1107_vm2, %v4097_v48 }
 0xea3   :  { %11494 = vmatmul.mubr.msk.f32.gmra.mxu1 %vm1107_vm2, %v4099_v21 }
 0xea4   :  { %11496 = vmatprep.mubr.msk.f32.mxu1 %vm1107_vm2, %v4101_v60 }
 0xea7   :  { %11497 = vmatmul.mubr.msk.f32.gmra.mxu1 %vm1107_vm2, %v4103_v62 }
 0xea8   :  { %11499 = vmatprep.mubr.msk.f32.mxu1 %vm1107_vm2, %v4105_v25 }
 0xeab   :  { %11500 = vmatmul.mubr.msk.f32.gmra.mxu1 %vm1107_vm2, %v4107_v14 }
 0xf1f   :  { %v14699_v55 = vpop.f32.mrf.mxu1 }
 0xf21   :  { %v14701_v20 = vpop.f32.mrf.mxu1 }
 0xf53   :  { %v14703_v54 = vpop.f32.mrf.mxu1 }
 0xf55   :  { %v14705_v6 = vpop.f32.mrf.mxu1 }
 0xf57   :  { %v14707_v32 = vpop.f32.mrf.mxu1 }
 0xf59   :  { %v14709_v15 = vpop.f32.mrf.mxu1 }
 0xf5b   :  { %v14711_v7 = vpop.f32.mrf.mxu1 }
 0xf5d   :  { %v14713_v35 = vpop.f32.mrf.mxu1 }
 0xf5f   :  { %v11492_v51 = vpop.f32.mrf.mxu1 }
 0xf60   :  { %v4262_v4 = vmul.f32 0.35355338, %v11492_v51 }
 0xf61   :  { %v4222_v61 = vpop.f32.mrf.mxu1 }
 0xf62   :  { %v4261_v39 = vmul.f32 0.35355338, %v4222_v61  ;;  %v4272_v38 = vsel %vm1269_vm3, %v4262_v4, -inf }
 0xf63   :  { %4273 = vmax.xlane.f32.xlu1 %v4272_v38  ;;  %v11495_v63 = vpop.f32.mrf.mxu1 }
 0xf64   :  { %v4269_v41 = vsel %vm1269_vm3, %v4261_v39, -inf  ;;  %v4264_v13 = vmul.f32 0.35355338, %v11495_v63 }
 0xf65   :  { %4270 = vmax.xlane.f32.xlu0 %v4269_v41  ;;  %v4232_v53 = vpop.f32.mrf.mxu1 }
 0xf66   :  { %v4263_v17 = vmul.f32 0.35355338, %v4232_v53  ;;  %v4278_v30 = vsel %vm1269_vm3, %v4264_v13, -inf }
 0xf67   :  { %v11498_v49 = vpop.f32.mrf.mxu1 }
 0xf68   :  { %v4275_v34 = vsel %vm1269_vm3, %v4263_v17, -inf  ;;  %v4266_v56 = vmul.f32 0.35355338, %v11498_v49 }
 0xf69   :  { %4276 = vmax.xlane.f32.xlu0 %v4275_v34  ;;  %v4242_v31 = vpop.f32.mrf.mxu1 }
 0xf6a   :  { %v4265_v58 = vmul.f32 0.35355338, %v4242_v31  ;;  %v4284_v16 = vsel %vm1269_vm3, %v4266_v56, -inf }
 0xf6b   :  { %v11501_v29 = vpop.f32.mrf.mxu1 }
 0xf6c   :  { %v4281_v12 = vsel %vm1269_vm3, %v4265_v58, -inf  ;;  %v4268_v1 = vmul.f32 0.35355338, %v11501_v29 }
 0xf6d   :  { %4279 = vmax.xlane.f32.xlu0 %v4278_v30  ;;  %4282 = vmax.xlane.f32.xlu1 %v4281_v12  ;;  %v4252_v46 = vpop.f32.mrf.mxu1 }
 0xf6e   :  { %v4290_v37 = vsel %vm1269_vm3, %v4268_v1, -inf  ;;  %v14730_v5 = vmul.f32 0.35355338, %v4252_v46 }
 0xf70   :  { %v4287_v18 = vsel %vm1269_vm3, %v14730_v5, -inf }
 0xf71   :  { %4285 = vmax.xlane.f32.xlu0 %v4284_v16 }
 0xf75   :  { %4291 = vmax.xlane.f32.xlu0 %v4290_v37 }
 0xf7e   :  { %4371 = vrot.lane.b32.xlu1 %v17101_v43, %s12842_s15 }
 0xf82   :  { %4367 = vrot.lane.b32.xlu1 %v17103_v8, %s12842_s15 }
 0xf8b   :  { %4369 = vrot.lane.b32.xlu0 %v14028_v57, %s12842_s15 }
 0xf8f   :  { %4363 = vrot.lane.b32.xlu0 %v17105_v9, %s12842_s15 }
 0xfa6   :  { %4288 = vmax.xlane.f32.xlu1 %v4287_v18 }
 0xfb7   :  { %4365 = vrot.lane.b32.xlu1 %v14038_v44, %s12842_s15 }
 0xfbb   :  { %4361 = vrot.lane.b32.xlu1 %v14047_v52, %s12842_s15 }
 0xfec   :  { %v4274_v43 = vpop.xlane.xlu1 %4273 }
 0xfed   :  { %v4294_v8 = vsub.f32 %v4262_v4, %v4274_v43 }
 0xfee   :  { %v4271_v48 = vpop.xlane.xlu0 %4270 }
 0xfef   :  { %v4303_v57 = vmul.f32 1.442695, %v4294_v8  ;;  %v4293_v21 = vsub.f32 %v4261_v39, %v4271_v48 }
 0xff1   :  { %12499 = vpow2.f32 %v4303_v57  ;;  %v4301_v9 = vmul.f32 1.442695, %v4293_v21 }
 0xff2   :  { %v4277_v60 = vpop.xlane.xlu0 %4276 }
 0xff3   :  { %12501 = vpow2.f32 %v4301_v9  ;;  %v4295_v62 = vsub.f32 %v4263_v17, %v4277_v60 }
 0xff5   :  { %v4305_v25 = vmul.f32 1.442695, %v4295_v62 }
 0xff6   :  { %v4280_v14 = vpop.xlane.xlu0 %4279  ;;  %v4283_v51 = vpop.xlane.xlu1 %4282 }
 0xff7   :  { %12503 = vpow2.f32 %v4305_v25  ;;  %v4296_v61 = vsub.f32 %v4264_v13, %v4280_v14  ;;  %v4297_v38 = vsub.f32 %v4265_v58, %v4283_v51 }
 0xff9   :  { %v4307_v44 = vmul.f32 1.442695, %v4296_v61  ;;  %v4309_v63 = vmul.f32 1.442695, %v4297_v38 }
 0xffa   :  { %v4286_v41 = vpop.xlane.xlu0 %4285  ;;  %v4372_v52 = vpop.permute.xlu1 %4371 }
 0xffb   :  { %12505 = vpow2.f32 %v4307_v44  ;;  %v4298_v4 = vsub.f32 %v4266_v56, %v4286_v41  ;;  %11502 = vmatprep.subr.mxu0 %v4372_v52 }
 0xffc   :  { %12507 = vpow2.f32 %v4309_v63  ;;  %11503 = vmatpush3.msra.mxu0 %v4372_v52 }
 0xffd   :  { %v4311_v39 = vmul.f32 1.442695, %v4298_v4 }
 0xffe   :  { %v14738_v53 = vpop.eup %12499  ;;  %v4292_v49 = vpop.xlane.xlu0 %4291 }
 0xfff   :  { %12509 = vpow2.f32 %v4311_v39  ;;  %v4300_v17 = vsub.f32 %v4268_v1, %v4292_v49  ;;  %v4320_v34 = vsel %vm1269_vm3, %v14738_v53, 0.0  ;;  %v4368_v12 = vpop.permute.xlu1 %4367 }
0x1000   :  { %v14742_v13 = vpop.eup %12501  ;;  %4321 = vadd.xlane.f32.xlu0 %v4320_v34 }
0x1001   :  { %v4315_v31 = vmul.f32 1.442695, %v4300_v17  ;;  %v4317_v58 = vsel %vm1269_vm3, %v14742_v13, 0.0  ;;  %v4633_v17 = vld [vmem:[#allocation2 + $0x90] sm:$0xff] }
0x1002   :  { %v4370_v56 = vpop.permute.xlu0 %4369  ;;  %4318 = vadd.xlane.f32.xlu1 %v4317_v58 }
0x1003   :  { %12511 = vpow2.f32 %v4315_v31  ;;  %11504 = vmatprep.subr.mxu0 %v4370_v56  ;;  %v4632_v31 = vld [vmem:[#allocation2 + $0x88] sm:$0xff] }
0x1004   :  { %v14746_v30 = vpop.eup %12503  ;;  %11505 = vmatpush3.msra.mxu0 %v4370_v56 }
0x1005   :  { %11506 = vmatprep.subr.mxu0 %v4368_v12  ;;  %v4323_v29 = vsel %vm1269_vm3, %v14746_v30, 0.0 }
0x1006   :  { %4324 = vadd.xlane.f32.xlu1 %v4323_v29  ;;  %11507 = vmatpush3.msra.mxu0 %v4368_v12  ;;  %v4364_v62 = vpop.permute.xlu0 %4363  ;;  %v4631_v29 = vld [vmem:[#allocation2 + $0x80] sm:$0xff] }
0x1008   :  { %v14750_v1 = vpop.eup %12505 }
0x1009   :  { %v14752_v16 = vpop.eup %12507  ;;  %v4326_v37 = vsel %vm1269_vm3, %v14750_v1, 0.0 }
0x100a   :  { %4327 = vadd.xlane.f32.xlu0 %v4326_v37  ;;  %v4329_v46 = vsel %vm1269_vm3, %v14752_v16, 0.0 }
0x100b   :  { %4330 = vadd.xlane.f32.xlu1 %v4329_v46 }
0x100c   :  { %v14758_v18 = vpop.eup %12509 }
0x100d   :  { %v4332_v43 = vsel %vm1269_vm3, %v14758_v18, 0.0 }
0x100e   :  { %4333 = vadd.xlane.f32.xlu0 %v4332_v43 }
0x1010   :  { %v14762_v8 = vpop.eup %12511 }
0x1011   :  { %v4338_v48 = vsel %vm1269_vm3, %v14762_v8, 0.0 }
0x1012   :  { %4339 = vadd.xlane.f32.xlu0 %v4338_v48 }
0x1028   :  { %4359 = vrot.lane.b32.xlu0 %v17108_v27, %s12842_s15 }
0x102c   :  { %2757 = vrot.lane.b32.xlu0 %v14079_v23, %s12839_s19 }
0x102f   :  { %v4289_v57 = vpop.xlane.xlu1 %4288 }
0x1030   :  { %v4299_v21 = vsub.f32 %v14730_v5, %v4289_v57  ;;  %2789 = vrot.lane.b32.xlu0 %v14095_v11, %s12843_s24  ;;  %v17173_v57 = vld [vmem:[#allocation59_spill] sm:$0xff] }
0x1032   :  { %v4313_v9 = vmul.f32 1.442695, %v4299_v21 }
0x1033   :  { %v4366_v60 = vpop.permute.xlu1 %4365 }
0x1034   :  { %12513 = vpow2.f32 %v4313_v9  ;;  %2821 = vrot.lane.b32.xlu0 %v14265_v10, %s12844_s25  ;;  %11508 = vmatprep.subr.mxu0 %v4366_v60  ;;  %v17165_v10 = vld [vmem:[#allocation45_spill] sm:$0xff] }
0x1035   :  { %11509 = vmatpush3.msra.mxu0 %v4366_v60 }
0x1036   :  { %11510 = vmatprep.subr.mxu0 %v4364_v62 }
0x1037   :  { %11511 = vmatpush3.msra.mxu0 %v4364_v62  ;;  %v4362_v27 = vpop.permute.xlu1 %4361  ;;  %v17174_v62 = vld [vmem:[#allocation54_spill] sm:$0xff] }
0x1038   :  { %2761 = vrot.lane.b32.xlu0 %v14083_v33, %s12839_s19  ;;  %11512 = vmatprep.subr.mxu0 %v4362_v27  ;;  %v17159_v33 = vld [vmem:[#allocation60_spill] sm:$0xff] }
0x1039   :  { %11513 = vmatpush3.msra.mxu0 %v4362_v27 }
0x103c   :  { %2793 = vrot.lane.b32.xlu0 %v14099_v45, %s12843_s24  ;;  %v17160_v45 = vld [vmem:[#allocation37_spill] sm:$0xff] }
0x1040   :  { %2825 = vrot.lane.b32.xlu0 %v14269_v36, %s12844_s25  ;;  %v17166_v36 = vld [vmem:[#allocation44_spill] sm:$0xff] }
0x1041   :  { %v14781_v23 = vpop.eup %12513 }
0x1042   :  { %v4335_v11 = vsel %vm1269_vm3, %v14781_v23, 0.0 }
0x1043   :  { %4336 = vadd.xlane.f32.xlu1 %v4335_v11  ;;  %v17175_v11 = vld [vmem:[#allocation53_spill] sm:$0xff] }
0x1044   :  { %2765 = vrot.lane.b32.xlu0 %v14087_v0, %s12839_s19  ;;  %v17161_v0 = vld [vmem:[#allocation51_spill] sm:$0xff] }
0x1048   :  { %2797 = vrot.lane.b32.xlu0 %v14103_v22, %s12843_s24  ;;  %v17162_v22 = vld [vmem:[#allocation43_spill] sm:$0xff] }
0x104c   :  { %2829 = vrot.lane.b32.xlu0 %v14273_v28, %s12844_s25  ;;  %v17167_v28 = vld [vmem:[#allocation47_spill] sm:$0xff] }
0x1050   :  { %2769 = vrot.lane.b32.xlu0 %v14091_v19, %s12839_s19  ;;  %v17163_v19 = vld [vmem:[#allocation46_spill] sm:$0xff] }
0x1054   :  { %2801 = vrot.lane.b32.xlu0 %v17159_v33, %s12843_s24  ;;  %4357 = vrot.lane.b32.xlu1 %v14054_v24, %s12842_s15  ;;  %v17164_v24 = vld [vmem:[#allocation56_spill] sm:$0xff] }
0x1058   :  { %2833 = vrot.lane.b32.xlu0 %v17160_v45, %s12844_s25  ;;  %2759 = vrot.lane.b32.xlu1 %v17161_v0, %s12839_s19 }
0x105c   :  { %4518 = vrot.lane.b32.xlu0 %v14573_v2, %s12839_s19  ;;  %2791 = vrot.lane.b32.xlu1 %v17162_v22, %s12843_s24  ;;  %v17168_v2 = vld [vmem:[#allocation41_spill] sm:$0xff] }
0x1060   :  { %4550 = vrot.lane.b32.xlu0 %v14701_v20, %s12843_s24  ;;  %2823 = vrot.lane.b32.xlu1 %v17163_v19, %s12844_s25  ;;  %v17171_v20 = vld [vmem:[#allocation39_spill] sm:$0xff] }
0x1064   :  { %4522 = vrot.lane.b32.xlu0 %v14577_v47, %s12839_s19  ;;  %2763 = vrot.lane.b32.xlu1 %v17164_v24, %s12839_s19  ;;  %v17169_v47 = vld [vmem:[#allocation50_spill] sm:$0xff] }
0x1068   :  { %4554 = vrot.lane.b32.xlu0 %v14705_v6, %s12843_s24  ;;  %2795 = vrot.lane.b32.xlu1 %v17165_v10, %s12843_s24  ;;  %v17172_v6 = vld [vmem:[#allocation48_spill] sm:$0xff] }
0x106c   :  { %4526 = vrot.lane.b32.xlu0 %v14581_v50, %s12839_s19  ;;  %2827 = vrot.lane.b32.xlu1 %v17166_v36, %s12844_s25  ;;  %v17170_v50 = vld [vmem:[#allocation49_spill] sm:$0xff]  ;;  %v17176_v36 = vld [vmem:[#allocation40_spill] sm:$0xff] }
0x1070   :  { %4558 = vrot.lane.b32.xlu0 %v14709_v15, %s12843_s24  ;;  %2767 = vrot.lane.b32.xlu1 %v17167_v28, %s12839_s19 }
0x1074   :  { %4530 = vrot.lane.b32.xlu0 %v14585_v40, %s12839_s19  ;;  %2799 = vrot.lane.b32.xlu1 %v17168_v2, %s12843_s24  ;;  %v17177_v2 = vld [vmem:[#allocation42_spill] sm:$0xff] }
0x1078   :  { %4562 = vrot.lane.b32.xlu0 %v14713_v35, %s12843_s24  ;;  %2831 = vrot.lane.b32.xlu1 %v17169_v47, %s12844_s25 }
0x107c   :  { %2771 = vrot.lane.b32.xlu1 %v17170_v50, %s12839_s19 }
0x1080   :  { %2803 = vrot.lane.b32.xlu1 %v17171_v20, %s12843_s24 }
0x1084   :  { %2835 = vrot.lane.b32.xlu1 %v17172_v6, %s12844_s25 }
0x1088   :  { %4520 = vrot.lane.b32.xlu1 %v14571_v42, %s12839_s19 }
0x1089   :  { %v4322_v15 = vpop.xlane.xlu0 %4321 }
0x108b   :  { %v4319_v40 = vpop.xlane.xlu1 %4318 }
0x108c   :  { %12515 = vrcp.f32 %v4319_v40  ;;  %4552 = vrot.lane.b32.xlu1 %v14699_v55, %s12843_s24 }
0x108d   :  { %12517 = vrcp.f32 %v4322_v15 }
0x1090   :  { %4524 = vrot.lane.b32.xlu1 %v14575_v26, %s12839_s19 }
0x1093   :  { %v4328_v35 = vpop.xlane.xlu0 %4327 }
0x1094   :  { %4556 = vrot.lane.b32.xlu1 %v14703_v54, %s12843_s24  ;;  %v4325_v54 = vpop.xlane.xlu1 %4324 }
0x1095   :  { %12519 = vrcp.f32 %v4325_v54 }
0x1096   :  { %12521 = vrcp.f32 %v4328_v35 }
0x1097   :  { %v4334_v5 = vpop.xlane.xlu0 %4333 }
0x1098   :  { %4528 = vrot.lane.b32.xlu1 %v14579_v3, %s12839_s19  ;;  %v4331_v61 = vpop.xlane.xlu1 %4330 }
0x1099   :  { %v12516_v25 = vpop.eup %12515  ;;  %12523 = vrcp.f32 %v4331_v61 }
0x109a   :  { %v4349_v42 = vmul.f32 %v12516_v25, %v14742_v13  ;;  %12525 = vrcp.f32 %v4334_v5 }
0x109b   :  { %v4340_v14 = vpop.xlane.xlu0 %4339 }
0x109c   :  { %4560 = vrot.lane.b32.xlu1 %v14707_v32, %s12843_s24  ;;  %11518 = vmatprep.mubr.msk.f32.mxu0 %vm1269_vm3, %v4349_v42  ;;  %12527 = vrcp.f32 %v4340_v14  ;;  %v17178_v14 = vld [vmem:[#allocation58_spill] sm:$0xff] }
0x109f   :  { %v4360_v55 = vpop.permute.xlu0 %4359 }
0x10a0   :  { %4532 = vrot.lane.b32.xlu1 %v14583_v59, %s12839_s19  ;;  %11514 = vmatprep.subr.mxu0 %v4360_v55  ;;  %v12518_v59 = vpop.eup %12517 }
0x10a1   :  { %11515 = vmatpush3.msra.mxu0 %v4360_v55  ;;  %v4350_v4 = vmul.f32 %v12518_v59, %v14738_v53 }
0x10a2   :  { %v12520_v63 = vpop.eup %12519 }
0x10a3   :  { %v2758_v26 = vpop.permute.xlu0 %2757  ;;  %v12522_v39 = vpop.eup %12521  ;;  %v4351_v49 = vmul.f32 %v12520_v63, %v14746_v30  ;;  %v17180_v63 = vld [vmem:[#allocation52_spill] sm:$0xff] }
0x10a4   :  { %4564 = vrot.lane.b32.xlu1 %v14711_v7, %s12843_s24  ;;  %v4634_v7 = vld [vmem:[#allocation2 + $0x98] sm:$0xff]  ;;  %v4352_v56 = vmul.f32 %v12522_v39, %v14750_v1  ;;  %v2845_v21 = vsel %vm1107_vm2, %v17173_v57, %v2758_v26  ;;  %v17179_v26 = vld [vmem:[#allocation57_spill] sm:$0xff]  ;;  %v17181_v57 = vld [vmem:[#allocation8_spill] sm:$0xff] }
0x10a5   :  { %v4856_v39 = vld [vmem:[#allocation2 + $0xb8] sm:$0xff] }
0x10a6   :  { %v12524_v34 = vpop.eup %12523  ;;  %11562 = vmatprep.subr.mxu1 %v4856_v39 }
0x10a7   :  { %v2790_v3 = vpop.permute.xlu0 %2789  ;;  %v12526_v53 = vpop.eup %12525  ;;  %v4353_v12 = vmul.f32 %v12524_v34, %v14752_v16  ;;  %11563 = vmatpush3.msra.mxu1 %v4856_v39  ;;  %v4853_v34 = vld [vmem:[#allocation2 + $0xa0] sm:$0xff] }
0x10a8   :  { %v4354_v46 = vmul.f32 %v12526_v53, %v14758_v18  ;;  %v2853_v60 = vsel %vm57_vm0, %v2845_v21, %v2790_v3 }
0x10a9   :  { %v12528_v37 = vpop.eup %12527 }
0x10aa   :  { %v4356_v9 = vmul.f32 %v12528_v37, %v14762_v8 }
0x10ab   :  { %v2822_v51 = vpop.permute.xlu0 %2821 }
0x10ac   :  { %v2862_v18 = vsel %vm2861_vm4, %v2853_v60, %v2822_v51 }
0x10af   :  { %v2762_v38 = vpop.permute.xlu0 %2761 }
0x10b0   :  { %v2847_v33 = vsel %vm1107_vm2, %v17175_v11, %v2762_v38  ;;  %v17183_v11 = vld [vmem:[#allocation10_spill] sm:$0xff] }
0x10b3   :  { %v2794_v32 = vpop.permute.xlu0 %2793 }
0x10b4   :  { %v2855_v8 = vsel %vm57_vm0, %v2847_v33, %v2794_v32 }
0x10b7   :  { %v2826_v41 = vpop.permute.xlu0 %2825 }
0x10b8   :  { %v2864_v19 = vsel %vm2861_vm4, %v2855_v8, %v2826_v41 }
0x10bb   :  { %v2766_v58 = vpop.permute.xlu0 %2765 }
0x10bc   :  { %v2849_v47 = vsel %vm1107_vm2, %v17177_v2, %v2766_v58 }
0x10bf   :  { %v2798_v1 = vpop.permute.xlu0 %2797 }
0x10c0   :  { %v2857_v6 = vsel %vm57_vm0, %v2849_v47, %v2798_v1 }
0x10c3   :  { %v2830_v45 = vpop.permute.xlu0 %2829 }
0x10c4   :  { %v2866_v15 = vsel %vm2861_vm4, %v2857_v6, %v2830_v45  ;;  %v17184_v45 = vld [vmem:[#allocation11_spill] sm:$0xff] }
0x10c7   :  { %v2770_v10 = vpop.permute.xlu0 %2769 }
0x10c8   :  { %v2851_v3 = vsel %vm1107_vm2, %v17179_v26, %v2770_v10  ;;  %v17185_v10 = vld [vmem:[#allocation12_spill] sm:$0xff] }
0x10cb   :  { %v2802_v5 = vpop.permute.xlu0 %2801 }
0x10cc   :  { %v4337_v44 = vpop.xlane.xlu1 %4336  ;;  %v2859_v61 = vsel %vm57_vm0, %v2851_v3, %v2802_v5 }
0x10cd   :  { %12529 = vrcp.f32 %v4337_v44 }
0x10cf   :  { %v2834_v42 = vpop.permute.xlu0 %2833 }
0x10d0   :  { %v4358_v52 = vpop.permute.xlu1 %4357  ;;  %v2868_v32 = vsel %vm2861_vm4, %v2859_v61, %v2834_v42  ;;  %v5053_v61 = vld [vmem:[#allocation2 + $0xd0] sm:$0xff] }
0x10d1   :  { %11516 = vmatprep.subr.mxu0 %v4358_v52 }
0x10d2   :  { %11517 = vmatpush3.msra.mxu0 %v4358_v52 }
0x10d3   :  { %11519 = vmatmul.mubr.msk.f32.vlgmr.msra.gmra.mxu0 %vm1269_vm3, %v4350_v4  ;;  %11530 = vmatprep.subr.mxu0 %v4634_v7  ;;  %v4519_v42 = vpop.permute.xlu0 %4518 }
0x10d4   :  { %11521 = vmatprep.mubr.msk.f32.mxu0 %vm1269_vm3, %v4351_v49  ;;  %v2760_v13 = vpop.permute.xlu1 %2759  ;;  %11531 = vmatpush3.msra.mxu0 %v4634_v7  ;;  %v4855_v49 = vld [vmem:[#allocation2 + $0xb0] sm:$0xff] }
0x10d5   :  { %11532 = vmatprep.subr.mxu0 %v4633_v17  ;;  %v2846_v27 = vsel %vm1107_vm2, %v17174_v62, %v2760_v13  ;;  %11564 = vmatprep.subr.mxu1 %v4855_v49 }
0x10d6   :  { %11533 = vmatpush3.msra.mxu0 %v4633_v17  ;;  %11565 = vmatpush3.msra.mxu1 %v4855_v49  ;;  %v4854_v17 = vld [vmem:[#allocation2 + $0xa8] sm:$0xff] }
0x10d7   :  { %11522 = vmatmul.mubr.msk.f32.gmra.mxu0 %vm1269_vm3, %v4352_v56  ;;  %11534 = vmatprep.subr.mxu0 %v4632_v31  ;;  %v5054_v56 = vld [vmem:[#allocation2 + $0xd8] sm:$0xff] }
0x10d8   :  { %11524 = vmatprep.mubr.msk.f32.mxu0 %vm1269_vm3, %v4353_v12  ;;  %v2792_v30 = vpop.permute.xlu1 %2791  ;;  %11535 = vmatpush3.msra.mxu0 %v4632_v31 }
0x10d9   :  { %11536 = vmatprep.subr.mxu0 %v4631_v29  ;;  %v2854_v0 = vsel %vm57_vm0, %v2846_v27, %v2792_v30  ;;  %11566 = vmatprep.subr.mxu1 %v4854_v17 }
0x10da   :  { %v12530_v43 = vpop.eup %12529  ;;  %11537 = vmatpush3.msra.mxu0 %v4631_v29  ;;  %11567 = vmatpush3.msra.mxu1 %v4854_v17  ;;  %v17189_v17 = vld [vmem:[#allocation33_spill] sm:$0xff] }
0x10db   :  { %11525 = vmatmul.mubr.msk.f32.gmra.mxu0 %vm1269_vm3, %v4354_v46  ;;  %v4355_v16 = vmul.f32 %v12530_v43, %v14781_v23  ;;  %11568 = vmatprep.subr.mxu1 %v4853_v34  ;;  %v14922_v46 = vld [vmem:[%s16964_s3 + $0x5] ss:$0 sm:$0xff] }
0x10dc   :  { %v2824_v48 = vpop.permute.xlu1 %2823  ;;  %11569 = vmatpush3.msra.mxu1 %v4853_v34  ;;  %11594 = vmatprep.subr.mxu0 %v5054_v56  ;;  %v4606_v34 = vsel %vm1107_vm2, %v17189_v17, %v4519_v42 }
0x10dd   :  { %11527 = vmatprep.mubr.msk.f32.mxu0 %vm1269_vm3, %v4355_v16  ;;  %v2863_v22 = vsel %vm2861_vm4, %v2854_v0, %v2824_v48 }
0x10df   :  { %11528 = vmatmul.mubr.msk.f32.gmra.mxu0 %vm1269_vm3, %v4356_v9  ;;  %v17182_v9 = vld [vmem:[#allocation9_spill] sm:$0xff] }
0x10e0   :  { %11538 = vmatprep.mubr.msk.f32.mxu0 %vm375_vm1, %v2862_v18  ;;  %v2764_v23 = vpop.permute.xlu1 %2763 }
0x10e1   :  { %v2848_v28 = vsel %vm1107_vm2, %v17176_v36, %v2764_v23 }
0x10e3   :  { %11539 = vmatmul.mubr.msk.f32.vlgmr.msra.gmra.mxu0 %vm375_vm1, %v2863_v22 }
0x10e4   :  { %11541 = vmatprep.mubr.msk.f32.mxu0 %vm375_vm1, %v2864_v19  ;;  %v2796_v24 = vpop.permute.xlu1 %2795  ;;  %11595 = vmatpush3.msra.mxu0 %v5054_v56 }
0x10e5   :  { %v2856_v50 = vsel %vm57_vm0, %v2848_v28, %v2796_v24  ;;  %v17186_v28 = vld [vmem:[#allocation13_spill] sm:$0xff]  ;;  %11596 = vmatprep.subr.mxu0 %v5053_v61 }
0x10e6   :  { %11597 = vmatpush3.msra.mxu0 %v5053_v61 }
0x10e8   :  { %v2828_v20 = vpop.permute.xlu1 %2827 }
0x10e9   :  { %v2865_v40 = vsel %vm2861_vm4, %v2856_v50, %v2828_v20 }
0x10ea   :  { %11542 = vmatmul.mubr.msk.f32.gmra.mxu0 %vm375_vm1, %v2865_v40  ;;  %v17187_v40 = vld [vmem:[#allocation14_spill] sm:$0xff] }
0x10eb   :  { %11544 = vmatprep.mubr.msk.f32.mxu0 %vm375_vm1, %v2866_v15 }
0x10ec   :  { %v2768_v35 = vpop.permute.xlu1 %2767 }
0x10ed   :  { %v2850_v55 = vsel %vm1107_vm2, %v17178_v14, %v2768_v35  ;;  %v17188_v35 = vld [vmem:[#allocation15_spill] sm:$0xff] }
0x10f0   :  { %v2800_v25 = vpop.permute.xlu1 %2799 }
0x10f1   :  { %v2858_v54 = vsel %vm57_vm0, %v2850_v55, %v2800_v25  ;;  %v4551_v55 = vpop.permute.xlu0 %4550 }
0x10f4   :  { %v2832_v51 = vpop.permute.xlu1 %2831 }
0x10f5   :  { %v2867_v38 = vsel %vm2861_vm4, %v2858_v54, %v2832_v51  ;;  %v4523_v3 = vpop.permute.xlu0 %4522 }
0x10f6   :  { %11545 = vmatmul.mubr.msk.f32.gmra.mxu0 %vm375_vm1, %v2867_v38  ;;  %v5052_v38 = vld [vmem:[#allocation2 + $0xc8] sm:$0xff] }
0x10f7   :  { %11547 = vmatprep.mubr.msk.f32.mxu0 %vm375_vm1, %v2868_v32  ;;  %v5051_v32 = vld [vmem:[#allocation2 + $0xc0] sm:$0xff]  ;;  %11598 = vmatprep.subr.mxu0 %v5052_v38 }
0x10f8   :  { %v2772_v44 = vpop.permute.xlu1 %2771  ;;  %11599 = vmatpush3.msra.mxu0 %v5052_v38 }
0x10f9   :  { %v2852_v41 = vsel %vm1107_vm2, %v17180_v63, %v2772_v44  ;;  %v4555_v51 = vpop.permute.xlu0 %4554  ;;  %11600 = vmatprep.subr.mxu0 %v5051_v32 }
0x10fa   :  { %11601 = vmatpush3.msra.mxu0 %v5051_v32 }
0x10fc   :  { %v2804_v59 = vpop.permute.xlu1 %2803 }
0x10fd   :  { %v2860_v52 = vsel %vm57_vm0, %v2852_v41, %v2804_v59  ;;  %v4527_v59 = vpop.permute.xlu0 %4526 }
0x1100   :  { %v2836_v7 = vpop.permute.xlu1 %2835 }
0x1101   :  { %v2869_v4 = vsel %vm2861_vm4, %v2860_v52, %v2836_v7  ;;  %v4559_v41 = vpop.permute.xlu0 %4558 }
0x1102   :  { %11548 = vmatmul.mubr.msk.f32.gmra.mxu0 %vm375_vm1, %v2869_v4 }
0x1104   :  { %v4521_v25 = vpop.permute.xlu1 %4520 }
0x1105   :  { %v4531_v7 = vpop.permute.xlu0 %4530 }
0x1108   :  { %v4553_v14 = vpop.permute.xlu1 %4552 }
0x1109   :  { %v4563_v39 = vpop.permute.xlu0 %4562 }
0x110c   :  { %v4525_v26 = vpop.permute.xlu1 %4524 }
0x1110   :  { %v4557_v54 = vpop.permute.xlu1 %4556 }
0x1114   :  { %v4529_v44 = vpop.permute.xlu1 %4528 }
0x1118   :  { %v4561_v63 = vpop.permute.xlu1 %4560 }
0x111c   :  { %v4533_v52 = vpop.permute.xlu1 %4532 }
0x1120   :  { %v4565_v4 = vpop.permute.xlu1 %4564 }
0x1193   :  { %v11520_v13 = vpop.f32.mrf.mxu0 }
0x1194   :  { %4584 = vrot.lane.b32.xlu1 %v11520_v13, %s12844_s25  ;;  %v4614_v13 = vsel %vm57_vm0, %v4606_v34, %v4551_v55 }
0x1195   :  { %v4471_v31 = vpop.f32.mrf.mxu0 }
0x1196   :  { %4582 = vrot.lane.b32.xlu0 %v4471_v31, %s12844_s25  ;;  %v17190_v31 = vld [vmem:[#allocation55_spill] sm:$0xff] }
0x1197   :  { %v11523_v58 = vpop.f32.mrf.mxu0 }
0x1198   :  { %4588 = vrot.lane.b32.xlu1 %v11523_v58, %s12844_s25  ;;  %v4607_v58 = vsel %vm1107_vm2, %v17190_v31, %v4521_v25  ;;  %v17205_v31 = vld [vmem:[#allocation16_spill] sm:$0xff] }
0x1199   :  { %v4481_v53 = vpop.f32.mrf.mxu0 }
0x119a   :  { %4586 = vrot.lane.b32.xlu0 %v4481_v53, %s12844_s25  ;;  %v4615_v53 = vsel %vm57_vm0, %v4607_v58, %v4553_v14 }
0x119b   :  { %v11526_v12 = vpop.f32.mrf.mxu0 }
0x119c   :  { %4592 = vrot.lane.b32.xlu1 %v11526_v12, %s12844_s25 }
0x119d   :  { %v4491_v29 = vpop.f32.mrf.mxu0 }
0x119e   :  { %4590 = vrot.lane.b32.xlu0 %v4491_v29, %s12844_s25 }
0x119f   :  { %v11529_v30 = vpop.f32.mrf.mxu0 }
0x11a0   :  { %4596 = vrot.lane.b32.xlu1 %v11529_v30, %s12844_s25 }
0x11a1   :  { %v4501_v37 = vpop.f32.mrf.mxu0 }
0x11a2   :  { %4594 = vrot.lane.b32.xlu0 %v4501_v37, %s12844_s25  ;;  %v17191_v37 = vld [vmem:[#allocation29_spill] sm:$0xff] }
0x11a3   :  { %v11540_v43 = vpop.f32.mrf.mxu0 }
0x11a4   :  { %v4763_v1 = vadd.f32 %v11540_v43, %v14922_v46  ;;  %v4608_v43 = vsel %vm1107_vm2, %v17191_v37, %v4523_v3  ;;  %v5259_v3 = vld [vmem:[#allocation2 + $0xf0] sm:$0xff] }
0x11a5   :  { %v4757_v16 = vpop.f32.mrf.mxu0 }
0x11a6   :  { %v4758_v48 = vadd.f32 %v14922_v46, %v4757_v16  ;;  %v14930_v60 = vadd.f32 %v4763_v1, %v17182_v9  ;;  %v4616_v1 = vsel %vm57_vm0, %v4608_v43, %v4555_v51  ;;  %v17192_v16 = vld [vmem:[#allocation35_spill] sm:$0xff]  ;;  %v5257_v51 = vld [vmem:[#allocation2 + $0xe0] sm:$0xff] }
0x11a7   :  { %v17208_v43 = vld [vmem:[#allocation19_spill] sm:$0xff] }
0x11a8   :  { %v14927_v21 = vadd.f32 %v4758_v48, %v17181_v57  ;;  %v4609_v48 = vsel %vm1107_vm2, %v17192_v16, %v4525_v26 }
0x11a9   :  { %v4617_v9 = vsel %vm57_vm0, %v4609_v48, %v4557_v54  ;;  %v5258_v54 = vld [vmem:[#allocation2 + $0xe8] sm:$0xff] }
0x11aa   :  { %v11543_v18 = vpop.f32.mrf.mxu0  ;;  %11570 = vmatprep.mubr.msk.f32.mxu1 %vm375_vm1, %v14927_v21 }
0x11ab   :  { %11571 = vmatmul.mubr.msk.f32.vlgmr.msra.gmra.mxu1 %vm375_vm1, %v14930_v60  ;;  %v4773_v62 = vadd.f32 %v11543_v18, %v14922_v46 }
0x11ac   :  { %v4767_v27 = vpop.f32.mrf.mxu0 }
0x11ad   :  { %v4768_v23 = vadd.f32 %v14922_v46, %v4767_v27  ;;  %v14942_v0 = vadd.f32 %v4773_v62, %v17184_v45 }
0x11af   :  { %v14939_v33 = vadd.f32 %v4768_v23, %v17183_v11  ;;  %v17193_v23 = vld [vmem:[#allocation25_spill] sm:$0xff] }
0x11b0   :  { %v4610_v11 = vsel %vm1107_vm2, %v17193_v23, %v4527_v59 }
0x11b1   :  { %11573 = vmatprep.mubr.msk.f32.mxu1 %vm375_vm1, %v14939_v33  ;;  %v4618_v45 = vsel %vm57_vm0, %v4610_v11, %v4559_v41 }
0x11b2   :  { %11574 = vmatmul.mubr.msk.f32.gmra.mxu1 %vm375_vm1, %v14942_v0 }
0x11b6   :  { %v11546_v8 = vpop.f32.mrf.mxu0 }
0x11b7   :  { %v4783_v22 = vadd.f32 %v11546_v8, %v14922_v46  ;;  %v17194_v8 = vld [vmem:[#allocation31_spill] sm:$0xff] }
0x11b8   :  { %v4777_v19 = vpop.f32.mrf.mxu0 }
0x11b9   :  { %v4778_v24 = vadd.f32 %v14922_v46, %v4777_v19  ;;  %v14954_v2 = vadd.f32 %v4783_v22, %v17186_v28  ;;  %v4611_v22 = vsel %vm1107_vm2, %v17194_v8, %v4529_v44 }
0x11bb   :  { %v14951_v36 = vadd.f32 %v4778_v24, %v17185_v10  ;;  %v5260_v24 = vld [vmem:[#allocation2 + $0xf8] sm:$0xff]  ;;  %v4619_v10 = vsel %vm57_vm0, %v4611_v22, %v4561_v63  ;;  %v17211_v22 = vld [vmem:[#allocation22_spill] sm:$0xff] }
0x11bc   :  { %11626 = vmatprep.subr.mxu1 %v5260_v24 }
0x11bd   :  { %11576 = vmatprep.mubr.msk.f32.mxu1 %vm375_vm1, %v14951_v36  ;;  %11627 = vmatpush3.msra.mxu1 %v5260_v24  ;;  %v17212_v24 = vld [vmem:[#allocation23_spill] sm:$0xff] }
0x11be   :  { %11577 = vmatmul.mubr.msk.f32.gmra.mxu1 %vm375_vm1, %v14954_v2  ;;  %11628 = vmatprep.subr.mxu1 %v5259_v3 }
0x11bf   :  { %11629 = vmatpush3.msra.mxu1 %v5259_v3 }
0x11c0   :  { %11630 = vmatprep.subr.mxu1 %v5258_v54 }
0x11c1   :  { %11631 = vmatpush3.msra.mxu1 %v5258_v54 }
0x11c2   :  { %v11549_v47 = vpop.f32.mrf.mxu0  ;;  %11632 = vmatprep.subr.mxu1 %v5257_v51 }
0x11c3   :  { %v4793_v50 = vadd.f32 %v11549_v47, %v14922_v46  ;;  %11633 = vmatpush3.msra.mxu1 %v5257_v51 }
0x11c4   :  { %v4787_v20 = vpop.f32.mrf.mxu0 }
0x11c5   :  { %v4788_v6 = vadd.f32 %v14922_v46, %v4787_v20  ;;  %v14966_v5 = vadd.f32 %v4793_v50, %v17188_v35  ;;  %v17195_v50 = vld [vmem:[#allocation26_spill] sm:$0xff]  ;;  %v17196_v35 = vld [vmem:[#allocation27_spill] sm:$0xff] }
0x11c6   :  { %v4612_v20 = vsel %vm1107_vm2, %v17195_v50, %v4531_v7  ;;  %v4613_v25 = vsel %vm1107_vm2, %v17196_v35, %v4533_v52  ;;  %v5415_v50 = vld [vmem:[#allocation2 + $0x100] sm:$0xff] }
0x11c7   :  { %v14963_v15 = vadd.f32 %v4788_v6, %v17187_v40  ;;  %v4620_v40 = vsel %vm57_vm0, %v4612_v20, %v4563_v39  ;;  %v4621_v14 = vsel %vm57_vm0, %v4613_v25, %v4565_v4 }
0x11c9   :  { %11579 = vmatprep.mubr.msk.f32.mxu1 %vm375_vm1, %v14963_v15 }
0x11ca   :  { %11580 = vmatmul.mubr.msk.f32.gmra.mxu1 %vm375_vm1, %v14966_v5 }
0x1206   :  { %v4585_v49 = vpop.permute.xlu1 %4584 }
0x1207   :  { %v4623_v29 = vsel %vm2861_vm4, %v4615_v53, %v4585_v49 }
0x1208   :  { %v4583_v56 = vpop.permute.xlu0 %4582 }
0x1209   :  { %v4622_v12 = vsel %vm2861_vm4, %v4614_v13, %v4583_v56 }
0x120a   :  { %11550 = vmatprep.mubr.msk.f32.mxu0 %vm375_vm1, %v4622_v12  ;;  %v4589_v30 = vpop.permute.xlu1 %4588 }
0x120b   :  { %11551 = vmatmul.mubr.msk.f32.gmra.mxu0 %vm375_vm1, %v4623_v29  ;;  %v4625_v62 = vsel %vm2861_vm4, %v4617_v9, %v4589_v30  ;;  %v17207_v30 = vld [vmem:[#allocation18_spill] sm:$0xff] }
0x120c   :  { %v4587_v57 = vpop.permute.xlu0 %4586 }
0x120d   :  { %v4624_v18 = vsel %vm2861_vm4, %v4616_v1, %v4587_v57 }
0x120e   :  { %11553 = vmatprep.mubr.msk.f32.mxu0 %vm375_vm1, %v4624_v18  ;;  %v4593_v27 = vpop.permute.xlu1 %4592  ;;  %v17209_v18 = vld [vmem:[#allocation20_spill] sm:$0xff] }
0x120f   :  { %11554 = vmatmul.mubr.msk.f32.gmra.mxu0 %vm375_vm1, %v4625_v62  ;;  %v4627_v47 = vsel %vm2861_vm4, %v4619_v10, %v4593_v27  ;;  %v17210_v27 = vld [vmem:[#allocation21_spill] sm:$0xff] }
0x1210   :  { %v4591_v19 = vpop.permute.xlu0 %4590 }
0x1211   :  { %v4626_v28 = vsel %vm2861_vm4, %v4618_v45, %v4591_v19 }
0x1212   :  { %11556 = vmatprep.mubr.msk.f32.mxu0 %vm375_vm1, %v4626_v28  ;;  %v4597_v6 = vpop.permute.xlu1 %4596  ;;  %v5417_v28 = vld [vmem:[#allocation2 + $0x110] sm:$0xff] }
0x1213   :  { %11557 = vmatmul.mubr.msk.f32.gmra.mxu0 %vm375_vm1, %v4627_v47  ;;  %v4629_v26 = vsel %vm2861_vm4, %v4621_v14, %v4597_v6  ;;  %v5416_v47 = vld [vmem:[#allocation2 + $0x108] sm:$0xff] }
0x1214   :  { %v4595_v42 = vpop.permute.xlu0 %4594 }
0x1215   :  { %v4628_v55 = vsel %vm2861_vm4, %v4620_v40, %v4595_v42 }
0x1216   :  { %11559 = vmatprep.mubr.msk.f32.mxu0 %vm375_vm1, %v4628_v55 }
0x1217   :  { %11560 = vmatmul.mubr.msk.f32.gmra.mxu0 %vm375_vm1, %v4629_v26 }
0x126b   :  { %v11572_v61 = vpop.f32.mrf.mxu1 }
0x126c   :  { %v15016_v44 = vadd.f32 %v11572_v61, %v14930_v60 }
0x126d   :  { %v4971_v38 = vpop.f32.mrf.mxu1 }
0x126e   :  { %v15013_v32 = vadd.f32 %v4971_v38, %v14927_v21  ;;  %17198 = vst [vmem:[#allocation24_spill] sm:$0xff] %v15016_v44 }
0x1270   :  { %17197 = vst [vmem:[#allocation30_spill] sm:$0xff] %v15013_v32  ;;  %11602 = vmatprep.mubr.msk.f32.mxu0 %vm375_vm1, %v15013_v32 }
0x1271   :  { %11603 = vmatmul.mubr.msk.f32.vlgmr.msra.gmra.mxu0 %vm375_vm1, %v15016_v44 }
0x1272   :  { %v11575_v59 = vpop.f32.mrf.mxu1 }
0x1273   :  { %v15026_v52 = vadd.f32 %v11575_v59, %v14942_v0 }
0x1274   :  { %v4981_v63 = vpop.f32.mrf.mxu1 }
0x1275   :  { %v15023_v41 = vadd.f32 %v4981_v63, %v14939_v33  ;;  %17200 = vst [vmem:[#allocation28_spill] sm:$0xff] %v15026_v52 }
0x1277   :  { %17199 = vst [vmem:[#allocation34_spill] sm:$0xff] %v15023_v41  ;;  %11605 = vmatprep.mubr.msk.f32.mxu0 %vm375_vm1, %v15023_v41 }
0x1278   :  { %11606 = vmatmul.mubr.msk.f32.gmra.mxu0 %vm375_vm1, %v15026_v52 }
0x127e   :  { %v11578_v21 = vpop.f32.mrf.mxu1 }
0x127f   :  { %v15036_v4 = vadd.f32 %v11578_v21, %v14954_v2 }
0x1280   :  { %v4991_v60 = vpop.f32.mrf.mxu1 }
0x1281   :  { %v15033_v7 = vadd.f32 %v4991_v60, %v14951_v36  ;;  %17202 = vst [vmem:[#allocation32_spill] sm:$0xff] %v15036_v4  ;;  %v15135_v60 = vld [vmem:[%s16964_s3 + $0x6] ss:$0 sm:$0xff] }
0x1283   :  { %17201 = vst [vmem:[#allocation38_spill] sm:$0xff] %v15033_v7  ;;  %11608 = vmatprep.mubr.msk.f32.mxu0 %vm375_vm1, %v15033_v7 }
0x1284   :  { %11609 = vmatmul.mubr.msk.f32.gmra.mxu0 %vm375_vm1, %v15036_v4 }
0x128a   :  { %v11581_v33 = vpop.f32.mrf.mxu1 }
0x128b   :  { %v15046_v49 = vadd.f32 %v11581_v33, %v14966_v5 }
0x128c   :  { %v5001_v0 = vpop.f32.mrf.mxu1 }
0x128d   :  { %v15043_v39 = vadd.f32 %v5001_v0, %v14963_v15  ;;  %17204 = vst [vmem:[#allocation60_spill] sm:$0xff] %v15046_v49  ;;  %v17206_v15 = vld [vmem:[#allocation17_spill] sm:$0xff] }
0x128f   :  { %17203 = vst [vmem:[#allocation36_spill] sm:$0xff] %v15043_v39  ;;  %11611 = vmatprep.mubr.msk.f32.mxu0 %vm375_vm1, %v15043_v39 }
0x1290   :  { %11612 = vmatmul.mubr.msk.f32.gmra.mxu0 %vm375_vm1, %v15046_v49 }
0x12cb   :  { %v11552_v36 = vpop.f32.mrf.mxu0 }
0x12cc   :  { %v4803_v2 = vadd.f32 %v11552_v36, %v14922_v46 }
0x12cd   :  { %v4797_v17 = vpop.f32.mrf.mxu0 }
0x12ce   :  { %v4798_v34 = vadd.f32 %v14922_v46, %v4797_v17  ;;  %v4845_v56 = vadd.f32 %v4803_v2, %v17206_v15 }
0x12cf   :  { %v11555_v13 = vpop.f32.mrf.mxu0 }
0x12d0   :  { %v4844_v58 = vadd.f32 %v4798_v34, %v17205_v31  ;;  %v4813_v5 = vadd.f32 %v11555_v13, %v14922_v46 }
0x12d1   :  { %v4807_v53 = vpop.f32.mrf.mxu0 }
0x12d2   :  { %v4808_v12 = vadd.f32 %v14922_v46, %v4807_v53  ;;  %11582 = vmatprep.mubr.msk.f32.mxu1 %vm375_vm1, %v4844_v58  ;;  %v4847_v1 = vadd.f32 %v4813_v5, %v17208_v43 }
0x12d3   :  { %v11558_v29 = vpop.f32.mrf.mxu0  ;;  %11583 = vmatmul.mubr.msk.f32.gmra.mxu1 %vm375_vm1, %v4845_v56 }
0x12d4   :  { %v4846_v37 = vadd.f32 %v4808_v12, %v17207_v30  ;;  %v4823_v16 = vadd.f32 %v11558_v29, %v14922_v46 }
0x12d5   :  { %v4817_v48 = vpop.f32.mrf.mxu0 }
0x12d6   :  { %v4818_v57 = vadd.f32 %v14922_v46, %v4817_v48  ;;  %11585 = vmatprep.mubr.msk.f32.mxu1 %vm375_vm1, %v4846_v37  ;;  %v4849_v23 = vadd.f32 %v4823_v16, %v17210_v27 }
0x12d7   :  { %v11561_v9 = vpop.f32.mrf.mxu0  ;;  %11586 = vmatmul.mubr.msk.f32.gmra.mxu1 %vm375_vm1, %v4847_v1 }
0x12d8   :  { %v4848_v62 = vadd.f32 %v4818_v57, %v17209_v18  ;;  %v4833_v11 = vadd.f32 %v11561_v9, %v14922_v46 }
0x12d9   :  { %v4827_v45 = vpop.f32.mrf.mxu0 }
0x12da   :  { %v4828_v8 = vadd.f32 %v14922_v46, %v4827_v45  ;;  %11588 = vmatprep.mubr.msk.f32.mxu1 %vm375_vm1, %v4848_v62  ;;  %v4851_v10 = vadd.f32 %v4833_v11, %v17212_v24  ;;  %v5418_v46 = vld [vmem:[#allocation2 + $0x118] sm:$0xff] }
0x12db   :  { %11589 = vmatmul.mubr.msk.f32.gmra.mxu1 %vm375_vm1, %v4849_v23  ;;  %11658 = vmatprep.subr.mxu0 %v5418_v46 }
0x12dc   :  { %v4850_v19 = vadd.f32 %v4828_v8, %v17211_v22  ;;  %11659 = vmatpush3.msra.mxu0 %v5418_v46 }
0x12dd   :  { %11660 = vmatprep.subr.mxu0 %v5417_v28 }
0x12de   :  { %11591 = vmatprep.mubr.msk.f32.mxu1 %vm375_vm1, %v4850_v19  ;;  %11661 = vmatpush3.msra.mxu0 %v5417_v28 }
0x12df   :  { %11592 = vmatmul.mubr.msk.f32.gmra.mxu1 %vm375_vm1, %v4851_v10  ;;  %11662 = vmatprep.subr.mxu0 %v5416_v47 }
0x12e0   :  { %11634 = vmatprep.mubr.msk.f32.mxu1 %vm375_vm1, %v15013_v32  ;;  %11663 = vmatpush3.msra.mxu0 %v5416_v47 }
0x12e1   :  { %11664 = vmatprep.subr.mxu0 %v5415_v50 }
0x12e2   :  { %11665 = vmatpush3.msra.mxu0 %v5415_v50 }
0x12e3   :  { %11635 = vmatmul.mubr.msk.f32.vlgmr.msra.gmra.mxu1 %vm375_vm1, %v15016_v44 }
0x12e4   :  { %11637 = vmatprep.mubr.msk.f32.mxu1 %vm375_vm1, %v15023_v41 }
0x12e7   :  { %11638 = vmatmul.mubr.msk.f32.gmra.mxu1 %vm375_vm1, %v15026_v52 }
0x12e8   :  { %11640 = vmatprep.mubr.msk.f32.mxu1 %vm375_vm1, %v15033_v7 }
0x12eb   :  { %11641 = vmatmul.mubr.msk.f32.gmra.mxu1 %vm375_vm1, %v15036_v4 }
0x12ec   :  { %11643 = vmatprep.mubr.msk.f32.mxu1 %vm375_vm1, %v15043_v39 }
0x12ef   :  { %11644 = vmatmul.mubr.msk.f32.gmra.mxu1 %vm375_vm1, %v15046_v49 }
0x1331   :  { %v15112_v3 = vpop.f32.mrf.mxu0 }
0x1332   :  { %v15239_v16 = vadd.f32 %v15112_v3, %v15135_v60 }
0x1333   :  { %v5177_v59 = vpop.f32.mrf.mxu0 }
0x1334   :  { %v15140_v36 = vadd.f32 %v15135_v60, %v5177_v59 }
0x1338   :  { %v11607_v48 = vpop.f32.mrf.mxu0 }
0x133a   :  { %v5187_v57 = vpop.f32.mrf.mxu0 }
0x133b   :  { %v15266_v18 = vadd.f32 %v15135_v60, %v5187_v57 }
0x1344   :  { %v11610_v9 = vpop.f32.mrf.mxu0 }
0x1345   :  { %v15289_v45 = vadd.f32 %v11610_v9, %v15135_v60 }
0x1346   :  { %v5197_v27 = vpop.f32.mrf.mxu0 }
0x1347   :  { %v15282_v11 = vadd.f32 %v15135_v60, %v5197_v27 }
0x1393   :  { %v11584_v20 = vpop.f32.mrf.mxu1 }
0x1394   :  { %v15094_v35 = vadd.f32 %v11584_v20, %v4845_v56 }
0x1395   :  { %v5011_v6 = vpop.f32.mrf.mxu1 }
0x1396   :  { %v15092_v40 = vadd.f32 %v5011_v6, %v4844_v58  ;;  %17214 = vst [vmem:[#allocation51_spill] sm:$0xff] %v15094_v35  ;;  %v9915_v58 = vld [vmem:[%s16964_s3 + $0x7] ss:$0 sm:$0xff] }
0x1397   :  { %v11587_v25 = vpop.f32.mrf.mxu1 }
0x1398   :  { %17213 = vst [vmem:[#allocation37_spill] sm:$0xff] %v15092_v40  ;;  %11614 = vmatprep.mubr.msk.f32.mxu0 %vm375_vm1, %v15092_v40  ;;  %11646 = vmatprep.mubr.msk.f32.mxu1 %vm375_vm1, %v15092_v40  ;;  %v15106_v55 = vadd.f32 %v11587_v25, %v4847_v1 }
0x1399   :  { %v5021_v42 = vpop.f32.mrf.mxu1  ;;  %11615 = vmatmul.mubr.msk.f32.gmra.mxu0 %vm375_vm1, %v15094_v35  ;;  %11647 = vmatmul.mubr.msk.f32.gmra.mxu1 %vm375_vm1, %v15094_v35 }
0x139a   :  { %v15104_v14 = vadd.f32 %v5021_v42, %v4846_v37  ;;  %17216 = vst [vmem:[#allocation46_spill] sm:$0xff] %v15106_v55 }
0x139b   :  { %v11590_v26 = vpop.f32.mrf.mxu1 }
0x139c   :  { %17215 = vst [vmem:[#allocation43_spill] sm:$0xff] %v15104_v14  ;;  %11617 = vmatprep.mubr.msk.f32.mxu0 %vm375_vm1, %v15104_v14  ;;  %11649 = vmatprep.mubr.msk.f32.mxu1 %vm375_vm1, %v15104_v14  ;;  %v15120_v61 = vadd.f32 %v11590_v26, %v4849_v23  ;;  %v11613_v23 = vpop.f32.mrf.mxu0 }
0x139d   :  { %v5031_v54 = vpop.f32.mrf.mxu1  ;;  %11618 = vmatmul.mubr.msk.f32.gmra.mxu0 %vm375_vm1, %v15106_v55  ;;  %11650 = vmatmul.mubr.msk.f32.gmra.mxu1 %vm375_vm1, %v15106_v55 }
0x139e   :  { %v15118_v51 = vadd.f32 %v5031_v54, %v4848_v62  ;;  %17218 = vst [vmem:[#allocation45_spill] sm:$0xff] %v15120_v61  ;;  %v15271_v62 = vadd.f32 %v11607_v48, %v15135_v60  ;;  %v5207_v8 = vpop.f32.mrf.mxu0 }
0x139f   :  { %v11593_v38 = vpop.f32.mrf.mxu1  ;;  %v15300_v22 = vadd.f32 %v15135_v60, %v5207_v8 }
0x13a0   :  { %17217 = vst [vmem:[#allocation56_spill] sm:$0xff] %v15118_v51  ;;  %11620 = vmatprep.mubr.msk.f32.mxu0 %vm375_vm1, %v15118_v51  ;;  %11652 = vmatprep.mubr.msk.f32.mxu1 %vm375_vm1, %v15118_v51  ;;  %v15137_v33 = vadd.f32 %v11593_v38, %v4851_v10 }
0x13a1   :  { %v5041_v63 = vpop.f32.mrf.mxu1  ;;  %11621 = vmatmul.mubr.msk.f32.gmra.mxu0 %vm375_vm1, %v15120_v61  ;;  %11653 = vmatmul.mubr.msk.f32.gmra.mxu1 %vm375_vm1, %v15120_v61 }
0x13a2   :  { %v15130_v21 = vadd.f32 %v5041_v63, %v4850_v19  ;;  %17220 = vst [vmem:[#allocation47_spill] sm:$0xff] %v15137_v33  ;;  %v15307_v19 = vadd.f32 %v11613_v23, %v15135_v60 }
0x13a3   :  { %v11636_v0 = vpop.f32.mrf.mxu1 }
0x13a4   :  { %17219 = vst [vmem:[#allocation44_spill] sm:$0xff] %v15130_v21  ;;  %11623 = vmatprep.mubr.msk.f32.mxu0 %vm375_vm1, %v15130_v21  ;;  %11655 = vmatprep.mubr.msk.f32.mxu1 %vm375_vm1, %v15130_v21  ;;  %v15209_v43 = vadd.f32 %v11636_v0, %v9915_v58 }
0x13a5   :  { %11624 = vmatmul.mubr.msk.f32.gmra.mxu0 %vm375_vm1, %v15137_v33  ;;  %v5335_v2 = vpop.f32.mrf.mxu1  ;;  %11656 = vmatmul.mubr.msk.f32.gmra.mxu1 %vm375_vm1, %v15137_v33 }
0x13a6   :  { %11666 = vmatprep.mubr.msk.f32.mxu0 %vm375_vm1, %v15013_v32  ;;  %11706 = vmatprep.mubr.msk.f32.mxu1 %vm1107_vm2, %v15140_v36  ;;  %v15219_v1 = vadd.f32 %v9915_v58, %v5335_v2 }
0x13a7   :  { %v11639_v17 = vpop.f32.mrf.mxu1 }
0x13a8   :  { %v15193_v30 = vadd.f32 %v11639_v17, %v9915_v58 }
0x13a9   :  { %v5345_v34 = vpop.f32.mrf.mxu1  ;;  %11667 = vmatmul.mubr.msk.f32.vlgmr.msra.gmra.mxu0 %vm375_vm1, %v15016_v44 }
0x13aa   :  { %11669 = vmatprep.mubr.msk.f32.mxu0 %vm375_vm1, %v15023_v41  ;;  %v15203_v37 = vadd.f32 %v9915_v58, %v5345_v34 }
0x13ab   :  { %v11642_v13 = vpop.f32.mrf.mxu1 }
0x13ac   :  { %v15177_v12 = vadd.f32 %v11642_v13, %v9915_v58 }
0x13ad   :  { %v5355_v31 = vpop.f32.mrf.mxu1  ;;  %11670 = vmatmul.mubr.msk.f32.gmra.mxu0 %vm375_vm1, %v15026_v52 }
0x13ae   :  { %11672 = vmatprep.mubr.msk.f32.mxu0 %vm375_vm1, %v15033_v7  ;;  %v15187_v29 = vadd.f32 %v9915_v58, %v5355_v31 }
0x13af   :  { %v11645_v15 = vpop.f32.mrf.mxu1 }
0x13b0   :  { %v15165_v56 = vadd.f32 %v11645_v15, %v9915_v58 }
0x13b1   :  { %v5365_v5 = vpop.f32.mrf.mxu1  ;;  %11673 = vmatmul.mubr.msk.f32.gmra.mxu0 %vm375_vm1, %v15036_v4 }
0x13b2   :  { %v15169_v53 = vadd.f32 %v9915_v58, %v5365_v5  ;;  %5980 = vrot.lane.b32.xlu0 %v15165_v56, %s12840_s11  ;;  %11675 = vmatprep.mubr.msk.f32.mxu0 %vm375_vm1, %v15043_v39 }
0x13b3   :  { %11690 = vmatprep.subr.msk.mxu1 %vm1107_vm2, %v15165_v56 }
0x13b4   :  { %11691 = vmatpush3.xpose.msk.msra.mxu1 %vm1107_vm2, %v15165_v56  ;;  %5978 = vrot.lane.b32.xlu1 %v15169_v53, %s12840_s11 }
0x13b5   :  { %11692 = vmatprep.subr.msk.mxu1 %vm1107_vm2, %v15169_v53  ;;  %11676 = vmatmul.mubr.msk.f32.gmra.mxu0 %vm375_vm1, %v15046_v49 }
0x13b6   :  { %5976 = vrot.lane.b32.xlu0 %v15177_v12, %s12840_s11  ;;  %11678 = vmatprep.mubr.msk.f32.mxu0 %vm375_vm1, %v15092_v40 }
0x13b8   :  { %11693 = vmatpush3.xpose.msk.msra.mxu1 %vm1107_vm2, %v15169_v53  ;;  %5974 = vrot.lane.b32.xlu1 %v15187_v29, %s12840_s11 }
0x13b9   :  { %11694 = vmatprep.subr.msk.mxu1 %vm1107_vm2, %v15177_v12  ;;  %11679 = vmatmul.mubr.msk.f32.gmra.mxu0 %vm375_vm1, %v15094_v35 }
0x13ba   :  { %5972 = vrot.lane.b32.xlu0 %v15193_v30, %s12840_s11  ;;  %11681 = vmatprep.mubr.msk.f32.mxu0 %vm375_vm1, %v15104_v14 }
0x13bc   :  { %11695 = vmatpush3.xpose.msk.msra.mxu1 %vm1107_vm2, %v15177_v12  ;;  %5970 = vrot.lane.b32.xlu1 %v15203_v37, %s12840_s11 }
0x13bd   :  { %11696 = vmatprep.subr.msk.mxu1 %vm1107_vm2, %v15187_v29  ;;  %11682 = vmatmul.mubr.msk.f32.gmra.mxu0 %vm375_vm1, %v15106_v55 }
0x13be   :  { %5968 = vrot.lane.b32.xlu0 %v15209_v43, %s12840_s11  ;;  %11684 = vmatprep.mubr.msk.f32.mxu0 %vm375_vm1, %v15118_v51 }
0x13c0   :  { %11697 = vmatpush3.xpose.msk.msra.mxu1 %vm1107_vm2, %v15187_v29  ;;  %5966 = vrot.lane.b32.xlu1 %v15219_v1, %s12840_s11 }
0x13c1   :  { %11698 = vmatprep.subr.msk.mxu1 %vm1107_vm2, %v15193_v30  ;;  %11685 = vmatmul.mubr.msk.f32.gmra.mxu0 %vm375_vm1, %v15120_v61 }
0x13c2   :  { %5950 = vrot.lane.b32.xlu0 %v15140_v36, %s12840_s11  ;;  %11687 = vmatprep.mubr.msk.f32.mxu0 %vm375_vm1, %v15130_v21 }
0x13c4   :  { %11699 = vmatpush3.xpose.msk.msra.mxu1 %vm1107_vm2, %v15193_v30  ;;  %6406 = vrot.lane.b32.xlu1 %v15165_v56, %s12841_s12 }
0x13c5   :  { %11700 = vmatprep.subr.msk.mxu1 %vm1107_vm2, %v15203_v37  ;;  %11688 = vmatmul.mubr.msk.f32.gmra.mxu0 %vm375_vm1, %v15137_v33 }
0x13c6   :  { %5952 = vrot.lane.b32.xlu0 %v15239_v16, %s12840_s11 }
0x13c8   :  { %11701 = vmatpush3.xpose.msk.msra.mxu1 %vm1107_vm2, %v15203_v37  ;;  %6404 = vrot.lane.b32.xlu1 %v15169_v53, %s12841_s12 }
0x13c9   :  { %11702 = vmatprep.subr.msk.mxu1 %vm1107_vm2, %v15209_v43 }
0x13ca   :  { %6402 = vrot.lane.b32.xlu0 %v15177_v12, %s12841_s12 }
0x13cc   :  { %11703 = vmatpush3.xpose.msk.msra.mxu1 %vm1107_vm2, %v15209_v43  ;;  %6400 = vrot.lane.b32.xlu1 %v15187_v29, %s12841_s12 }
0x13cd   :  { %11704 = vmatprep.subr.msk.mxu1 %vm1107_vm2, %v15219_v1 }
0x13ce   :  { %6398 = vrot.lane.b32.xlu0 %v15193_v30, %s12841_s12 }
0x13d0   :  { %11705 = vmatpush3.xpose.msk.msra.mxu1 %vm1107_vm2, %v15219_v1  ;;  %5954 = vrot.lane.b32.xlu1 %v15266_v18, %s12840_s11 }
0x13d2   :  { %5956 = vrot.lane.b32.xlu0 %v15271_v62, %s12840_s11 }
0x13d3   :  { %11707 = vmatmul.mubr.msk.f32.vlgmr.msra.gmra.mxu1 %vm1107_vm2, %v15239_v16 }
0x13d4   :  { %11709 = vmatprep.mubr.msk.f32.mxu1 %vm1107_vm2, %v15266_v18  ;;  %6396 = vrot.lane.b32.xlu1 %v15203_v37, %s12841_s12 }
0x13d6   :  { %5958 = vrot.lane.b32.xlu0 %v15282_v11, %s12840_s11 }
0x13d7   :  { %11710 = vmatmul.mubr.msk.f32.gmra.mxu1 %vm1107_vm2, %v15271_v62 }
0x13d8   :  { %11712 = vmatprep.mubr.msk.f32.mxu1 %vm1107_vm2, %v15282_v11  ;;  %5960 = vrot.lane.b32.xlu1 %v15289_v45, %s12840_s11 }
0x13da   :  { %6394 = vrot.lane.b32.xlu0 %v15209_v43, %s12841_s12 }
0x13db   :  { %11713 = vmatmul.mubr.msk.f32.gmra.mxu1 %vm1107_vm2, %v15289_v45 }
0x13dc   :  { %11715 = vmatprep.mubr.msk.f32.mxu1 %vm1107_vm2, %v15300_v22  ;;  %5962 = vrot.lane.b32.xlu1 %v15300_v22, %s12840_s11 }
0x13de   :  { %5964 = vrot.lane.b32.xlu0 %v15307_v19, %s12840_s11 }
0x13df   :  { %11716 = vmatmul.mubr.msk.f32.gmra.mxu1 %vm1107_vm2, %v15307_v19 }
0x13e0   :  { %6392 = vrot.lane.b32.xlu1 %v15219_v1, %s12841_s12 }
0x13e2   :  { %6376 = vrot.lane.b32.xlu0 %v15140_v36, %s12841_s12 }
0x13e4   :  { %6378 = vrot.lane.b32.xlu1 %v15239_v16, %s12841_s12 }
0x13e6   :  { %6380 = vrot.lane.b32.xlu0 %v15266_v18, %s12841_s12 }
0x13e8   :  { %6382 = vrot.lane.b32.xlu1 %v15271_v62, %s12841_s12 }
0x13ea   :  { %6384 = vrot.lane.b32.xlu0 %v15282_v11, %s12841_s12 }
0x13ec   :  { %6386 = vrot.lane.b32.xlu1 %v15289_v45, %s12841_s12 }
0x13ee   :  { %6388 = vrot.lane.b32.xlu0 %v15300_v22, %s12841_s12 }
0x13f0   :  { %6390 = vrot.lane.b32.xlu1 %v15307_v19, %s12841_s12 }
0x13f2   :  { %6824 = vrot.lane.b32.xlu0 %v15165_v56, %s12842_s15 }
0x13f4   :  { %6822 = vrot.lane.b32.xlu1 %v15169_v53, %s12842_s15 }
0x1424   :  { %v5981_v24 = vpop.permute.xlu0 %5980 }
0x1425   :  { %11746 = vmatprep.subr.msk.mxu0 %vm1107_vm2, %v5981_v24 }
0x1426   :  { %v5979_v10 = vpop.permute.xlu1 %5978  ;;  %11747 = vmatpush3.xpose.msk.msra.mxu0 %vm1107_vm2, %v5981_v24 }
0x1427   :  { %11748 = vmatprep.subr.msk.mxu0 %vm1107_vm2, %v5979_v10 }
0x1428   :  { %v5977_v46 = vpop.permute.xlu0 %5976 }
0x142a   :  { %v5975_v28 = vpop.permute.xlu1 %5974  ;;  %11749 = vmatpush3.xpose.msk.msra.mxu0 %vm1107_vm2, %v5979_v10 }
0x142b   :  { %11750 = vmatprep.subr.msk.mxu0 %vm1107_vm2, %v5977_v46 }
0x142c   :  { %v5973_v47 = vpop.permute.xlu0 %5972 }
0x142e   :  { %v5971_v50 = vpop.permute.xlu1 %5970  ;;  %11751 = vmatpush3.xpose.msk.msra.mxu0 %vm1107_vm2, %v5977_v46 }
0x142f   :  { %11752 = vmatprep.subr.msk.mxu0 %vm1107_vm2, %v5975_v28 }
0x1430   :  { %v5969_v20 = vpop.permute.xlu0 %5968 }
0x1432   :  { %v5967_v6 = vpop.permute.xlu1 %5966  ;;  %11753 = vmatpush3.xpose.msk.msra.mxu0 %vm1107_vm2, %v5975_v28  ;;  %v15401_v28 = vld [vmem:[%s16964_s3 + $0x8] ss:$0 sm:$0xff] }
0x1433   :  { %11754 = vmatprep.subr.msk.mxu0 %vm1107_vm2, %v5973_v47 }
0x1434   :  { %v5951_v25 = vpop.permute.xlu0 %5950 }
0x1435   :  { %11762 = vmatprep.mubr.msk.f32.mxu0 %vm1107_vm2, %v5951_v25 }
0x1436   :  { %v6407_v42 = vpop.permute.xlu1 %6406  ;;  %11755 = vmatpush3.xpose.msk.msra.mxu0 %vm1107_vm2, %v5973_v47 }
0x1437   :  { %11756 = vmatprep.subr.msk.mxu0 %vm1107_vm2, %v5971_v50 }
0x1438   :  { %v5953_v26 = vpop.permute.xlu0 %5952 }
0x143a   :  { %v6405_v3 = vpop.permute.xlu1 %6404  ;;  %11757 = vmatpush3.xpose.msk.msra.mxu0 %vm1107_vm2, %v5971_v50 }
0x143b   :  { %11758 = vmatprep.subr.msk.mxu0 %vm1107_vm2, %v5969_v20 }
0x143c   :  { %v6403_v54 = vpop.permute.xlu0 %6402 }
0x143e   :  { %v6401_v38 = vpop.permute.xlu1 %6400  ;;  %11759 = vmatpush3.xpose.msk.msra.mxu0 %vm1107_vm2, %v5969_v20 }
0x143f   :  { %11760 = vmatprep.subr.msk.mxu0 %vm1107_vm2, %v5967_v6 }
0x1440   :  { %v6399_v59 = vpop.permute.xlu0 %6398 }
0x1442   :  { %v5955_v63 = vpop.permute.xlu1 %5954  ;;  %11761 = vmatpush3.xpose.msk.msra.mxu0 %vm1107_vm2, %v5967_v6 }
0x1443   :  { %11802 = vmatprep.subr.msk.mxu0 %vm1107_vm2, %v6407_v42 }
0x1444   :  { %v5957_v60 = vpop.permute.xlu0 %5956 }
0x1445   :  { %11763 = vmatmul.mubr.msk.f32.vlgmr.msra.gmra.mxu0 %vm1107_vm2, %v5953_v26 }
0x1446   :  { %v6397_v0 = vpop.permute.xlu1 %6396  ;;  %11765 = vmatprep.mubr.msk.f32.mxu0 %vm1107_vm2, %v5955_v63  ;;  %11803 = vmatpush3.xpose.msk.msra.mxu0 %vm1107_vm2, %v6407_v42 }
0x1447   :  { %11804 = vmatprep.subr.msk.mxu0 %vm1107_vm2, %v6405_v3 }
0x1448   :  { %v5959_v2 = vpop.permute.xlu0 %5958 }
0x1449   :  { %11766 = vmatmul.mubr.msk.f32.gmra.mxu0 %vm1107_vm2, %v5957_v60 }
0x144a   :  { %v5961_v17 = vpop.permute.xlu1 %5960  ;;  %11768 = vmatprep.mubr.msk.f32.mxu0 %vm1107_vm2, %v5959_v2  ;;  %11805 = vmatpush3.xpose.msk.msra.mxu0 %vm1107_vm2, %v6405_v3 }
0x144b   :  { %11806 = vmatprep.subr.msk.mxu0 %vm1107_vm2, %v6403_v54 }
0x144c   :  { %v6395_v34 = vpop.permute.xlu0 %6394 }
0x144d   :  { %11769 = vmatmul.mubr.msk.f32.gmra.mxu0 %vm1107_vm2, %v5961_v17 }
0x144e   :  { %v5963_v13 = vpop.permute.xlu1 %5962  ;;  %11807 = vmatpush3.xpose.msk.msra.mxu0 %vm1107_vm2, %v6403_v54 }
0x144f   :  { %11771 = vmatprep.mubr.msk.f32.mxu0 %vm1107_vm2, %v5963_v13  ;;  %11808 = vmatprep.subr.msk.mxu0 %vm1107_vm2, %v6401_v38 }
0x1450   :  { %v5965_v31 = vpop.permute.xlu0 %5964 }
0x1451   :  { %11772 = vmatmul.mubr.msk.f32.gmra.mxu0 %vm1107_vm2, %v5965_v31 }
0x1452   :  { %11809 = vmatpush3.xpose.msk.msra.mxu0 %vm1107_vm2, %v6401_v38  ;;  %v6393_v15 = vpop.permute.xlu1 %6392 }
0x1453   :  { %11810 = vmatprep.subr.msk.mxu0 %vm1107_vm2, %v6399_v59 }
0x1454   :  { %v6377_v58 = vpop.permute.xlu0 %6376 }
0x1455   :  { %11818 = vmatprep.mubr.msk.f32.mxu0 %vm1107_vm2, %v6377_v58 }
0x1456   :  { %11811 = vmatpush3.xpose.msk.msra.mxu0 %vm1107_vm2, %v6399_v59  ;;  %v6379_v48 = vpop.permute.xlu1 %6378 }
0x1457   :  { %11812 = vmatprep.subr.msk.mxu0 %vm1107_vm2, %v6397_v0 }
0x1458   :  { %v6381_v9 = vpop.permute.xlu0 %6380 }
0x1459   :  { %v15375_v56 = vpop.f32.mrf.mxu0  ;;  %v15427_v60 = vpop.f32.mrf.mxu1 }
0x145a   :  { %17221 = vst [vmem:[#allocation41_spill] sm:$0xff] %v15375_v56  ;;  %11813 = vmatpush3.xpose.msk.msra.mxu0 %vm1107_vm2, %v6397_v0  ;;  %v6383_v8 = vpop.permute.xlu1 %6382  ;;  %17232 = vst [vmem:[#allocation57_spill] sm:$0xff] %v15427_v60 }
0x145b   :  { %v15378_v5 = vpop.f32.mrf.mxu0  ;;  %11814 = vmatprep.subr.msk.mxu0 %vm1107_vm2, %v6395_v34  ;;  %v15446_v58 = vpop.f32.mrf.mxu1 }
0x145c   :  { %17222 = vst [vmem:[#allocation50_spill] sm:$0xff] %v15378_v5  ;;  %v6385_v10 = vpop.permute.xlu0 %6384  ;;  %17235 = vst [vmem:[#allocation9_spill] sm:$0xff] %v15446_v58 }
0x145d   :  { %v15381_v53 = vpop.f32.mrf.mxu0 }
0x145e   :  { %17223 = vst [vmem:[#allocation49_spill] sm:$0xff] %v15381_v53  ;;  %11815 = vmatpush3.xpose.msk.msra.mxu0 %vm1107_vm2, %v6395_v34  ;;  %v6387_v50 = vpop.permute.xlu1 %6386 }
0x145f   :  { %v15384_v57 = vpop.f32.mrf.mxu0  ;;  %11816 = vmatprep.subr.msk.mxu0 %vm1107_vm2, %v6393_v15 }
0x1460   :  { %17224 = vst [vmem:[#allocation39_spill] sm:$0xff] %v15384_v57  ;;  %v6389_v42 = vpop.permute.xlu0 %6388 }
0x1461   :  { %v15387_v27 = vpop.f32.mrf.mxu0 }
0x1462   :  { %17225 = vst [vmem:[#allocation48_spill] sm:$0xff] %v15387_v27  ;;  %11817 = vmatpush3.xpose.msk.msra.mxu0 %vm1107_vm2, %v6393_v15  ;;  %v6391_v54 = vpop.permute.xlu1 %6390 }
0x1463   :  { %v15390_v23 = vpop.f32.mrf.mxu0 }
0x1464   :  { %17226 = vst [vmem:[#allocation59_spill] sm:$0xff] %v15390_v23 }
0x1465   :  { %v15392_v24 = vpop.f32.mrf.mxu0  ;;  %11819 = vmatmul.mubr.msk.f32.vlgmr.msra.gmra.mxu0 %vm1107_vm2, %v6379_v48 }
0x1466   :  { %17227 = vst [vmem:[#allocation54_spill] sm:$0xff] %v15392_v24  ;;  %11821 = vmatprep.mubr.msk.f32.mxu0 %vm1107_vm2, %v6381_v9 }
0x1467   :  { %v15396_v46 = vpop.f32.mrf.mxu0 }
0x1468   :  { %17228 = vst [vmem:[#allocation53_spill] sm:$0xff] %v15396_v46 }
0x1469   :  { %v11668_v47 = vpop.f32.mrf.mxu0  ;;  %11822 = vmatmul.mubr.msk.f32.gmra.mxu0 %vm1107_vm2, %v6383_v8 }
0x146a   :  { %v15405_v20 = vadd.f32 %v11668_v47, %v15401_v28  ;;  %11824 = vmatprep.mubr.msk.f32.mxu0 %vm1107_vm2, %v6385_v10  ;;  %v15465_v47 = vpop.f32.mrf.mxu1 }
0x146b   :  { %v5493_v6 = vpop.f32.mrf.mxu0  ;;  %17239 = vst [vmem:[#allocation13_spill] sm:$0xff] %v15465_v47 }
0x146c   :  { %17229 = vst [vmem:[#allocation40_spill] sm:$0xff] %v15405_v20  ;;  %v15409_v25 = vadd.f32 %v15401_v28, %v5493_v6  ;;  %6225 = vrot.lane.b32.xlu0 %v15405_v20, %s12840_s11 }
0x146d   :  { %v11671_v26 = vpop.f32.mrf.mxu0  ;;  %11825 = vmatmul.mubr.msk.f32.gmra.mxu0 %vm1107_vm2, %v6387_v50 }
0x146e   :  { %17230 = vst [vmem:[#allocation42_spill] sm:$0xff] %v15409_v25  ;;  %11827 = vmatprep.mubr.msk.f32.mxu0 %vm1107_vm2, %v6389_v42  ;;  %6223 = vrot.lane.b32.xlu1 %v15409_v25, %s12840_s11  ;;  %v15421_v59 = vadd.f32 %v11671_v26, %v15401_v28 }
0x146f   :  { %v5503_v3 = vpop.f32.mrf.mxu0 }
0x1470   :  { %6643 = vrot.lane.b32.xlu0 %v15405_v20, %s12841_s12  ;;  %17231 = vst [vmem:[#allocation58_spill] sm:$0xff] %v15421_v59  ;;  %v15438_v13 = vadd.f32 %v15401_v28, %v5503_v3  ;;  %v15481_v3 = vpop.f32.mrf.mxu1 }
0x1471   :  { %v11674_v38 = vpop.f32.mrf.mxu0  ;;  %11828 = vmatmul.mubr.msk.f32.gmra.mxu0 %vm1107_vm2, %v6391_v54  ;;  %17242 = vst [vmem:[#allocation33_spill] sm:$0xff] %v15481_v3 }
0x1472   :  { %6641 = vrot.lane.b32.xlu1 %v15409_v25, %s12841_s12  ;;  %v15430_v2 = vadd.f32 %v11674_v38, %v15401_v28  ;;  %17234 = vst [vmem:[#allocation8_spill] sm:$0xff] %v15438_v13 }
0x1473   :  { %v5513_v63 = vpop.f32.mrf.mxu0 }
0x1474   :  { %6647 = vrot.lane.b32.xlu0 %v15421_v59, %s12841_s12  ;;  %17233 = vst [vmem:[#allocation52_spill] sm:$0xff] %v15430_v2  ;;  %v15457_v8 = vadd.f32 %v15401_v28, %v5513_v63 }
0x1475   :  { %v11677_v0 = vpop.f32.mrf.mxu0 }
0x1476   :  { %v15433_v17 = vadd.f32 %v11677_v0, %v15401_v28  ;;  %6229 = vrot.lane.b32.xlu1 %v15421_v59, %s12840_s11  ;;  %17237 = vst [vmem:[#allocation11_spill] sm:$0xff] %v15457_v8 }
0x1477   :  { %v5523_v34 = vpop.f32.mrf.mxu0 }
0x1478   :  { %v15441_v31 = vadd.f32 %v15401_v28, %v5523_v34  ;;  %6233 = vrot.lane.b32.xlu0 %v15430_v2, %s12840_s11  ;;  %11718 = vmatprep.subr.mxu1 %v15433_v17  ;;  %v15497_v34 = vpop.f32.mrf.mxu1 }
0x1479   :  { %v11680_v15 = vpop.f32.mrf.mxu0  ;;  %11719 = vmatpush3.msra.mxu1 %v15433_v17  ;;  %17245 = vst [vmem:[#allocation35_spill] sm:$0xff] %v15497_v34 }
0x147a   :  { %v15450_v48 = vadd.f32 %v11680_v15, %v15401_v28  ;;  %11720 = vmatprep.subr.mxu1 %v15441_v31  ;;  %6227 = vrot.lane.b32.xlu1 %v15438_v13, %s12840_s11 }
0x147b   :  { %v5533_v9 = vpop.f32.mrf.mxu0  ;;  %11721 = vmatpush3.msra.mxu1 %v15441_v31 }
0x147c   :  { %17236 = vst [vmem:[#allocation10_spill] sm:$0xff] %v15450_v48  ;;  %v15460_v10 = vadd.f32 %v15401_v28, %v5533_v9  ;;  %6651 = vrot.lane.b32.xlu0 %v15430_v2, %s12841_s12  ;;  %11722 = vmatprep.subr.mxu1 %v15430_v2 }
0x147d   :  { %v11683_v50 = vpop.f32.mrf.mxu0  ;;  %11723 = vmatpush3.msra.mxu1 %v15430_v2 }
0x147e   :  { %17238 = vst [vmem:[#allocation12_spill] sm:$0xff] %v15460_v10  ;;  %v15469_v6 = vadd.f32 %v11683_v50, %v15401_v28  ;;  %11724 = vmatprep.subr.mxu1 %v15457_v8  ;;  %6645 = vrot.lane.b32.xlu1 %v15438_v13, %s12841_s12  ;;  %v15509_v50 = vpop.f32.mrf.mxu1 }
0x147f   :  { %v5543_v42 = vpop.f32.mrf.mxu0  ;;  %11725 = vmatpush3.msra.mxu1 %v15457_v8  ;;  %17247 = vst [vmem:[#allocation31_spill] sm:$0xff] %v15509_v50 }
0x1480   :  { %17240 = vst [vmem:[#allocation14_spill] sm:$0xff] %v15469_v6  ;;  %v15476_v26 = vadd.f32 %v15401_v28, %v5543_v42  ;;  %6231 = vrot.lane.b32.xlu0 %v15457_v8, %s12840_s11  ;;  %11726 = vmatprep.subr.mxu1 %v15421_v59  ;;  %v15513_v42 = vpop.f32.mrf.mxu1 }
0x1481   :  { %v11686_v54 = vpop.f32.mrf.mxu0  ;;  %11727 = vmatpush3.msra.mxu1 %v15421_v59  ;;  %17248 = vst [vmem:[#allocation26_spill] sm:$0xff] %v15513_v42 }
0x1482   :  { %17241 = vst [vmem:[#allocation15_spill] sm:$0xff] %v15476_v26  ;;  %v15485_v38 = vadd.f32 %v11686_v54, %v15401_v28  ;;  %11728 = vmatprep.subr.mxu1 %v15438_v13  ;;  %6649 = vrot.lane.b32.xlu1 %v15457_v8, %s12841_s12  ;;  %v15515_v54 = vpop.f32.mrf.mxu1 }
0x1483   :  { %v5553_v63 = vpop.f32.mrf.mxu0  ;;  %11729 = vmatpush3.msra.mxu1 %v15438_v13  ;;  %17249 = vst [vmem:[#allocation27_spill] sm:$0xff] %v15515_v54 }
0x1484   :  { %17243 = vst [vmem:[#allocation55_spill] sm:$0xff] %v15485_v38  ;;  %v15492_v0 = vadd.f32 %v15401_v28, %v5553_v63  ;;  %6237 = vrot.lane.b32.xlu0 %v15433_v17, %s12840_s11  ;;  %11730 = vmatprep.subr.mxu1 %v15405_v20 }
0x1485   :  { %v11689_v15 = vpop.f32.mrf.mxu0  ;;  %11731 = vmatpush3.msra.mxu1 %v15405_v20 }
0x1486   :  { %17244 = vst [vmem:[#allocation29_spill] sm:$0xff] %v15492_v0  ;;  %v15501_v9 = vadd.f32 %v11689_v15, %v15401_v28  ;;  %6235 = vrot.lane.b32.xlu1 %v15441_v31, %s12840_s11  ;;  %11732 = vmatprep.subr.mxu1 %v15409_v25 }
0x1487   :  { %11733 = vmatpush3.msra.mxu1 %v15409_v25 }
0x1488   :  { %17246 = vst [vmem:[#allocation25_spill] sm:$0xff] %v15501_v9  ;;  %6655 = vrot.lane.b32.xlu0 %v15433_v17, %s12841_s12 }
0x148a   :  { %6653 = vrot.lane.b32.xlu1 %v15441_v31, %s12841_s12 }
0x1493   :  { %v11708_v28 = vpop.f32.mrf.mxu1 }
0x1494   :  { %v15523_v35 = vmul.f32 0.35355338, %v11708_v28 }
0x1495   :  { %v5686_v63 = vpop.f32.mrf.mxu1 }
0x1496   :  { %v15517_v21 = vmul.f32 0.35355338, %v5686_v63  ;;  %v5736_v63 = vsel %vm1269_vm3, %v15523_v35, -inf }
0x1497   :  { %v11711_v15 = vpop.f32.mrf.mxu1 }
0x1498   :  { %v15519_v51 = vmul.f32 0.35355338, %v11711_v15  ;;  %v5733_v14 = vsel %vm1269_vm3, %v15517_v21, -inf }
0x1499   :  { %v5696_v33 = vpop.f32.mrf.mxu1 }
0x149a   :  { %v15525_v40 = vmul.f32 0.35355338, %v5696_v33  ;;  %v5742_v39 = vsel %vm1269_vm3, %v15519_v51, -inf }
0x149b   :  { %v11714_v61 = vpop.f32.mrf.mxu1 }
0x149c   :  { %v15533_v15 = vmul.f32 0.35355338, %v11714_v61 }
0x149d   :  { %v5706_v55 = vpop.f32.mrf.mxu1 }
0x149e   :  { %v15529_v4 = vmul.f32 0.35355338, %v5706_v55 }
0x149f   :  { %v11717_v49 = vpop.f32.mrf.mxu1 }
0x14a0   :  { %v5745_v28 = vsel %vm1269_vm3, %v15529_v4, -inf  ;;  %v15541_v52 = vmul.f32 0.35355338, %v11717_v49 }
0x14a1   :  { %v5716_v7 = vpop.f32.mrf.mxu1 }
0x14a2   :  { %v15537_v33 = vmul.f32 0.35355338, %v5716_v7  ;;  %v5754_v61 = vsel %vm1269_vm3, %v15541_v52, -inf  ;;  %v15549_v7 = vpop.permute.xlu0 %6824 }
0x14a3   :  { %17250 = vst [vmem:[#allocation16_spill] sm:$0xff] %v15549_v7 }
0x14a4   :  { %v5751_v55 = vsel %vm1269_vm3, %v15537_v33, -inf }
0x14a7   :  { %5734 = vmax.xlane.f32.xlu0 %v5733_v14  ;;  %v5739_v14 = vsel %vm1269_vm3, %v15525_v40, -inf }
0x14ab   :  { %5743 = vmax.xlane.f32.xlu0 %v5742_v39  ;;  %v5748_v39 = vsel %vm1269_vm3, %v15533_v15, -inf }
0x14ae   :  { %5737 = vmax.xlane.f32.xlu1 %v5736_v63 }
0x14af   :  { %5740 = vmax.xlane.f32.xlu0 %v5739_v14 }
0x14b2   :  { %5746 = vmax.xlane.f32.xlu1 %v5745_v28 }
0x14b3   :  { %5749 = vmax.xlane.f32.xlu0 %v5748_v39 }
0x14b6   :  { %5752 = vmax.xlane.f32.xlu1 %v5751_v55  ;;  %v15566_v55 = vpop.f32.mrf.mxu0 }
0x14b7   :  { %5755 = vmax.xlane.f32.xlu0 %v5754_v61  ;;  %17253 = vst [vmem:[#allocation19_spill] sm:$0xff] %v15566_v55 }
0x14de   :  { %v15551_v63 = vpop.permute.xlu0 %6225 }
0x14e2   :  { %v15553_v14 = vpop.permute.xlu0 %6643 }
0x14e3   :  { %17251 = vst [vmem:[#allocation17_spill] sm:$0xff] %v15553_v14 }
0x14e6   :  { %v15555_v49 = vpop.permute.xlu0 %6647 }
0x14e7   :  { %17252 = vst [vmem:[#allocation18_spill] sm:$0xff] %v15555_v49 }
0x14ea   :  { %v15557_v28 = vpop.permute.xlu0 %6233 }
0x14ee   :  { %v15559_v41 = vpop.permute.xlu0 %6651 }
0x14f2   :  { %v15561_v39 = vpop.permute.xlu0 %6231 }
0x14f6   :  { %v15563_v44 = vpop.permute.xlu0 %6237 }
0x14f7   :  { %11774 = vmatprep.subr.mxu1 %v15563_v44 }
0x1505   :  { %v11764_v61 = vpop.f32.mrf.mxu0 }
0x1506   :  { %v15568_v32 = vmul.f32 0.35355338, %v11764_v61 }
0x1507   :  { %v6080_v24 = vpop.f32.mrf.mxu0 }
0x1508   :  { %v15570_v46 = vmul.f32 0.35355338, %v6080_v24  ;;  %v6130_v27 = vsel %vm1269_vm3, %v15568_v32, -inf  ;;  %v15582_v24 = vpop.permute.xlu1 %6822 }
0x1509   :  { %v11767_v23 = vpop.f32.mrf.mxu0  ;;  %6131 = vmax.xlane.f32.xlu0 %v6130_v27  ;;  %17254 = vst [vmem:[#allocation20_spill] sm:$0xff] %v15582_v24 }
0x150a   :  { %v15574_v53 = vmul.f32 0.35355338, %v11767_v23  ;;  %v6127_v57 = vsel %vm1269_vm3, %v15570_v46, -inf }
0x150b   :  { %v6090_v56 = vpop.f32.mrf.mxu0  ;;  %6128 = vmax.xlane.f32.xlu1 %v6127_v57 }
0x150c   :  { %v15578_v5 = vmul.f32 0.35355338, %v6090_v56  ;;  %v6136_v61 = vsel %vm1269_vm3, %v15574_v53, -inf  ;;  %v15592_v47 = vpop.permute.xlu1 %6223 }
0x150d   :  { %v11770_v58 = vpop.f32.mrf.mxu0  ;;  %6137 = vmax.xlane.f32.xlu0 %v6136_v61 }
0x150e   :  { %v15584_v60 = vmul.f32 0.35355338, %v11770_v58  ;;  %v6133_v27 = vsel %vm1269_vm3, %v15578_v5, -inf }
0x150f   :  { %v6100_v23 = vpop.f32.mrf.mxu0  ;;  %6134 = vmax.xlane.f32.xlu1 %v6133_v27 }
0x1510   :  { %v15588_v3 = vmul.f32 0.35355338, %v6100_v23  ;;  %v6142_v56 = vsel %vm1269_vm3, %v15584_v60, -inf }
0x1511   :  { %v11773_v57 = vpop.f32.mrf.mxu0  ;;  %6143 = vmax.xlane.f32.xlu0 %v6142_v56  ;;  %v15604_v56 = vpop.permute.xlu1 %6641 }
0x1512   :  { %v15594_v50 = vmul.f32 0.35355338, %v11773_v57  ;;  %v6139_v58 = vsel %vm1269_vm3, %v15588_v3, -inf  ;;  %17255 = vst [vmem:[#allocation21_spill] sm:$0xff] %v15604_v56 }
0x1513   :  { %v6110_v61 = vpop.f32.mrf.mxu0  ;;  %6140 = vmax.xlane.f32.xlu1 %v6139_v58 }
0x1514   :  { %v15598_v34 = vmul.f32 0.35355338, %v6110_v61  ;;  %v6148_v27 = vsel %vm1269_vm3, %v15594_v50, -inf }
0x1515   :  { %6149 = vmax.xlane.f32.xlu0 %v6148_v27  ;;  %v15606_v54 = vpop.permute.xlu1 %6229 }
0x1516   :  { %v6145_v23 = vsel %vm1269_vm3, %v15598_v34, -inf }
0x1517   :  { %6146 = vmax.xlane.f32.xlu1 %v6145_v23  ;;  %v15620_v23 = vpop.permute.xlu0 %6655 }
0x1519   :  { %v15608_v57 = vpop.permute.xlu1 %6227 }
0x151d   :  { %v15616_v61 = vpop.permute.xlu1 %6645 }
0x151e   :  { %17256 = vst [vmem:[#allocation22_spill] sm:$0xff] %v15616_v61 }
0x1521   :  { %v15618_v27 = vpop.permute.xlu1 %6649 }
0x1525   :  { %v11820_v42 = vpop.f32.mrf.mxu0  ;;  %v15622_v25 = vpop.permute.xlu1 %6235 }
0x1526   :  { %v15610_v20 = vmul.f32 0.35355338, %v11820_v42 }
0x1527   :  { %v6506_v42 = vpop.f32.mrf.mxu0 }
0x1528   :  { %6818 = vrot.lane.b32.xlu1 %v15187_v29, %s12842_s15  ;;  %v6556_v58 = vsel %vm1269_vm3, %v15610_v20, -inf  ;;  %v15629_v55 = vmul.f32 0.35355338, %v6506_v42 }
0x1529   :  { %6557 = vmax.xlane.f32.xlu0 %v6556_v58  ;;  %v15624_v13 = vpop.permute.xlu1 %6653  ;;  %v11823_v29 = vpop.f32.mrf.mxu0 }
0x152b   :  { %v6516_v6 = vpop.f32.mrf.mxu0 }
0x152c   :  { %v15632_v7 = vmul.f32 0.35355338, %v6516_v6 }
0x152d   :  { %v11826_v24 = vpop.f32.mrf.mxu0 }
0x152e   :  { %v6559_v42 = vsel %vm1269_vm3, %v15632_v7, -inf }
0x1530   :  { %v5735_v59 = vpop.xlane.xlu0 %5734 }
0x1531   :  { %v5757_v48 = vsub.f32 %v15517_v21, %v5735_v59  ;;  %v6526_v59 = vpop.f32.mrf.mxu0 }
0x1533   :  { %v5765_v26 = vmul.f32 1.442695, %v5757_v48 }
0x1534   :  { %v5744_v10 = vpop.xlane.xlu0 %5743 }
0x1535   :  { %12531 = vpow2.f32 %v5765_v26  ;;  %v15640_v26 = vmul.f32 0.35355338, %v6526_v59  ;;  %v5760_v59 = vsub.f32 %v15519_v51, %v5744_v10  ;;  %v15661_v10 = vmul.f32 0.35355338, %v11826_v24 }
0x1537   :  { %v5738_v58 = vpop.xlane.xlu1 %5737 }
0x1538   :  { %v5741_v0 = vpop.xlane.xlu0 %5740  ;;  %v5758_v48 = vsub.f32 %v15523_v35, %v5738_v58 }
0x1539   :  { %v5759_v9 = vsub.f32 %v15525_v40, %v5741_v0  ;;  %v11829_v0 = vpop.f32.mrf.mxu0 }
0x153b   :  { %v5747_v38 = vpop.xlane.xlu1 %5746  ;;  %v5769_v8 = vmul.f32 1.442695, %v5759_v9  ;;  %v6565_v9 = vsel %vm1269_vm3, %v15640_v26, -inf  ;;  %v6536_v35 = vpop.f32.mrf.mxu0 }
0x153c   :  { %v5761_v21 = vsub.f32 %v15529_v4, %v5747_v38  ;;  %v5767_v4 = vmul.f32 1.442695, %v5758_v48  ;;  %v5750_v58 = vpop.xlane.xlu0 %5749 }
0x153d   :  { %12533 = vpow2.f32 %v5769_v8  ;;  %v15648_v8 = vmul.f32 0.35355338, %v6536_v35  ;;  %v5762_v48 = vsub.f32 %v15533_v15, %v5750_v58  ;;  %v6568_v35 = vsel %vm1269_vm3, %v15661_v10, -inf }
0x153e   :  { %v5773_v40 = vmul.f32 1.442695, %v5761_v21  ;;  %v5771_v21 = vmul.f32 1.442695, %v5760_v59 }
0x153f   :  { %6820 = vrot.lane.b32.xlu0 %v15177_v12, %s12842_s15  ;;  %v6553_v12 = vsel %vm1269_vm3, %v15629_v55, -inf  ;;  %v5753_v56 = vpop.xlane.xlu1 %5752 }
0x1540   :  { %v5763_v6 = vsub.f32 %v15537_v33, %v5753_v56  ;;  %12535 = vpow2.f32 %v5773_v40  ;;  %v15652_v56 = vmul.f32 0.35355338, %v11823_v29  ;;  %v6571_v40 = vsel %vm1269_vm3, %v15648_v8, -inf }
0x1541   :  { %12537 = vpow2.f32 %v5767_v4  ;;  %v5775_v4 = vmul.f32 1.442695, %v5762_v48 }
0x1542   :  { %v5777_v38 = vmul.f32 1.442695, %v5763_v6  ;;  %v6562_v51 = vsel %vm1269_vm3, %v15652_v56, -inf }
0x1544   :  { %12539 = vpow2.f32 %v5777_v38 }
0x1545   :  { %12541 = vpow2.f32 %v5771_v21 }
0x1546   :  { %12543 = vpow2.f32 %v5775_v4 }
0x154c   :  { %6554 = vmax.xlane.f32.xlu1 %v6553_v12  ;;  %v15645_v12 = vpop.eup %12531 }
0x154d   :  { %v5781_v33 = vsel %vm1269_vm3, %v15645_v12, 0.0  ;;  %v15657_v6 = vpop.eup %12533 }
0x154e   :  { %v5787_v15 = vsel %vm1269_vm3, %v15657_v6, 0.0  ;;  %v15666_v38 = vpop.eup %12535 }
0x154f   :  { %v15670_v58 = vpop.eup %12537  ;;  %v5793_v24 = vsel %vm1269_vm3, %v15666_v38, 0.0 }
0x1550   :  { %6560 = vmax.xlane.f32.xlu1 %v6559_v42  ;;  %v5756_v42 = vpop.xlane.xlu0 %5755 }
0x1551   :  { %v5764_v29 = vsub.f32 %v15541_v52, %v5756_v42  ;;  %v15674_v59 = vpop.eup %12539  ;;  %v15676_v52 = vmul.f32 0.35355338, %v11829_v0 }
0x1552   :  { %v5799_v21 = vsel %vm1269_vm3, %v15674_v59, 0.0  ;;  %v15684_v42 = vpop.eup %12541 }
0x1553   :  { %v6574_v48 = vsel %vm1269_vm3, %v15676_v52, -inf  ;;  %v15688_v0 = vpop.eup %12543 }
0x1554   :  { %6566 = vmax.xlane.f32.xlu1 %v6565_v9  ;;  %v5779_v9 = vmul.f32 1.442695, %v5764_v29 }
0x1556   :  { %12545 = vpow2.f32 %v5779_v9 }
0x1558   :  { %5782 = vadd.xlane.f32.xlu1 %v5781_v33  ;;  %v5784_v33 = vsel %vm1269_vm3, %v15670_v58, 0.0 }
0x155c   :  { %6572 = vmax.xlane.f32.xlu1 %v6571_v40  ;;  %v5790_v40 = vsel %vm1269_vm3, %v15684_v42, 0.0 }
0x155e   :  { %6563 = vmax.xlane.f32.xlu0 %v6562_v51  ;;  %v5796_v51 = vsel %vm1269_vm3, %v15688_v0, 0.0 }
0x1560   :  { %5788 = vadd.xlane.f32.xlu1 %v5787_v15 }
0x1562   :  { %6569 = vmax.xlane.f32.xlu0 %v6568_v35 }
0x1563   :  { %v15692_v4 = vpop.eup %12545 }
0x1564   :  { %5794 = vadd.xlane.f32.xlu1 %v5793_v24  ;;  %v5802_v29 = vsel %vm1269_vm3, %v15692_v4, 0.0 }
0x1566   :  { %5785 = vadd.xlane.f32.xlu0 %v5784_v33 }
0x1568   :  { %5800 = vadd.xlane.f32.xlu1 %v5799_v21 }
0x156a   :  { %6575 = vmax.xlane.f32.xlu0 %v6574_v48 }
0x156e   :  { %5791 = vadd.xlane.f32.xlu0 %v5790_v40 }
0x1572   :  { %5797 = vadd.xlane.f32.xlu0 %v5796_v51 }
0x1576   :  { %5803 = vadd.xlane.f32.xlu0 %v5802_v29 }
0x1592   :  { %v6132_v15 = vpop.xlane.xlu0 %6131 }
0x1593   :  { %v6152_v9 = vsub.f32 %v15568_v32, %v6132_v15 }
0x1594   :  { %v6129_v35 = vpop.xlane.xlu1 %6128 }
0x1595   :  { %v6161_v24 = vmul.f32 1.442695, %v6152_v9  ;;  %v6151_v33 = vsub.f32 %v15570_v46, %v6129_v35 }
0x1596   :  { %v6138_v21 = vpop.xlane.xlu0 %6137 }
0x1597   :  { %12547 = vpow2.f32 %v6161_v24  ;;  %v6159_v48 = vmul.f32 1.442695, %v6151_v33  ;;  %v6154_v40 = vsub.f32 %v15574_v53, %v6138_v21 }
0x1598   :  { %v6135_v14 = vpop.xlane.xlu1 %6134 }
0x1599   :  { %12549 = vpow2.f32 %v6159_v48  ;;  %v6165_v2 = vmul.f32 1.442695, %v6154_v40  ;;  %v6153_v51 = vsub.f32 %v15578_v5, %v6135_v14 }
0x159a   :  { %v6144_v61 = vpop.xlane.xlu0 %6143 }
0x159b   :  { %12551 = vpow2.f32 %v6165_v2  ;;  %v6163_v29 = vmul.f32 1.442695, %v6153_v51  ;;  %v6156_v49 = vsub.f32 %v15584_v60, %v6144_v61 }
0x159c   :  { %v6141_v32 = vpop.xlane.xlu1 %6140 }
0x159d   :  { %12553 = vpow2.f32 %v6163_v29  ;;  %v6169_v15 = vmul.f32 1.442695, %v6156_v49  ;;  %v6155_v46 = vsub.f32 %v15588_v3, %v6141_v32 }
0x159e   :  { %v6150_v9 = vpop.xlane.xlu0 %6149 }
0x159f   :  { %12555 = vpow2.f32 %v6169_v15  ;;  %v6167_v35 = vmul.f32 1.442695, %v6155_v46  ;;  %v6158_v53 = vsub.f32 %v15594_v50, %v6150_v9 }
0x15a0   :  { %v6147_v24 = vpop.xlane.xlu1 %6146 }
0x15a1   :  { %12557 = vpow2.f32 %v6167_v35  ;;  %v6173_v33 = vmul.f32 1.442695, %v6158_v53  ;;  %v6157_v5 = vsub.f32 %v15598_v34, %v6147_v24 }
0x15a3   :  { %12559 = vpow2.f32 %v6173_v33  ;;  %v6171_v2 = vmul.f32 1.442695, %v6157_v5 }
0x15a4   :  { %v15704_v14 = vpop.eup %12547 }
0x15a5   :  { %v6178_v60 = vsel %vm1269_vm3, %v15704_v14, 0.0  ;;  %12561 = vpow2.f32 %v6171_v2  ;;  %v15741_v2 = vpop.permute.xlu1 %6818 }
0x15a6   :  { %v15708_v49 = vpop.eup %12549  ;;  %6179 = vadd.xlane.f32.xlu0 %v6178_v60 }
0x15a7   :  { %v6175_v3 = vsel %vm1269_vm3, %v15708_v49, 0.0 }
0x15a8   :  { %v15712_v50 = vpop.eup %12551  ;;  %6176 = vadd.xlane.f32.xlu1 %v6175_v3 }
0x15a9   :  { %v6184_v34 = vsel %vm1269_vm3, %v15712_v50, 0.0 }
0x15aa   :  { %v15716_v61 = vpop.eup %12553  ;;  %6185 = vadd.xlane.f32.xlu0 %v6184_v34 }
0x15ab   :  { %v6181_v21 = vsel %vm1269_vm3, %v15716_v61, 0.0 }
0x15ac   :  { %v15720_v48 = vpop.eup %12555  ;;  %6182 = vadd.xlane.f32.xlu1 %v6181_v21 }
0x15ad   :  { %v6190_v40 = vsel %vm1269_vm3, %v15720_v48, 0.0 }
0x15ae   :  { %v15724_v51 = vpop.eup %12557  ;;  %6191 = vadd.xlane.f32.xlu0 %v6190_v40 }
0x15af   :  { %v6187_v29 = vsel %vm1269_vm3, %v15724_v51, 0.0 }
0x15b0   :  { %v15728_v32 = vpop.eup %12559  ;;  %6188 = vadd.xlane.f32.xlu1 %v6187_v29 }
0x15b1   :  { %v6196_v9 = vsel %vm1269_vm3, %v15728_v32, 0.0 }
0x15b2   :  { %v6558_v15 = vpop.xlane.xlu0 %6557  ;;  %v15733_v35 = vpop.eup %12561 }
0x15b3   :  { %v6578_v46 = vsub.f32 %v15610_v20, %v6558_v15  ;;  %v6193_v24 = vsel %vm1269_vm3, %v15733_v35, 0.0 }
0x15b4   :  { %6197 = vadd.xlane.f32.xlu1 %v6196_v9 }
0x15b5   :  { %v6587_v53 = vmul.f32 1.442695, %v6578_v46 }
0x15b6   :  { %v15747_v15 = vpop.permute.xlu0 %6820 }
0x15b7   :  { %12563 = vpow2.f32 %v6587_v53 }
0x15b8   :  { %6194 = vadd.xlane.f32.xlu1 %v6193_v24 }
0x15c4   :  { %v15737_v33 = vpop.eup %12563 }
0x15c5   :  { %v6604_v5 = vsel %vm1269_vm3, %v15737_v33, 0.0 }
0x15c6   :  { %6605 = vadd.xlane.f32.xlu0 %v6604_v5 }
0x15d5   :  { %v6555_v20 = vpop.xlane.xlu1 %6554 }
0x15d6   :  { %v6577_v60 = vsub.f32 %v15629_v55, %v6555_v20 }
0x15d8   :  { %v6585_v3 = vmul.f32 1.442695, %v6577_v60 }
0x15d9   :  { %v6561_v34 = vpop.xlane.xlu1 %6560 }
0x15da   :  { %12565 = vpow2.f32 %v6585_v3  ;;  %v6579_v29 = vsub.f32 %v15632_v7, %v6561_v34 }
0x15dc   :  { %6816 = vrot.lane.b32.xlu0 %v15193_v30, %s12842_s15  ;;  %v6589_v46 = vmul.f32 1.442695, %v6579_v29 }
0x15dd   :  { %v6567_v21 = vpop.xlane.xlu1 %6566 }
0x15de   :  { %v6581_v9 = vsub.f32 %v15640_v26, %v6567_v21 }
0x15e0   :  { %v6593_v30 = vmul.f32 1.442695, %v6581_v9 }
0x15e1   :  { %v5783_v40 = vpop.xlane.xlu1 %5782 }
0x15e2   :  { %12567 = vrcp.f32 %v5783_v40 }
0x15e3   :  { %12569 = vpow2.f32 %v6589_v46 }
0x15e4   :  { %12571 = vpow2.f32 %v6593_v30 }
0x15e5   :  { %v6573_v53 = vpop.xlane.xlu1 %6572 }
0x15e6   :  { %v6583_v20 = vsub.f32 %v15648_v8, %v6573_v53 }
0x15e7   :  { %v15750_v24 = vpop.eup %12565  ;;  %v6564_v55 = vpop.xlane.xlu0 %6563 }
0x15e8   :  { %v6601_v5 = vsel %vm1269_vm3, %v15750_v24, 0.0  ;;  %v6597_v3 = vmul.f32 1.442695, %v6583_v20 }
0x15e9   :  { %6602 = vadd.xlane.f32.xlu1 %v6601_v5  ;;  %v5789_v7 = vpop.xlane.xlu1 %5788 }
0x15ea   :  { %12573 = vrcp.f32 %v5789_v7 }
0x15eb   :  { %v15755_v60 = vpop.xlane.xlu0 %6569 }
0x15ed   :  { %v5795_v21 = vpop.xlane.xlu1 %5794 }
0x15ef   :  { %v5786_v34 = vpop.xlane.xlu0 %5785  ;;  %v12568_v40 = vpop.eup %12567 }
0x15f0   :  { %12575 = vrcp.f32 %v5786_v34  ;;  %v5813_v26 = vmul.f32 %v12568_v40, %v15645_v12  ;;  %v15759_v46 = vpop.eup %12569 }
0x15f1   :  { %12577 = vpow2.f32 %v6597_v3  ;;  %v5801_v8 = vpop.xlane.xlu1 %5800  ;;  %v6607_v53 = vsel %vm1269_vm3, %v15759_v46, 0.0  ;;  %v15765_v5 = vpop.eup %12571 }
0x15f2   :  { %11734 = vmatprep.mubr.msk.f32.mxu1 %vm1269_vm3, %v5813_v26  ;;  %12579 = vrcp.f32 %v5795_v21  ;;  %v6613_v7 = vsel %vm1269_vm3, %v15765_v5, 0.0  ;;  %v6580_v21 = vsub.f32 %v15652_v56, %v6564_v55 }
0x15f3   :  { %v6576_v29 = vpop.xlane.xlu0 %6575 }
0x15f7   :  { %v5792_v9 = vpop.xlane.xlu0 %5791  ;;  %v12574_v30 = vpop.eup %12573 }
0x15f8   :  { %12581 = vrcp.f32 %v5792_v9 }
0x15f9   :  { %12583 = vrcp.f32 %v5801_v8 }
0x15fa   :  { %6814 = vrot.lane.b32.xlu1 %v15203_v37, %s12842_s15  ;;  %v5815_v37 = vmul.f32 %v12574_v30, %v15657_v6 }
0x15fb   :  { %v5798_v12 = vpop.xlane.xlu0 %5797  ;;  %6608 = vadd.xlane.f32.xlu0 %v6607_v53 }
0x15fc   :  { %12585 = vrcp.f32 %v5798_v12  ;;  %v6591_v12 = vmul.f32 1.442695, %v6580_v21 }
0x15fd   :  { %v12576_v20 = vpop.eup %12575 }
0x15fe   :  { %v15769_v3 = vpop.eup %12577  ;;  %v5814_v34 = vmul.f32 %v12576_v20, %v15670_v58 }
0x15ff   :  { %v5804_v40 = vpop.xlane.xlu0 %5803  ;;  %6614 = vadd.xlane.f32.xlu0 %v6613_v7  ;;  %v6619_v26 = vsel %vm1269_vm3, %v15769_v3, 0.0  ;;  %v12580_v58 = vpop.eup %12579 }
0x1600   :  { %12587 = vrcp.f32 %v5804_v40  ;;  %11735 = vmatmul.mubr.msk.f32.vlgmr.msra.gmra.mxu1 %vm1269_vm3, %v5814_v34  ;;  %v5817_v8 = vmul.f32 %v12580_v58, %v15666_v38  ;;  %v17262_v34 = vld [vmem:[#allocation11_spill] sm:$0xff]  ;;  %v17263_v40 = vld [vmem:[#allocation16_spill] sm:$0xff] }
0x1601   :  { %11775 = vmatpush3.msra.mxu1 %v15563_v44  ;;  %11737 = vmatprep.mubr.msk.f32.mxu1 %vm1269_vm3, %v5815_v37  ;;  %12589 = vpow2.f32 %v6591_v12 }
0x1602   :  { %11776 = vmatprep.subr.mxu1 %v15622_v25 }
0x1603   :  { %6620 = vadd.xlane.f32.xlu0 %v6619_v26  ;;  %11777 = vmatpush3.msra.mxu1 %v15622_v25  ;;  %v6582_v25 = vsub.f32 %v15661_v10, %v15755_v60  ;;  %v6584_v10 = vsub.f32 %v15676_v52, %v6576_v29 }
0x1604   :  { %11778 = vmatprep.subr.mxu1 %v15557_v28 }
0x1605   :  { %v12582_v6 = vpop.eup %12581  ;;  %11779 = vmatpush3.msra.mxu1 %v15557_v28  ;;  %v6595_v38 = vmul.f32 1.442695, %v6582_v25 }
0x1606   :  { %11780 = vmatprep.subr.mxu1 %v15561_v39  ;;  %v5816_v44 = vmul.f32 %v12582_v6, %v15684_v42  ;;  %v12584_v9 = vpop.eup %12583 }
0x1607   :  { %11781 = vmatpush3.msra.mxu1 %v15561_v39  ;;  %v5819_v39 = vmul.f32 %v12584_v9, %v15674_v59  ;;  %12591 = vpow2.f32 %v6595_v38  ;;  %v17264_v9 = vld [vmem:[#allocation20_spill] sm:$0xff] }
0x1608   :  { %11782 = vmatprep.subr.mxu1 %v15606_v54  ;;  %11738 = vmatmul.mubr.msk.f32.gmra.mxu1 %vm1269_vm3, %v5816_v44 }
0x1609   :  { %v12586_v53 = vpop.eup %12585  ;;  %11783 = vmatpush3.msra.mxu1 %v15606_v54  ;;  %11740 = vmatprep.mubr.msk.f32.mxu1 %vm1269_vm3, %v5817_v8 }
0x160a   :  { %v5818_v28 = vmul.f32 %v12586_v53, %v15688_v0  ;;  %11784 = vmatprep.subr.mxu1 %v15608_v57 }
0x160b   :  { %11785 = vmatpush3.msra.mxu1 %v15608_v57  ;;  %v6599_v57 = vmul.f32 1.442695, %v6584_v10  ;;  %v17265_v10 = vld [vmem:[#allocation25_spill] sm:$0xff] }
0x160c   :  { %11786 = vmatprep.subr.mxu1 %v15551_v63  ;;  %11741 = vmatmul.mubr.msk.f32.gmra.mxu1 %vm1269_vm3, %v5818_v28 }
0x160d   :  { %v12588_v56 = vpop.eup %12587  ;;  %11787 = vmatpush3.msra.mxu1 %v15551_v63  ;;  %11743 = vmatprep.mubr.msk.f32.mxu1 %vm1269_vm3, %v5819_v39  ;;  %12593 = vpow2.f32 %v6599_v57 }
0x160e   :  { %v5820_v54 = vmul.f32 %v12588_v56, %v15692_v4  ;;  %11788 = vmatprep.subr.mxu1 %v15592_v47  ;;  %v15809_v59 = vpop.eup %12589 }
0x160f   :  { %11789 = vmatpush3.msra.mxu1 %v15592_v47  ;;  %v6610_v63 = vsel %vm1269_vm3, %v15809_v59, 0.0 }
0x1610   :  { %11830 = vmatprep.subr.mxu1 %v15620_v23  ;;  %11744 = vmatmul.mubr.msk.f32.gmra.mxu1 %vm1269_vm3, %v5820_v54 }
0x1614   :  { %v15815_v52 = vpop.eup %12591 }
0x1615   :  { %v6616_v47 = vsel %vm1269_vm3, %v15815_v52, 0.0 }
0x1619   :  { %6812 = vrot.lane.b32.xlu0 %v15209_v43, %s12842_s15 }
0x161a   :  { %v15821_v42 = vpop.eup %12593 }
0x161d   :  { %6794 = vrot.lane.b32.xlu0 %v15140_v36, %s12842_s15  ;;  %v6622_v36 = vsel %vm1269_vm3, %v15821_v42, 0.0 }
0x161e   :  { %6611 = vadd.xlane.f32.xlu1 %v6610_v63 }
0x1621   :  { %6798 = vrot.lane.b32.xlu0 %v15266_v18, %s12842_s15 }
0x1622   :  { %6617 = vadd.xlane.f32.xlu1 %v6616_v47 }
0x1625   :  { %6802 = vrot.lane.b32.xlu0 %v15282_v11, %s12842_s15 }
0x1626   :  { %6623 = vadd.xlane.f32.xlu1 %v6622_v36 }
0x1629   :  { %6806 = vrot.lane.b32.xlu0 %v15300_v22, %s12842_s15 }
0x162d   :  { %7071 = vrot.lane.b32.xlu0 %v15441_v31, %s12842_s15 }
0x162f   :  { %v6180_v43 = vpop.xlane.xlu0 %6179 }
0x1630   :  { %12595 = vrcp.f32 %v6180_v43 }
0x1631   :  { %v6177_v18 = vpop.xlane.xlu1 %6176 }
0x1632   :  { %12597 = vrcp.f32 %v6177_v18 }
0x1633   :  { %v6186_v0 = vpop.xlane.xlu0 %6185 }
0x1634   :  { %12599 = vrcp.f32 %v6186_v0 }
0x1635   :  { %v6183_v4 = vpop.xlane.xlu1 %6182 }
0x1636   :  { %12601 = vrcp.f32 %v6183_v4 }
0x1637   :  { %v6192_v55 = vpop.xlane.xlu0 %6191  ;;  %6810 = vrot.lane.b32.xlu1 %v15219_v1, %s12842_s15 }
0x1638   :  { %12603 = vrcp.f32 %v6192_v55 }
0x1639   :  { %v6189_v11 = vpop.xlane.xlu1 %6188 }
0x163a   :  { %12605 = vrcp.f32 %v6189_v11 }
0x163b   :  { %6796 = vrot.lane.b32.xlu1 %v15239_v16, %s12842_s15 }
0x163d   :  { %v6198_v22 = vpop.xlane.xlu1 %6197  ;;  %v12596_v31 = vpop.eup %12595 }
0x163e   :  { %v6208_v30 = vmul.f32 %v12596_v31, %v15704_v14  ;;  %12607 = vrcp.f32 %v6198_v22  ;;  %v17266_v31 = vld [vmem:[#allocation19_spill] sm:$0xff] }
0x163f   :  { %v12598_v60 = vpop.eup %12597  ;;  %6800 = vrot.lane.b32.xlu1 %v15271_v62, %s12842_s15 }
0x1640   :  { %v6207_v29 = vmul.f32 %v12598_v60, %v15708_v49 }
0x1641   :  { %v6195_v20 = vpop.xlane.xlu1 %6194  ;;  %v12600_v7 = vpop.eup %12599 }
0x1642   :  { %12609 = vrcp.f32 %v6195_v20  ;;  %11790 = vmatprep.mubr.msk.f32.mxu1 %vm1269_vm3, %v6207_v29  ;;  %v6210_v14 = vmul.f32 %v12600_v7, %v15712_v50  ;;  %v17258_v50 = vld [vmem:[#allocation22_spill] sm:$0xff]  ;;  %v17267_v29 = vld [vmem:[#allocation55_spill] sm:$0xff]  ;;  %v17268_v20 = vld [vmem:[#allocation29_spill] sm:$0xff] }
0x1643   :  { %v12602_v1 = vpop.eup %12601  ;;  %6804 = vrot.lane.b32.xlu1 %v15289_v45, %s12842_s15  ;;  %11791 = vmatmul.mubr.msk.f32.vlgmr.msra.gmra.mxu1 %vm1269_vm3, %v6208_v30 }
0x1644   :  { %11831 = vmatpush3.msra.mxu1 %v15620_v23  ;;  %v6209_v16 = vmul.f32 %v12602_v1, %v15716_v61  ;;  %v17257_v23 = vld [vmem:[#allocation18_spill] sm:$0xff]  ;;  %v17259_v61 = vld [vmem:[#allocation52_spill] sm:$0xff] }
0x1645   :  { %11832 = vmatprep.subr.mxu1 %v15624_v13  ;;  %v12604_v62 = vpop.eup %12603  ;;  %v17269_v1 = vld [vmem:[#allocation14_spill] sm:$0xff] }
0x1646   :  { %11833 = vmatpush3.msra.mxu1 %v15624_v13  ;;  %11793 = vmatprep.mubr.msk.f32.mxu1 %vm1269_vm3, %v6209_v16  ;;  %v6212_v13 = vmul.f32 %v12604_v62, %v15720_v48  ;;  %v17260_v48 = vld [vmem:[#allocation17_spill] sm:$0xff]  ;;  %v17270_v62 = vld [vmem:[#allocation15_spill] sm:$0xff] }
0x1647   :  { %v12606_v49 = vpop.eup %12605  ;;  %11834 = vmatprep.subr.mxu1 %v15559_v41  ;;  %6808 = vrot.lane.b32.xlu1 %v15307_v19, %s12842_s15 }
0x1648   :  { %11794 = vmatmul.mubr.msk.f32.gmra.mxu1 %vm1269_vm3, %v6210_v14  ;;  %v6211_v45 = vmul.f32 %v12606_v49, %v15724_v51  ;;  %v17271_v14 = vld [vmem:[#allocation10_spill] sm:$0xff]  ;;  %v17272_v49 = vld [vmem:[#allocation12_spill] sm:$0xff] }
0x1649   :  { %11835 = vmatpush3.msra.mxu1 %v15559_v41 }
0x164a   :  { %11836 = vmatprep.subr.mxu1 %v15618_v27  ;;  %11796 = vmatprep.mubr.msk.f32.mxu1 %vm1269_vm3, %v6211_v45 }
0x164b   :  { %11837 = vmatpush3.msra.mxu1 %v15618_v27  ;;  %7073 = vrot.lane.b32.xlu1 %v15433_v17, %s12842_s15  ;;  %v12608_v19 = vpop.eup %12607  ;;  %v17261_v17 = vld [vmem:[#allocation21_spill] sm:$0xff] }
0x164c   :  { %11838 = vmatprep.subr.mxu1 %v17257_v23  ;;  %11797 = vmatmul.mubr.msk.f32.gmra.mxu1 %vm1269_vm3, %v6212_v13  ;;  %v6214_v51 = vmul.f32 %v12608_v19, %v15728_v32 }
0x164d   :  { %11839 = vmatpush3.msra.mxu1 %v17257_v23 }
0x164e   :  { %11840 = vmatprep.subr.mxu1 %v17258_v50 }
0x164f   :  { %v12610_v41 = vpop.eup %12609  ;;  %11841 = vmatpush3.msra.mxu1 %v17258_v50  ;;  %7069 = vrot.lane.b32.xlu1 %v17259_v61, %s12842_s15  ;;  %v6606_v37 = vpop.xlane.xlu0 %6605 }
0x1650   :  { %11842 = vmatprep.subr.mxu1 %v17260_v48  ;;  %v6213_v27 = vmul.f32 %v12610_v41, %v15733_v35  ;;  %12611 = vrcp.f32 %v6606_v37 }
0x1651   :  { %11843 = vmatpush3.msra.mxu1 %v17260_v48 }
0x1652   :  { %11844 = vmatprep.subr.mxu1 %v17261_v17  ;;  %11799 = vmatprep.mubr.msk.f32.mxu1 %vm1269_vm3, %v6213_v27 }
0x1653   :  { %11845 = vmatpush3.msra.mxu1 %v17261_v17  ;;  %7067 = vrot.lane.b32.xlu1 %v17262_v34, %s12842_s15  ;;  %v6817_v21 = vpop.permute.xlu0 %6816 }
0x1654   :  { %11858 = vmatprep.subr.msk.mxu1 %vm1107_vm2, %v17263_v40  ;;  %11800 = vmatmul.mubr.msk.f32.gmra.mxu1 %vm1269_vm3, %v6214_v51 }
0x165d   :  { %v12612_v26 = vpop.eup %12611 }
0x165e   :  { %v6634_v32 = vmul.f32 %v12612_v26, %v15737_v33 }
0x1672   :  { %v6603_v35 = vpop.xlane.xlu1 %6602 }
0x1673   :  { %12613 = vrcp.f32 %v6603_v35 }
0x1676   :  { %v6815_v12 = vpop.permute.xlu1 %6814 }
0x1680   :  { %v12614_v58 = vpop.eup %12613 }
0x1681   :  { %v6633_v6 = vmul.f32 %v12614_v58, %v15750_v24 }
0x1683   :  { %11846 = vmatprep.mubr.msk.f32.mxu1 %vm1269_vm3, %v6633_v6 }
0x1684   :  { %v6609_v44 = vpop.xlane.xlu0 %6608  ;;  %11847 = vmatmul.mubr.msk.f32.vlgmr.msra.gmra.mxu1 %vm1269_vm3, %v6634_v32 }
0x1685   :  { %12615 = vrcp.f32 %v6609_v44  ;;  %11859 = vmatpush3.xpose.msk.msra.mxu1 %vm1107_vm2, %v17263_v40 }
0x1686   :  { %11860 = vmatprep.subr.msk.mxu1 %vm1107_vm2, %v17264_v9 }
0x1688   :  { %v6615_v24 = vpop.xlane.xlu0 %6614 }
0x1689   :  { %11861 = vmatpush3.xpose.msk.msra.mxu1 %vm1107_vm2, %v17264_v9  ;;  %12617 = vrcp.f32 %v6615_v24 }
0x168a   :  { %11862 = vmatprep.subr.msk.mxu1 %vm1107_vm2, %v15747_v15 }
0x168c   :  { %v6621_v8 = vpop.xlane.xlu0 %6620 }
0x168d   :  { %11863 = vmatpush3.xpose.msk.msra.mxu1 %vm1107_vm2, %v15747_v15 }
0x168e   :  { %11864 = vmatprep.subr.msk.mxu1 %vm1107_vm2, %v15741_v2 }
0x1690   :  { %v6813_v15 = vpop.permute.xlu0 %6812 }
0x1691   :  { %11865 = vmatpush3.xpose.msk.msra.mxu1 %vm1107_vm2, %v15741_v2 }
0x1692   :  { %v12616_v33 = vpop.eup %12615  ;;  %11866 = vmatprep.subr.msk.mxu1 %vm1107_vm2, %v6817_v21 }
0x1693   :  { %v6635_v53 = vmul.f32 %v12616_v33, %v15759_v46 }
0x1694   :  { %v6795_v28 = vpop.permute.xlu0 %6794 }
0x1695   :  { %11867 = vmatpush3.xpose.msk.msra.mxu1 %vm1107_vm2, %v6817_v21  ;;  %11849 = vmatprep.mubr.msk.f32.mxu1 %vm1269_vm3, %v6635_v53 }
0x1696   :  { %11868 = vmatprep.subr.msk.mxu1 %vm1107_vm2, %v6815_v12  ;;  %v12618_v56 = vpop.eup %12617 }
0x1697   :  { %v6637_v63 = vmul.f32 %v12618_v56, %v15765_v5 }
0x1698   :  { %v6799_v36 = vpop.permute.xlu0 %6798 }
0x1699   :  { %11869 = vmatpush3.xpose.msk.msra.mxu1 %vm1107_vm2, %v6815_v12 }
0x169a   :  { %11870 = vmatprep.subr.msk.mxu1 %vm1107_vm2, %v6813_v15 }
0x169d   :  { %11871 = vmatpush3.xpose.msk.msra.mxu1 %vm1107_vm2, %v6813_v15 }
0x16a7   :  { %v6612_v2 = vpop.xlane.xlu1 %6611 }
0x16a8   :  { %12619 = vrcp.f32 %v6612_v2 }
0x16a9   :  { %12621 = vrcp.f32 %v6621_v8 }
0x16ab   :  { %v6618_v25 = vpop.xlane.xlu1 %6617 }
0x16ac   :  { %12623 = vrcp.f32 %v6618_v25 }
0x16af   :  { %v6624_v46 = vpop.xlane.xlu1 %6623 }
0x16b0   :  { %12625 = vrcp.f32 %v6624_v46 }
0x16b3   :  { %v6811_v39 = vpop.permute.xlu1 %6810 }
0x16b4   :  { %11872 = vmatprep.subr.msk.mxu1 %vm1107_vm2, %v6811_v39 }
0x16b5   :  { %v12620_v38 = vpop.eup %12619  ;;  %11873 = vmatpush3.xpose.msk.msra.mxu1 %vm1107_vm2, %v6811_v39 }
0x16b6   :  { %11942 = vmatprep.subr.mxu1 %v17265_v10  ;;  %v6636_v54 = vmul.f32 %v12620_v38, %v15809_v59  ;;  %v12622_v47 = vpop.eup %12621  ;;  %v6803_v59 = vpop.permute.xlu0 %6802 }
0x16b7   :  { %v6797_v57 = vpop.permute.xlu1 %6796  ;;  %v6639_v4 = vmul.f32 %v12622_v47, %v15769_v3 }
0x16b8   :  { %11850 = vmatmul.mubr.msk.f32.gmra.mxu1 %vm1269_vm3, %v6636_v54 }
0x16b9   :  { %v12624_v43 = vpop.eup %12623  ;;  %11852 = vmatprep.mubr.msk.f32.mxu1 %vm1269_vm3, %v6637_v63 }
0x16ba   :  { %v6638_v18 = vmul.f32 %v12624_v43, %v15815_v52  ;;  %v12790_v52 = vld [vmem:[%s16964_s3 + $0x8] ss:$0 sm:$0xff]  ;;  %v6807_v60 = vpop.permute.xlu0 %6806 }
0x16bb   :  { %v6801_v0 = vpop.permute.xlu1 %6800  ;;  %v15924_v3 = vadd.f32 %v12790_v52, %v17266_v31  ;;  %v17291_v52 = vld [vmem:[#allocation58_spill] sm:$0xff] }
0x16bc   :  { %11853 = vmatmul.mubr.msk.f32.gmra.mxu1 %vm1269_vm3, %v6638_v18 }
0x16bd   :  { %v12626_v55 = vpop.eup %12625  ;;  %11855 = vmatprep.mubr.msk.f32.mxu1 %vm1269_vm3, %v6639_v4 }
0x16be   :  { %v6640_v5 = vmul.f32 %v12626_v55, %v15821_v42  ;;  %v7072_v30 = vpop.permute.xlu0 %7071 }
0x16bf   :  { %v6805_v11 = vpop.permute.xlu1 %6804 }
0x16c0   :  { %11856 = vmatmul.mubr.msk.f32.gmra.mxu1 %vm1269_vm3, %v6640_v5  ;;  %v15948_v45 = vpop.f32.mrf.mxu1 }
0x16c1   :  { %11874 = vmatprep.mubr.msk.f32.mxu1 %vm1107_vm2, %v6795_v28  ;;  %17273 = vst [vmem:[#allocation23_spill] sm:$0xff] %v15948_v45 }
0x16c2   :  { %v15950_v13 = vpop.f32.mrf.mxu1 }
0x16c3   :  { %v6809_v22 = vpop.permute.xlu1 %6808  ;;  %17274 = vst [vmem:[#allocation18_spill] sm:$0xff] %v15950_v13 }
0x16c4   :  { %11875 = vmatmul.mubr.msk.f32.vlgmr.msra.gmra.mxu1 %vm1107_vm2, %v6797_v57 }
0x16c5   :  { %11943 = vmatpush3.msra.mxu1 %v17265_v10  ;;  %11877 = vmatprep.mubr.msk.f32.mxu1 %vm1107_vm2, %v6799_v36 }
0x16c6   :  { %11944 = vmatprep.subr.mxu1 %v15924_v3 }
0x16c7   :  { %11945 = vmatpush3.msra.mxu1 %v15924_v3  ;;  %v7074_v42 = vpop.permute.xlu1 %7073 }
0x16c8   :  { %11946 = vmatprep.subr.mxu1 %v17267_v29  ;;  %11878 = vmatmul.mubr.msk.f32.gmra.mxu1 %vm1107_vm2, %v6801_v0  ;;  %v15952_v23 = vpop.f32.mrf.mxu1 }
0x16c9   :  { %11886 = vmatprep.subr.mxu0 %v7074_v42  ;;  %11947 = vmatpush3.msra.mxu1 %v17267_v29  ;;  %17275 = vst [vmem:[#allocation22_spill] sm:$0xff] %v15952_v23 }
0x16ca   :  { %11880 = vmatprep.mubr.msk.f32.mxu1 %vm1107_vm2, %v6803_v59  ;;  %11887 = vmatpush3.msra.mxu0 %v7074_v42  ;;  %v15954_v19 = vpop.f32.mrf.mxu1 }
0x16cb   :  { %11948 = vmatprep.subr.mxu1 %v17268_v20  ;;  %11888 = vmatprep.subr.mxu0 %v7072_v30  ;;  %v7070_v7 = vpop.permute.xlu1 %7069  ;;  %17276 = vst [vmem:[#allocation52_spill] sm:$0xff] %v15954_v19 }
0x16cc   :  { %11949 = vmatpush3.msra.mxu1 %v17268_v20  ;;  %11889 = vmatpush3.msra.mxu0 %v7072_v30  ;;  %v15956_v50 = vpop.f32.mrf.mxu1 }
0x16cd   :  { %11950 = vmatprep.subr.mxu1 %v17269_v1  ;;  %11881 = vmatmul.mubr.msk.f32.gmra.mxu1 %vm1107_vm2, %v6805_v11  ;;  %17277 = vst [vmem:[#allocation17_spill] sm:$0xff] %v15956_v50 }
0x16ce   :  { %11890 = vmatprep.subr.mxu0 %v7070_v7  ;;  %11951 = vmatpush3.msra.mxu1 %v17269_v1  ;;  %v15958_v41 = vpop.f32.mrf.mxu1 }
0x16cf   :  { %11883 = vmatprep.mubr.msk.f32.mxu1 %vm1107_vm2, %v6807_v60  ;;  %11891 = vmatpush3.msra.mxu0 %v7070_v7  ;;  %v7068_v16 = vpop.permute.xlu1 %7067  ;;  %17278 = vst [vmem:[#allocation21_spill] sm:$0xff] %v15958_v41 }
0x16d0   :  { %11952 = vmatprep.subr.mxu1 %v17270_v62  ;;  %11892 = vmatprep.subr.mxu0 %v7068_v16  ;;  %v15960_v61 = vpop.f32.mrf.mxu1 }
0x16d1   :  { %11953 = vmatpush3.msra.mxu1 %v17270_v62  ;;  %11893 = vmatpush3.msra.mxu0 %v7068_v16  ;;  %17279 = vst [vmem:[#allocation11_spill] sm:$0xff] %v15960_v61 }
0x16d2   :  { %11954 = vmatprep.subr.mxu1 %v17271_v14  ;;  %11884 = vmatmul.mubr.msk.f32.gmra.mxu1 %vm1107_vm2, %v6809_v22  ;;  %v15962_v48 = vpop.f32.mrf.mxu1  ;;  %v17290_v22 = vld [vmem:[#allocation8_spill] sm:$0xff] }
0x16d3   :  { %11955 = vmatpush3.msra.mxu1 %v17271_v14  ;;  %17280 = vst [vmem:[#allocation16_spill] sm:$0xff] %v15962_v48 }
0x16d4   :  { %11956 = vmatprep.subr.mxu1 %v17272_v49 }
0x16d5   :  { %11957 = vmatpush3.msra.mxu1 %v17272_v49 }
0x1703   :  { %v15964_v27 = vpop.f32.mrf.mxu1 }
0x1704   :  { %17281 = vst [vmem:[#allocation20_spill] sm:$0xff] %v15964_v27 }
0x1705   :  { %v15966_v17 = vpop.f32.mrf.mxu1 }
0x1708   :  { %v15968_v51 = vpop.f32.mrf.mxu1 }
0x1709   :  { %17282 = vst [vmem:[#allocation25_spill] sm:$0xff] %v15968_v51 }
0x170a   :  { %v15970_v34 = vpop.f32.mrf.mxu1 }
0x170c   :  { %v15972_v40 = vpop.f32.mrf.mxu1 }
0x170d   :  { %17283 = vst [vmem:[#allocation19_spill] sm:$0xff] %v15972_v40 }
0x170e   :  { %v15974_v37 = vpop.f32.mrf.mxu1 }
0x1714   :  { %v15976_v35 = vpop.f32.mrf.mxu1 }
0x1715   :  { %17284 = vst [vmem:[#allocation55_spill] sm:$0xff] %v15976_v35 }
0x1716   :  { %v15978_v26 = vpop.f32.mrf.mxu1 }
0x1744   :  { %v15980_v58 = vpop.f32.mrf.mxu1 }
0x1745   :  { %17285 = vst [vmem:[#allocation29_spill] sm:$0xff] %v15980_v58 }
0x1746   :  { %v15982_v21 = vpop.f32.mrf.mxu1 }
0x1778   :  { %v15984_v6 = vpop.f32.mrf.mxu1 }
0x1779   :  { %17286 = vst [vmem:[#allocation14_spill] sm:$0xff] %v15984_v6 }
0x177a   :  { %v15986_v32 = vpop.f32.mrf.mxu1 }
0x177c   :  { %v15988_v44 = vpop.f32.mrf.mxu1 }
0x177d   :  { %17287 = vst [vmem:[#allocation15_spill] sm:$0xff] %v15988_v44 }
0x177e   :  { %v15990_v9 = vpop.f32.mrf.mxu1 }
0x1780   :  { %v15992_v24 = vpop.f32.mrf.mxu1 }
0x1781   :  { %17288 = vst [vmem:[#allocation10_spill] sm:$0xff] %v15992_v24 }
0x1782   :  { %v15994_v33 = vpop.f32.mrf.mxu1 }
0x1783   :  { %17289 = vst [vmem:[#allocation12_spill] sm:$0xff] %v15994_v33 }
0x1784   :  { %v11876_v8 = vpop.f32.mrf.mxu1 }
0x1785   :  { %v6964_v53 = vmul.f32 0.35355338, %v11876_v8 }
0x1786   :  { %v6924_v12 = vpop.f32.mrf.mxu1 }
0x1787   :  { %v6963_v15 = vmul.f32 0.35355338, %v6924_v12  ;;  %v6974_v2 = vsel %vm1269_vm3, %v6964_v53, -inf }
0x1788   :  { %6975 = vmax.xlane.f32.xlu1 %v6974_v2  ;;  %v11879_v25 = vpop.f32.mrf.mxu1 }
0x1789   :  { %v6966_v46 = vmul.f32 0.35355338, %v11879_v25  ;;  %v6971_v28 = vsel %vm1269_vm3, %v6963_v15, -inf }
0x178a   :  { %6972 = vmax.xlane.f32.xlu0 %v6971_v28  ;;  %v6934_v39 = vpop.f32.mrf.mxu1 }
0x178b   :  { %v6965_v56 = vmul.f32 0.35355338, %v6934_v39  ;;  %v6980_v54 = vsel %vm1269_vm3, %v6966_v46, -inf }
0x178d   :  { %v11882_v38 = vpop.f32.mrf.mxu1  ;;  %v6977_v36 = vsel %vm1269_vm3, %v6965_v56, -inf }
0x178e   :  { %6981 = vmax.xlane.f32.xlu0 %v6980_v54  ;;  %v6968_v47 = vmul.f32 0.35355338, %v11882_v38 }
0x178f   :  { %v6944_v57 = vpop.f32.mrf.mxu1 }
0x1790   :  { %v6967_v63 = vmul.f32 0.35355338, %v6944_v57  ;;  %v6986_v59 = vsel %vm1269_vm3, %v6968_v47, -inf }
0x1792   :  { %v11885_v43 = vpop.f32.mrf.mxu1  ;;  %6978 = vmax.xlane.f32.xlu0 %v6977_v36  ;;  %v6983_v18 = vsel %vm1269_vm3, %v6967_v63, -inf }
0x1793   :  { %6984 = vmax.xlane.f32.xlu1 %v6983_v18  ;;  %v6970_v4 = vmul.f32 0.35355338, %v11885_v43  ;;  %v17292_v43 = vld [vmem:[#allocation42_spill] sm:$0xff]  ;;  %v17293_v18 = vld [vmem:[#allocation40_spill] sm:$0xff] }
0x1794   :  { %v6954_v0 = vpop.f32.mrf.mxu1 }
0x1795   :  { %v6969_v55 = vmul.f32 0.35355338, %v6954_v0  ;;  %v6992_v11 = vsel %vm1269_vm3, %v6970_v4, -inf }
0x1796   :  { %6987 = vmax.xlane.f32.xlu0 %v6986_v59 }
0x1797   :  { %v6989_v5 = vsel %vm1269_vm3, %v6969_v55, -inf }
0x1798   :  { %6990 = vmax.xlane.f32.xlu1 %v6989_v5 }
0x179a   :  { %6993 = vmax.xlane.f32.xlu0 %v6992_v11 }
0x17a9   :  { %7063 = vrot.lane.b32.xlu1 %v17290_v22, %s12842_s15 }
0x17b0   :  { %7065 = vrot.lane.b32.xlu0 %v17291_v52, %s12842_s15 }
0x1811   :  { %v6976_v31 = vpop.xlane.xlu1 %6975 }
0x1812   :  { %v6996_v60 = vsub.f32 %v6964_v53, %v6976_v31 }
0x1813   :  { %v6973_v42 = vpop.xlane.xlu0 %6972 }
0x1814   :  { %v7005_v30 = vmul.f32 1.442695, %v6996_v60  ;;  %v6995_v7 = vsub.f32 %v6963_v15, %v6973_v42 }
0x1816   :  { %12627 = vpow2.f32 %v7005_v30  ;;  %v7003_v16 = vmul.f32 1.442695, %v6995_v7 }
0x1817   :  { %v6982_v8 = vpop.xlane.xlu0 %6981 }
0x1818   :  { %12629 = vpow2.f32 %v7003_v16  ;;  %v6998_v59 = vsub.f32 %v6966_v46, %v6982_v8 }
0x181a   :  { %v7009_v22 = vmul.f32 1.442695, %v6998_v59  ;;  %v17297_v59 = vld [vmem:[#allocation31_spill] sm:$0xff] }
0x181b   :  { %v6979_v12 = vpop.xlane.xlu0 %6978 }
0x181c   :  { %v6985_v2 = vpop.xlane.xlu1 %6984  ;;  %v6997_v0 = vsub.f32 %v6965_v56, %v6979_v12 }
0x181d   :  { %v6999_v11 = vsub.f32 %v6967_v63, %v6985_v2 }
0x181e   :  { %v7007_v5 = vmul.f32 1.442695, %v6997_v0 }
0x181f   :  { %v6988_v25 = vpop.xlane.xlu0 %6987  ;;  %v7011_v31 = vmul.f32 1.442695, %v6999_v11 }
0x1820   :  { %v7000_v52 = vsub.f32 %v6968_v47, %v6988_v25  ;;  %12631 = vpow2.f32 %v7007_v5 }
0x1821   :  { %v6991_v39 = vpop.xlane.xlu1 %6990  ;;  %12633 = vpow2.f32 %v7009_v22 }
0x1822   :  { %v7001_v60 = vsub.f32 %v6969_v55, %v6991_v39  ;;  %v7013_v42 = vmul.f32 1.442695, %v7000_v52  ;;  %12635 = vpow2.f32 %v7011_v31 }
0x1823   :  { %v16008_v28 = vpop.eup %12627  ;;  %v6994_v38 = vpop.xlane.xlu0 %6993 }
0x1824   :  { %v7022_v54 = vsel %vm1269_vm3, %v16008_v28, 0.0  ;;  %v7002_v30 = vsub.f32 %v6970_v4, %v6994_v38  ;;  %v7015_v7 = vmul.f32 1.442695, %v7001_v60  ;;  %12637 = vpow2.f32 %v7013_v42  ;;  %v12791_v38 = vld [vmem:[%s16964_s3 + $0x7] ss:$0 sm:$0xff] }
0x1825   :  { %v16012_v57 = vpop.eup %12629  ;;  %7023 = vadd.xlane.f32.xlu0 %v7022_v54  ;;  %v7064_v36 = vpop.permute.xlu1 %7063  ;;  %v16063_v5 = vadd.f32 %v12791_v38, %v17297_v59 }
0x1826   :  { %v7019_v53 = vsel %vm1269_vm3, %v16012_v57, 0.0  ;;  %v7017_v16 = vmul.f32 1.442695, %v7002_v30  ;;  %12639 = vpow2.f32 %v7015_v7 }
0x1827   :  { %v7066_v15 = vpop.permute.xlu0 %7065  ;;  %7020 = vadd.xlane.f32.xlu1 %v7019_v53  ;;  %v17294_v53 = vld [vmem:[#allocation26_spill] sm:$0xff] }
0x1828   :  { %11894 = vmatprep.subr.mxu0 %v7066_v15  ;;  %12641 = vpow2.f32 %v7017_v16  ;;  %v17299_v16 = vld [vmem:[#allocation33_spill] sm:$0xff] }
0x1829   :  { %11895 = vmatpush3.msra.mxu0 %v7066_v15  ;;  %v16048_v15 = vadd.f32 %v12791_v38, %v17294_v53 }
0x182a   :  { %11896 = vmatprep.subr.mxu0 %v7064_v36 }
0x182b   :  { %11897 = vmatpush3.msra.mxu0 %v7064_v36  ;;  %v17295_v36 = vld [vmem:[#allocation27_spill] sm:$0xff] }
0x182d   :  { %v16020_v54 = vpop.eup %12631 }
0x182e   :  { %v16022_v56 = vpop.eup %12633  ;;  %v7025_v46 = vsel %vm1269_vm3, %v16020_v54, 0.0 }
0x182f   :  { %v16026_v63 = vpop.eup %12635  ;;  %v7028_v47 = vsel %vm1269_vm3, %v16022_v56, 0.0 }
0x1830   :  { %v7031_v55 = vsel %vm1269_vm3, %v16026_v63, 0.0 }
0x1831   :  { %v16030_v4 = vpop.eup %12637 }
0x1832   :  { %v7034_v12 = vsel %vm1269_vm3, %v16030_v4, 0.0 }
0x1833   :  { %v16034_v8 = vpop.eup %12639 }
0x1834   :  { %v7037_v25 = vsel %vm1269_vm3, %v16034_v8, 0.0 }
0x1835   :  { %v16038_v2 = vpop.eup %12641 }
0x1836   :  { %v7040_v39 = vsel %vm1269_vm3, %v16038_v2, 0.0 }
0x1838   :  { %7059 = vrot.lane.b32.xlu1 %v17292_v43, %s12842_s15  ;;  %v16053_v43 = vadd.f32 %v12791_v38, %v17295_v36 }
0x183b   :  { %7061 = vrot.lane.b32.xlu0 %v17293_v18, %s12842_s15  ;;  %v17296_v18 = vld [vmem:[#allocation35_spill] sm:$0xff] }
0x183c   :  { %v16056_v0 = vadd.f32 %v12791_v38, %v17296_v18 }
0x185a   :  { %7026 = vadd.xlane.f32.xlu0 %v7025_v46  ;;  %v16093_v46 = vadd.f32 %v12791_v38, %v17299_v16 }
0x185c   :  { %7029 = vadd.xlane.f32.xlu1 %v7028_v47  ;;  %v17300_v47 = vld [vmem:[#allocation57_spill] sm:$0xff] }
0x185e   :  { %7032 = vadd.xlane.f32.xlu0 %v7031_v55  ;;  %v16100_v55 = vadd.f32 %v12791_v38, %v17300_v47 }
0x1860   :  { %7035 = vadd.xlane.f32.xlu1 %v7034_v12  ;;  %v17301_v12 = vld [vmem:[#allocation9_spill] sm:$0xff] }
0x1862   :  { %7038 = vadd.xlane.f32.xlu0 %v7037_v25  ;;  %v16107_v25 = vadd.f32 %v12791_v38, %v17301_v12  ;;  %v12792_v12 = vld [vmem:[%s16964_s3 + $0x6] ss:$0 sm:$0xff] }
0x1864   :  { %7041 = vadd.xlane.f32.xlu1 %v7040_v39 }
0x1875   :  { %7740 = vrot.lane.b32.xlu1 %v16048_v15, %s12840_s11 }
0x1878   :  { %7738 = vrot.lane.b32.xlu0 %v16053_v43, %s12840_s11 }
0x1879   :  { %7736 = vrot.lane.b32.xlu1 %v16056_v0, %s12840_s11 }
0x187d   :  { %7734 = vrot.lane.b32.xlu1 %v16063_v5, %s12840_s11 }
0x18ae   :  { %v7024_v11 = vpop.xlane.xlu0 %7023 }
0x18af   :  { %12643 = vrcp.f32 %v7024_v11 }
0x18b0   :  { %v7021_v22 = vpop.xlane.xlu1 %7020 }
0x18b1   :  { %12645 = vrcp.f32 %v7021_v22 }
0x18b2   :  { %v7062_v52 = vpop.permute.xlu0 %7061 }
0x18b3   :  { %11898 = vmatprep.subr.mxu0 %v7062_v52 }
0x18b4   :  { %11899 = vmatpush3.msra.mxu0 %v7062_v52  ;;  %v7060_v31 = vpop.permute.xlu1 %7059 }
0x18b5   :  { %11900 = vmatprep.subr.mxu0 %v7060_v31 }
0x18b6   :  { %11901 = vmatpush3.msra.mxu0 %v7060_v31 }
0x18b7   :  { %11914 = vmatprep.subr.msk.mxu0 %vm1107_vm2, %v16048_v15 }
0x18bc   :  { %v12644_v60 = vpop.eup %12643 }
0x18bd   :  { %v7052_v7 = vmul.f32 %v12644_v60, %v16008_v28  ;;  %v17298_v28 = vld [vmem:[#allocation13_spill] sm:$0xff] }
0x18be   :  { %v12646_v42 = vpop.eup %12645 }
0x18bf   :  { %v7051_v30 = vmul.f32 %v12646_v42, %v16012_v57  ;;  %v16086_v57 = vadd.f32 %v12791_v38, %v17298_v28 }
0x18c1   :  { %11902 = vmatprep.mubr.msk.f32.mxu0 %vm1269_vm3, %v7051_v30 }
0x18c2   :  { %11903 = vmatmul.mubr.msk.f32.vlgmr.msra.gmra.mxu0 %vm1269_vm3, %v7052_v7 }
0x18c3   :  { %11915 = vmatpush3.xpose.msk.msra.mxu0 %vm1107_vm2, %v16048_v15 }
0x18c4   :  { %11916 = vmatprep.subr.msk.mxu0 %vm1107_vm2, %v16053_v43 }
0x18c7   :  { %11917 = vmatpush3.xpose.msk.msra.mxu0 %vm1107_vm2, %v16053_v43 }
0x18c8   :  { %11918 = vmatprep.subr.msk.mxu0 %vm1107_vm2, %v16056_v0 }
0x18cb   :  { %11919 = vmatpush3.xpose.msk.msra.mxu0 %vm1107_vm2, %v16056_v0 }
0x18cc   :  { %11920 = vmatprep.subr.msk.mxu0 %vm1107_vm2, %v16063_v5 }
0x18cf   :  { %11921 = vmatpush3.xpose.msk.msra.mxu0 %vm1107_vm2, %v16063_v5 }
0x18d0   :  { %11922 = vmatprep.subr.msk.mxu0 %vm1107_vm2, %v16086_v57 }
0x18d3   :  { %11923 = vmatpush3.xpose.msk.msra.mxu0 %vm1107_vm2, %v16086_v57 }
0x18d4   :  { %11924 = vmatprep.subr.msk.mxu0 %vm1107_vm2, %v16093_v46 }
0x18d7   :  { %11925 = vmatpush3.xpose.msk.msra.mxu0 %vm1107_vm2, %v16093_v46 }
0x18d8   :  { %11926 = vmatprep.subr.msk.mxu0 %vm1107_vm2, %v16100_v55 }
0x18db   :  { %11927 = vmatpush3.xpose.msk.msra.mxu0 %vm1107_vm2, %v16100_v55 }
0x18dc   :  { %11928 = vmatprep.subr.msk.mxu0 %vm1107_vm2, %v16107_v25 }
0x18df   :  { %11929 = vmatpush3.xpose.msk.msra.mxu0 %vm1107_vm2, %v16107_v25 }
0x18e3   :  { %v7027_v39 = vpop.xlane.xlu0 %7026 }
0x18e4   :  { %12647 = vrcp.f32 %v7027_v39 }
0x18e5   :  { %v7030_v53 = vpop.xlane.xlu1 %7029 }
0x18e6   :  { %12649 = vrcp.f32 %v7030_v53 }
0x18e7   :  { %v7033_v36 = vpop.xlane.xlu0 %7032 }
0x18e8   :  { %12651 = vrcp.f32 %v7033_v36 }
0x18e9   :  { %v7036_v18 = vpop.xlane.xlu1 %7035 }
0x18ea   :  { %12653 = vrcp.f32 %v7036_v18 }
0x18eb   :  { %v7039_v59 = vpop.xlane.xlu0 %7038 }
0x18ec   :  { %12655 = vrcp.f32 %v7039_v59  ;;  %v17306_v59 = vld [vmem:[#allocation59_spill] sm:$0xff] }
0x18ed   :  { %v7042_v38 = vpop.xlane.xlu1 %7041 }
0x18ee   :  { %12657 = vrcp.f32 %v7042_v38  ;;  %v16153_v38 = vadd.f32 %v12792_v12, %v17306_v59 }
0x18f1   :  { %v12648_v11 = vpop.eup %12647  ;;  %v16115_v22 = vpop.permute.xlu1 %7740 }
0x18f2   :  { %11970 = vmatprep.subr.msk.mxu1 %vm1107_vm2, %v16115_v22  ;;  %v7053_v52 = vmul.f32 %v12648_v11, %v16020_v54  ;;  %v17307_v11 = vld [vmem:[#allocation48_spill] sm:$0xff] }
0x18f3   :  { %v12650_v31 = vpop.eup %12649 }
0x18f4   :  { %11905 = vmatprep.mubr.msk.f32.mxu0 %vm1269_vm3, %v7053_v52  ;;  %v7054_v60 = vmul.f32 %v12650_v31, %v16022_v56  ;;  %v16160_v52 = vadd.f32 %v12792_v12, %v17307_v11  ;;  %v17308_v31 = vld [vmem:[#allocation53_spill] sm:$0xff] }
0x18f5   :  { %v12652_v42 = vpop.eup %12651  ;;  %v16212_v44 = vpop.permute.xlu1 %7736 }
0x18f6   :  { %11906 = vmatmul.mubr.msk.f32.gmra.mxu0 %vm1269_vm3, %v7054_v60  ;;  %v7055_v30 = vmul.f32 %v12652_v42, %v16026_v63  ;;  %v17302_v63 = vld [vmem:[#allocation50_spill] sm:$0xff]  ;;  %v16163_v60 = vadd.f32 %v12792_v12, %v17308_v31 }
0x18f7   :  { %v12654_v7 = vpop.eup %12653  ;;  %v16134_v39 = vadd.f32 %v12792_v12, %v17302_v63  ;;  %v17309_v42 = vld [vmem:[#allocation54_spill] sm:$0xff] }
0x18f8   :  { %11908 = vmatprep.mubr.msk.f32.mxu0 %vm1269_vm3, %v7055_v30  ;;  %v7056_v28 = vmul.f32 %v12654_v7, %v16030_v4  ;;  %v17303_v4 = vld [vmem:[#allocation41_spill] sm:$0xff]  ;;  %v16170_v30 = vadd.f32 %v12792_v12, %v17309_v42 }
0x18f9   :  { %v12656_v16 = vpop.eup %12655  ;;  %v16140_v53 = vadd.f32 %v12792_v12, %v17303_v4 }
0x18fa   :  { %11909 = vmatmul.mubr.msk.f32.gmra.mxu0 %vm1269_vm3, %v7056_v28  ;;  %v7057_v54 = vmul.f32 %v12656_v16, %v16034_v8  ;;  %v17304_v8 = vld [vmem:[#allocation39_spill] sm:$0xff] }
0x18fb   :  { %v12658_v47 = vpop.eup %12657  ;;  %v16143_v36 = vadd.f32 %v12792_v12, %v17304_v8 }
0x18fc   :  { %11911 = vmatprep.mubr.msk.f32.mxu0 %vm1269_vm3, %v7057_v54  ;;  %v7058_v56 = vmul.f32 %v12658_v47, %v16038_v2  ;;  %v17305_v2 = vld [vmem:[#allocation49_spill] sm:$0xff] }
0x18fd   :  { %v16150_v18 = vadd.f32 %v12792_v12, %v17305_v2 }
0x18fe   :  { %11912 = vmatmul.mubr.msk.f32.gmra.mxu0 %vm1269_vm3, %v7058_v56 }
0x18ff   :  { %11930 = vmatprep.mubr.msk.f32.mxu0 %vm1107_vm2, %v16134_v39 }
0x1902   :  { %11931 = vmatmul.mubr.msk.f32.vlgmr.msra.gmra.mxu0 %vm1107_vm2, %v16140_v53 }
0x1903   :  { %11933 = vmatprep.mubr.msk.f32.mxu0 %vm1107_vm2, %v16143_v36 }
0x1906   :  { %11934 = vmatmul.mubr.msk.f32.gmra.mxu0 %vm1107_vm2, %v16150_v18 }
0x1907   :  { %11936 = vmatprep.mubr.msk.f32.mxu0 %vm1107_vm2, %v16153_v38 }
0x190a   :  { %11937 = vmatmul.mubr.msk.f32.gmra.mxu0 %vm1107_vm2, %v16160_v52 }
0x190b   :  { %11939 = vmatprep.mubr.msk.f32.mxu0 %vm1107_vm2, %v16163_v60 }
0x190e   :  { %11940 = vmatmul.mubr.msk.f32.gmra.mxu0 %vm1107_vm2, %v16170_v30 }
0x1982   :  { %v16174_v7 = vpop.f32.mrf.mxu0 }
0x1983   :  { %17310 = vst [vmem:[#allocation8_spill] sm:$0xff] %v16174_v7 }
0x1984   :  { %v16176_v28 = vpop.f32.mrf.mxu0 }
0x19b6   :  { %v16178_v16 = vpop.f32.mrf.mxu0 }
0x19b7   :  { %17311 = vst [vmem:[#allocation58_spill] sm:$0xff] %v16178_v16 }
0x19b8   :  { %v16180_v54 = vpop.f32.mrf.mxu0 }
0x19ba   :  { %v16182_v47 = vpop.f32.mrf.mxu0 }
0x19bb   :  { %17312 = vst [vmem:[#allocation42_spill] sm:$0xff] %v16182_v47 }
0x19bc   :  { %v16184_v56 = vpop.f32.mrf.mxu0 }
0x19be   :  { %v16186_v63 = vpop.f32.mrf.mxu0 }
0x19bf   :  { %17313 = vst [vmem:[#allocation40_spill] sm:$0xff] %v16186_v63 }
0x19c0   :  { %v16188_v4 = vpop.f32.mrf.mxu0 }
0x19c1   :  { %17314 = vst [vmem:[#allocation26_spill] sm:$0xff] %v16188_v4 }
0x19c2   :  { %v11932_v12 = vpop.f32.mrf.mxu0 }
0x19c3   :  { %v7486_v8 = vmul.f32 0.35355338, %v11932_v12 }
0x19c4   :  { %v7446_v2 = vpop.f32.mrf.mxu0 }
0x19c5   :  { %v7485_v59 = vmul.f32 0.35355338, %v7446_v2  ;;  %v7496_v11 = vsel %vm1269_vm3, %v7486_v8, -inf }
0x19c6   :  { %7497 = vmax.xlane.f32.xlu0 %v7496_v11  ;;  %v11935_v31 = vpop.f32.mrf.mxu0 }
0x19c7   :  { %v7488_v61 = vmul.f32 0.35355338, %v11935_v31  ;;  %v7493_v50 = vsel %vm1269_vm3, %v7485_v59, -inf }
0x19c8   :  { %v7456_v42 = vpop.f32.mrf.mxu0 }
0x19c9   :  { %v7487_v48 = vmul.f32 0.35355338, %v7456_v42  ;;  %v7502_v12 = vsel %vm1269_vm3, %v7488_v61, -inf }
0x19ca   :  { %7494 = vmax.xlane.f32.xlu0 %v7493_v50  ;;  %v11938_v41 = vpop.f32.mrf.mxu0 }
0x19cb   :  { %v7499_v23 = vsel %vm1269_vm3, %v7487_v48, -inf  ;;  %v7490_v45 = vmul.f32 0.35355338, %v11938_v41 }
0x19cc   :  { %7500 = vmax.xlane.f32.xlu1 %v7499_v23  ;;  %v7466_v19 = vpop.f32.mrf.mxu0 }
0x19cd   :  { %v7489_v13 = vmul.f32 0.35355338, %v7466_v19  ;;  %v7508_v24 = vsel %vm1269_vm3, %v7490_v45, -inf  ;;  %v16202_v19 = vpop.permute.xlu0 %7738 }
0x19ce   :  { %7503 = vmax.xlane.f32.xlu0 %v7502_v12  ;;  %v11941_v2 = vpop.f32.mrf.mxu0 }
0x19cf   :  { %v7505_v11 = vsel %vm1269_vm3, %v7489_v13, -inf  ;;  %v7492_v31 = vmul.f32 0.35355338, %v11941_v2 }
0x19d0   :  { %7506 = vmax.xlane.f32.xlu1 %v7505_v11  ;;  %v7476_v63 = vpop.f32.mrf.mxu0 }
0x19d1   :  { %v7491_v42 = vmul.f32 0.35355338, %v7476_v63  ;;  %v7514_v23 = vsel %vm1269_vm3, %v7492_v31, -inf }
0x19d2   :  { %7509 = vmax.xlane.f32.xlu0 %v7508_v24 }
0x19d3   :  { %v7511_v50 = vsel %vm1269_vm3, %v7491_v42, -inf }
0x19d4   :  { %7512 = vmax.xlane.f32.xlu1 %v7511_v50 }
0x19d6   :  { %7515 = vmax.xlane.f32.xlu0 %v7514_v23 }
0x19e5   :  { %7730 = vrot.lane.b32.xlu1 %v16093_v46, %s12840_s11 }
0x19ec   :  { %7732 = vrot.lane.b32.xlu0 %v16086_v57, %s12840_s11 }
0x1a4f   :  { %v7498_v41 = vpop.xlane.xlu0 %7497 }
0x1a50   :  { %v7518_v12 = vsub.f32 %v7486_v8, %v7498_v41  ;;  %v16214_v8 = vpop.permute.xlu1 %7734 }
0x1a52   :  { %v7527_v63 = vmul.f32 1.442695, %v7518_v12 }
0x1a53   :  { %v7495_v2 = vpop.xlane.xlu0 %7494 }
0x1a54   :  { %12659 = vpow2.f32 %v7527_v63  ;;  %v7517_v24 = vsub.f32 %v7485_v59, %v7495_v2 }
0x1a55   :  { %v7501_v59 = vpop.xlane.xlu1 %7500 }
0x1a56   :  { %v7525_v11 = vmul.f32 1.442695, %v7517_v24  ;;  %v7519_v2 = vsub.f32 %v7487_v48, %v7501_v59 }
0x1a57   :  { %v7504_v41 = vpop.xlane.xlu0 %7503 }
0x1a58   :  { %12661 = vpow2.f32 %v7525_v11  ;;  %v7520_v63 = vsub.f32 %v7488_v61, %v7504_v41 }
0x1a59   :  { %v7507_v24 = vpop.xlane.xlu1 %7506 }
0x1a5a   :  { %v7531_v11 = vmul.f32 1.442695, %v7520_v63  ;;  %v7521_v16 = vsub.f32 %v7489_v13, %v7507_v24 }
0x1a5b   :  { %v7510_v12 = vpop.xlane.xlu0 %7509 }
0x1a5c   :  { %12663 = vpow2.f32 %v7531_v11  ;;  %v7533_v58 = vmul.f32 1.442695, %v7521_v16 }
0x1a5d   :  { %v7513_v7 = vpop.xlane.xlu1 %7512 }
0x1a5e   :  { %v7523_v27 = vsub.f32 %v7491_v42, %v7513_v7 }
0x1a5f   :  { %v7516_v40 = vpop.xlane.xlu0 %7515 }
0x1a60   :  { %v7524_v51 = vsub.f32 %v7492_v31, %v7516_v40  ;;  %v7537_v33 = vmul.f32 1.442695, %v7523_v27 }
0x1a61   :  { %v16204_v50 = vpop.eup %12659  ;;  %v7731_v31 = vpop.permute.xlu1 %7730 }
0x1a62   :  { %v7544_v23 = vsel %vm1269_vm3, %v16204_v50, 0.0  ;;  %v7539_v4 = vmul.f32 1.442695, %v7524_v51 }
0x1a63   :  { %7545 = vadd.xlane.f32.xlu0 %v7544_v23  ;;  %v7522_v23 = vsub.f32 %v7490_v45, %v7510_v12 }
0x1a65   :  { %v16208_v35 = vpop.eup %12661  ;;  %v7535_v6 = vmul.f32 1.442695, %v7522_v23 }
0x1a66   :  { %v7541_v47 = vsel %vm1269_vm3, %v16208_v35, 0.0 }
0x1a67   :  { %7542 = vadd.xlane.f32.xlu1 %v7541_v47  ;;  %v7529_v47 = vmul.f32 1.442695, %v7519_v2 }
0x1a69   :  { %12665 = vpow2.f32 %v7529_v47  ;;  %v16220_v61 = vpop.eup %12663 }
0x1a6a   :  { %12667 = vpow2.f32 %v7535_v6  ;;  %v7550_v45 = vsel %vm1269_vm3, %v16220_v61, 0.0 }
0x1a6b   :  { %12669 = vpow2.f32 %v7533_v58 }
0x1a6c   :  { %12671 = vpow2.f32 %v7539_v4  ;;  %v7733_v4 = vpop.permute.xlu0 %7732 }
0x1a6d   :  { %12673 = vpow2.f32 %v7537_v33 }
0x1a76   :  { %v16222_v48 = vpop.eup %12665 }
0x1a77   :  { %v16226_v13 = vpop.eup %12667  ;;  %v7547_v27 = vsel %vm1269_vm3, %v16222_v48, 0.0 }
0x1a78   :  { %7726 = vrot.lane.b32.xlu1 %v16107_v25, %s12840_s11  ;;  %v16228_v40 = vpop.eup %12669  ;;  %v7556_v6 = vsel %vm1269_vm3, %v16226_v13, 0.0 }
0x1a79   :  { %7728 = vrot.lane.b32.xlu0 %v16100_v55, %s12840_s11  ;;  %v16234_v51 = vpop.eup %12671  ;;  %v7553_v33 = vsel %vm1269_vm3, %v16228_v40, 0.0 }
0x1a7a   :  { %v7562_v58 = vsel %vm1269_vm3, %v16234_v51, 0.0  ;;  %v16240_v7 = vpop.eup %12673 }
0x1a7b   :  { %v7559_v16 = vsel %vm1269_vm3, %v16240_v7, 0.0 }
0x1a98   :  { %7551 = vadd.xlane.f32.xlu0 %v7550_v45 }
0x1a9c   :  { %7557 = vadd.xlane.f32.xlu0 %v7556_v6  ;;  %7548 = vadd.xlane.f32.xlu1 %v7547_v27 }
0x1aa0   :  { %7563 = vadd.xlane.f32.xlu0 %v7562_v58  ;;  %7554 = vadd.xlane.f32.xlu1 %v7553_v33 }
0x1aa4   :  { %7560 = vadd.xlane.f32.xlu1 %v7559_v16 }
0x1ab5   :  { %7712 = vrot.lane.b32.xlu1 %v16140_v53, %s12840_s11 }
0x1ab6   :  { %7710 = vrot.lane.b32.xlu0 %v16134_v39, %s12840_s11 }
0x1ab9   :  { %7716 = vrot.lane.b32.xlu1 %v16150_v18, %s12840_s11 }
0x1aba   :  { %7714 = vrot.lane.b32.xlu0 %v16143_v36, %s12840_s11 }
0x1abd   :  { %7720 = vrot.lane.b32.xlu1 %v16160_v52, %s12840_s11 }
0x1abe   :  { %7718 = vrot.lane.b32.xlu0 %v16153_v38, %s12840_s11 }
0x1ac1   :  { %7724 = vrot.lane.b32.xlu1 %v16170_v30, %s12840_s11 }
0x1ac2   :  { %7722 = vrot.lane.b32.xlu0 %v16163_v60, %s12840_s11 }
0x1ac5   :  { %7997 = vrot.lane.b32.xlu1 %v17265_v10, %s12840_s11 }
0x1ac6   :  { %7995 = vrot.lane.b32.xlu0 %v15924_v3, %s12840_s11 }
0x1ac9   :  { %7993 = vrot.lane.b32.xlu1 %v17267_v29, %s12840_s11 }
0x1aca   :  { %7989 = vrot.lane.b32.xlu0 %v17269_v1, %s12840_s11 }
0x1acd   :  { %7991 = vrot.lane.b32.xlu1 %v17268_v20, %s12840_s11 }
0x1ace   :  { %7985 = vrot.lane.b32.xlu0 %v17271_v14, %s12840_s11 }
0x1ad1   :  { %7987 = vrot.lane.b32.xlu1 %v17270_v62, %s12840_s11 }
0x1ad2   :  { %8166 = vrot.lane.b32.xlu0 %v16048_v15, %s12841_s12 }
0x1ad5   :  { %7983 = vrot.lane.b32.xlu1 %v17272_v49, %s12840_s11 }
0x1ad9   :  { %8164 = vrot.lane.b32.xlu1 %v16053_v43, %s12841_s12 }
0x1aec   :  { %v7546_v42 = vpop.xlane.xlu0 %7545 }
0x1aed   :  { %12675 = vrcp.f32 %v7546_v42 }
0x1af0   :  { %v7543_v41 = vpop.xlane.xlu1 %7542 }
0x1af1   :  { %12677 = vrcp.f32 %v7543_v41 }
0x1afa   :  { %v12676_v59 = vpop.eup %12675 }
0x1afb   :  { %v7574_v2 = vmul.f32 %v12676_v59, %v16204_v50 }
0x1afe   :  { %v12678_v12 = vpop.eup %12677 }
0x1aff   :  { %v7573_v63 = vmul.f32 %v12678_v12, %v16208_v35  ;;  %v7729_v35 = vpop.permute.xlu0 %7728 }
0x1b01   :  { %11958 = vmatprep.mubr.msk.f32.mxu1 %vm1269_vm3, %v7573_v63 }
0x1b02   :  { %11959 = vmatmul.mubr.msk.f32.vlgmr.msra.gmra.mxu1 %vm1269_vm3, %v7574_v2 }
0x1b03   :  { %11971 = vmatpush3.xpose.msk.msra.mxu1 %vm1107_vm2, %v16115_v22  ;;  %v7727_v22 = vpop.permute.xlu1 %7726 }
0x1b04   :  { %11972 = vmatprep.subr.msk.mxu1 %vm1107_vm2, %v16202_v19 }
0x1b07   :  { %11973 = vmatpush3.xpose.msk.msra.mxu1 %vm1107_vm2, %v16202_v19 }
0x1b08   :  { %11974 = vmatprep.subr.msk.mxu1 %vm1107_vm2, %v16212_v44 }
0x1b0b   :  { %11975 = vmatpush3.xpose.msk.msra.mxu1 %vm1107_vm2, %v16212_v44 }
0x1b0c   :  { %11976 = vmatprep.subr.msk.mxu1 %vm1107_vm2, %v16214_v8 }
0x1b0f   :  { %11977 = vmatpush3.xpose.msk.msra.mxu1 %vm1107_vm2, %v16214_v8 }
0x1b10   :  { %11978 = vmatprep.subr.msk.mxu1 %vm1107_vm2, %v7733_v4 }
0x1b13   :  { %11979 = vmatpush3.xpose.msk.msra.mxu1 %vm1107_vm2, %v7733_v4 }
0x1b14   :  { %11980 = vmatprep.subr.msk.mxu1 %vm1107_vm2, %v7731_v31 }
0x1b17   :  { %11981 = vmatpush3.xpose.msk.msra.mxu1 %vm1107_vm2, %v7731_v31 }
0x1b18   :  { %11982 = vmatprep.subr.msk.mxu1 %vm1107_vm2, %v7729_v35 }
0x1b1b   :  { %11983 = vmatpush3.xpose.msk.msra.mxu1 %vm1107_vm2, %v7729_v35 }
0x1b1c   :  { %11984 = vmatprep.subr.msk.mxu1 %vm1107_vm2, %v7727_v22 }
0x1b1f   :  { %11985 = vmatpush3.xpose.msk.msra.mxu1 %vm1107_vm2, %v7727_v22 }
0x1b21   :  { %v7552_v44 = vpop.xlane.xlu0 %7551 }
0x1b22   :  { %12679 = vrcp.f32 %v7552_v44 }
0x1b25   :  { %v7558_v19 = vpop.xlane.xlu0 %7557  ;;  %v7549_v50 = vpop.xlane.xlu1 %7548 }
0x1b26   :  { %12681 = vrcp.f32 %v7549_v50 }
0x1b27   :  { %12683 = vrcp.f32 %v7558_v19 }
0x1b29   :  { %v7564_v8 = vpop.xlane.xlu0 %7563  ;;  %v7555_v24 = vpop.xlane.xlu1 %7554 }
0x1b2a   :  { %12685 = vrcp.f32 %v7555_v24 }
0x1b2b   :  { %12687 = vrcp.f32 %v7564_v8 }
0x1b2d   :  { %v7711_v11 = vpop.permute.xlu0 %7710  ;;  %v7561_v23 = vpop.xlane.xlu1 %7560 }
0x1b2e   :  { %12689 = vrcp.f32 %v7561_v23 }
0x1b2f   :  { %v12680_v6 = vpop.eup %12679 }
0x1b30   :  { %v7576_v4 = vmul.f32 %v12680_v6, %v16220_v61 }
0x1b31   :  { %v7715_v47 = vpop.permute.xlu0 %7714  ;;  %v7713_v45 = vpop.permute.xlu1 %7712 }
0x1b33   :  { %v12682_v27 = vpop.eup %12681 }
0x1b34   :  { %v7575_v16 = vmul.f32 %v12682_v27, %v16222_v48  ;;  %v12684_v31 = vpop.eup %12683 }
0x1b35   :  { %v7719_v58 = vpop.permute.xlu0 %7718  ;;  %v7717_v33 = vpop.permute.xlu1 %7716  ;;  %v7578_v63 = vmul.f32 %v12684_v31, %v16226_v13 }
0x1b36   :  { %11961 = vmatprep.mubr.msk.f32.mxu1 %vm1269_vm3, %v7575_v16 }
0x1b37   :  { %v12686_v42 = vpop.eup %12685  ;;  %11962 = vmatmul.mubr.msk.f32.gmra.mxu1 %vm1269_vm3, %v7576_v4 }
0x1b38   :  { %v7577_v59 = vmul.f32 %v12686_v42, %v16228_v40  ;;  %v12688_v12 = vpop.eup %12687 }
0x1b39   :  { %v7721_v41 = vpop.permute.xlu1 %7720  ;;  %v7723_v35 = vpop.permute.xlu0 %7722  ;;  %v7580_v22 = vmul.f32 %v12688_v12, %v16234_v51 }
0x1b3a   :  { %11964 = vmatprep.mubr.msk.f32.mxu1 %vm1269_vm3, %v7577_v59 }
0x1b3b   :  { %v12690_v2 = vpop.eup %12689  ;;  %11965 = vmatmul.mubr.msk.f32.gmra.mxu1 %vm1269_vm3, %v7578_v63 }
0x1b3c   :  { %v7579_v61 = vmul.f32 %v12690_v2, %v16240_v7 }
0x1b3d   :  { %v7725_v48 = vpop.permute.xlu1 %7724  ;;  %v7996_v44 = vpop.permute.xlu0 %7995 }
0x1b3e   :  { %11967 = vmatprep.mubr.msk.f32.mxu1 %vm1269_vm3, %v7579_v61 }
0x1b3f   :  { %11968 = vmatmul.mubr.msk.f32.gmra.mxu1 %vm1269_vm3, %v7580_v22 }
0x1b40   :  { %11986 = vmatprep.mubr.msk.f32.mxu1 %vm1107_vm2, %v7711_v11 }
0x1b41   :  { %v7998_v40 = vpop.permute.xlu1 %7997  ;;  %v7990_v7 = vpop.permute.xlu0 %7989 }
0x1b42   :  { %11998 = vmatprep.subr.mxu0 %v7998_v40 }
0x1b43   :  { %11999 = vmatpush3.msra.mxu0 %v7998_v40  ;;  %11987 = vmatmul.mubr.msk.f32.vlgmr.msra.gmra.mxu1 %vm1107_vm2, %v7713_v45 }
0x1b44   :  { %12000 = vmatprep.subr.mxu0 %v7996_v44  ;;  %11989 = vmatprep.mubr.msk.f32.mxu1 %vm1107_vm2, %v7715_v47 }
0x1b45   :  { %12001 = vmatpush3.msra.mxu0 %v7996_v44  ;;  %v7994_v13 = vpop.permute.xlu1 %7993  ;;  %v7986_v19 = vpop.permute.xlu0 %7985 }
0x1b46   :  { %12002 = vmatprep.subr.mxu0 %v7994_v13 }
0x1b47   :  { %12003 = vmatpush3.msra.mxu0 %v7994_v13  ;;  %11990 = vmatmul.mubr.msk.f32.gmra.mxu1 %vm1107_vm2, %v7717_v33 }
0x1b48   :  { %11992 = vmatprep.mubr.msk.f32.mxu1 %vm1107_vm2, %v7719_v58 }
0x1b49   :  { %v7992_v51 = vpop.permute.xlu1 %7991  ;;  %v16326_v24 = vpop.permute.xlu0 %8166 }
0x1b4a   :  { %12004 = vmatprep.subr.mxu0 %v7992_v51 }
0x1b4b   :  { %12005 = vmatpush3.msra.mxu0 %v7992_v51  ;;  %11993 = vmatmul.mubr.msk.f32.gmra.mxu1 %vm1107_vm2, %v7721_v41 }
0x1b4c   :  { %12006 = vmatprep.subr.mxu0 %v7990_v7  ;;  %11995 = vmatprep.mubr.msk.f32.mxu1 %vm1107_vm2, %v7723_v35 }
0x1b4d   :  { %12007 = vmatpush3.msra.mxu0 %v7990_v7  ;;  %v7988_v50 = vpop.permute.xlu1 %7987 }
0x1b4e   :  { %12008 = vmatprep.subr.mxu0 %v7988_v50 }
0x1b4f   :  { %12009 = vmatpush3.msra.mxu0 %v7988_v50  ;;  %11996 = vmatmul.mubr.msk.f32.gmra.mxu1 %vm1107_vm2, %v7725_v48 }
0x1b50   :  { %12010 = vmatprep.subr.mxu0 %v7986_v19 }
0x1b51   :  { %12011 = vmatpush3.msra.mxu0 %v7986_v19  ;;  %v7984_v8 = vpop.permute.xlu1 %7983 }
0x1b52   :  { %12012 = vmatprep.subr.mxu0 %v7984_v8 }
0x1b53   :  { %12013 = vmatpush3.msra.mxu0 %v7984_v8 }
0x1b54   :  { %12026 = vmatprep.subr.msk.mxu0 %vm1107_vm2, %v16326_v24 }
0x1bc2   :  { %v16330_v11 = vpop.f32.mrf.mxu1 }
0x1bc3   :  { %17315 = vst [vmem:[#allocation27_spill] sm:$0xff] %v16330_v11 }
0x1bc4   :  { %v16332_v23 = vpop.f32.mrf.mxu1 }
0x1bc5   :  { %17316 = vst [vmem:[#allocation35_spill] sm:$0xff] %v16332_v23 }
0x1bf7   :  { %v16334_v47 = vpop.f32.mrf.mxu1 }
0x1bf8   :  { %17317 = vst [vmem:[#allocation31_spill] sm:$0xff] %v16334_v47 }
0x1bf9   :  { %v16336_v45 = vpop.f32.mrf.mxu1 }
0x1bfa   :  { %17318 = vst [vmem:[#allocation13_spill] sm:$0xff] %v16336_v45 }
0x1bfb   :  { %v16338_v6 = vpop.f32.mrf.mxu1 }
0x1bfc   :  { %17319 = vst [vmem:[#allocation33_spill] sm:$0xff] %v16338_v6 }
0x1bfd   :  { %v16340_v27 = vpop.f32.mrf.mxu1 }
0x1bfe   :  { %17320 = vst [vmem:[#allocation57_spill] sm:$0xff] %v16340_v27 }
0x1bff   :  { %v16342_v58 = vpop.f32.mrf.mxu1 }
0x1c00   :  { %17321 = vst [vmem:[#allocation9_spill] sm:$0xff] %v16342_v58 }
0x1c01   :  { %v16344_v33 = vpop.f32.mrf.mxu1 }
0x1c02   :  { %17322 = vst [vmem:[#allocation50_spill] sm:$0xff] %v16344_v33 }
0x1c03   :  { %v11988_v16 = vpop.f32.mrf.mxu1 }
0x1c04   :  { %v7880_v4 = vmul.f32 0.35355338, %v11988_v16 }
0x1c05   :  { %v7840_v31 = vpop.f32.mrf.mxu1 }
0x1c06   :  { %v7879_v42 = vmul.f32 0.35355338, %v7840_v31  ;;  %v7890_v41 = vsel %vm1269_vm3, %v7880_v4, -inf }
0x1c07   :  { %7891 = vmax.xlane.f32.xlu1 %v7890_v41  ;;  %v11991_v59 = vpop.f32.mrf.mxu1 }
0x1c08   :  { %v7882_v12 = vmul.f32 0.35355338, %v11991_v59  ;;  %v7887_v63 = vsel %vm1269_vm3, %v7879_v42, -inf  ;;  %v16358_v59 = vpop.permute.xlu1 %8164 }
0x1c09   :  { %7888 = vmax.xlane.f32.xlu0 %v7887_v63  ;;  %v7850_v2 = vpop.f32.mrf.mxu1 }
0x1c0a   :  { %v7881_v61 = vmul.f32 0.35355338, %v7850_v2  ;;  %v7896_v48 = vsel %vm1269_vm3, %v7882_v12, -inf }
0x1c0b   :  { %v11994_v35 = vpop.f32.mrf.mxu1 }
0x1c0c   :  { %v7884_v13 = vmul.f32 0.35355338, %v11994_v35  ;;  %v7893_v7 = vsel %vm1269_vm3, %v7881_v61, -inf }
0x1c0d   :  { %7897 = vmax.xlane.f32.xlu0 %v7896_v48  ;;  %v7860_v22 = vpop.f32.mrf.mxu1 }
0x1c0e   :  { %v7883_v44 = vmul.f32 0.35355338, %v7860_v22  ;;  %v7902_v16 = vsel %vm1269_vm3, %v7884_v13, -inf }
0x1c0f   :  { %v11997_v40 = vpop.f32.mrf.mxu1 }
0x1c10   :  { %v7899_v51 = vsel %vm1269_vm3, %v7883_v44, -inf  ;;  %v7886_v8 = vmul.f32 0.35355338, %v11997_v40 }
0x1c11   :  { %7894 = vmax.xlane.f32.xlu0 %v7893_v7  ;;  %7900 = vmax.xlane.f32.xlu1 %v7899_v51  ;;  %v7870_v19 = vpop.f32.mrf.mxu1 }
0x1c12   :  { %v7885_v50 = vmul.f32 0.35355338, %v7870_v19  ;;  %v7908_v41 = vsel %vm1269_vm3, %v7886_v8, -inf }
0x1c14   :  { %v7905_v31 = vsel %vm1269_vm3, %v7885_v50, -inf }
0x1c15   :  { %7903 = vmax.xlane.f32.xlu0 %v7902_v16  ;;  %7906 = vmax.xlane.f32.xlu1 %v7905_v31 }
0x1c19   :  { %7909 = vmax.xlane.f32.xlu0 %v7908_v41 }
0x1c26   :  { %8160 = vrot.lane.b32.xlu1 %v16063_v5, %s12841_s12 }
0x1c2f   :  { %8162 = vrot.lane.b32.xlu0 %v16056_v0, %s12841_s12 }
0x1c90   :  { %v7892_v63 = vpop.xlane.xlu1 %7891 }
0x1c91   :  { %v7912_v2 = vsub.f32 %v7880_v4, %v7892_v63 }
0x1c92   :  { %v7889_v35 = vpop.xlane.xlu0 %7888 }
0x1c93   :  { %v7921_v48 = vmul.f32 1.442695, %v7912_v2  ;;  %v7911_v22 = vsub.f32 %v7879_v42, %v7889_v35 }
0x1c95   :  { %12691 = vpow2.f32 %v7921_v48  ;;  %v7919_v40 = vmul.f32 1.442695, %v7911_v22 }
0x1c96   :  { %v7898_v31 = vpop.xlane.xlu0 %7897 }
0x1c97   :  { %12693 = vpow2.f32 %v7919_v40  ;;  %v7914_v2 = vsub.f32 %v7882_v12, %v7898_v31 }
0x1c99   :  { %v7925_v40 = vmul.f32 1.442695, %v7914_v2 }
0x1c9a   :  { %v7895_v4 = vpop.xlane.xlu0 %7894  ;;  %v7901_v42 = vpop.xlane.xlu1 %7900 }
0x1c9b   :  { %v7913_v41 = vsub.f32 %v7881_v61, %v7895_v4  ;;  %v7915_v48 = vsub.f32 %v7883_v44, %v7901_v42 }
0x1c9d   :  { %v7923_v35 = vmul.f32 1.442695, %v7913_v41 }
0x1c9e   :  { %v7904_v63 = vpop.xlane.xlu0 %7903  ;;  %v7907_v22 = vpop.xlane.xlu1 %7906 }
0x1c9f   :  { %12695 = vpow2.f32 %v7923_v35  ;;  %v7917_v33 = vsub.f32 %v7885_v50, %v7907_v22 }
0x1ca0   :  { %12697 = vpow2.f32 %v7925_v40 }
0x1ca1   :  { %v7931_v47 = vmul.f32 1.442695, %v7917_v33 }
0x1ca2   :  { %v16360_v7 = vpop.eup %12691  ;;  %v7910_v58 = vpop.xlane.xlu0 %7909 }
0x1ca3   :  { %v7938_v51 = vsel %vm1269_vm3, %v16360_v7, 0.0  ;;  %v7918_v27 = vsub.f32 %v7886_v8, %v7910_v58  ;;  %v8161_v4 = vpop.permute.xlu1 %8160 }
0x1ca4   :  { %v16364_v19 = vpop.eup %12693  ;;  %7939 = vadd.xlane.f32.xlu0 %v7938_v51  ;;  %v7916_v51 = vsub.f32 %v7884_v13, %v7904_v63 }
0x1ca5   :  { %v7935_v16 = vsel %vm1269_vm3, %v16364_v19, 0.0  ;;  %v7933_v45 = vmul.f32 1.442695, %v7918_v27 }
0x1ca6   :  { %7936 = vadd.xlane.f32.xlu1 %v7935_v16  ;;  %v7927_v16 = vmul.f32 1.442695, %v7915_v48  ;;  %v7929_v6 = vmul.f32 1.442695, %v7916_v51  ;;  %v8163_v31 = vpop.permute.xlu0 %8162 }
0x1ca8   :  { %12699 = vpow2.f32 %v7927_v16 }
0x1ca9   :  { %12701 = vpow2.f32 %v7929_v6 }
0x1caa   :  { %12703 = vpow2.f32 %v7931_v47 }
0x1cab   :  { %12705 = vpow2.f32 %v7933_v45 }
0x1cac   :  { %v16372_v61 = vpop.eup %12695 }
0x1cad   :  { %v16374_v12 = vpop.eup %12697  ;;  %v7941_v44 = vsel %vm1269_vm3, %v16372_v61, 0.0 }
0x1cae   :  { %v7944_v50 = vsel %vm1269_vm3, %v16374_v12, 0.0 }
0x1cb5   :  { %v16378_v13 = vpop.eup %12699 }
0x1cb6   :  { %v16382_v58 = vpop.eup %12701  ;;  %v7947_v47 = vsel %vm1269_vm3, %v16378_v13, 0.0 }
0x1cb7   :  { %8156 = vrot.lane.b32.xlu1 %v16093_v46, %s12841_s12  ;;  %v16386_v45 = vpop.eup %12703  ;;  %v7950_v6 = vsel %vm1269_vm3, %v16382_v58, 0.0 }
0x1cb8   :  { %v16390_v27 = vpop.eup %12705  ;;  %v7953_v33 = vsel %vm1269_vm3, %v16386_v45, 0.0 }
0x1cb9   :  { %v7956_v8 = vsel %vm1269_vm3, %v16390_v27, 0.0 }
0x1cba   :  { %8158 = vrot.lane.b32.xlu0 %v16086_v57, %s12841_s12 }
0x1cd9   :  { %7942 = vadd.xlane.f32.xlu0 %v7941_v44 }
0x1cdb   :  { %7945 = vadd.xlane.f32.xlu1 %v7944_v50 }
0x1cdd   :  { %7948 = vadd.xlane.f32.xlu0 %v7947_v47 }
0x1cdf   :  { %7951 = vadd.xlane.f32.xlu1 %v7950_v6 }
0x1ce1   :  { %7954 = vadd.xlane.f32.xlu0 %v7953_v33 }
0x1ce3   :  { %7957 = vadd.xlane.f32.xlu1 %v7956_v8 }
0x1cf4   :  { %8152 = vrot.lane.b32.xlu1 %v16107_v25, %s12841_s12 }
0x1cf7   :  { %8154 = vrot.lane.b32.xlu0 %v16100_v55, %s12841_s12 }
0x1cf8   :  { %8138 = vrot.lane.b32.xlu1 %v16140_v53, %s12841_s12 }
0x1cfb   :  { %8136 = vrot.lane.b32.xlu0 %v16134_v39, %s12841_s12 }
0x1cfc   :  { %8142 = vrot.lane.b32.xlu1 %v16150_v18, %s12841_s12 }
0x1cff   :  { %8140 = vrot.lane.b32.xlu0 %v16143_v36, %s12841_s12 }
0x1d00   :  { %8146 = vrot.lane.b32.xlu1 %v16160_v52, %s12841_s12 }
0x1d03   :  { %8144 = vrot.lane.b32.xlu0 %v16153_v38, %s12841_s12 }
0x1d04   :  { %8150 = vrot.lane.b32.xlu1 %v16170_v30, %s12841_s12 }
0x1d07   :  { %8148 = vrot.lane.b32.xlu0 %v16163_v60, %s12841_s12 }
0x1d08   :  { %8415 = vrot.lane.b32.xlu1 %v17265_v10, %s12841_s12 }
0x1d0b   :  { %8413 = vrot.lane.b32.xlu0 %v15924_v3, %s12841_s12 }
0x1d0c   :  { %8411 = vrot.lane.b32.xlu1 %v17267_v29, %s12841_s12 }
0x1d0f   :  { %8407 = vrot.lane.b32.xlu0 %v17269_v1, %s12841_s12 }
0x1d10   :  { %8409 = vrot.lane.b32.xlu1 %v17268_v20, %s12841_s12 }
0x1d13   :  { %8403 = vrot.lane.b32.xlu0 %v17271_v14, %s12841_s12 }
0x1d14   :  { %8405 = vrot.lane.b32.xlu1 %v17270_v62, %s12841_s12 }
0x1d17   :  { %8584 = vrot.lane.b32.xlu0 %v16048_v15, %s12842_s15 }
0x1d18   :  { %8401 = vrot.lane.b32.xlu1 %v17272_v49, %s12841_s12 }
0x1d1c   :  { %8582 = vrot.lane.b32.xlu1 %v16053_v43, %s12842_s15 }
0x1d2d   :  { %v7940_v42 = vpop.xlane.xlu0 %7939 }
0x1d2e   :  { %12707 = vrcp.f32 %v7940_v42 }
0x1d2f   :  { %v7937_v41 = vpop.xlane.xlu1 %7936 }
0x1d30   :  { %12709 = vrcp.f32 %v7937_v41 }
0x1d31   :  { %v8159_v15 = vpop.permute.xlu0 %8158 }
0x1d33   :  { %v8157_v43 = vpop.permute.xlu1 %8156 }
0x1d3b   :  { %v12708_v63 = vpop.eup %12707 }
0x1d3c   :  { %v7968_v48 = vmul.f32 %v12708_v63, %v16360_v7 }
0x1d3d   :  { %v12710_v2 = vpop.eup %12709 }
0x1d3e   :  { %v7967_v35 = vmul.f32 %v12710_v2, %v16364_v19 }
0x1d40   :  { %12014 = vmatprep.mubr.msk.f32.mxu0 %vm1269_vm3, %v7967_v35 }
0x1d41   :  { %12015 = vmatmul.mubr.msk.f32.vlgmr.msra.gmra.mxu0 %vm1269_vm3, %v7968_v48 }
0x1d42   :  { %12027 = vmatpush3.xpose.msk.msra.mxu0 %vm1107_vm2, %v16326_v24 }
0x1d43   :  { %12028 = vmatprep.subr.msk.mxu0 %vm1107_vm2, %v16358_v59 }
0x1d46   :  { %12029 = vmatpush3.xpose.msk.msra.mxu0 %vm1107_vm2, %v16358_v59 }
0x1d47   :  { %12030 = vmatprep.subr.msk.mxu0 %vm1107_vm2, %v8163_v31 }
0x1d4a   :  { %12031 = vmatpush3.xpose.msk.msra.mxu0 %vm1107_vm2, %v8163_v31 }
0x1d4b   :  { %12032 = vmatprep.subr.msk.mxu0 %vm1107_vm2, %v8161_v4 }
0x1d4e   :  { %12033 = vmatpush3.xpose.msk.msra.mxu0 %vm1107_vm2, %v8161_v4 }
0x1d4f   :  { %12034 = vmatprep.subr.msk.mxu0 %vm1107_vm2, %v8159_v15 }
0x1d52   :  { %12035 = vmatpush3.xpose.msk.msra.mxu0 %vm1107_vm2, %v8159_v15 }
0x1d53   :  { %12036 = vmatprep.subr.msk.mxu0 %vm1107_vm2, %v8157_v43 }
0x1d56   :  { %12037 = vmatpush3.xpose.msk.msra.mxu0 %vm1107_vm2, %v8157_v43 }
0x1d62   :  { %v7943_v24 = vpop.xlane.xlu0 %7942 }
0x1d63   :  { %12711 = vrcp.f32 %v7943_v24 }
0x1d64   :  { %v7946_v59 = vpop.xlane.xlu1 %7945 }
0x1d65   :  { %12713 = vrcp.f32 %v7946_v59 }
0x1d66   :  { %v7949_v7 = vpop.xlane.xlu0 %7948 }
0x1d67   :  { %12715 = vrcp.f32 %v7949_v7 }
0x1d68   :  { %v7952_v19 = vpop.xlane.xlu1 %7951 }
0x1d69   :  { %12717 = vrcp.f32 %v7952_v19 }
0x1d6a   :  { %v7955_v22 = vpop.xlane.xlu0 %7954 }
0x1d6b   :  { %12719 = vrcp.f32 %v7955_v22 }
0x1d6c   :  { %v7958_v40 = vpop.xlane.xlu1 %7957 }
0x1d6d   :  { %12721 = vrcp.f32 %v7958_v40 }
0x1d6e   :  { %v8155_v51 = vpop.permute.xlu0 %8154 }
0x1d6f   :  { %12038 = vmatprep.subr.msk.mxu0 %vm1107_vm2, %v8155_v51 }
0x1d70   :  { %v12712_v16 = vpop.eup %12711  ;;  %12039 = vmatpush3.xpose.msk.msra.mxu0 %vm1107_vm2, %v8155_v51  ;;  %v8153_v44 = vpop.permute.xlu1 %8152 }
0x1d71   :  { %12040 = vmatprep.subr.msk.mxu0 %vm1107_vm2, %v8153_v44  ;;  %v7969_v50 = vmul.f32 %v12712_v16, %v16372_v61 }
0x1d72   :  { %v12714_v47 = vpop.eup %12713  ;;  %v8137_v6 = vpop.permute.xlu0 %8136 }
0x1d73   :  { %12017 = vmatprep.mubr.msk.f32.mxu0 %vm1269_vm3, %v7969_v50  ;;  %v7970_v33 = vmul.f32 %v12714_v47, %v16374_v12 }
0x1d74   :  { %v12716_v8 = vpop.eup %12715  ;;  %12041 = vmatpush3.xpose.msk.msra.mxu0 %vm1107_vm2, %v8153_v44  ;;  %v8139_v31 = vpop.permute.xlu1 %8138 }
0x1d75   :  { %12018 = vmatmul.mubr.msk.f32.gmra.mxu0 %vm1269_vm3, %v7970_v33  ;;  %v7971_v4 = vmul.f32 %v12716_v8, %v16378_v13 }
0x1d76   :  { %v12718_v42 = vpop.eup %12717  ;;  %v8141_v41 = vpop.permute.xlu0 %8140 }
0x1d77   :  { %12020 = vmatprep.mubr.msk.f32.mxu0 %vm1269_vm3, %v7971_v4  ;;  %v7972_v61 = vmul.f32 %v12718_v42, %v16382_v58 }
0x1d78   :  { %v12720_v63 = vpop.eup %12719  ;;  %v8143_v2 = vpop.permute.xlu1 %8142 }
0x1d79   :  { %12021 = vmatmul.mubr.msk.f32.gmra.mxu0 %vm1269_vm3, %v7972_v61  ;;  %v7973_v12 = vmul.f32 %v12720_v63, %v16386_v45 }
0x1d7a   :  { %v12722_v35 = vpop.eup %12721  ;;  %v8145_v48 = vpop.permute.xlu0 %8144 }
0x1d7b   :  { %12023 = vmatprep.mubr.msk.f32.mxu0 %vm1269_vm3, %v7973_v12  ;;  %v7974_v15 = vmul.f32 %v12722_v35, %v16390_v27 }
0x1d7c   :  { %v8147_v43 = vpop.permute.xlu1 %8146 }
0x1d7d   :  { %12024 = vmatmul.mubr.msk.f32.gmra.mxu0 %vm1269_vm3, %v7974_v15 }
0x1d7e   :  { %v8149_v13 = vpop.permute.xlu0 %8148  ;;  %12042 = vmatprep.mubr.msk.f32.mxu0 %vm1107_vm2, %v8137_v6 }
0x1d80   :  { %v8151_v24 = vpop.permute.xlu1 %8150 }
0x1d81   :  { %12043 = vmatmul.mubr.msk.f32.vlgmr.msra.gmra.mxu0 %vm1107_vm2, %v8139_v31 }
0x1d82   :  { %12045 = vmatprep.mubr.msk.f32.mxu0 %vm1107_vm2, %v8141_v41  ;;  %v8414_v58 = vpop.permute.xlu0 %8413 }
0x1d84   :  { %v8416_v59 = vpop.permute.xlu1 %8415 }
0x1d85   :  { %12046 = vmatmul.mubr.msk.f32.gmra.mxu0 %vm1107_vm2, %v8143_v2  ;;  %12054 = vmatprep.subr.mxu1 %v8416_v59 }
0x1d86   :  { %12048 = vmatprep.mubr.msk.f32.mxu0 %vm1107_vm2, %v8145_v48  ;;  %12055 = vmatpush3.msra.mxu1 %v8416_v59  ;;  %v8408_v27 = vpop.permute.xlu0 %8407 }
0x1d87   :  { %12056 = vmatprep.subr.mxu1 %v8414_v58 }
0x1d88   :  { %12057 = vmatpush3.msra.mxu1 %v8414_v58  ;;  %v8412_v45 = vpop.permute.xlu1 %8411 }
0x1d89   :  { %12049 = vmatmul.mubr.msk.f32.gmra.mxu0 %vm1107_vm2, %v8147_v43  ;;  %12058 = vmatprep.subr.mxu1 %v8412_v45 }
0x1d8a   :  { %12051 = vmatprep.mubr.msk.f32.mxu0 %vm1107_vm2, %v8149_v13  ;;  %12059 = vmatpush3.msra.mxu1 %v8412_v45  ;;  %v8404_v19 = vpop.permute.xlu0 %8403 }
0x1d8c   :  { %v8410_v7 = vpop.permute.xlu1 %8409 }
0x1d8d   :  { %12052 = vmatmul.mubr.msk.f32.gmra.mxu0 %vm1107_vm2, %v8151_v24  ;;  %12060 = vmatprep.subr.mxu1 %v8410_v7 }
0x1d8e   :  { %12061 = vmatpush3.msra.mxu1 %v8410_v7  ;;  %v16478_v51 = vpop.permute.xlu0 %8584 }
0x1d8f   :  { %12062 = vmatprep.subr.mxu1 %v8408_v27 }
0x1d90   :  { %12063 = vmatpush3.msra.mxu1 %v8408_v27  ;;  %v8406_v22 = vpop.permute.xlu1 %8405 }
0x1d91   :  { %12064 = vmatprep.subr.mxu1 %v8406_v22 }
0x1d92   :  { %12065 = vmatpush3.msra.mxu1 %v8406_v22 }
0x1d93   :  { %12066 = vmatprep.subr.mxu1 %v8404_v19 }
0x1d94   :  { %12067 = vmatpush3.msra.mxu1 %v8404_v19  ;;  %v8402_v40 = vpop.permute.xlu1 %8401 }
0x1d95   :  { %12068 = vmatprep.subr.mxu1 %v8402_v40 }
0x1d96   :  { %12069 = vmatpush3.msra.mxu1 %v8402_v40 }
0x1d97   :  { %12082 = vmatprep.subr.msk.mxu1 %vm1107_vm2, %v16478_v51 }
0x1e01   :  { %v16482_v16 = vpop.f32.mrf.mxu0 }
0x1e03   :  { %v16484_v44 = vpop.f32.mrf.mxu0 }
0x1e35   :  { %v16486_v50 = vpop.f32.mrf.mxu0 }
0x1e37   :  { %v16488_v47 = vpop.f32.mrf.mxu0 }
0x1e39   :  { %v16490_v6 = vpop.f32.mrf.mxu0 }
0x1e3b   :  { %v16492_v33 = vpop.f32.mrf.mxu0 }
0x1e3d   :  { %v16494_v8 = vpop.f32.mrf.mxu0 }
0x1e3f   :  { %v16496_v31 = vpop.f32.mrf.mxu0 }
0x1e41   :  { %v12044_v4 = vpop.f32.mrf.mxu0 }
0x1e42   :  { %v8306_v42 = vmul.f32 0.35355338, %v12044_v4 }
0x1e43   :  { %v8266_v41 = vpop.f32.mrf.mxu0 }
0x1e44   :  { %v8305_v61 = vmul.f32 0.35355338, %v8266_v41  ;;  %v8316_v63 = vsel %vm1269_vm3, %v8306_v42, -inf }
0x1e45   :  { %8317 = vmax.xlane.f32.xlu1 %v8316_v63  ;;  %v12047_v2 = vpop.f32.mrf.mxu0 }
0x1e46   :  { %v8308_v12 = vmul.f32 0.35355338, %v12047_v2  ;;  %v8313_v35 = vsel %vm1269_vm3, %v8305_v61, -inf  ;;  %v16510_v2 = vpop.permute.xlu1 %8582 }
0x1e47   :  { %8314 = vmax.xlane.f32.xlu0 %v8313_v35  ;;  %v8276_v48 = vpop.f32.mrf.mxu0 }
0x1e48   :  { %v8307_v43 = vmul.f32 0.35355338, %v8276_v48  ;;  %v8322_v13 = vsel %vm1269_vm3, %v8308_v12, -inf }
0x1e49   :  { %v12050_v15 = vpop.f32.mrf.mxu0 }
0x1e4a   :  { %v8310_v45 = vmul.f32 0.35355338, %v12050_v15  ;;  %v8319_v27 = vsel %vm1269_vm3, %v8307_v43, -inf }
0x1e4b   :  { %8323 = vmax.xlane.f32.xlu0 %v8322_v13  ;;  %v8286_v24 = vpop.f32.mrf.mxu0 }
0x1e4c   :  { %v8309_v58 = vmul.f32 0.35355338, %v8286_v24  ;;  %v8328_v4 = vsel %vm1269_vm3, %v8310_v45, -inf }
0x1e4d   :  { %v12053_v59 = vpop.f32.mrf.mxu0 }
0x1e4e   :  { %v8325_v7 = vsel %vm1269_vm3, %v8309_v58, -inf  ;;  %v8312_v40 = vmul.f32 0.35355338, %v12053_v59 }
0x1e4f   :  { %8320 = vmax.xlane.f32.xlu0 %v8319_v27  ;;  %8326 = vmax.xlane.f32.xlu1 %v8325_v7  ;;  %v8296_v19 = vpop.f32.mrf.mxu0 }
0x1e50   :  { %v8311_v22 = vmul.f32 0.35355338, %v8296_v19  ;;  %v8334_v63 = vsel %vm1269_vm3, %v8312_v40, -inf }
0x1e52   :  { %v8331_v41 = vsel %vm1269_vm3, %v8311_v22, -inf }
0x1e53   :  { %8329 = vmax.xlane.f32.xlu0 %v8328_v4  ;;  %8332 = vmax.xlane.f32.xlu1 %v8331_v41 }
0x1e57   :  { %8335 = vmax.xlane.f32.xlu0 %v8334_v63 }
0x1e64   :  { %8578 = vrot.lane.b32.xlu1 %v16063_v5, %s12842_s15 }
0x1e6d   :  { %8580 = vrot.lane.b32.xlu0 %v16056_v0, %s12842_s15 }
0x1ece   :  { %v8318_v35 = vpop.xlane.xlu1 %8317 }
0x1ecf   :  { %v8338_v48 = vsub.f32 %v8306_v42, %v8318_v35 }
0x1ed0   :  { %v8315_v15 = vpop.xlane.xlu0 %8314 }
0x1ed1   :  { %v8347_v13 = vmul.f32 1.442695, %v8338_v48  ;;  %v8337_v24 = vsub.f32 %v8305_v61, %v8315_v15 }
0x1ed3   :  { %12723 = vpow2.f32 %v8347_v13  ;;  %v8345_v59 = vmul.f32 1.442695, %v8337_v24 }
0x1ed4   :  { %v8324_v5 = vpop.xlane.xlu0 %8323 }
0x1ed5   :  { %12725 = vpow2.f32 %v8345_v59  ;;  %v8340_v63 = vsub.f32 %v8308_v12, %v8324_v5 }
0x1ed7   :  { %v8351_v13 = vmul.f32 1.442695, %v8340_v63 }
0x1ed8   :  { %v8321_v42 = vpop.xlane.xlu0 %8320  ;;  %v8327_v61 = vpop.xlane.xlu1 %8326 }
0x1ed9   :  { %v8339_v4 = vsub.f32 %v8307_v43, %v8321_v42  ;;  %v8341_v48 = vsub.f32 %v8309_v58, %v8327_v61 }
0x1edb   :  { %v8349_v35 = vmul.f32 1.442695, %v8339_v4 }
0x1edc   :  { %v8330_v41 = vpop.xlane.xlu0 %8329  ;;  %v8333_v15 = vpop.xlane.xlu1 %8332 }
0x1edd   :  { %v8342_v24 = vsub.f32 %v8310_v45, %v8330_v41  ;;  %12727 = vpow2.f32 %v8349_v35 }
0x1ede   :  { %12729 = vpow2.f32 %v8351_v13 }
0x1edf   :  { %v8355_v11 = vmul.f32 1.442695, %v8342_v24 }
0x1ee0   :  { %v16512_v27 = vpop.eup %12723  ;;  %v8336_v59 = vpop.xlane.xlu0 %8335 }
0x1ee1   :  { %v8364_v7 = vsel %vm1269_vm3, %v16512_v27, 0.0 }
0x1ee2   :  { %v16516_v19 = vpop.eup %12725  ;;  %8365 = vadd.xlane.f32.xlu0 %v8364_v7  ;;  %v8353_v7 = vmul.f32 1.442695, %v8341_v48 }
0x1ee3   :  { %v8361_v0 = vsel %vm1269_vm3, %v16516_v19, 0.0 }
0x1ee4   :  { %8362 = vadd.xlane.f32.xlu1 %v8361_v0  ;;  %v8343_v0 = vsub.f32 %v8311_v22, %v8333_v15  ;;  %12731 = vpow2.f32 %v8353_v7 }
0x1ee5   :  { %12733 = vpow2.f32 %v8355_v11 }
0x1ee6   :  { %v8357_v23 = vmul.f32 1.442695, %v8343_v0 }
0x1ee8   :  { %12735 = vpow2.f32 %v8357_v23 }
0x1eea   :  { %v16524_v43 = vpop.eup %12727 }
0x1eeb   :  { %v16526_v12 = vpop.eup %12729  ;;  %v8367_v58 = vsel %vm1269_vm3, %v16524_v43, 0.0 }
0x1eec   :  { %v8370_v22 = vsel %vm1269_vm3, %v16526_v12, 0.0 }
0x1ef1   :  { %v16530_v45 = vpop.eup %12731 }
0x1ef2   :  { %v8373_v11 = vsel %vm1269_vm3, %v16530_v45, 0.0 }
0x1ef5   :  { %8574 = vrot.lane.b32.xlu1 %v16093_v46, %s12842_s15  ;;  %v8344_v46 = vsub.f32 %v8312_v40, %v8336_v59  ;;  %v16534_v40 = vpop.eup %12733 }
0x1ef6   :  { %v16538_v23 = vpop.eup %12735  ;;  %v8376_v5 = vsel %vm1269_vm3, %v16534_v40, 0.0 }
0x1ef7   :  { %v8379_v61 = vsel %vm1269_vm3, %v16538_v23, 0.0 }
0x1ef8   :  { %8576 = vrot.lane.b32.xlu0 %v16086_v57, %s12842_s15  ;;  %v8359_v57 = vmul.f32 1.442695, %v8344_v46 }
0x1efa   :  { %12737 = vpow2.f32 %v8359_v57 }
0x1f07   :  { %v16542_v42 = vpop.eup %12737 }
0x1f08   :  { %v8382_v4 = vsel %vm1269_vm3, %v16542_v42, 0.0 }
0x1f17   :  { %8368 = vadd.xlane.f32.xlu0 %v8367_v58 }
0x1f19   :  { %8371 = vadd.xlane.f32.xlu1 %v8370_v22 }
0x1f1b   :  { %8374 = vadd.xlane.f32.xlu0 %v8373_v11 }
0x1f1d   :  { %8377 = vadd.xlane.f32.xlu1 %v8376_v5 }
0x1f1f   :  { %8380 = vadd.xlane.f32.xlu0 %v8379_v61 }
0x1f21   :  { %8383 = vadd.xlane.f32.xlu1 %v8382_v4 }
0x1f32   :  { %8570 = vrot.lane.b32.xlu1 %v16107_v25, %s12842_s15  ;;  %v8579_v25 = vpop.permute.xlu1 %8578 }
0x1f35   :  { %8572 = vrot.lane.b32.xlu0 %v16100_v55, %s12842_s15  ;;  %v8581_v55 = vpop.permute.xlu0 %8580 }
0x1f36   :  { %8556 = vrot.lane.b32.xlu1 %v16140_v53, %s12842_s15 }
0x1f39   :  { %8554 = vrot.lane.b32.xlu0 %v16134_v39, %s12842_s15 }
0x1f3a   :  { %8560 = vrot.lane.b32.xlu1 %v16150_v18, %s12842_s15 }
0x1f3d   :  { %8558 = vrot.lane.b32.xlu0 %v16143_v36, %s12842_s15 }
0x1f3e   :  { %8564 = vrot.lane.b32.xlu1 %v16160_v52, %s12842_s15 }
0x1f41   :  { %8562 = vrot.lane.b32.xlu0 %v16153_v38, %s12842_s15 }
0x1f42   :  { %8568 = vrot.lane.b32.xlu1 %v16170_v30, %s12842_s15 }
0x1f45   :  { %8566 = vrot.lane.b32.xlu0 %v16163_v60, %s12842_s15 }
0x1f6b   :  { %v8366_v39 = vpop.xlane.xlu0 %8365 }
0x1f6c   :  { %12739 = vrcp.f32 %v8366_v39 }
0x1f6d   :  { %v8363_v53 = vpop.xlane.xlu1 %8362 }
0x1f6e   :  { %12741 = vrcp.f32 %v8363_v53 }
0x1f6f   :  { %v8577_v38 = vpop.permute.xlu0 %8576 }
0x1f71   :  { %v8575_v60 = vpop.permute.xlu1 %8574 }
0x1f79   :  { %v12740_v18 = vpop.eup %12739 }
0x1f7a   :  { %v8394_v52 = vmul.f32 %v12740_v18, %v16512_v27 }
0x1f7b   :  { %v12742_v36 = vpop.eup %12741 }
0x1f7c   :  { %v8393_v41 = vmul.f32 %v12742_v36, %v16516_v19 }
0x1f7e   :  { %12070 = vmatprep.mubr.msk.f32.mxu1 %vm1269_vm3, %v8393_v41 }
0x1f7f   :  { %12071 = vmatmul.mubr.msk.f32.vlgmr.msra.gmra.mxu1 %vm1269_vm3, %v8394_v52 }
0x1f80   :  { %12083 = vmatpush3.xpose.msk.msra.mxu1 %vm1107_vm2, %v16478_v51 }
0x1f81   :  { %12084 = vmatprep.subr.msk.mxu1 %vm1107_vm2, %v16510_v2 }
0x1f84   :  { %12085 = vmatpush3.xpose.msk.msra.mxu1 %vm1107_vm2, %v16510_v2 }
0x1f85   :  { %12086 = vmatprep.subr.msk.mxu1 %vm1107_vm2, %v8581_v55 }
0x1f88   :  { %12087 = vmatpush3.xpose.msk.msra.mxu1 %vm1107_vm2, %v8581_v55 }
0x1f89   :  { %12088 = vmatprep.subr.msk.mxu1 %vm1107_vm2, %v8579_v25 }
0x1f8c   :  { %12089 = vmatpush3.xpose.msk.msra.mxu1 %vm1107_vm2, %v8579_v25 }
0x1f8d   :  { %12090 = vmatprep.subr.msk.mxu1 %vm1107_vm2, %v8577_v38 }
0x1f90   :  { %12091 = vmatpush3.xpose.msk.msra.mxu1 %vm1107_vm2, %v8577_v38 }
0x1f91   :  { %12092 = vmatprep.subr.msk.mxu1 %vm1107_vm2, %v8575_v60 }
0x1f94   :  { %12093 = vmatpush3.xpose.msk.msra.mxu1 %vm1107_vm2, %v8575_v60 }
0x1fa0   :  { %v8369_v30 = vpop.xlane.xlu0 %8368 }
0x1fa1   :  { %12743 = vrcp.f32 %v8369_v30 }
0x1fa2   :  { %v8372_v51 = vpop.xlane.xlu1 %8371 }
0x1fa3   :  { %12745 = vrcp.f32 %v8372_v51 }
0x1fa4   :  { %v8375_v2 = vpop.xlane.xlu0 %8374 }
0x1fa5   :  { %12747 = vrcp.f32 %v8375_v2 }
0x1fa6   :  { %v8378_v27 = vpop.xlane.xlu1 %8377 }
0x1fa7   :  { %12749 = vrcp.f32 %v8378_v27 }
0x1fa8   :  { %v8381_v19 = vpop.xlane.xlu0 %8380 }
0x1fa9   :  { %12751 = vrcp.f32 %v8381_v19 }
0x1faa   :  { %v8384_v63 = vpop.xlane.xlu1 %8383 }
0x1fab   :  { %12753 = vrcp.f32 %v8384_v63 }
0x1fac   :  { %v8573_v35 = vpop.permute.xlu0 %8572 }
0x1fad   :  { %12094 = vmatprep.subr.msk.mxu1 %vm1107_vm2, %v8573_v35 }
0x1fae   :  { %v12744_v48 = vpop.eup %12743  ;;  %12095 = vmatpush3.xpose.msk.msra.mxu1 %vm1107_vm2, %v8573_v35  ;;  %v8571_v15 = vpop.permute.xlu1 %8570 }
0x1faf   :  { %12096 = vmatprep.subr.msk.mxu1 %vm1107_vm2, %v8571_v15  ;;  %v8395_v13 = vmul.f32 %v12744_v48, %v16524_v43 }
0x1fb0   :  { %v12746_v24 = vpop.eup %12745  ;;  %v8555_v57 = vpop.permute.xlu0 %8554 }
0x1fb1   :  { %12073 = vmatprep.mubr.msk.f32.mxu1 %vm1269_vm3, %v8395_v13  ;;  %v8396_v59 = vmul.f32 %v12746_v24, %v16526_v12 }
0x1fb2   :  { %v12748_v7 = vpop.eup %12747  ;;  %12097 = vmatpush3.xpose.msk.msra.mxu1 %vm1107_vm2, %v8571_v15  ;;  %v8557_v12 = vpop.permute.xlu1 %8556 }
0x1fb3   :  { %12074 = vmatmul.mubr.msk.f32.gmra.mxu1 %vm1269_vm3, %v8396_v59  ;;  %v8397_v0 = vmul.f32 %v12748_v7, %v16530_v45 }
0x1fb4   :  { %v12750_v46 = vpop.eup %12749  ;;  %v8559_v61 = vpop.permute.xlu0 %8558 }
0x1fb5   :  { %12076 = vmatprep.mubr.msk.f32.mxu1 %vm1269_vm3, %v8397_v0  ;;  %v8398_v58 = vmul.f32 %v12750_v46, %v16534_v40 }
0x1fb6   :  { %v12752_v22 = vpop.eup %12751  ;;  %v8561_v45 = vpop.permute.xlu1 %8560 }
0x1fb7   :  { %12077 = vmatmul.mubr.msk.f32.gmra.mxu1 %vm1269_vm3, %v8398_v58  ;;  %v8399_v43 = vmul.f32 %v12752_v22, %v16538_v23 }
0x1fb8   :  { %v12754_v11 = vpop.eup %12753  ;;  %v8563_v40 = vpop.permute.xlu0 %8562 }
0x1fb9   :  { %12079 = vmatprep.mubr.msk.f32.mxu1 %vm1269_vm3, %v8399_v43  ;;  %v8400_v5 = vmul.f32 %v12754_v11, %v16542_v42 }
0x1fba   :  { %v8565_v23 = vpop.permute.xlu1 %8564 }
0x1fbb   :  { %12080 = vmatmul.mubr.msk.f32.gmra.mxu1 %vm1269_vm3, %v8400_v5 }
0x1fbc   :  { %12098 = vmatprep.mubr.msk.f32.mxu1 %vm1107_vm2, %v8555_v57  ;;  %v8567_v4 = vpop.permute.xlu0 %8566 }
0x1fbe   :  { %v8569_v42 = vpop.permute.xlu1 %8568 }
0x1fbf   :  { %12099 = vmatmul.mubr.msk.f32.vlgmr.msra.gmra.mxu1 %vm1107_vm2, %v8557_v12 }
0x1fc0   :  { %12101 = vmatprep.mubr.msk.f32.mxu1 %vm1107_vm2, %v8559_v61 }
0x1fc3   :  { %12102 = vmatmul.mubr.msk.f32.gmra.mxu1 %vm1107_vm2, %v8561_v45 }
0x1fc4   :  { %12104 = vmatprep.mubr.msk.f32.mxu1 %vm1107_vm2, %v8563_v40 }
0x1fc7   :  { %12105 = vmatmul.mubr.msk.f32.gmra.mxu1 %vm1107_vm2, %v8565_v23 }
0x1fc8   :  { %12107 = vmatprep.mubr.msk.f32.mxu1 %vm1107_vm2, %v8567_v4 }
0x1fcb   :  { %12108 = vmatmul.mubr.msk.f32.gmra.mxu1 %vm1107_vm2, %v8569_v42 }
0x203f   :  { %v16610_v55 = vpop.f32.mrf.mxu1 }
0x2041   :  { %v16612_v25 = vpop.f32.mrf.mxu1 }
0x2073   :  { %v16614_v39 = vpop.f32.mrf.mxu1 }
0x2075   :  { %v16616_v53 = vpop.f32.mrf.mxu1 }
0x2077   :  { %v16618_v18 = vpop.f32.mrf.mxu1 }
0x2079   :  { %v16620_v36 = vpop.f32.mrf.mxu1 }
0x207b   :  { %v16622_v41 = vpop.f32.mrf.mxu1 }
0x207d   :  { %v16624_v52 = vpop.f32.mrf.mxu1 }
0x207f   :  { %v12100_v38 = vpop.f32.mrf.mxu1 }
0x2080   :  { %v8724_v60 = vmul.f32 0.35355338, %v12100_v38 }
0x2081   :  { %v8684_v30 = vpop.f32.mrf.mxu1 }
0x2082   :  { %v8723_v51 = vmul.f32 0.35355338, %v8684_v30  ;;  %v8734_v2 = vsel %vm1269_vm3, %v8724_v60, -inf }
0x2083   :  { %8735 = vmax.xlane.f32.xlu1 %v8734_v2  ;;  %v12103_v27 = vpop.f32.mrf.mxu1 }
0x2084   :  { %v8731_v19 = vsel %vm1269_vm3, %v8723_v51, -inf  ;;  %v8726_v15 = vmul.f32 0.35355338, %v12103_v27 }
0x2085   :  { %8732 = vmax.xlane.f32.xlu0 %v8731_v19  ;;  %v8694_v63 = vpop.f32.mrf.mxu1 }
0x2086   :  { %v8725_v35 = vmul.f32 0.35355338, %v8694_v63  ;;  %v8740_v0 = vsel %vm1269_vm3, %v8726_v15, -inf }
0x2087   :  { %v12106_v48 = vpop.f32.mrf.mxu1 }
0x2088   :  { %v8737_v13 = vsel %vm1269_vm3, %v8725_v35, -inf  ;;  %v8728_v7 = vmul.f32 0.35355338, %v12106_v48 }
0x2089   :  { %8738 = vmax.xlane.f32.xlu0 %v8737_v13  ;;  %v8704_v24 = vpop.f32.mrf.mxu1 }
0x208a   :  { %v8727_v59 = vmul.f32 0.35355338, %v8704_v24  ;;  %v8746_v22 = vsel %vm1269_vm3, %v8728_v7, -inf }
0x208b   :  { %v12109_v57 = vpop.f32.mrf.mxu1 }
0x208c   :  { %v8743_v46 = vsel %vm1269_vm3, %v8727_v59, -inf  ;;  %v8730_v58 = vmul.f32 0.35355338, %v12109_v57 }
0x208d   :  { %8741 = vmax.xlane.f32.xlu0 %v8740_v0  ;;  %8744 = vmax.xlane.f32.xlu1 %v8743_v46  ;;  %v8714_v11 = vpop.f32.mrf.mxu1 }
0x208e   :  { %v8752_v43 = vsel %vm1269_vm3, %v8730_v58, -inf  ;;  %v16641_v12 = vmul.f32 0.35355338, %v8714_v11 }
0x2090   :  { %v8749_v5 = vsel %vm1269_vm3, %v16641_v12, -inf }
0x2091   :  { %8747 = vmax.xlane.f32.xlu0 %v8746_v22 }
0x2095   :  { %8753 = vmax.xlane.f32.xlu0 %v8752_v43 }
0x209e   :  { %8833 = vrot.lane.b32.xlu1 %v17265_v10, %s12842_s15 }
0x20a2   :  { %8829 = vrot.lane.b32.xlu1 %v17267_v29, %s12842_s15 }
0x20ab   :  { %8831 = vrot.lane.b32.xlu0 %v15924_v3, %s12842_s15 }
0x20af   :  { %8825 = vrot.lane.b32.xlu0 %v17269_v1, %s12842_s15 }
0x20c6   :  { %8750 = vmax.xlane.f32.xlu1 %v8749_v5 }
0x20d7   :  { %8827 = vrot.lane.b32.xlu1 %v17268_v20, %s12842_s15 }
0x20db   :  { %8823 = vrot.lane.b32.xlu1 %v17270_v62, %s12842_s15 }
0x210c   :  { %v8736_v10 = vpop.xlane.xlu1 %8735 }
0x210d   :  { %v8756_v29 = vsub.f32 %v8724_v60, %v8736_v10 }
0x210e   :  { %v8733_v61 = vpop.xlane.xlu0 %8732 }
0x210f   :  { %v8765_v3 = vmul.f32 1.442695, %v8756_v29  ;;  %v8755_v45 = vsub.f32 %v8723_v51, %v8733_v61 }
0x2111   :  { %12755 = vpow2.f32 %v8765_v3  ;;  %v8763_v1 = vmul.f32 1.442695, %v8755_v45 }
0x2112   :  { %v8739_v40 = vpop.xlane.xlu0 %8738 }
0x2113   :  { %12757 = vpow2.f32 %v8763_v1  ;;  %v8757_v23 = vsub.f32 %v8725_v35, %v8739_v40 }
0x2115   :  { %v8767_v4 = vmul.f32 1.442695, %v8757_v23 }
0x2116   :  { %v8742_v42 = vpop.xlane.xlu0 %8741  ;;  %v8745_v38 = vpop.xlane.xlu1 %8744 }
0x2117   :  { %12759 = vpow2.f32 %v8767_v4  ;;  %v8758_v30 = vsub.f32 %v8726_v15, %v8742_v42  ;;  %v8759_v2 = vsub.f32 %v8727_v59, %v8745_v38 }
0x2119   :  { %v8769_v20 = vmul.f32 1.442695, %v8758_v30  ;;  %v8771_v27 = vmul.f32 1.442695, %v8759_v2 }
0x211a   :  { %v8748_v19 = vpop.xlane.xlu0 %8747  ;;  %v8834_v62 = vpop.permute.xlu1 %8833 }
0x211b   :  { %12761 = vpow2.f32 %v8769_v20  ;;  %v8760_v60 = vsub.f32 %v8728_v7, %v8748_v19  ;;  %12110 = vmatprep.subr.mxu0 %v8834_v62 }
0x211c   :  { %12763 = vpow2.f32 %v8771_v27  ;;  %12111 = vmatpush3.msra.mxu0 %v8834_v62 }
0x211d   :  { %v8773_v51 = vmul.f32 1.442695, %v8760_v60 }
0x211e   :  { %v16649_v63 = vpop.eup %12755  ;;  %v8754_v48 = vpop.xlane.xlu0 %8753 }
0x211f   :  { %12765 = vpow2.f32 %v8773_v51  ;;  %v8762_v35 = vsub.f32 %v8730_v58, %v8754_v48  ;;  %v8782_v13 = vsel %vm1269_vm3, %v16649_v63, 0.0  ;;  %v8830_v46 = vpop.permute.xlu1 %8829 }
0x2120   :  { %v16653_v15 = vpop.eup %12757  ;;  %8783 = vadd.xlane.f32.xlu0 %v8782_v13 }
0x2121   :  { %v8777_v24 = vmul.f32 1.442695, %v8762_v35  ;;  %v8779_v59 = vsel %vm1269_vm3, %v16653_v15, 0.0  ;;  %v9095_v35 = vld [vmem:[#allocation2 + $0x130] sm:$0xff] }
0x2122   :  { %v8832_v7 = vpop.permute.xlu0 %8831  ;;  %8780 = vadd.xlane.f32.xlu1 %v8779_v59 }
0x2123   :  { %12767 = vpow2.f32 %v8777_v24  ;;  %12112 = vmatprep.subr.mxu0 %v8832_v7  ;;  %v9094_v24 = vld [vmem:[#allocation2 + $0x128] sm:$0xff] }
0x2124   :  { %v16657_v0 = vpop.eup %12759  ;;  %12113 = vmatpush3.msra.mxu0 %v8832_v7 }
0x2125   :  { %12114 = vmatprep.subr.mxu0 %v8830_v46  ;;  %v8785_v57 = vsel %vm1269_vm3, %v16657_v0, 0.0 }
0x2126   :  { %8786 = vadd.xlane.f32.xlu1 %v8785_v57  ;;  %12115 = vmatpush3.msra.mxu0 %v8830_v46  ;;  %v8826_v23 = vpop.permute.xlu0 %8825  ;;  %v9093_v57 = vld [vmem:[#allocation2 + $0x120] sm:$0xff] }
0x2128   :  { %v16661_v58 = vpop.eup %12761 }
0x2129   :  { %v16663_v22 = vpop.eup %12763  ;;  %v8788_v43 = vsel %vm1269_vm3, %v16661_v58, 0.0 }
0x212a   :  { %8789 = vadd.xlane.f32.xlu0 %v8788_v43  ;;  %v8791_v11 = vsel %vm1269_vm3, %v16663_v22, 0.0 }
0x212b   :  { %8792 = vadd.xlane.f32.xlu1 %v8791_v11 }
0x212c   :  { %v16669_v5 = vpop.eup %12765 }
0x212d   :  { %v8794_v10 = vsel %vm1269_vm3, %v16669_v5, 0.0 }
0x212e   :  { %8795 = vadd.xlane.f32.xlu0 %v8794_v10 }
0x2130   :  { %v16673_v29 = vpop.eup %12767 }
0x2131   :  { %v8800_v61 = vsel %vm1269_vm3, %v16673_v29, 0.0 }
0x2132   :  { %8801 = vadd.xlane.f32.xlu0 %v8800_v61 }
0x2148   :  { %8821 = vrot.lane.b32.xlu0 %v17271_v14, %s12842_s15 }
0x214c   :  { %7220 = vrot.lane.b32.xlu0 %v15966_v17, %s12839_s19 }
0x214f   :  { %v8751_v3 = vpop.xlane.xlu1 %8750 }
0x2150   :  { %v8761_v45 = vsub.f32 %v16641_v12, %v8751_v3  ;;  %7252 = vrot.lane.b32.xlu0 %v15982_v21, %s12843_s24  ;;  %v17337_v3 = vld [vmem:[#allocation18_spill] sm:$0xff] }
0x2152   :  { %v8775_v1 = vmul.f32 1.442695, %v8761_v45 }
0x2153   :  { %v8828_v40 = vpop.permute.xlu1 %8827 }
0x2154   :  { %12769 = vpow2.f32 %v8775_v1  ;;  %7284 = vrot.lane.b32.xlu0 %v16176_v28, %s12844_s25  ;;  %12116 = vmatprep.subr.mxu0 %v8828_v40  ;;  %v17329_v28 = vld [vmem:[#allocation14_spill] sm:$0xff] }
0x2155   :  { %12117 = vmatpush3.msra.mxu0 %v8828_v40 }
0x2156   :  { %12118 = vmatprep.subr.mxu0 %v8826_v23 }
0x2157   :  { %12119 = vmatpush3.msra.mxu0 %v8826_v23  ;;  %v8824_v14 = vpop.permute.xlu1 %8823  ;;  %v17338_v23 = vld [vmem:[#allocation23_spill] sm:$0xff] }
0x2158   :  { %7224 = vrot.lane.b32.xlu0 %v15970_v34, %s12839_s19  ;;  %12120 = vmatprep.subr.mxu0 %v8824_v14  ;;  %v17323_v34 = vld [vmem:[#allocation12_spill] sm:$0xff] }
0x2159   :  { %12121 = vmatpush3.msra.mxu0 %v8824_v14 }
0x215c   :  { %7256 = vrot.lane.b32.xlu0 %v15986_v32, %s12843_s24  ;;  %v17324_v32 = vld [vmem:[#allocation26_spill] sm:$0xff] }
0x2160   :  { %7288 = vrot.lane.b32.xlu0 %v16180_v54, %s12844_s25  ;;  %v17330_v54 = vld [vmem:[#allocation58_spill] sm:$0xff] }
0x2161   :  { %v16692_v17 = vpop.eup %12769 }
0x2162   :  { %v8797_v21 = vsel %vm1269_vm3, %v16692_v17, 0.0 }
0x2163   :  { %8798 = vadd.xlane.f32.xlu1 %v8797_v21  ;;  %v17339_v21 = vld [vmem:[#allocation52_spill] sm:$0xff] }
0x2164   :  { %7228 = vrot.lane.b32.xlu0 %v15974_v37, %s12839_s19  ;;  %v17325_v37 = vld [vmem:[#allocation20_spill] sm:$0xff] }
0x2168   :  { %7260 = vrot.lane.b32.xlu0 %v15990_v9, %s12843_s24  ;;  %v17326_v9 = vld [vmem:[#allocation29_spill] sm:$0xff] }
0x216c   :  { %7292 = vrot.lane.b32.xlu0 %v16184_v56, %s12844_s25  ;;  %v17331_v56 = vld [vmem:[#allocation19_spill] sm:$0xff] }
0x2170   :  { %7232 = vrot.lane.b32.xlu0 %v15978_v26, %s12839_s19  ;;  %v17327_v26 = vld [vmem:[#allocation8_spill] sm:$0xff] }
0x2174   :  { %7264 = vrot.lane.b32.xlu0 %v17323_v34, %s12843_s24  ;;  %8819 = vrot.lane.b32.xlu1 %v17272_v49, %s12842_s15  ;;  %v17328_v49 = vld [vmem:[#allocation25_spill] sm:$0xff] }
0x2178   :  { %7296 = vrot.lane.b32.xlu0 %v17324_v32, %s12844_s25  ;;  %7222 = vrot.lane.b32.xlu1 %v17325_v37, %s12839_s19 }
0x217c   :  { %8980 = vrot.lane.b32.xlu0 %v16484_v44, %s12839_s19  ;;  %7254 = vrot.lane.b32.xlu1 %v17326_v9, %s12843_s24  ;;  %v17332_v44 = vld [vmem:[#allocation15_spill] sm:$0xff] }
0x2180   :  { %9012 = vrot.lane.b32.xlu0 %v16612_v25, %s12843_s24  ;;  %7286 = vrot.lane.b32.xlu1 %v17327_v26, %s12844_s25  ;;  %v17335_v25 = vld [vmem:[#allocation10_spill] sm:$0xff] }
0x2184   :  { %8984 = vrot.lane.b32.xlu0 %v16488_v47, %s12839_s19  ;;  %7226 = vrot.lane.b32.xlu1 %v17328_v49, %s12839_s19  ;;  %v17333_v47 = vld [vmem:[#allocation42_spill] sm:$0xff] }
0x2188   :  { %9016 = vrot.lane.b32.xlu0 %v16616_v53, %s12843_s24  ;;  %7258 = vrot.lane.b32.xlu1 %v17329_v28, %s12843_s24  ;;  %v17336_v53 = vld [vmem:[#allocation40_spill] sm:$0xff] }
0x218c   :  { %8988 = vrot.lane.b32.xlu0 %v16492_v33, %s12839_s19  ;;  %7290 = vrot.lane.b32.xlu1 %v17330_v54, %s12844_s25  ;;  %v17334_v33 = vld [vmem:[#allocation55_spill] sm:$0xff]  ;;  %v17340_v54 = vld [vmem:[#allocation22_spill] sm:$0xff] }
0x2190   :  { %9020 = vrot.lane.b32.xlu0 %v16620_v36, %s12843_s24  ;;  %7230 = vrot.lane.b32.xlu1 %v17331_v56, %s12839_s19 }
0x2194   :  { %8992 = vrot.lane.b32.xlu0 %v16496_v31, %s12839_s19  ;;  %7262 = vrot.lane.b32.xlu1 %v17332_v44, %s12843_s24  ;;  %v17341_v44 = vld [vmem:[#allocation21_spill] sm:$0xff] }
0x2198   :  { %9024 = vrot.lane.b32.xlu0 %v16624_v52, %s12843_s24  ;;  %7294 = vrot.lane.b32.xlu1 %v17333_v47, %s12844_s25 }
0x219c   :  { %7234 = vrot.lane.b32.xlu1 %v17334_v33, %s12839_s19 }
0x21a0   :  { %7266 = vrot.lane.b32.xlu1 %v17335_v25, %s12843_s24 }
0x21a4   :  { %7298 = vrot.lane.b32.xlu1 %v17336_v53, %s12844_s25 }
0x21a8   :  { %8982 = vrot.lane.b32.xlu1 %v16482_v16, %s12839_s19 }
0x21a9   :  { %v8784_v36 = vpop.xlane.xlu0 %8783 }
0x21ab   :  { %v8781_v31 = vpop.xlane.xlu1 %8780 }
0x21ac   :  { %12771 = vrcp.f32 %v8781_v31  ;;  %9014 = vrot.lane.b32.xlu1 %v16610_v55, %s12843_s24 }
0x21ad   :  { %12773 = vrcp.f32 %v8784_v36 }
0x21b0   :  { %8986 = vrot.lane.b32.xlu1 %v16486_v50, %s12839_s19 }
0x21b3   :  { %v8790_v52 = vpop.xlane.xlu0 %8789 }
0x21b4   :  { %9018 = vrot.lane.b32.xlu1 %v16614_v39, %s12843_s24  ;;  %v8787_v39 = vpop.xlane.xlu1 %8786 }
0x21b5   :  { %12775 = vrcp.f32 %v8787_v39 }
0x21b6   :  { %12777 = vrcp.f32 %v8790_v52 }
0x21b7   :  { %v8796_v12 = vpop.xlane.xlu0 %8795 }
0x21b8   :  { %8990 = vrot.lane.b32.xlu1 %v16490_v6, %s12839_s19  ;;  %v8793_v30 = vpop.xlane.xlu1 %8792 }
0x21b9   :  { %v12772_v4 = vpop.eup %12771  ;;  %12779 = vrcp.f32 %v8793_v30 }
0x21ba   :  { %v8811_v16 = vmul.f32 %v12772_v4, %v16653_v15  ;;  %12781 = vrcp.f32 %v8796_v12 }
0x21bb   :  { %v8802_v42 = vpop.xlane.xlu0 %8801 }
0x21bc   :  { %9022 = vrot.lane.b32.xlu1 %v16618_v18, %s12843_s24  ;;  %12126 = vmatprep.mubr.msk.f32.mxu0 %vm1269_vm3, %v8811_v16  ;;  %12783 = vrcp.f32 %v8802_v42  ;;  %v17342_v42 = vld [vmem:[#allocation17_spill] sm:$0xff] }
0x21bf   :  { %v8822_v55 = vpop.permute.xlu0 %8821 }
0x21c0   :  { %8994 = vrot.lane.b32.xlu1 %v16494_v8, %s12839_s19  ;;  %12122 = vmatprep.subr.mxu0 %v8822_v55  ;;  %v12774_v8 = vpop.eup %12773 }
0x21c1   :  { %12123 = vmatpush3.msra.mxu0 %v8822_v55  ;;  %v8812_v60 = vmul.f32 %v12774_v8, %v16649_v63 }
0x21c2   :  { %v12776_v27 = vpop.eup %12775 }
0x21c3   :  { %v7221_v50 = vpop.permute.xlu0 %7220  ;;  %v12778_v51 = vpop.eup %12777  ;;  %v8813_v48 = vmul.f32 %v12776_v27, %v16657_v0  ;;  %v17344_v27 = vld [vmem:[#allocation11_spill] sm:$0xff] }
0x21c4   :  { %9026 = vrot.lane.b32.xlu1 %v16622_v41, %s12843_s24  ;;  %v9096_v41 = vld [vmem:[#allocation2 + $0x138] sm:$0xff]  ;;  %v8814_v7 = vmul.f32 %v12778_v51, %v16661_v58  ;;  %v7308_v45 = vsel %vm1107_vm2, %v17337_v3, %v7221_v50  ;;  %v17343_v50 = vld [vmem:[#allocation16_spill] sm:$0xff] }
0x21c5   :  { %v9318_v51 = vld [vmem:[#allocation2 + $0x158] sm:$0xff] }
0x21c6   :  { %v12780_v13 = vpop.eup %12779  ;;  %12170 = vmatprep.subr.mxu1 %v9318_v51 }
0x21c7   :  { %v7253_v6 = vpop.permute.xlu0 %7252  ;;  %v12782_v63 = vpop.eup %12781  ;;  %v8815_v46 = vmul.f32 %v12780_v13, %v16663_v22  ;;  %12171 = vmatpush3.msra.mxu1 %v9318_v51  ;;  %v9315_v13 = vld [vmem:[#allocation2 + $0x140] sm:$0xff] }
0x21c8   :  { %v8816_v11 = vmul.f32 %v12782_v63, %v16669_v5  ;;  %v7316_v40 = vsel %vm57_vm0, %v7308_v45, %v7253_v6  ;;  %v17346_v45 = vld [vmem:[#allocation24_spill] sm:$0xff] }
0x21c9   :  { %v12784_v43 = vpop.eup %12783 }
0x21ca   :  { %v8818_v1 = vmul.f32 %v12784_v43, %v16673_v29  ;;  %v16833_v43 = vld [vmem:[%s16964_s3 + $0x9] ss:$0 sm:$0xff]  ;;  %s12845_s3 = smov [#allocation5]  }
0x21cb   :  { %v7285_v38 = vpop.permute.xlu0 %7284  ;;  %s9553_s13 = sshll.u32 %s12845_s3, 4  ;;  %s9554_s13 = int_to_ptr.vmem [resolvable:$true] %s9553_s13 }
0x21cc   :  { %v7324_v5 = vsel %vm2861_vm4, %v7316_v40, %v7285_v38  ;;  %s12813_s14 = scalar_lea.vmem %s9554_s13, 512  ;;  %p12818_p6 = scmp.lt.s32.totalorder %s9554_s13, %s9554_s13 }
0x21cd   :  { %p12814_p5 = scmp.ne.s32.totalorder %s9554_s13, %s12813_s14  ;;  %p12819_p7 = scmp.lt.s32.totalorder %s12813_s14, %s12813_s14 }
0x21cf   :  { %v7225_v2 = vpop.permute.xlu0 %7224  ;;  %p12820_p8 = por %p12819_p7, %p12818_p6 }
0x21d0   :  { %v7310_v34 = vsel %vm1107_vm2, %v17339_v21, %v7225_v2 }
0x21d1   :  { %p12821_p9 = pnand %p12820_p8, %p12814_p5 }
0x21d3   :  { %v7257_v18 = vpop.permute.xlu0 %7256 }
0x21d4   :  { %v7318_v29 = vsel %vm57_vm0, %v7310_v34, %v7257_v18  ;;  %v17348_v34 = vld [vmem:[#allocation28_spill] sm:$0xff] }
0x21d7   :  { %v7289_v19 = vpop.permute.xlu0 %7288 }
0x21d8   :  { %v7326_v26 = vsel %vm2861_vm4, %v7318_v29, %v7289_v19 }
0x21db   :  { %v7229_v59 = vpop.permute.xlu0 %7228 }
0x21dc   :  { %v7312_v47 = vsel %vm1107_vm2, %v17341_v44, %v7229_v59 }
0x21df   :  { %v7261_v58 = vpop.permute.xlu0 %7260 }
0x21e0   :  { %v7320_v53 = vsel %vm57_vm0, %v7312_v47, %v7261_v58 }
0x21e3   :  { %v7293_v32 = vpop.permute.xlu0 %7292 }
0x21e4   :  { %v7328_v36 = vsel %vm2861_vm4, %v7320_v53, %v7293_v32  ;;  %v17351_v53 = vld [vmem:[#allocation36_spill] sm:$0xff] }
0x21e7   :  { %v7233_v28 = vpop.permute.xlu0 %7232 }
0x21e8   :  { %v7314_v6 = vsel %vm1107_vm2, %v17343_v50, %v7233_v28 }
0x21eb   :  { %v7265_v12 = vpop.permute.xlu0 %7264 }
0x21ec   :  { %v8799_v20 = vpop.xlane.xlu1 %8798  ;;  %v7322_v30 = vsel %vm57_vm0, %v7314_v6, %v7265_v12 }
0x21ed   :  { %12785 = vrcp.f32 %v8799_v20 }
0x21ef   :  { %v7297_v16 = vpop.permute.xlu0 %7296 }
0x21f0   :  { %v8820_v62 = vpop.permute.xlu1 %8819  ;;  %v7330_v18 = vsel %vm2861_vm4, %v7322_v30, %v7297_v16 }
0x21f1   :  { %12124 = vmatprep.subr.mxu0 %v8820_v62 }
0x21f2   :  { %12125 = vmatpush3.msra.mxu0 %v8820_v62 }
0x21f3   :  { %12127 = vmatmul.mubr.msk.f32.vlgmr.msra.gmra.mxu0 %vm1269_vm3, %v8812_v60  ;;  %12138 = vmatprep.subr.mxu0 %v9096_v41 }
0x21f4   :  { %12129 = vmatprep.mubr.msk.f32.mxu0 %vm1269_vm3, %v8813_v48  ;;  %v7223_v15 = vpop.permute.xlu1 %7222  ;;  %12139 = vmatpush3.msra.mxu0 %v9096_v41  ;;  %v9317_v48 = vld [vmem:[#allocation2 + $0x150] sm:$0xff] }
0x21f5   :  { %12140 = vmatprep.subr.mxu0 %v9095_v35  ;;  %v7309_v14 = vsel %vm1107_vm2, %v17338_v23, %v7223_v15  ;;  %12172 = vmatprep.subr.mxu1 %v9317_v48 }
0x21f6   :  { %12141 = vmatpush3.msra.mxu0 %v9095_v35  ;;  %12173 = vmatpush3.msra.mxu1 %v9317_v48  ;;  %v9316_v35 = vld [vmem:[#allocation2 + $0x148] sm:$0xff]  ;;  %v17354_v48 = vld [vmem:[#allocation27_spill] sm:$0xff] }
0x21f7   :  { %12130 = vmatmul.mubr.msk.f32.gmra.mxu0 %vm1269_vm3, %v8814_v7  ;;  %12142 = vmatprep.subr.mxu0 %v9094_v24 }
0x21f8   :  { %12132 = vmatprep.mubr.msk.f32.mxu0 %vm1269_vm3, %v8815_v46  ;;  %v7255_v0 = vpop.permute.xlu1 %7254  ;;  %12143 = vmatpush3.msra.mxu0 %v9094_v24 }
0x21f9   :  { %12144 = vmatprep.subr.mxu0 %v9093_v57  ;;  %v7317_v37 = vsel %vm57_vm0, %v7309_v14, %v7255_v0  ;;  %12174 = vmatprep.subr.mxu1 %v9316_v35 }
0x21fa   :  { %v12786_v10 = vpop.eup %12785  ;;  %12145 = vmatpush3.msra.mxu0 %v9093_v57  ;;  %12175 = vmatpush3.msra.mxu1 %v9316_v35 }
0x21fb   :  { %12133 = vmatmul.mubr.msk.f32.gmra.mxu0 %vm1269_vm3, %v8816_v11  ;;  %v8817_v22 = vmul.f32 %v12786_v10, %v16692_v17  ;;  %12176 = vmatprep.subr.mxu1 %v9315_v13 }
0x21fc   :  { %v7287_v61 = vpop.permute.xlu1 %7286  ;;  %12177 = vmatpush3.msra.mxu1 %v9315_v13 }
0x21fd   :  { %12135 = vmatprep.mubr.msk.f32.mxu0 %vm1269_vm3, %v8817_v22  ;;  %v7325_v9 = vsel %vm2861_vm4, %v7317_v37, %v7287_v61  ;;  %v17345_v61 = vld [vmem:[#allocation30_spill] sm:$0xff] }
0x21ff   :  { %12136 = vmatmul.mubr.msk.f32.gmra.mxu0 %vm1269_vm3, %v8818_v1 }
0x2200   :  { %12146 = vmatprep.mubr.msk.f32.mxu0 %vm375_vm1, %v7324_v5  ;;  %v7227_v17 = vpop.permute.xlu1 %7226 }
0x2201   :  { %v7311_v56 = vsel %vm1107_vm2, %v17340_v54, %v7227_v17  ;;  %v17347_v17 = vld [vmem:[#allocation34_spill] sm:$0xff]  ;;  %v17350_v54 = vld [vmem:[#allocation32_spill] sm:$0xff] }
0x2203   :  { %12147 = vmatmul.mubr.msk.f32.vlgmr.msra.gmra.mxu0 %vm375_vm1, %v7325_v9 }
0x2204   :  { %12149 = vmatprep.mubr.msk.f32.mxu0 %vm375_vm1, %v7326_v26  ;;  %v7259_v49 = vpop.permute.xlu1 %7258 }
0x2205   :  { %v7319_v33 = vsel %vm57_vm0, %v7311_v56, %v7259_v49  ;;  %v17349_v49 = vld [vmem:[#allocation38_spill] sm:$0xff] }
0x2208   :  { %v7291_v25 = vpop.permute.xlu1 %7290 }
0x2209   :  { %v7327_v31 = vsel %vm2861_vm4, %v7319_v33, %v7291_v25 }
0x220a   :  { %12150 = vmatmul.mubr.msk.f32.gmra.mxu0 %vm375_vm1, %v7327_v31 }
0x220b   :  { %12152 = vmatprep.mubr.msk.f32.mxu0 %vm375_vm1, %v7328_v36  ;;  %v17352_v36 = vld [vmem:[#allocation60_spill] sm:$0xff] }
0x220c   :  { %v7231_v52 = vpop.permute.xlu1 %7230 }
0x220d   :  { %v7313_v55 = vsel %vm1107_vm2, %v17342_v42, %v7231_v52 }
0x2210   :  { %v7263_v4 = vpop.permute.xlu1 %7262 }
0x2211   :  { %v7321_v39 = vsel %vm57_vm0, %v7313_v55, %v7263_v4  ;;  %v8981_v4 = vpop.permute.xlu0 %8980 }
0x2214   :  { %v7295_v38 = vpop.permute.xlu1 %7294 }
0x2215   :  { %v7329_v2 = vsel %vm2861_vm4, %v7321_v39, %v7295_v38  ;;  %v9013_v42 = vpop.permute.xlu0 %9012 }
0x2216   :  { %12153 = vmatmul.mubr.msk.f32.gmra.mxu0 %vm375_vm1, %v7329_v2 }
0x2217   :  { %12155 = vmatprep.mubr.msk.f32.mxu0 %vm375_vm1, %v7330_v18 }
0x2218   :  { %v7235_v20 = vpop.permute.xlu1 %7234 }
0x2219   :  { %v7315_v19 = vsel %vm1107_vm2, %v17344_v27, %v7235_v20  ;;  %v8985_v50 = vpop.permute.xlu0 %8984 }
0x221c   :  { %v7267_v8 = vpop.permute.xlu1 %7266 }
0x221d   :  { %v7323_v62 = vsel %vm57_vm0, %v7315_v19, %v7267_v8  ;;  %v9017_v39 = vpop.permute.xlu0 %9016 }
0x2220   :  { %v7299_v41 = vpop.permute.xlu1 %7298 }
0x2221   :  { %v7331_v60 = vsel %vm2861_vm4, %v7323_v62, %v7299_v41  ;;  %v8989_v30 = vpop.permute.xlu0 %8988  ;;  %v17353_v41 = vld [vmem:[#allocation35_spill] sm:$0xff] }
0x2222   :  { %12156 = vmatmul.mubr.msk.f32.gmra.mxu0 %vm375_vm1, %v7331_v60  ;;  %v9068_v60 = vsel %vm1107_vm2, %v17353_v41, %v8981_v4 }
0x2223   :  { %v9076_v51 = vsel %vm57_vm0, %v9068_v60, %v9013_v42 }
0x2224   :  { %v8983_v12 = vpop.permute.xlu1 %8982 }
0x2225   :  { %v9021_v18 = vpop.permute.xlu0 %9020  ;;  %v9069_v35 = vsel %vm1107_vm2, %v17354_v48, %v8983_v12 }
0x2228   :  { %v9015_v16 = vpop.permute.xlu1 %9014 }
0x2229   :  { %v8993_v8 = vpop.permute.xlu0 %8992 }
0x222c   :  { %v8987_v55 = vpop.permute.xlu1 %8986 }
0x222d   :  { %v9025_v19 = vpop.permute.xlu0 %9024 }
0x2230   :  { %v9019_v6 = vpop.permute.xlu1 %9018 }
0x2234   :  { %v8991_v38 = vpop.permute.xlu1 %8990 }
0x2238   :  { %v9023_v2 = vpop.permute.xlu1 %9022 }
0x223c   :  { %v8995_v20 = vpop.permute.xlu1 %8994 }
0x2240   :  { %v9027_v27 = vpop.permute.xlu1 %9026 }
0x22b3   :  { %v12128_v15 = vpop.f32.mrf.mxu0 }
0x22b4   :  { %9046 = vrot.lane.b32.xlu1 %v12128_v15, %s12844_s25  ;;  %v9077_v15 = vsel %vm57_vm0, %v9069_v35, %v9015_v16 }
0x22b5   :  { %v8933_v24 = vpop.f32.mrf.mxu0 }
0x22b6   :  { %9044 = vrot.lane.b32.xlu0 %v8933_v24, %s12844_s25 }
0x22b7   :  { %v12131_v59 = vpop.f32.mrf.mxu0 }
0x22b8   :  { %9050 = vrot.lane.b32.xlu1 %v12131_v59, %s12844_s25 }
0x22b9   :  { %v8943_v7 = vpop.f32.mrf.mxu0 }
0x22ba   :  { %9048 = vrot.lane.b32.xlu0 %v8943_v7, %s12844_s25 }
0x22bb   :  { %v12134_v63 = vpop.f32.mrf.mxu0 }
0x22bc   :  { %9054 = vrot.lane.b32.xlu1 %v12134_v63, %s12844_s25  ;;  %v17355_v63 = vld [vmem:[#allocation13_spill] sm:$0xff] }
0x22bd   :  { %v8953_v46 = vpop.f32.mrf.mxu0 }
0x22be   :  { %9052 = vrot.lane.b32.xlu0 %v8953_v46, %s12844_s25  ;;  %v9070_v46 = vsel %vm1107_vm2, %v17355_v63, %v8985_v50 }
0x22bf   :  { %v12137_v57 = vpop.f32.mrf.mxu0 }
0x22c0   :  { %9058 = vrot.lane.b32.xlu1 %v12137_v57, %s12844_s25  ;;  %v9078_v57 = vsel %vm57_vm0, %v9070_v46, %v9017_v39 }
0x22c1   :  { %v8963_v0 = vpop.f32.mrf.mxu0 }
0x22c2   :  { %9056 = vrot.lane.b32.xlu0 %v8963_v0, %s12844_s25  ;;  %v17356_v0 = vld [vmem:[#allocation31_spill] sm:$0xff] }
0x22c3   :  { %v12148_v11 = vpop.f32.mrf.mxu0 }
0x22c4   :  { %v9225_v10 = vadd.f32 %v12148_v11, %v16833_v43  ;;  %v9071_v11 = vsel %vm1107_vm2, %v17356_v0, %v8987_v55  ;;  %v17365_v0 = vld [vmem:[#allocation56_spill] sm:$0xff] }
0x22c5   :  { %v9219_v58 = vpop.f32.mrf.mxu0 }
0x22c6   :  { %v9220_v22 = vadd.f32 %v16833_v43, %v9219_v58  ;;  %v16841_v1 = vadd.f32 %v9225_v10, %v17346_v45  ;;  %v9079_v58 = vsel %vm57_vm0, %v9071_v11, %v9019_v6 }
0x22c8   :  { %v16838_v3 = vadd.f32 %v9220_v22, %v17345_v61 }
0x22ca   :  { %v12151_v40 = vpop.f32.mrf.mxu0  ;;  %12178 = vmatprep.mubr.msk.f32.mxu1 %vm375_vm1, %v16838_v3 }
0x22cb   :  { %12179 = vmatmul.mubr.msk.f32.vlgmr.msra.gmra.mxu1 %vm375_vm1, %v16841_v1  ;;  %v9235_v5 = vadd.f32 %v12151_v40, %v16833_v43  ;;  %v17357_v40 = vld [vmem:[#allocation57_spill] sm:$0xff] }
0x22cc   :  { %v9229_v23 = vpop.f32.mrf.mxu0 }
0x22cd   :  { %v9230_v14 = vadd.f32 %v16833_v43, %v9229_v23  ;;  %v16853_v32 = vadd.f32 %v9235_v5, %v17348_v34  ;;  %v9072_v5 = vsel %vm1107_vm2, %v17357_v40, %v8989_v30  ;;  %v17367_v40 = vld [vmem:[#allocation44_spill] sm:$0xff] }
0x22ce   :  { %v9080_v23 = vsel %vm57_vm0, %v9072_v5, %v9021_v18 }
0x22cf   :  { %v16850_v21 = vadd.f32 %v9230_v14, %v17347_v17  ;;  %v17358_v14 = vld [vmem:[#allocation33_spill] sm:$0xff] }
0x22d0   :  { %v9073_v17 = vsel %vm1107_vm2, %v17358_v14, %v8991_v38 }
0x22d1   :  { %12181 = vmatprep.mubr.msk.f32.mxu1 %vm375_vm1, %v16850_v21 }
0x22d2   :  { %12182 = vmatmul.mubr.msk.f32.gmra.mxu1 %vm375_vm1, %v16853_v32 }
0x22d6   :  { %v12154_v37 = vpop.f32.mrf.mxu0 }
0x22d7   :  { %v9245_v29 = vadd.f32 %v12154_v37, %v16833_v43  ;;  %v9081_v37 = vsel %vm57_vm0, %v9073_v17, %v9023_v2 }
0x22d8   :  { %v9239_v9 = vpop.f32.mrf.mxu0 }
0x22d9   :  { %v9240_v26 = vadd.f32 %v16833_v43, %v9239_v9  ;;  %v16865_v56 = vadd.f32 %v9245_v29, %v17350_v54 }
0x22db   :  { %v16862_v28 = vadd.f32 %v9240_v26, %v17349_v49  ;;  %v17359_v26 = vld [vmem:[#allocation50_spill] sm:$0xff] }
0x22dc   :  { %v9074_v49 = vsel %vm1107_vm2, %v17359_v26, %v8993_v8 }
0x22dd   :  { %12184 = vmatprep.mubr.msk.f32.mxu1 %vm375_vm1, %v16862_v28 }
0x22de   :  { %12185 = vmatmul.mubr.msk.f32.gmra.mxu1 %vm375_vm1, %v16865_v56 }
0x22e2   :  { %v12157_v44 = vpop.f32.mrf.mxu0 }
0x22e3   :  { %v9255_v47 = vadd.f32 %v12157_v44, %v16833_v43  ;;  %v9082_v44 = vsel %vm57_vm0, %v9074_v49, %v9025_v19 }
0x22e4   :  { %v9249_v33 = vpop.f32.mrf.mxu0 }
0x22e5   :  { %v9250_v25 = vadd.f32 %v16833_v43, %v9249_v33  ;;  %v16877_v52 = vadd.f32 %v9255_v47, %v17352_v36  ;;  %v17360_v47 = vld [vmem:[#allocation9_spill] sm:$0xff] }
0x22e6   :  { %v9075_v33 = vsel %vm1107_vm2, %v17360_v47, %v8995_v20 }
0x22e7   :  { %v16874_v31 = vadd.f32 %v9250_v25, %v17351_v53  ;;  %v9083_v53 = vsel %vm57_vm0, %v9075_v33, %v9027_v27 }
0x22e9   :  { %12187 = vmatprep.mubr.msk.f32.mxu1 %vm375_vm1, %v16874_v31 }
0x22ea   :  { %12188 = vmatmul.mubr.msk.f32.gmra.mxu1 %vm375_vm1, %v16877_v52 }
0x2326   :  { %v9047_v62 = vpop.permute.xlu1 %9046 }
0x2327   :  { %v9085_v59 = vsel %vm2861_vm4, %v9077_v15, %v9047_v62 }
0x2328   :  { %v9045_v13 = vpop.permute.xlu0 %9044 }
0x2329   :  { %v9084_v24 = vsel %vm2861_vm4, %v9076_v51, %v9045_v13  ;;  %v17362_v51 = vld [vmem:[#allocation51_spill] sm:$0xff] }
0x232a   :  { %12158 = vmatprep.mubr.msk.f32.mxu0 %vm375_vm1, %v9084_v24  ;;  %v9051_v7 = vpop.permute.xlu1 %9050  ;;  %v17363_v13 = vld [vmem:[#allocation43_spill] sm:$0xff]  ;;  %v17364_v24 = vld [vmem:[#allocation46_spill] sm:$0xff] }
0x232b   :  { %12159 = vmatmul.mubr.msk.f32.gmra.mxu0 %vm375_vm1, %v9085_v59  ;;  %v9087_v61 = vsel %vm2861_vm4, %v9079_v58, %v9051_v7 }
0x232c   :  { %v9049_v10 = vpop.permute.xlu0 %9048 }
0x232d   :  { %v9086_v22 = vsel %vm2861_vm4, %v9078_v57, %v9049_v10  ;;  %v17366_v10 = vld [vmem:[#allocation45_spill] sm:$0xff] }
0x232e   :  { %12161 = vmatprep.mubr.msk.f32.mxu0 %vm375_vm1, %v9086_v22  ;;  %v9055_v45 = vpop.permute.xlu1 %9054 }
0x232f   :  { %12162 = vmatmul.mubr.msk.f32.gmra.mxu0 %vm375_vm1, %v9087_v61  ;;  %v9089_v9 = vsel %vm2861_vm4, %v9081_v37, %v9055_v45 }
0x2330   :  { %v9053_v34 = vpop.permute.xlu0 %9052 }
0x2331   :  { %v9088_v29 = vsel %vm2861_vm4, %v9080_v23, %v9053_v34  ;;  %v17368_v23 = vld [vmem:[#allocation47_spill] sm:$0xff] }
0x2332   :  { %12164 = vmatprep.mubr.msk.f32.mxu0 %vm375_vm1, %v9088_v29  ;;  %v9059_v54 = vpop.permute.xlu1 %9058 }
0x2333   :  { %12165 = vmatmul.mubr.msk.f32.gmra.mxu0 %vm375_vm1, %v9089_v9  ;;  %v9091_v12 = vsel %vm2861_vm4, %v9083_v53, %v9059_v54 }
0x2334   :  { %v9057_v25 = vpop.permute.xlu0 %9056 }
0x2335   :  { %v9090_v36 = vsel %vm2861_vm4, %v9082_v44, %v9057_v25 }
0x2336   :  { %12167 = vmatprep.mubr.msk.f32.mxu0 %vm375_vm1, %v9090_v36 }
0x2337   :  { %12168 = vmatmul.mubr.msk.f32.gmra.mxu0 %vm375_vm1, %v9091_v12 }
0x238b   :  { %v12180_v4 = vpop.f32.mrf.mxu1 }
0x238c   :  { %v9439_v55 = vadd.f32 %v12180_v4, %v16841_v1 }
0x238d   :  { %v9433_v16 = vpop.f32.mrf.mxu1 }
0x238e   :  { %v9434_v42 = vadd.f32 %v9433_v16, %v16838_v3 }
0x2390   :  { %9512 = vxpose.xlu0.b32.start [1/16] (narrow) %v9434_v42, 32 }
0x2392   :  { %v12183_v50 = vpop.f32.mrf.mxu1 }
0x2393   :  { %v9449_v38 = vadd.f32 %v12183_v50, %v16853_v32 }
0x2394   :  { %9513 = vxpose.xlu0.b32.cont [2/16] (narrow) %v9439_v55, 32  ;;  %v9443_v6 = vpop.f32.mrf.mxu1 }
0x2395   :  { %v9444_v39 = vadd.f32 %v9443_v6, %v16850_v21 }
0x2398   :  { %9514 = vxpose.xlu0.b32.cont [3/16] (narrow) %v9444_v39, 32 }
0x239c   :  { %9515 = vxpose.xlu0.b32.cont [4/16] (narrow) %v9449_v38, 32 }
0x239e   :  { %v12186_v30 = vpop.f32.mrf.mxu1 }
0x239f   :  { %v9459_v20 = vadd.f32 %v12186_v30, %v16865_v56 }
0x23a0   :  { %v9453_v2 = vpop.f32.mrf.mxu1 }
0x23a1   :  { %v9454_v18 = vadd.f32 %v9453_v2, %v16862_v28  ;;  %v17361_v28 = vld [vmem:[#allocation37_spill] sm:$0xff] }
0x23a3   :  { %9516 = vxpose.xlu0.b32.cont [5/16] (narrow) %v9454_v18, 32 }
0x23a7   :  { %9517 = vxpose.xlu0.b32.cont [6/16] (narrow) %v9459_v20, 32 }
0x23aa   :  { %v12189_v3 = vpop.f32.mrf.mxu1 }
0x23ab   :  { %v9469_v27 = vadd.f32 %v12189_v3, %v16877_v52 }
0x23ac   :  { %v9463_v8 = vpop.f32.mrf.mxu1 }
0x23ad   :  { %v9464_v1 = vadd.f32 %v9463_v8, %v16874_v31 }
0x23af   :  { %9518 = vxpose.xlu0.b32.cont [7/16] (narrow) %v9464_v1, 32 }
0x23b3   :  { %9519 = vxpose.xlu0.b32.cont [8/16] (narrow) %v9469_v27, 32 }
0x23eb   :  { %v12160_v21 = vpop.f32.mrf.mxu0 }
0x23ec   :  { %v9265_v32 = vadd.f32 %v12160_v21, %v16833_v43 }
0x23ed   :  { %v9259_v19 = vpop.f32.mrf.mxu0 }
0x23ee   :  { %v9260_v62 = vadd.f32 %v16833_v43, %v9259_v19  ;;  %v9307_v56 = vadd.f32 %v9265_v32, %v17362_v51 }
0x23ef   :  { %v12163_v41 = vpop.f32.mrf.mxu0 }
0x23f0   :  { %v9306_v60 = vadd.f32 %v9260_v62, %v17361_v28  ;;  %v9275_v48 = vadd.f32 %v12163_v41, %v16833_v43 }
0x23f1   :  { %v9269_v35 = vpop.f32.mrf.mxu0 }
0x23f2   :  { %v9270_v31 = vadd.f32 %v16833_v43, %v9269_v35  ;;  %12190 = vmatprep.mubr.msk.f32.mxu1 %vm375_vm1, %v9306_v60  ;;  %v9309_v59 = vadd.f32 %v9275_v48, %v17364_v24 }
0x23f3   :  { %v12166_v52 = vpop.f32.mrf.mxu0  ;;  %12191 = vmatmul.mubr.msk.f32.gmra.mxu1 %vm375_vm1, %v9307_v56 }
0x23f4   :  { %v9308_v15 = vadd.f32 %v9270_v31, %v17363_v13  ;;  %v9285_v7 = vadd.f32 %v12166_v52, %v16833_v43 }
0x23f5   :  { %v9279_v63 = vpop.f32.mrf.mxu0 }
0x23f6   :  { %v9280_v46 = vadd.f32 %v16833_v43, %v9279_v63  ;;  %12193 = vmatprep.mubr.msk.f32.mxu1 %vm375_vm1, %v9308_v15  ;;  %v9311_v58 = vadd.f32 %v9285_v7, %v17366_v10 }
0x23f7   :  { %v12169_v57 = vpop.f32.mrf.mxu0  ;;  %12194 = vmatmul.mubr.msk.f32.gmra.mxu1 %vm375_vm1, %v9309_v59 }
0x23f8   :  { %v9310_v11 = vadd.f32 %v9280_v46, %v17365_v0  ;;  %v9295_v22 = vadd.f32 %v12169_v57, %v16833_v43 }
0x23f9   :  { %v9289_v61 = vpop.f32.mrf.mxu0 }
0x23fa   :  { %v9290_v45 = vadd.f32 %v16833_v43, %v9289_v61  ;;  %12196 = vmatprep.mubr.msk.f32.mxu1 %vm375_vm1, %v9310_v11  ;;  %v9313_v14 = vadd.f32 %v9295_v22, %v17368_v23 }
0x23fb   :  { %12197 = vmatmul.mubr.msk.f32.gmra.mxu1 %vm375_vm1, %v9311_v58 }
0x23fc   :  { %v9312_v5 = vadd.f32 %v9290_v45, %v17367_v40 }
0x23fe   :  { %12199 = vmatprep.mubr.msk.f32.mxu1 %vm375_vm1, %v9312_v5 }
0x23ff   :  { %12200 = vmatmul.mubr.msk.f32.gmra.mxu1 %vm375_vm1, %v9313_v14 }
0x24b3   :  { %v12192_v17 = vpop.f32.mrf.mxu1 }
0x24b4   :  { %v9479_v9 = vadd.f32 %v12192_v17, %v9307_v56 }
0x24b5   :  { %v9473_v34 = vpop.f32.mrf.mxu1 }
0x24b6   :  { %v9474_v37 = vadd.f32 %v9473_v34, %v9306_v60 }
0x24b7   :  { %v12195_v29 = vpop.f32.mrf.mxu1 }
0x24b8   :  { %9520 = vxpose.xlu0.b32.cont [9/16] (narrow) %v9474_v37, 32  ;;  %v9489_v54 = vadd.f32 %v12195_v29, %v9309_v59 }
0x24b9   :  { %v9483_v26 = vpop.f32.mrf.mxu1 }
0x24ba   :  { %v9484_v43 = vadd.f32 %v9483_v26, %v9308_v15 }
0x24bb   :  { %v12198_v49 = vpop.f32.mrf.mxu1 }
0x24bc   :  { %9521 = vxpose.xlu0.b32.cont [10/16] (narrow) %v9479_v9, 32  ;;  %v9499_v25 = vadd.f32 %v12198_v49, %v9311_v58 }
0x24bd   :  { %v9493_v44 = vpop.f32.mrf.mxu1 }
0x24be   :  { %v9494_v47 = vadd.f32 %v9493_v44, %v9310_v11 }
0x24bf   :  { %v12201_v33 = vpop.f32.mrf.mxu1 }
0x24c0   :  { %9522 = vxpose.xlu0.b32.cont [11/16] (narrow) %v9484_v43, 32  ;;  %v9509_v12 = vadd.f32 %v12201_v33, %v9313_v14 }
0x24c1   :  { %v9503_v53 = vpop.f32.mrf.mxu1 }
0x24c2   :  { %v9504_v36 = vadd.f32 %v9503_v53, %v9312_v5 }
0x24c4   :  { %9523 = vxpose.xlu0.b32.cont [12/16] (narrow) %v9489_v54, 32 }
0x24c8   :  { %9524 = vxpose.xlu0.b32.cont [13/16] (narrow) %v9494_v47, 32 }
0x24cc   :  { %9525 = vxpose.xlu0.b32.cont [14/16] (narrow) %v9499_v25, 32 }
0x24d0   :  { %9526 = vxpose.xlu0.b32.cont [15/16] (narrow) %v9504_v36, 32 }
0x24d4   :  { %9527 = vxpose.xlu0.b32.end [16/16] (narrow) %v9509_v12, 32 }
0x2514   :  { %v9528_v4 = vpop.trf.xlu0 }
0x2515   :  { %9544 = vst [vmem:[#allocation5] sm:$0xff] %v9528_v4 }
0x2518   :  { %v9529_v16 = vpop.trf.xlu0 }
0x2519   :  { %9545 = vst [vmem:[#allocation5 + $0x8] sm:$0xff] %v9529_v16 }
0x251c   :  { %v9530_v42 = vpop.trf.xlu0 }
0x251d   :  { %9546 = vst [vmem:[#allocation5 + $0x10] sm:$0xff] %v9530_v42 }
0x2520   :  { %v9531_v55 = vpop.trf.xlu0 }
0x2521   :  { %9547 = vst [vmem:[#allocation5 + $0x18] sm:$0xff] %v9531_v55 }
0x2522   :  { %12824 = shalt.err (!%p12821_p9)
}
0x2523   :  { %9559 = dma.vmem_to_hbm [thread:$0]  %s9554_s13, 512, %s16965_s4, [#allocation4], %s12838_s18, %s12838_s18, %s12839_s19  }
0x2524   :  { %12835 = dma.done.wait [#allocation4], 512  }
0x2525   :  { %12836 = vsyncadd [#allocation4], 4294966784 }
0x2526   :  { %9563 = vsyncpa [#allocation3], 1 }
0x2527   :  { %9564 = vsyncpa [#allocation4], 1 }

</bundles_post_ra>
